<compile_context>
chip_gen: v6e
topology: v6e:2x2x1
jax: 0.10.0
libtpu: 0.0.40
codegen_flags: <defaults>
</compile_context>

<pallas_src>
import math

import numpy as np
import jax
import jax.numpy as jnp
from jax import lax
from jax.experimental import pallas as pl
from jax.experimental.pallas import tpu as pltpu

# Keep kernel and pure-JAX reference matmuls at full f32 precision (TPU default matmul
# precision is bf16-based, which would break the apples-to-apples 1e-4 comparison).
jax.config.update("jax_default_matmul_precision", "highest")

# ---------------- config (small synthetic shapes) ----------------
B = 2            # batch
C = 4            # backbone feature channels (= input_channel = hidden_channel)
H = W = 8        # backbone feature-map spatial size
N_PTS = 64       # number of query coordinates per batch element
IN_DIM = 3       # coordinate dimension
HIDDEN = 32      # siren_hidden_dim
N_LAYERS = 5     # num_layers
MAP_OUT = HIDDEN * N_LAYERS * 2   # mapping_output_dim = hidden * layers * 2
BN_EPS = 1e-5

P_SPATIAL = B * H * W    # 128, lane axis of conv feature maps (index = b*H*W + y*W + x)
P_POINTS = B * N_PTS     # 128, lane axis of SIREN activations (index = b*N_PTS + n)
assert P_SPATIAL == 128 and P_POINTS == 128, "lane layout hard-codes 128-wide vregs"

CW = 9 * C               # 36, im2col contraction size per conv

# const_slab (CONST_ROWS, 128) row layout
MASK_OFF = 0                          # rows [0, 9): per-tap boundary masks
POOL_OFF = 16                         # rows [16, 144): fused avgpool+expand matrix
CONST_ROWS = POOL_OFF + P_SPATIAL     # 144

# w_slab (W_ROWS, 32) row layout  (all offsets are multiples of 8 sublanes)
FC_OFF = 0                            # rows [0, 320): fc weight (cols 0..C-1) | fc bias (col C)
W0_OFF = MAP_OUT                      # rows [320, 352): film_w0 (cols 0..2) | film_b[0] (col 3)
WR_OFF = W0_OFF + HIDDEN              # rows [352, 480): film_w_rest, 4 layers x 32 rows
FB_OFF = WR_OFF + (N_LAYERS - 1) * HIDDEN   # rows [480, 512): film_b[1..4] as cols 0..3
FIN_OFF = FB_OFF + HIDDEN             # row 512: final_w; row 513 col 0: final_b
W_ROWS = FIN_OFF + 8                  # 520


def _vmem():
    return pl.BlockSpec(memory_space=pltpu.MemorySpace.VMEM)


# ------------------------------------------------------------------
# The single fused kernel: conv1+BN+ReLU -> conv2+BN -> pool+fc -> FiLM-SIREN
# ------------------------------------------------------------------
def _shape_network_kernel(feat_ref, coords_ref, const_ref, convw_ref, w_ref, out_ref):
    f32 = jnp.float32

    # Hoisted constant loads (used across loops below).
    masks = const_ref[MASK_OFF:MASK_OFF + 9, :]               # (9, 128) boundary masks
    poolmat = const_ref[POOL_OFF:POOL_OFF + P_SPATIAL, :]     # (128, 128) avgpool + expand

    def conv3x3(x, w):
        # x: (C, B*H*W); w: (C_out, 9*C_in) im2col weight -> (C_out, B*H*W).
        # Build the im2col slab in VMEM: 8 static lane rotations (pltpu.roll) of the flattened
        # map, boundary-masked, stacked along the sublane axis; then ONE MXU matmul.
        taps = []
        for dy in range(3):
            for dx in range(3):
                k = dy * 3 + dx
                d = (dy - 1) * W + (dx - 1)          # flat-index offset of the tap
                t = x if d == 0 else pltpu.roll(x, shift=(-d) % P_SPATIAL, axis=1)
                if k != 4:                           # center tap is always in-bounds
                    t = t * masks[k:k + 1, :]
                taps.append(t)
        im2col = jnp.concatenate(taps, axis=0)       # (9*C, 128)
        return jnp.dot(w, im2col, preferred_element_type=f32)

    def batchnorm(y, gamma, beta):
        # training-mode stats per channel (sublane) over the B*H*W lane axis
        mean = jnp.mean(y, axis=1, keepdims=True)
        yc = y - mean
        var = jnp.mean(yc * yc, axis=1, keepdims=True)
        return yc * lax.rsqrt(var + BN_EPS) * gamma + beta

    # ---- ConvMappingNetwork ----
    cw1 = convw_ref[0]                               # (C, 9C+2) = conv weight | gamma | beta
    cw2 = convw_ref[1]
    h1 = jnp.maximum(batchnorm(conv3x3(feat_ref[...], cw1[:, :CW]),
                               cw1[:, CW:CW + 1], cw1[:, CW + 1:CW + 2]), 0.0)
    h2 = batchnorm(conv3x3(h1, cw2[:, :CW]),
                   cw2[:, CW:CW + 1], cw2[:, CW + 1:CW + 2])

    # AvgPool2d over the full HxW map + per-query-point batch expansion, fused as one matmul:
    # pooled_pp[c, p] = mean_{s in batch(p)} h2[c, s]
    pooled_pp = jnp.dot(h2, poolmat, preferred_element_type=f32)      # (C, B*N_PTS)

    # ---- FiLM-SIREN SDF decoder: activations are (HIDDEN, B*N_PTS) ----
    fb_rest = w_ref[FB_OFF:FB_OFF + HIDDEN, 0:N_LAYERS - 1]           # (32, 4)
    coords = coords_ref[...]                                          # (IN_DIM+1, 128), ones row
    h = None
    for l in range(N_LAYERS):
        # Per-layer FiLM freq/phase (64, 128): never materialize the full (320, 128) slab.
        wl = w_ref[FC_OFF + l * 2 * HIDDEN:FC_OFF + (l + 1) * 2 * HIDDEN, :]   # (64, 32)
        fs_l = (jnp.dot(wl[:, 0:C], pooled_pp, preferred_element_type=f32)
                + wl[:, C:C + 1])
        freq, phase = fs_l[0:HIDDEN, :], fs_l[HIDDEN:2 * HIDDEN, :]
        if l == 0:
            w0 = w_ref[W0_OFF:W0_OFF + HIDDEN, 0:IN_DIM + 1]          # (32, 4), bias folded in
            pre = jnp.dot(w0, coords, preferred_element_type=f32)
        else:
            wr = w_ref[WR_OFF + (l - 1) * HIDDEN:WR_OFF + l * HIDDEN, :]   # (32, 32)
            pre = jnp.dot(wr, h, preferred_element_type=f32) + fb_rest[:, l - 1:l]
        h = jnp.sin(freq * pre + phase)

    # lane-dense SDF output (1, B*N_PTS)
    fin = w_ref[FIN_OFF:FIN_OFF + 8, :]                               # (8, 32)
    out_ref[...] = jnp.dot(fin[0:1, :], h, preferred_element_type=f32) + fin[1:2, 0:1]


def shape_network_forward(img_nchw, coords, packed):
    # Model-input layout prep only: feature map -> (C, B*H*W), coords -> (IN_DIM+1, B*N_PTS)
    # with a ones row appended so the first SIREN layer's bias folds into its weight matmul.
    feat = jnp.transpose(img_nchw, (1, 0, 2, 3)).reshape(C, P_SPATIAL)
    coords_t = jnp.transpose(coords.reshape(P_POINTS, IN_DIM), (1, 0))
    coords_aug = jnp.concatenate(
        [coords_t, jnp.ones((1, P_POINTS), jnp.float32)], axis=0)

    out = pl.pallas_call(
        _shape_network_kernel,
        out_shape=jax.ShapeDtypeStruct((1, P_POINTS), jnp.float32),
        in_specs=[_vmem() for _ in range(5)],
        out_specs=_vmem(),
    )(feat, coords_aug, packed["const_slab"], packed["conv_w"], packed["w_slab"])
    return out.reshape(B, N_PTS, 1)


# ------------------------------------------------------------------
# Host-side packing of constants + parameters into a few lane-dense slabs
# ------------------------------------------------------------------
def _make_conv_masks():
    # mask[k, b*H*W + y*W + x] = 1 iff the (dy, dx) tap of output (y, x) is inside the image
    m = np.zeros((9, P_SPATIAL), np.float32)
    ys, xs = np.meshgrid(np.arange(H), np.arange(W), indexing="ij")
    for dy in range(3):
        for dx in range(3):
            k = dy * 3 + dx
            ok = ((ys + dy - 1 >= 0) & (ys + dy - 1 < H) &
                  (xs + dx - 1 >= 0) & (xs + dx - 1 < W)).astype(np.float32)
            m[k] = np.tile(ok.reshape(-1), B)
    return m


def pack_params(p):
    # conv weights in im2col layout (C_out, 9*C_in) with BN gamma/beta appended as 2 extra cols
    conv_w = np.zeros((2, C, CW + 2), np.float32)
    for i, (wk, gk, bk) in enumerate([("conv1_w", "bn1_g", "bn1_b"),
                                      ("conv2_w", "bn2_g", "bn2_b")]):
        w = np.asarray(p[wk])                                   # (C_out, C_in, 3, 3)
        conv_w[i, :, :CW] = w.transpose(0, 2, 3, 1).reshape(C, CW)   # col = k*C_in + i_in
        conv_w[i, :, CW] = np.asarray(p[gk])
        conv_w[i, :, CW + 1] = np.asarray(p[bk])

    # lane-dense constant slab: conv boundary masks + fused avgpool/expand matrix
    const_slab = np.zeros((CONST_ROWS, 128), np.float32)
    const_slab[MASK_OFF:MASK_OFF + 9] = _make_conv_masks()
    sp_b = np.arange(P_SPATIAL) // (H * W)          # batch of each spatial index
    pt_b = np.arange(P_POINTS) // N_PTS             # batch of each query point
    const_slab[POOL_OFF:POOL_OFF + P_SPATIAL] = (
        (sp_b[:, None] == pt_b[None, :]).astype(np.float32) / float(H * W))

    # single weight slab, lane width = HIDDEN, all row offsets multiples of 8
    w_slab = np.zeros((W_ROWS, HIDDEN), np.float32)
    w_slab[FC_OFF:FC_OFF + MAP_OUT, 0:C] = np.asarray(p["fc_w"])
    w_slab[FC_OFF:FC_OFF + MAP_OUT, C] = np.asarray(p["fc_b"])
    w_slab[W0_OFF:W0_OFF + HIDDEN, 0:IN_DIM] = np.asarray(p["film_w0"])
    w_slab[W0_OFF:W0_OFF + HIDDEN, IN_DIM] = np.asarray(p["film_b"])[0]
    w_slab[WR_OFF:WR_OFF + (N_LAYERS - 1) * HIDDEN, :] = (
        np.asarray(p["film_w_rest"]).reshape((N_LAYERS - 1) * HIDDEN, HIDDEN))
    w_slab[FB_OFF:FB_OFF + HIDDEN, 0:N_LAYERS - 1] = np.asarray(p["film_b"])[1:].T
    w_slab[FIN_OFF, :] = np.asarray(p["final_w"])[0]
    w_slab[FIN_OFF + 1, 0] = np.asarray(p["final_b"])[0]

    return {"conv_w": jnp.asarray(conv_w),
            "const_slab": jnp.asarray(const_slab),
            "w_slab": jnp.asarray(w_slab)}


# ------------------------------------------------------------------
# Parameters (random, mirroring the PyTorch init bounds), natural layouts
# ------------------------------------------------------------------
def init_params(key):
    def uinit(k, shape, bound):
        return jax.random.uniform(k, shape, jnp.float32, -bound, bound)

    ks = jax.random.split(key, 10)
    conv_bound = 1.0 / math.sqrt(9 * C)        # Conv2d default init bound
    fc_bound = 1.0 / math.sqrt(C)
    first_bound = 30.0 / IN_DIM                # first_layer_film_sine_init
    hid_bound = math.sqrt(6.0 / HIDDEN)        # film_sine_init
    b0_bound = 1.0 / math.sqrt(IN_DIM)
    bh_bound = 1.0 / math.sqrt(HIDDEN)

    film_b = jnp.concatenate([uinit(ks[6], (1, HIDDEN), b0_bound),
                              uinit(ks[7], (N_LAYERS - 1, HIDDEN), bh_bound)], axis=0)
    return {
        "conv1_w": uinit(ks[0], (C, C, 3, 3), conv_bound),
        "conv2_w": uinit(ks[1], (C, C, 3, 3), conv_bound),
        "bn1_g": jnp.ones((C,), jnp.float32), "bn1_b": jnp.zeros((C,), jnp.float32),
        "bn2_g": jnp.ones((C,), jnp.float32), "bn2_b": jnp.zeros((C,), jnp.float32),
        "fc_w": uinit(ks[2], (MAP_OUT, C), fc_bound),
        "fc_b": uinit(ks[3], (MAP_OUT,), fc_bound),
        # TODO(synk): weight_norm folded into plain weights (g == ||v|| holds only at init).
        "film_w0": uinit(ks[4], (HIDDEN, IN_DIM), first_bound),
        "film_w_rest": uinit(ks[5], (N_LAYERS - 1, HIDDEN, HIDDEN), hid_bound),
        "film_b": film_b,                                        # (N_LAYERS, HIDDEN)
        "final_w": uinit(ks[8], (1, HIDDEN), bh_bound),
        "final_b": uinit(ks[9], (1,), bh_bound),
    }


# ------------------------------------------------------------------
# Pure-JAX reference (independent of the kernel's roll/mask/packed layouts)
# ------------------------------------------------------------------
def reference_forward(img_nchw, coords, p):
    def conv3x3_ref(x, w):                      # x (B,Cin,H,W), w (Cout,Cin,3,3)
        xp = jnp.pad(x, ((0, 0), (0, 0), (1, 1), (1, 1)))
        out = jnp.zeros((x.shape[0], w.shape[0], H, W), jnp.float32)
        for dy in range(3):
            for dx in range(3):
                patch = xp[:, :, dy:dy + H, dx:dx + W]
                out = out + jnp.einsum("oi,bihw->bohw", w[:, :, dy, dx], patch)
        return out

    def bn_ref(y, g, b):
        m = y.mean(axis=(0, 2, 3), keepdims=True)
        v = ((y - m) ** 2).mean(axis=(0, 2, 3), keepdims=True)
        return ((y - m) / jnp.sqrt(v + BN_EPS) * g.reshape(1, -1, 1, 1)
                + b.reshape(1, -1, 1, 1))

    h1 = jnp.maximum(bn_ref(conv3x3_ref(img_nchw, p["conv1_w"]),
                            p["bn1_g"], p["bn1_b"]), 0.0)
    h2 = bn_ref(conv3x3_ref(h1, p["conv2_w"]), p["bn2_g"], p["bn2_b"])
    pooled = h2.mean(axis=(2, 3))                                  # (B, C)
    fs = pooled @ p["fc_w"].T + p["fc_b"]                          # (B, MAP_OUT)

    h = jnp.einsum("bnd,hd->bnh", coords, p["film_w0"]) + p["film_b"][0]
    h = jnp.sin(fs[:, None, 0:HIDDEN] * h + fs[:, None, HIDDEN:2 * HIDDEN])
    for l in range(1, N_LAYERS):
        h = jnp.einsum("bnh,kh->bnk", h, p["film_w_rest"][l - 1]) + p["film_b"][l]
        freq = fs[:, None, 2 * l * HIDDEN:(2 * l + 1) * HIDDEN]
        phase = fs[:, None, (2 * l + 1) * HIDDEN:(2 * l + 2) * HIDDEN]
        h = jnp.sin(freq * h + phase)
    return jnp.einsum("bnh,oh->bno", h, p["final_w"]) + p["final_b"]


if __name__ == "__main__":
    key = jax.random.PRNGKey(0)
    k_img, k_coords, k_params = jax.random.split(key, 3)
    img = jax.random.normal(k_img, (B, C, H, W), jnp.float32)
    coords = jax.random.uniform(k_coords, (B, N_PTS, IN_DIM), jnp.float32, -1.0, 1.0)
    params = init_params(k_params)
    packed = pack_params(params)     # one-time host-side packing into lane-dense slabs

    fwd = jax.jit(shape_network_forward)
    sdf = jax.block_until_ready(fwd(img, coords, packed))

    ref = reference_forward(img, coords, params)
    assert sdf.shape == (B, N_PTS, 1), sdf.shape
    if not bool(jnp.allclose(sdf, ref, atol=1e-4, rtol=1e-4)):
        err = float(jnp.max(jnp.abs(sdf - ref)))
        raise AssertionError(f"Pallas result does not match JAX reference (max abs err {err})")
    print("KERNEL_OK")
</pallas_src>

<mosaic_0001>
module attributes {stable_mosaic.version = 11 : i64} {
  func.func @_shape_network_kernel(%arg0: memref<4x128xf32, #tpu.memory_space<vmem>>, %arg1: memref<4x128xf32, #tpu.memory_space<vmem>>, %arg2: memref<144x128xf32, #tpu.memory_space<vmem>>, %arg3: memref<2x4x38xf32, #tpu.memory_space<vmem>>, %arg4: memref<520x32xf32, #tpu.memory_space<vmem>>, %arg5: memref<1x128xf32, #tpu.memory_space<vmem>>) attributes {dimension_semantics = [], scalar_prefetch = 0 : i64, scratch_operands = 0 : i64, tpu.core_type = #tpu.core_type<tc>} {
    %c0 = arith.constant 0 : index
    %c0_0 = arith.constant 0 : index
    %0 = vector.load %arg2[%c0, %c0_0] : memref<144x128xf32, #tpu.memory_space<vmem>>, vector<9x128xf32>
    %c16 = arith.constant 16 : index
    %c0_1 = arith.constant 0 : index
    %1 = vector.load %arg2[%c16, %c0_1] : memref<144x128xf32, #tpu.memory_space<vmem>>, vector<128x128xf32>
    %c0_2 = arith.constant 0 : index
    %c0_3 = arith.constant 0 : index
    %c0_4 = arith.constant 0 : index
    %2 = vector.load %arg3[%c0_2, %c0_3, %c0_4] : memref<2x4x38xf32, #tpu.memory_space<vmem>>, vector<1x4x38xf32>
    %3 = vector.shape_cast %2 : vector<1x4x38xf32> to vector<4x38xf32>
    %c1 = arith.constant 1 : index
    %c0_5 = arith.constant 0 : index
    %c0_6 = arith.constant 0 : index
    %4 = vector.load %arg3[%c1, %c0_5, %c0_6] : memref<2x4x38xf32, #tpu.memory_space<vmem>>, vector<1x4x38xf32>
    %5 = vector.shape_cast %4 : vector<1x4x38xf32> to vector<4x38xf32>
    %c0_7 = arith.constant 0 : index
    %c0_8 = arith.constant 0 : index
    %6 = vector.load %arg0[%c0_7, %c0_8] : memref<4x128xf32, #tpu.memory_space<vmem>>, vector<4x128xf32>
    %7 = vector.extract_strided_slice %3 {offsets = [0, 0], sizes = [4, 36], strides = [1, 1]} : vector<4x38xf32> to vector<4x36xf32>
    %c9_i32 = arith.constant 9 : i32
    %8 = tpu.dynamic_rotate %6 by %c9_i32 dim 1 : vector<4x128xf32>, i32 -> vector<4x128xf32>
    %9 = vector.extract_strided_slice %0 {offsets = [0, 0], sizes = [1, 128], strides = [1, 1]} : vector<9x128xf32> to vector<1x128xf32>
    %10 = vector.broadcast %9 : vector<1x128xf32> to vector<4x128xf32>
    %11 = arith.mulf %8, %10 : vector<4x128xf32>
    %c8_i32 = arith.constant 8 : i32
    %12 = tpu.dynamic_rotate %6 by %c8_i32 dim 1 : vector<4x128xf32>, i32 -> vector<4x128xf32>
    %13 = vector.extract_strided_slice %0 {offsets = [1, 0], sizes = [1, 128], strides = [1, 1]} : vector<9x128xf32> to vector<1x128xf32>
    %14 = vector.broadcast %13 : vector<1x128xf32> to vector<4x128xf32>
    %15 = arith.mulf %12, %14 : vector<4x128xf32>
    %c7_i32 = arith.constant 7 : i32
    %16 = tpu.dynamic_rotate %6 by %c7_i32 dim 1 : vector<4x128xf32>, i32 -> vector<4x128xf32>
    %17 = vector.extract_strided_slice %0 {offsets = [2, 0], sizes = [1, 128], strides = [1, 1]} : vector<9x128xf32> to vector<1x128xf32>
    %18 = vector.broadcast %17 : vector<1x128xf32> to vector<4x128xf32>
    %19 = arith.mulf %16, %18 : vector<4x128xf32>
    %c1_i32 = arith.constant 1 : i32
    %20 = tpu.dynamic_rotate %6 by %c1_i32 dim 1 : vector<4x128xf32>, i32 -> vector<4x128xf32>
    %21 = vector.extract_strided_slice %0 {offsets = [3, 0], sizes = [1, 128], strides = [1, 1]} : vector<9x128xf32> to vector<1x128xf32>
    %22 = vector.broadcast %21 : vector<1x128xf32> to vector<4x128xf32>
    %23 = arith.mulf %20, %22 : vector<4x128xf32>
    %c127_i32 = arith.constant 127 : i32
    %24 = tpu.dynamic_rotate %6 by %c127_i32 dim 1 : vector<4x128xf32>, i32 -> vector<4x128xf32>
    %25 = vector.extract_strided_slice %0 {offsets = [5, 0], sizes = [1, 128], strides = [1, 1]} : vector<9x128xf32> to vector<1x128xf32>
    %26 = vector.broadcast %25 : vector<1x128xf32> to vector<4x128xf32>
    %27 = arith.mulf %24, %26 : vector<4x128xf32>
    %c121_i32 = arith.constant 121 : i32
    %28 = tpu.dynamic_rotate %6 by %c121_i32 dim 1 : vector<4x128xf32>, i32 -> vector<4x128xf32>
    %29 = vector.extract_strided_slice %0 {offsets = [6, 0], sizes = [1, 128], strides = [1, 1]} : vector<9x128xf32> to vector<1x128xf32>
    %30 = vector.broadcast %29 : vector<1x128xf32> to vector<4x128xf32>
    %31 = arith.mulf %28, %30 : vector<4x128xf32>
    %c120_i32 = arith.constant 120 : i32
    %32 = tpu.dynamic_rotate %6 by %c120_i32 dim 1 : vector<4x128xf32>, i32 -> vector<4x128xf32>
    %33 = vector.extract_strided_slice %0 {offsets = [7, 0], sizes = [1, 128], strides = [1, 1]} : vector<9x128xf32> to vector<1x128xf32>
    %34 = vector.broadcast %33 : vector<1x128xf32> to vector<4x128xf32>
    %35 = arith.mulf %32, %34 : vector<4x128xf32>
    %c119_i32 = arith.constant 119 : i32
    %36 = tpu.dynamic_rotate %6 by %c119_i32 dim 1 : vector<4x128xf32>, i32 -> vector<4x128xf32>
    %37 = vector.extract_strided_slice %0 {offsets = [8, 0], sizes = [1, 128], strides = [1, 1]} : vector<9x128xf32> to vector<1x128xf32>
    %38 = vector.broadcast %37 : vector<1x128xf32> to vector<4x128xf32>
    %39 = arith.mulf %36, %38 : vector<4x128xf32>
    %40 = tpu.concatenate %11, %15, %19, %23, %6, %27, %31, %35, %39 in 0 : vector<4x128xf32>, vector<4x128xf32>, vector<4x128xf32>, vector<4x128xf32>, vector<4x128xf32>, vector<4x128xf32>, vector<4x128xf32>, vector<4x128xf32>, vector<4x128xf32> -> vector<36x128xf32>
    %cst = arith.constant dense<0.000000e+00> : vector<4x128xf32>
    %41 = tpu.matmul %7, %40, %cst {dimension_numbers = #tpu.dot_dimension_numbers<[1], [0], [0], [1], [0, 0, 1, 1], [], []>, precision = #tpu.contract_precision<fp32>} : vector<4x36xf32>, vector<36x128xf32>, vector<4x128xf32> -> vector<4x128xf32>
    %42 = vector.extract_strided_slice %3 {offsets = [0, 36], sizes = [4, 1], strides = [1, 1]} : vector<4x38xf32> to vector<4x1xf32>
    %43 = vector.extract_strided_slice %3 {offsets = [0, 37], sizes = [4, 1], strides = [1, 1]} : vector<4x38xf32> to vector<4x1xf32>
    %cst_9 = arith.constant dense<0.000000e+00> : vector<4xf32>
    %44 = vector.multi_reduction <add>, %41, %cst_9 [1] : vector<4x128xf32> to vector<4xf32>
    %45 = vector.shape_cast %44 : vector<4xf32> to vector<4x1xf32>
    %cst_10 = arith.constant 1.280000e+02 : f32
    %46 = vector.broadcast %cst_10 : f32 to vector<4x1xf32>
    %47 = arith.divf %45, %46 : vector<4x1xf32>
    %48 = vector.broadcast %47 : vector<4x1xf32> to vector<4x128xf32>
    %49 = arith.subf %41, %48 : vector<4x128xf32>
    %50 = arith.mulf %49, %49 : vector<4x128xf32>
    %cst_11 = arith.constant dense<0.000000e+00> : vector<4xf32>
    %51 = vector.multi_reduction <add>, %50, %cst_11 [1] : vector<4x128xf32> to vector<4xf32>
    %52 = vector.shape_cast %51 : vector<4xf32> to vector<4x1xf32>
    %cst_12 = arith.constant 1.280000e+02 : f32
    %53 = vector.broadcast %cst_12 : f32 to vector<4x1xf32>
    %54 = arith.divf %52, %53 : vector<4x1xf32>
    %cst_13 = arith.constant 9.99999974E-6 : f32
    %55 = vector.broadcast %cst_13 : f32 to vector<4x1xf32>
    %56 = arith.addf %54, %55 : vector<4x1xf32>
    %57 = math.rsqrt %56 : vector<4x1xf32>
    %58 = vector.broadcast %57 : vector<4x1xf32> to vector<4x128xf32>
    %59 = arith.mulf %49, %58 : vector<4x128xf32>
    %60 = vector.broadcast %42 : vector<4x1xf32> to vector<4x128xf32>
    %61 = arith.mulf %59, %60 : vector<4x128xf32>
    %62 = vector.broadcast %43 : vector<4x1xf32> to vector<4x128xf32>
    %63 = arith.addf %61, %62 : vector<4x128xf32>
    %cst_14 = arith.constant 0.000000e+00 : f32
    %64 = vector.broadcast %cst_14 : f32 to vector<4x128xf32>
    %65 = arith.maximumf %63, %64 : vector<4x128xf32>
    %66 = vector.extract_strided_slice %5 {offsets = [0, 0], sizes = [4, 36], strides = [1, 1]} : vector<4x38xf32> to vector<4x36xf32>
    %c9_i32_15 = arith.constant 9 : i32
    %67 = tpu.dynamic_rotate %65 by %c9_i32_15 dim 1 : vector<4x128xf32>, i32 -> vector<4x128xf32>
    %68 = vector.extract_strided_slice %0 {offsets = [0, 0], sizes = [1, 128], strides = [1, 1]} : vector<9x128xf32> to vector<1x128xf32>
    %69 = vector.broadcast %68 : vector<1x128xf32> to vector<4x128xf32>
    %70 = arith.mulf %67, %69 : vector<4x128xf32>
    %c8_i32_16 = arith.constant 8 : i32
    %71 = tpu.dynamic_rotate %65 by %c8_i32_16 dim 1 : vector<4x128xf32>, i32 -> vector<4x128xf32>
    %72 = vector.extract_strided_slice %0 {offsets = [1, 0], sizes = [1, 128], strides = [1, 1]} : vector<9x128xf32> to vector<1x128xf32>
    %73 = vector.broadcast %72 : vector<1x128xf32> to vector<4x128xf32>
    %74 = arith.mulf %71, %73 : vector<4x128xf32>
    %c7_i32_17 = arith.constant 7 : i32
    %75 = tpu.dynamic_rotate %65 by %c7_i32_17 dim 1 : vector<4x128xf32>, i32 -> vector<4x128xf32>
    %76 = vector.extract_strided_slice %0 {offsets = [2, 0], sizes = [1, 128], strides = [1, 1]} : vector<9x128xf32> to vector<1x128xf32>
    %77 = vector.broadcast %76 : vector<1x128xf32> to vector<4x128xf32>
    %78 = arith.mulf %75, %77 : vector<4x128xf32>
    %c1_i32_18 = arith.constant 1 : i32
    %79 = tpu.dynamic_rotate %65 by %c1_i32_18 dim 1 : vector<4x128xf32>, i32 -> vector<4x128xf32>
    %80 = vector.extract_strided_slice %0 {offsets = [3, 0], sizes = [1, 128], strides = [1, 1]} : vector<9x128xf32> to vector<1x128xf32>
    %81 = vector.broadcast %80 : vector<1x128xf32> to vector<4x128xf32>
    %82 = arith.mulf %79, %81 : vector<4x128xf32>
    %c127_i32_19 = arith.constant 127 : i32
    %83 = tpu.dynamic_rotate %65 by %c127_i32_19 dim 1 : vector<4x128xf32>, i32 -> vector<4x128xf32>
    %84 = vector.extract_strided_slice %0 {offsets = [5, 0], sizes = [1, 128], strides = [1, 1]} : vector<9x128xf32> to vector<1x128xf32>
    %85 = vector.broadcast %84 : vector<1x128xf32> to vector<4x128xf32>
    %86 = arith.mulf %83, %85 : vector<4x128xf32>
    %c121_i32_20 = arith.constant 121 : i32
    %87 = tpu.dynamic_rotate %65 by %c121_i32_20 dim 1 : vector<4x128xf32>, i32 -> vector<4x128xf32>
    %88 = vector.extract_strided_slice %0 {offsets = [6, 0], sizes = [1, 128], strides = [1, 1]} : vector<9x128xf32> to vector<1x128xf32>
    %89 = vector.broadcast %88 : vector<1x128xf32> to vector<4x128xf32>
    %90 = arith.mulf %87, %89 : vector<4x128xf32>
    %c120_i32_21 = arith.constant 120 : i32
    %91 = tpu.dynamic_rotate %65 by %c120_i32_21 dim 1 : vector<4x128xf32>, i32 -> vector<4x128xf32>
    %92 = vector.extract_strided_slice %0 {offsets = [7, 0], sizes = [1, 128], strides = [1, 1]} : vector<9x128xf32> to vector<1x128xf32>
    %93 = vector.broadcast %92 : vector<1x128xf32> to vector<4x128xf32>
    %94 = arith.mulf %91, %93 : vector<4x128xf32>
    %c119_i32_22 = arith.constant 119 : i32
    %95 = tpu.dynamic_rotate %65 by %c119_i32_22 dim 1 : vector<4x128xf32>, i32 -> vector<4x128xf32>
    %96 = vector.extract_strided_slice %0 {offsets = [8, 0], sizes = [1, 128], strides = [1, 1]} : vector<9x128xf32> to vector<1x128xf32>
    %97 = vector.broadcast %96 : vector<1x128xf32> to vector<4x128xf32>
    %98 = arith.mulf %95, %97 : vector<4x128xf32>
    %99 = tpu.concatenate %70, %74, %78, %82, %65, %86, %90, %94, %98 in 0 : vector<4x128xf32>, vector<4x128xf32>, vector<4x128xf32>, vector<4x128xf32>, vector<4x128xf32>, vector<4x128xf32>, vector<4x128xf32>, vector<4x128xf32>, vector<4x128xf32> -> vector<36x128xf32>
    %cst_23 = arith.constant dense<0.000000e+00> : vector<4x128xf32>
    %100 = tpu.matmul %66, %99, %cst_23 {dimension_numbers = #tpu.dot_dimension_numbers<[1], [0], [0], [1], [0, 0, 1, 1], [], []>, precision = #tpu.contract_precision<fp32>} : vector<4x36xf32>, vector<36x128xf32>, vector<4x128xf32> -> vector<4x128xf32>
    %101 = vector.extract_strided_slice %5 {offsets = [0, 36], sizes = [4, 1], strides = [1, 1]} : vector<4x38xf32> to vector<4x1xf32>
    %102 = vector.extract_strided_slice %5 {offsets = [0, 37], sizes = [4, 1], strides = [1, 1]} : vector<4x38xf32> to vector<4x1xf32>
    %cst_24 = arith.constant dense<0.000000e+00> : vector<4xf32>
    %103 = vector.multi_reduction <add>, %100, %cst_24 [1] : vector<4x128xf32> to vector<4xf32>
    %104 = vector.shape_cast %103 : vector<4xf32> to vector<4x1xf32>
    %cst_25 = arith.constant 1.280000e+02 : f32
    %105 = vector.broadcast %cst_25 : f32 to vector<4x1xf32>
    %106 = arith.divf %104, %105 : vector<4x1xf32>
    %107 = vector.broadcast %106 : vector<4x1xf32> to vector<4x128xf32>
    %108 = arith.subf %100, %107 : vector<4x128xf32>
    %109 = arith.mulf %108, %108 : vector<4x128xf32>
    %cst_26 = arith.constant dense<0.000000e+00> : vector<4xf32>
    %110 = vector.multi_reduction <add>, %109, %cst_26 [1] : vector<4x128xf32> to vector<4xf32>
    %111 = vector.shape_cast %110 : vector<4xf32> to vector<4x1xf32>
    %cst_27 = arith.constant 1.280000e+02 : f32
    %112 = vector.broadcast %cst_27 : f32 to vector<4x1xf32>
    %113 = arith.divf %111, %112 : vector<4x1xf32>
    %cst_28 = arith.constant 9.99999974E-6 : f32
    %114 = vector.broadcast %cst_28 : f32 to vector<4x1xf32>
    %115 = arith.addf %113, %114 : vector<4x1xf32>
    %116 = math.rsqrt %115 : vector<4x1xf32>
    %117 = vector.broadcast %116 : vector<4x1xf32> to vector<4x128xf32>
    %118 = arith.mulf %108, %117 : vector<4x128xf32>
    %119 = vector.broadcast %101 : vector<4x1xf32> to vector<4x128xf32>
    %120 = arith.mulf %118, %119 : vector<4x128xf32>
    %121 = vector.broadcast %102 : vector<4x1xf32> to vector<4x128xf32>
    %122 = arith.addf %120, %121 : vector<4x128xf32>
    %cst_29 = arith.constant dense<0.000000e+00> : vector<4x128xf32>
    %123 = tpu.matmul %122, %1, %cst_29 {dimension_numbers = #tpu.dot_dimension_numbers<[1], [0], [0], [1], [0, 0, 1, 1], [], []>, precision = #tpu.contract_precision<fp32>} : vector<4x128xf32>, vector<128x128xf32>, vector<4x128xf32> -> vector<4x128xf32>
    %c480 = arith.constant 480 : index
    %c0_30 = arith.constant 0 : index
    %124 = vector.load %arg4[%c480, %c0_30] : memref<520x32xf32, #tpu.memory_space<vmem>>, vector<32x4xf32>
    %c0_31 = arith.constant 0 : index
    %c0_32 = arith.constant 0 : index
    %125 = vector.load %arg1[%c0_31, %c0_32] : memref<4x128xf32, #tpu.memory_space<vmem>>, vector<4x128xf32>
    %c0_33 = arith.constant 0 : index
    %c0_34 = arith.constant 0 : index
    %126 = vector.load %arg4[%c0_33, %c0_34] : memref<520x32xf32, #tpu.memory_space<vmem>>, vector<64x32xf32>
    %127 = vector.extract_strided_slice %126 {offsets = [0, 0], sizes = [64, 4], strides = [1, 1]} : vector<64x32xf32> to vector<64x4xf32>
    %cst_35 = arith.constant dense<0.000000e+00> : vector<64x128xf32>
    %128 = tpu.matmul %127, %123, %cst_35 {dimension_numbers = #tpu.dot_dimension_numbers<[1], [0], [0], [1], [0, 0, 1, 1], [], []>, precision = #tpu.contract_precision<fp32>} : vector<64x4xf32>, vector<4x128xf32>, vector<64x128xf32> -> vector<64x128xf32>
    %129 = vector.extract_strided_slice %126 {offsets = [0, 4], sizes = [64, 1], strides = [1, 1]} : vector<64x32xf32> to vector<64x1xf32>
    %130 = vector.broadcast %129 : vector<64x1xf32> to vector<64x128xf32>
    %131 = arith.addf %128, %130 : vector<64x128xf32>
    %132 = vector.extract_strided_slice %131 {offsets = [0, 0], sizes = [32, 128], strides = [1, 1]} : vector<64x128xf32> to vector<32x128xf32>
    %133 = vector.extract_strided_slice %131 {offsets = [32, 0], sizes = [32, 128], strides = [1, 1]} : vector<64x128xf32> to vector<32x128xf32>
    %c320 = arith.constant 320 : index
    %c0_36 = arith.constant 0 : index
    %134 = vector.load %arg4[%c320, %c0_36] : memref<520x32xf32, #tpu.memory_space<vmem>>, vector<32x4xf32>
    %cst_37 = arith.constant dense<0.000000e+00> : vector<32x128xf32>
    %135 = tpu.matmul %134, %125, %cst_37 {dimension_numbers = #tpu.dot_dimension_numbers<[1], [0], [0], [1], [0, 0, 1, 1], [], []>, precision = #tpu.contract_precision<fp32>} : vector<32x4xf32>, vector<4x128xf32>, vector<32x128xf32> -> vector<32x128xf32>
    %136 = arith.mulf %132, %135 : vector<32x128xf32>
    %137 = arith.addf %136, %133 : vector<32x128xf32>
    %138 = math.sin %137 : vector<32x128xf32>
    %c64 = arith.constant 64 : index
    %c0_38 = arith.constant 0 : index
    %139 = vector.load %arg4[%c64, %c0_38] : memref<520x32xf32, #tpu.memory_space<vmem>>, vector<64x32xf32>
    %140 = vector.extract_strided_slice %139 {offsets = [0, 0], sizes = [64, 4], strides = [1, 1]} : vector<64x32xf32> to vector<64x4xf32>
    %cst_39 = arith.constant dense<0.000000e+00> : vector<64x128xf32>
    %141 = tpu.matmul %140, %123, %cst_39 {dimension_numbers = #tpu.dot_dimension_numbers<[1], [0], [0], [1], [0, 0, 1, 1], [], []>, precision = #tpu.contract_precision<fp32>} : vector<64x4xf32>, vector<4x128xf32>, vector<64x128xf32> -> vector<64x128xf32>
    %142 = vector.extract_strided_slice %139 {offsets = [0, 4], sizes = [64, 1], strides = [1, 1]} : vector<64x32xf32> to vector<64x1xf32>
    %143 = vector.broadcast %142 : vector<64x1xf32> to vector<64x128xf32>
    %144 = arith.addf %141, %143 : vector<64x128xf32>
    %145 = vector.extract_strided_slice %144 {offsets = [0, 0], sizes = [32, 128], strides = [1, 1]} : vector<64x128xf32> to vector<32x128xf32>
    %146 = vector.extract_strided_slice %144 {offsets = [32, 0], sizes = [32, 128], strides = [1, 1]} : vector<64x128xf32> to vector<32x128xf32>
    %c352 = arith.constant 352 : index
    %c0_40 = arith.constant 0 : index
    %147 = vector.load %arg4[%c352, %c0_40] : memref<520x32xf32, #tpu.memory_space<vmem>>, vector<32x32xf32>
    %cst_41 = arith.constant dense<0.000000e+00> : vector<32x128xf32>
    %148 = tpu.matmul %147, %138, %cst_41 {dimension_numbers = #tpu.dot_dimension_numbers<[1], [0], [0], [1], [0, 0, 1, 1], [], []>, precision = #tpu.contract_precision<fp32>} : vector<32x32xf32>, vector<32x128xf32>, vector<32x128xf32> -> vector<32x128xf32>
    %149 = vector.extract_strided_slice %124 {offsets = [0, 0], sizes = [32, 1], strides = [1, 1]} : vector<32x4xf32> to vector<32x1xf32>
    %150 = vector.broadcast %149 : vector<32x1xf32> to vector<32x128xf32>
    %151 = arith.addf %148, %150 : vector<32x128xf32>
    %152 = arith.mulf %145, %151 : vector<32x128xf32>
    %153 = arith.addf %152, %146 : vector<32x128xf32>
    %154 = math.sin %153 : vector<32x128xf32>
    %c128 = arith.constant 128 : index
    %c0_42 = arith.constant 0 : index
    %155 = vector.load %arg4[%c128, %c0_42] : memref<520x32xf32, #tpu.memory_space<vmem>>, vector<64x32xf32>
    %156 = vector.extract_strided_slice %155 {offsets = [0, 0], sizes = [64, 4], strides = [1, 1]} : vector<64x32xf32> to vector<64x4xf32>
    %cst_43 = arith.constant dense<0.000000e+00> : vector<64x128xf32>
    %157 = tpu.matmul %156, %123, %cst_43 {dimension_numbers = #tpu.dot_dimension_numbers<[1], [0], [0], [1], [0, 0, 1, 1], [], []>, precision = #tpu.contract_precision<fp32>} : vector<64x4xf32>, vector<4x128xf32>, vector<64x128xf32> -> vector<64x128xf32>
    %158 = vector.extract_strided_slice %155 {offsets = [0, 4], sizes = [64, 1], strides = [1, 1]} : vector<64x32xf32> to vector<64x1xf32>
    %159 = vector.broadcast %158 : vector<64x1xf32> to vector<64x128xf32>
    %160 = arith.addf %157, %159 : vector<64x128xf32>
    %161 = vector.extract_strided_slice %160 {offsets = [0, 0], sizes = [32, 128], strides = [1, 1]} : vector<64x128xf32> to vector<32x128xf32>
    %162 = vector.extract_strided_slice %160 {offsets = [32, 0], sizes = [32, 128], strides = [1, 1]} : vector<64x128xf32> to vector<32x128xf32>
    %c384 = arith.constant 384 : index
    %c0_44 = arith.constant 0 : index
    %163 = vector.load %arg4[%c384, %c0_44] : memref<520x32xf32, #tpu.memory_space<vmem>>, vector<32x32xf32>
    %cst_45 = arith.constant dense<0.000000e+00> : vector<32x128xf32>
    %164 = tpu.matmul %163, %154, %cst_45 {dimension_numbers = #tpu.dot_dimension_numbers<[1], [0], [0], [1], [0, 0, 1, 1], [], []>, precision = #tpu.contract_precision<fp32>} : vector<32x32xf32>, vector<32x128xf32>, vector<32x128xf32> -> vector<32x128xf32>
    %165 = vector.extract_strided_slice %124 {offsets = [0, 1], sizes = [32, 1], strides = [1, 1]} : vector<32x4xf32> to vector<32x1xf32>
    %166 = vector.broadcast %165 : vector<32x1xf32> to vector<32x128xf32>
    %167 = arith.addf %164, %166 : vector<32x128xf32>
    %168 = arith.mulf %161, %167 : vector<32x128xf32>
    %169 = arith.addf %168, %162 : vector<32x128xf32>
    %170 = math.sin %169 : vector<32x128xf32>
    %c192 = arith.constant 192 : index
    %c0_46 = arith.constant 0 : index
    %171 = vector.load %arg4[%c192, %c0_46] : memref<520x32xf32, #tpu.memory_space<vmem>>, vector<64x32xf32>
    %172 = vector.extract_strided_slice %171 {offsets = [0, 0], sizes = [64, 4], strides = [1, 1]} : vector<64x32xf32> to vector<64x4xf32>
    %cst_47 = arith.constant dense<0.000000e+00> : vector<64x128xf32>
    %173 = tpu.matmul %172, %123, %cst_47 {dimension_numbers = #tpu.dot_dimension_numbers<[1], [0], [0], [1], [0, 0, 1, 1], [], []>, precision = #tpu.contract_precision<fp32>} : vector<64x4xf32>, vector<4x128xf32>, vector<64x128xf32> -> vector<64x128xf32>
    %174 = vector.extract_strided_slice %171 {offsets = [0, 4], sizes = [64, 1], strides = [1, 1]} : vector<64x32xf32> to vector<64x1xf32>
    %175 = vector.broadcast %174 : vector<64x1xf32> to vector<64x128xf32>
    %176 = arith.addf %173, %175 : vector<64x128xf32>
    %177 = vector.extract_strided_slice %176 {offsets = [0, 0], sizes = [32, 128], strides = [1, 1]} : vector<64x128xf32> to vector<32x128xf32>
    %178 = vector.extract_strided_slice %176 {offsets = [32, 0], sizes = [32, 128], strides = [1, 1]} : vector<64x128xf32> to vector<32x128xf32>
    %c416 = arith.constant 416 : index
    %c0_48 = arith.constant 0 : index
    %179 = vector.load %arg4[%c416, %c0_48] : memref<520x32xf32, #tpu.memory_space<vmem>>, vector<32x32xf32>
    %cst_49 = arith.constant dense<0.000000e+00> : vector<32x128xf32>
    %180 = tpu.matmul %179, %170, %cst_49 {dimension_numbers = #tpu.dot_dimension_numbers<[1], [0], [0], [1], [0, 0, 1, 1], [], []>, precision = #tpu.contract_precision<fp32>} : vector<32x32xf32>, vector<32x128xf32>, vector<32x128xf32> -> vector<32x128xf32>
    %181 = vector.extract_strided_slice %124 {offsets = [0, 2], sizes = [32, 1], strides = [1, 1]} : vector<32x4xf32> to vector<32x1xf32>
    %182 = vector.broadcast %181 : vector<32x1xf32> to vector<32x128xf32>
    %183 = arith.addf %180, %182 : vector<32x128xf32>
    %184 = arith.mulf %177, %183 : vector<32x128xf32>
    %185 = arith.addf %184, %178 : vector<32x128xf32>
    %186 = math.sin %185 : vector<32x128xf32>
    %c256 = arith.constant 256 : index
    %c0_50 = arith.constant 0 : index
    %187 = vector.load %arg4[%c256, %c0_50] : memref<520x32xf32, #tpu.memory_space<vmem>>, vector<64x32xf32>
    %188 = vector.extract_strided_slice %187 {offsets = [0, 0], sizes = [64, 4], strides = [1, 1]} : vector<64x32xf32> to vector<64x4xf32>
    %cst_51 = arith.constant dense<0.000000e+00> : vector<64x128xf32>
    %189 = tpu.matmul %188, %123, %cst_51 {dimension_numbers = #tpu.dot_dimension_numbers<[1], [0], [0], [1], [0, 0, 1, 1], [], []>, precision = #tpu.contract_precision<fp32>} : vector<64x4xf32>, vector<4x128xf32>, vector<64x128xf32> -> vector<64x128xf32>
    %190 = vector.extract_strided_slice %187 {offsets = [0, 4], sizes = [64, 1], strides = [1, 1]} : vector<64x32xf32> to vector<64x1xf32>
    %191 = vector.broadcast %190 : vector<64x1xf32> to vector<64x128xf32>
    %192 = arith.addf %189, %191 : vector<64x128xf32>
    %193 = vector.extract_strided_slice %192 {offsets = [0, 0], sizes = [32, 128], strides = [1, 1]} : vector<64x128xf32> to vector<32x128xf32>
    %194 = vector.extract_strided_slice %192 {offsets = [32, 0], sizes = [32, 128], strides = [1, 1]} : vector<64x128xf32> to vector<32x128xf32>
    %c448 = arith.constant 448 : index
    %c0_52 = arith.constant 0 : index
    %195 = vector.load %arg4[%c448, %c0_52] : memref<520x32xf32, #tpu.memory_space<vmem>>, vector<32x32xf32>
    %cst_53 = arith.constant dense<0.000000e+00> : vector<32x128xf32>
    %196 = tpu.matmul %195, %186, %cst_53 {dimension_numbers = #tpu.dot_dimension_numbers<[1], [0], [0], [1], [0, 0, 1, 1], [], []>, precision = #tpu.contract_precision<fp32>} : vector<32x32xf32>, vector<32x128xf32>, vector<32x128xf32> -> vector<32x128xf32>
    %197 = vector.extract_strided_slice %124 {offsets = [0, 3], sizes = [32, 1], strides = [1, 1]} : vector<32x4xf32> to vector<32x1xf32>
    %198 = vector.broadcast %197 : vector<32x1xf32> to vector<32x128xf32>
    %199 = arith.addf %196, %198 : vector<32x128xf32>
    %200 = arith.mulf %193, %199 : vector<32x128xf32>
    %201 = arith.addf %200, %194 : vector<32x128xf32>
    %202 = math.sin %201 : vector<32x128xf32>
    %c512 = arith.constant 512 : index
    %c0_54 = arith.constant 0 : index
    %203 = vector.load %arg4[%c512, %c0_54] : memref<520x32xf32, #tpu.memory_space<vmem>>, vector<8x32xf32>
    %204 = vector.extract_strided_slice %203 {offsets = [0, 0], sizes = [1, 32], strides = [1, 1]} : vector<8x32xf32> to vector<1x32xf32>
    %cst_55 = arith.constant dense<0.000000e+00> : vector<1x128xf32>
    %205 = tpu.matmul %204, %202, %cst_55 {dimension_numbers = #tpu.dot_dimension_numbers<[1], [0], [0], [1], [0, 0, 1, 1], [], []>, precision = #tpu.contract_precision<fp32>} : vector<1x32xf32>, vector<32x128xf32>, vector<1x128xf32> -> vector<1x128xf32>
    %206 = vector.extract_strided_slice %203 {offsets = [1, 0], sizes = [1, 1], strides = [1, 1]} : vector<8x32xf32> to vector<1x1xf32>
    %207 = vector.broadcast %206 : vector<1x1xf32> to vector<1x128xf32>
    %208 = arith.addf %205, %207 : vector<1x128xf32>
    %c0_56 = arith.constant 0 : index
    %c0_57 = arith.constant 0 : index
    %209 = vector.load %arg5[%c0_56, %c0_57] : memref<1x128xf32, #tpu.memory_space<vmem>>, vector<1x128xf32>
    tpu.vector_store %arg5[%c0_56, %c0_57], %208 {strides = array<i32>} : memref<1x128xf32, #tpu.memory_space<vmem>>, vector<1x128xf32>,
    return
  }
}

</mosaic_0001>

<bundles_post_ra>
// kernel: shape_network_forward.1
= control target key start
LH: loop header
LB: loop body
LE: loop exit
PB: predicated region body
PF: predicated region fallthrough
CT: control target
= control target key end

     0   :  { %v18612_v1 = vmov 0.0   ;;  %s13978_s20 = smov 127   ;;  %s13979_s21 = smov 120   ;;  %vm13982_vm0 = vmmov 0   ;;  %v44_v2 = vlaneseq  ;;  %vm115_vm1 = vcmask 293888   ;;  %s18606_s0 = inlined_call_operand.vmem [shape: f32[4,128], index: 0, kind: input, shape index: {}]   ;;  %s18607_s2 = inlined_call_operand.vmem [shape: f32[144,128], index: 2, kind: input, shape index: {}]   ;;  %s18608_s3 = inlined_call_operand.vmem [shape: f32[2,4,38], index: 3, kind: input, shape index: {}]   ;;  %s18609_s4 = inlined_call_operand.vmem [shape: f32[520,32], index: 4, kind: input, shape index: {}]   ;;  %s18610_s1 = inlined_call_operand.vmem [shape: f32[4,128], index: 1, kind: input, shape index: {}]   ;;  %s18611_s5 = inlined_call_operand.vmem [shape: f32[1,128], index: 5, kind: output, shape index: {}]  }
   0x1   :  { %v41_v0 = vld [vmem:[%s18606_s0] sm:$0xf]  ;;  %12497 = vmatprep.subr.mxu0 %v18612_v1  ;;  %12510 = vmatprep.subr.mxu1 %v18612_v1  ;;  %s13980_s22 = smov 121   ;;  %s13981_s23 = smov 119   ;;  %vm110_vm2 = vcmask 1043456   ;;  %vm1906_vm3 = vcmask 31744  }
   0x2   :  { %70 = vrot.lane.b32.xlu1 %v41_v0, %s13978_s20  ;;  %84 = vrot.lane.b32.xlu0 %v41_v0, %s13979_s21  ;;  %s13983_s0 = smov 8   ;;  %s13984_s24 = smov 1   ;;  %v45_v3 = vshrl.u32 %v44_v2, 7  ;;  %v20_v6 = vld [vmem:[%s18607_s2] sm:$0xff]  ;;  %v14068_v19 = vld [vmem:[%s18607_s2 + $0x8] ss:$0 sm:$0xff] }
   0x3   :  { %12507 = vmatprep.mubr.msk.f32.mxu0 %vm13982_vm0, %v18612_v1  ;;  %12520 = vmatprep.mubr.msk.f32.mxu1 %vm13982_vm0, %v18612_v1  ;;  %s13985_s25 = smov 9   ;;  %s13986_s26 = smov 7   ;;  %v14053_v7 = vld [vmem:[%s18608_s3] sm:$0xf] }
   0x4   :  { %v74_v4 = vsub.s32 5, %v45_v3  ;;  %v88_v5 = vsub.s32 7, %v45_v3  ;;  %v81_v10 = vsub.s32 6, %v45_v3  ;;  %v117_v11 = vsel %vm115_vm1, %v14053_v7, 0 }
   0x5   :  { %v53_v14 = vsub.s32 1, %v45_v3  ;;  %v67_v15 = vsub.s32 3, %v45_v3  ;;  %v14070_v20 = vand.u32 4294901760, %v117_v11  ;;  %v46_v26 = vsub.s32 0, %v45_v3 }
   0x6   :  { %77 = vrot.lane.b32.xlu1 %v41_v0, %s13980_s22  ;;  %91 = vrot.lane.b32.xlu0 %v41_v0, %s13981_s23  ;;  %v14055_v8 = vrot.slane %v20_v6, %v74_v4  ;;  %v14057_v9 = vrot.slane %v20_v6, %v88_v5  ;;  %v14063_v18 = vrot.slane %v20_v6, %v81_v10  ;;  %v60_v27 = vsub.s32 2, %v45_v3 }
   0x7   :  { %v14072_v24 = vrot.slane %v20_v6, %v53_v14  ;;  %v14074_v25 = vrot.slane %v20_v6, %v67_v15  ;;  %v14082_v33 = vsub.f32 %v117_v11, %v14070_v20  ;;  %v14095_v43 = vrot.slane %v20_v6, %v46_v26 }
   0x8   :  { %v14097_v44 = vrot.slane %v20_v6, %v60_v27 }
   0x9   :  { %v194_v47 = vand.u32 4294901760, %v14082_v33 }
   0xa   :  { %49 = vrot.lane.b32.xlu1 %v41_v0, %s13983_s0  ;;  %63 = vrot.lane.b32.xlu0 %v41_v0, %s13984_s24 }
   0xb   :  { %v195_v59 = vsub.f32 %v14082_v33, %v194_v47 }
   0xd   :  { %v196_v6 = vand.u32 4294901760, %v195_v59  ;;  %v14210_v59 = vld [vmem:[%s18608_s3 + $0x4] sm:$0xf] }
   0xe   :  { %42 = vrot.lane.b32.xlu1 %v41_v0, %s13985_s25  ;;  %56 = vrot.lane.b32.xlu0 %v41_v0, %s13986_s26 }
  0x74   :  { %v71_v12 = vpop.permute.xlu1 %70  ;;  %v85_v13 = vpop.permute.xlu0 %84 }
  0x75   :  { %v76_v16 = vmul.f32 %v14055_v8, %v71_v12  ;;  %v90_v17 = vmul.f32 %v14057_v9, %v85_v13 }
  0x77   :  { %v105_v21 = vrot.slane %v76_v16, 4  ;;  %v108_v29 = vrot.slane %v90_v17, 4 }
  0x78   :  { %v78_v22 = vpop.permute.xlu1 %77  ;;  %v92_v23 = vpop.permute.xlu0 %91 }
  0x79   :  { %v113_v28 = vsel %vm110_vm2, %v41_v0, %v105_v21  ;;  %v83_v30 = vmul.f32 %v14063_v18, %v78_v22  ;;  %v97_v31 = vmul.f32 %v14068_v19, %v92_v23 }
  0x7a   :  { %v14079_v32 = vand.u32 4294901760, %v113_v28 }
  0x7b   :  { %v114_v34 = vsel %vm110_vm2, %v83_v30, %v108_v29  ;;  %v120_v35 = vsel %vm110_vm2, %v97_v31, 0 }
  0x7c   :  { %v14087_v36 = vsub.f32 %v113_v28, %v14079_v32  ;;  %v14089_v37 = vand.u32 4294901760, %v114_v34  ;;  %v14091_v38 = vand.u32 4294901760, %v120_v35  ;;  %v50_v39 = vpop.permute.xlu1 %49  ;;  %v64_v40 = vpop.permute.xlu0 %63 }
  0x7d   :  { %v55_v41 = vmul.f32 %v14072_v24, %v50_v39  ;;  %v69_v42 = vmul.f32 %v14074_v25, %v64_v40  ;;  %v13987_v39 = vmov 36   ;;  %v13988_v40 = vmov 37  }
  0x7e   :  { %v14100_v45 = vsub.f32 %v114_v34, %v14089_v37  ;;  %v14103_v46 = vsub.f32 %v120_v35, %v14091_v38  ;;  %12498 = vmatpush3.msra.mxu0 %v14091_v38  ;;  %v241_v53 = vand.u32 4294901760, %v14087_v36  ;;  %13836 = vset.pattern.permute.xlu0 %v13987_v39 }
  0x7f   :  { %v99_v48 = vrot.slane %v55_v41, 4  ;;  %12499 = vmatprep.subr.mxu0 %v18612_v1  ;;  %v102_v54 = vrot.slane %v69_v42, 4  ;;  %13837 = vset.pattern.permute.xlu1 %v13988_v40 }
  0x80   :  { %v43_v49 = vpop.permute.xlu1 %42  ;;  %12500 = vmatpush3.msra.mxu0 %v14089_v37  ;;  %v57_v50 = vpop.permute.xlu0 %56  ;;  %v227_v51 = vand.u32 4294901760, %v14103_v46  ;;  %v234_v52 = vand.u32 4294901760, %v14100_v45  ;;  %v242_v2 = vsub.f32 %v14087_v36, %v241_v53 }
  0x81   :  { %v48_v55 = vmul.f32 %v14095_v43, %v43_v49  ;;  %v62_v56 = vmul.f32 %v14097_v44, %v57_v50  ;;  %12501 = vmatprep.subr.mxu0 %v18612_v1 }
  0x82   :  { %12502 = vmatpush3.msra.mxu0 %v14079_v32  ;;  %v228_v57 = vsub.f32 %v14103_v46, %v227_v51  ;;  %v235_v58 = vsub.f32 %v14100_v45, %v234_v52  ;;  %v243_v10 = vand.u32 4294901760, %v242_v2 }
  0x83   :  { %v111_v60 = vsel %vm110_vm2, %v48_v55, %v99_v48  ;;  %v112_v61 = vsel %vm110_vm2, %v62_v56, %v102_v54  ;;  %12503 = vmatprep.subr.mxu0 %v18612_v1 }
  0x84   :  { %v14124_v62 = vand.u32 4294901760, %v111_v60  ;;  %v14126_v63 = vand.u32 4294901760, %v112_v61  ;;  %v229_v0 = vand.u32 4294901760, %v228_v57  ;;  %v236_v5 = vand.u32 4294901760, %v235_v58 }
  0x86   :  { %v254_v3 = vsub.f32 %v111_v60, %v14124_v62  ;;  %v247_v4 = vsub.f32 %v112_v61, %v14126_v63  ;;  %12504 = vmatpush3.msra.mxu0 %v14126_v63  ;;  %12511 = vmatpush3.msra.mxu1 %v229_v0 }
  0x87   :  { %12505 = vmatprep.subr.mxu0 %v18612_v1  ;;  %12512 = vmatprep.subr.mxu1 %v18612_v1 }
  0x88   :  { %12506 = vmatpush3.msra.mxu0 %v14124_v62  ;;  %12513 = vmatpush3.msra.mxu1 %v236_v5  ;;  %v248_v11 = vand.u32 4294901760, %v247_v4  ;;  %v255_v12 = vand.u32 4294901760, %v254_v3 }
  0x89   :  { %12514 = vmatprep.subr.mxu1 %v18612_v1  ;;  %12523 = vmatprep.subr.mxu0 %v18612_v1 }
  0x8a   :  { %12508 = vmatmul.mubr.f32.vlgmr.msra.gmra.mxu0 %v196_v6  ;;  %12515 = vmatpush3.msra.mxu1 %v243_v10  ;;  %v249_v13 = vsub.f32 %v247_v4, %v248_v11  ;;  %v256_v14 = vsub.f32 %v254_v3, %v255_v12 }
  0x8b   :  { %12524 = vmatpush3.msra.mxu0 %v14103_v46  ;;  %12516 = vmatprep.subr.mxu1 %v18612_v1 }
  0x8c   :  { %12525 = vmatprep.subr.mxu0 %v18612_v1  ;;  %v250_v15 = vand.u32 4294901760, %v249_v13  ;;  %12533 = vmatprep.mubr.msk.f32.mxu0 %vm13982_vm0, %v18612_v1  ;;  %v257_v16 = vand.u32 4294901760, %v256_v14 }
  0x8d   :  { %12526 = vmatpush3.msra.mxu0 %v14100_v45 }
  0x8e   :  { %12527 = vmatprep.subr.mxu0 %v18612_v1  ;;  %12517 = vmatpush3.msra.mxu1 %v250_v15 }
  0x8f   :  { %12528 = vmatpush3.msra.mxu0 %v14087_v36  ;;  %12518 = vmatprep.subr.mxu1 %v18612_v1 }
  0x90   :  { %12529 = vmatprep.subr.mxu0 %v18612_v1  ;;  %12519 = vmatpush3.msra.mxu1 %v257_v16 }
  0x91   :  { %12530 = vmatpush3.msra.mxu0 %v247_v4  ;;  %12521 = vmatmul.mubr.f32.vlgmr.msra.gmra.mxu1 %v14070_v20 }
  0x92   :  { %12531 = vmatprep.subr.mxu0 %v18612_v1  ;;  %12536 = vmatprep.subr.mxu1 %v18612_v1 }
  0x93   :  { %12532 = vmatpush3.msra.mxu0 %v254_v3  ;;  %12537 = vmatpush3.msra.mxu1 %v14091_v38 }
  0x94   :  { %12534 = vmatmul.mubr.f32.vlgmr.msra.gmra.mxu0 %v14082_v33  ;;  %12538 = vmatprep.subr.mxu1 %v18612_v1 }
  0x95   :  { %12549 = vmatprep.subr.mxu0 %v18612_v1  ;;  %12539 = vmatpush3.msra.mxu1 %v14089_v37 }
  0x96   :  { %12550 = vmatpush3.msra.mxu0 %v227_v51  ;;  %12540 = vmatprep.subr.mxu1 %v18612_v1 }
  0x97   :  { %12551 = vmatprep.subr.mxu0 %v18612_v1  ;;  %12541 = vmatpush3.msra.mxu1 %v14079_v32 }
  0x98   :  { %12552 = vmatpush3.msra.mxu0 %v234_v52  ;;  %12542 = vmatprep.subr.mxu1 %v18612_v1 }
  0x99   :  { %12553 = vmatprep.subr.mxu0 %v18612_v1  ;;  %12543 = vmatpush3.msra.mxu1 %v14126_v63 }
  0x9a   :  { %12554 = vmatpush3.msra.mxu0 %v241_v53  ;;  %12544 = vmatprep.subr.mxu1 %v18612_v1 }
  0x9b   :  { %12555 = vmatprep.subr.mxu0 %v18612_v1  ;;  %12545 = vmatpush3.msra.mxu1 %v14124_v62 }
  0x9c   :  { %12546 = vmatprep.mubr.msk.f32.mxu1 %vm13982_vm0, %v18612_v1  ;;  %12556 = vmatpush3.msra.mxu0 %v248_v11 }
  0x9d   :  { %12547 = vmatmul.mubr.f32.vlgmr.msra.gmra.mxu1 %v194_v47  ;;  %12557 = vmatprep.subr.mxu0 %v18612_v1 }
  0x9e   :  { %12562 = vmatprep.subr.mxu1 %v18612_v1  ;;  %12558 = vmatpush3.msra.mxu0 %v255_v12 }
  0x9f   :  { %12559 = vmatprep.mubr.msk.f32.mxu0 %vm13982_vm0, %v18612_v1  ;;  %12563 = vmatpush3.msra.mxu1 %v14091_v38 }
  0xa0   :  { %12560 = vmatmul.mubr.f32.vlgmr.msra.gmra.mxu0 %v14070_v20  ;;  %12564 = vmatprep.subr.mxu1 %v18612_v1 }
  0xa1   :  { %12565 = vmatpush3.msra.mxu1 %v14089_v37  ;;  %12572 = vmatprep.mubr.msk.f32.mxu1 %vm13982_vm0, %v18612_v1 }
  0xa2   :  { %12566 = vmatprep.subr.mxu1 %v18612_v1  ;;  %12575 = vmatprep.subr.mxu0 %v18612_v1 }
  0xa3   :  { %12567 = vmatpush3.msra.mxu1 %v14079_v32  ;;  %12585 = vmatprep.mubr.msk.f32.mxu0 %vm13982_vm0, %v18612_v1 }
  0xa4   :  { %12568 = vmatprep.subr.mxu1 %v18612_v1 }
  0xa5   :  { %12569 = vmatpush3.msra.mxu1 %v14126_v63 }
  0xa6   :  { %12570 = vmatprep.subr.mxu1 %v18612_v1 }
  0xa7   :  { %12571 = vmatpush3.msra.mxu1 %v14124_v62  ;;  %v686_v62 = vsel %vm115_vm1, %v14210_v59, 0 }
  0xa8   :  { %12573 = vmatmul.mubr.f32.vlgmr.msra.gmra.mxu1 %v14070_v20  ;;  %12588 = vmatprep.subr.mxu1 %v18612_v1  ;;  %v14224_v5 = vand.u32 4294901760, %v686_v62 }
  0xa9   :  { %12598 = vmatprep.mubr.msk.f32.mxu1 %vm13982_vm0, %v18612_v1 }
  0xaa   :  { %v14237_v15 = vsub.f32 %v686_v62, %v14224_v5 }
 0x14a   :  { %v198_v17 = vpop.f32.mrf.mxu0 }
 0x14c   :  { %v12509_v21 = vpop.f32.mrf.mxu0 }
 0x151   :  { %v294_v22 = vpop.f32.mrf.mxu1 }
 0x152   :  { %v295_v28 = vadd.f32 %v294_v22, %v198_v17 }
 0x153   :  { %v12522_v23 = vpop.f32.mrf.mxu1 }
 0x154   :  { %v376_v26 = vpop.f32.mrf.mxu0 }
 0x155   :  { %v377_v32 = vadd.f32 %v376_v26, %v295_v28 }
 0x156   :  { %v12535_v27 = vpop.f32.mrf.mxu0 }
 0x15d   :  { %v454_v29 = vpop.f32.mrf.mxu1 }
 0x15e   :  { %v455_v34 = vadd.f32 %v454_v29, %v377_v32 }
 0x15f   :  { %v12548_v30 = vpop.f32.mrf.mxu1 }
 0x160   :  { %v540_v31 = vpop.f32.mrf.mxu0  ;;  %v763_v30 = vand.u32 4294901760, %v14237_v15 }
 0x161   :  { %v541_v35 = vadd.f32 %v540_v31, %v455_v34 }
 0x162   :  { %v12561_v33 = vpop.f32.mrf.mxu0 }
 0x168   :  { %v616_v20 = vpop.f32.mrf.mxu1 }
 0x169   :  { %v617_v36 = vadd.f32 %v616_v20, %v541_v35  ;;  %v764_v20 = vsub.f32 %v14237_v15, %v763_v30 }
 0x16a   :  { %v12574_v37 = vpop.f32.mrf.mxu1 }
 0x16b   :  { %v620_v38 = vsel %vm110_vm2, %v617_v36, 0.0 }
 0x16c   :  { %621 = vadd.xlane.f32.xlu0 %v620_v38 }
 0x182   :  { %635 = vperm.xlu0 %13836, %v14053_v7  }
 0x1f5   :  { %v622_v41 = vpop.xlane.xlu0 %621 }
 0x1f6   :  { %v624_v42 = vmul.f32 0.0078125, %v622_v41 }
 0x1f8   :  { %v625_v45 = vsub.f32 %v617_v36, %v624_v42 }
 0x1fa   :  { %v626_v46 = vmul.f32 %v625_v45, %v625_v45 }
 0x1fc   :  { %v627_v47 = vsel %vm110_vm2, %v626_v46, 0.0 }
 0x1fd   :  { %628 = vadd.xlane.f32.xlu1 %v627_v47  ;;  %v636_v52 = vpop.permute.xlu0 %635 }
 0x20e   :  { %640 = vperm.xlu1 %13837, %v14053_v7  }
 0x286   :  { %v629_v48 = vpop.xlane.xlu1 %628 }
 0x287   :  { %v630_v49 = vmul.f32 0.0078125, %v629_v48 }
 0x289   :  { %v631_v50 = vadd.f32 1e-05, %v630_v49 }
 0x28a   :  { %v641_v54 = vpop.permute.xlu1 %640 }
 0x28b   :  { %13865 = vrsqrt.f32 %v631_v50 }
 0x298   :  { %v13866_v51 = vpop.eup %13865 }
 0x299   :  { %v633_v53 = vmul.f32 %v13866_v51, %v625_v45  ;;  %v765_v45 = vand.u32 4294901760, %v764_v20 }
 0x29b   :  { %v638_v55 = vmul.f32 %v636_v52, %v633_v53 }
 0x29d   :  { %v643_v56 = vadd.f32 %v641_v54, %v638_v55 }
 0x29f   :  { %v644_v57 = vmax.f32 %v643_v56, 0.0 }
 0x2a1   :  { %651 = vrot.lane.b32.xlu0 %v644_v57, %s13986_s26  ;;  %663 = vrot.lane.b32.xlu1 %v644_v57, %s13979_s21 }
 0x2a5   :  { %666 = vrot.lane.b32.xlu1 %v644_v57, %s13981_s23 }
 0x2a9   :  { %657 = vrot.lane.b32.xlu1 %v644_v57, %s13978_s20 }
 0x2ad   :  { %660 = vrot.lane.b32.xlu1 %v644_v57, %s13980_s22 }
 0x2b1   :  { %654 = vrot.lane.b32.xlu1 %v644_v57, %s13984_s24 }
 0x2b5   :  { %648 = vrot.lane.b32.xlu1 %v644_v57, %s13983_s0 }
 0x2b9   :  { %645 = vrot.lane.b32.xlu1 %v644_v57, %s13985_s25 }
 0x313   :  { %v664_v7 = vpop.permute.xlu1 %663  ;;  %v652_v16 = vpop.permute.xlu0 %651 }
 0x314   :  { %v665_v2 = vmul.f32 %v664_v7, %v14057_v9  ;;  %v653_v28 = vmul.f32 %v652_v16, %v14097_v44 }
 0x316   :  { %v679_v11 = vrot.slane %v665_v2, 4 }
 0x317   :  { %v667_v58 = vpop.permute.xlu1 %666 }
 0x318   :  { %v668_v60 = vmul.f32 %v14068_v19, %v667_v58 }
 0x31a   :  { %v689_v61 = vsel %vm110_vm2, %v668_v60, 0 }
 0x31b   :  { %v14216_v63 = vand.u32 4294901760, %v689_v61  ;;  %v658_v0 = vpop.permute.xlu1 %657 }
 0x31c   :  { %v659_v3 = vmul.f32 %v658_v0, %v14055_v8 }
 0x31d   :  { %v14221_v4 = vsub.f32 %v689_v61, %v14216_v63  ;;  %12576 = vmatpush3.msra.mxu0 %v14216_v63 }
 0x31e   :  { %v676_v19 = vrot.slane %v659_v3, 4  ;;  %12577 = vmatprep.subr.mxu0 %v18612_v1 }
 0x31f   :  { %v796_v6 = vand.u32 4294901760, %v14221_v4  ;;  %v661_v10 = vpop.permute.xlu1 %660 }
 0x320   :  { %v683_v12 = vsel %vm110_vm2, %v644_v57, %v676_v19  ;;  %v662_v9 = vmul.f32 %v661_v10, %v14063_v18  ;;  %v36_v10 = vld [vmem:[%s18607_s2 + $0x80] sm:$0xff] }
 0x321   :  { %v14230_v13 = vand.u32 4294901760, %v683_v12  ;;  %v797_v8 = vsub.f32 %v14221_v4, %v796_v6 }
 0x322   :  { %v684_v14 = vsel %vm110_vm2, %v662_v9, %v679_v11  ;;  %v35_v11 = vld [vmem:[%s18607_s2 + $0x78] sm:$0xff]  ;;  %v14344_v9 = vand.u32 4294901760, %v36_v10 }
 0x323   :  { %v14240_v17 = vsub.f32 %v683_v12, %v14230_v13  ;;  %v14242_v21 = vand.u32 4294901760, %v684_v14  ;;  %v655_v22 = vpop.permute.xlu1 %654  ;;  %v798_v23 = vand.u32 4294901760, %v797_v8 }
 0x324   :  { %v656_v18 = vmul.f32 %v655_v22, %v14074_v25 }
 0x325   :  { %v14246_v26 = vsub.f32 %v684_v14, %v14242_v21  ;;  %12578 = vmatpush3.msra.mxu0 %v14242_v21  ;;  %12589 = vmatpush3.msra.mxu1 %v798_v23  ;;  %v810_v27 = vand.u32 4294901760, %v14240_v17  ;;  %v14352_v14 = vsub.f32 %v36_v10, %v14344_v9 }
 0x326   :  { %v673_v29 = vrot.slane %v656_v18, 4  ;;  %12579 = vmatprep.subr.mxu0 %v18612_v1  ;;  %12590 = vmatprep.subr.mxu1 %v18612_v1 }
 0x327   :  { %12580 = vmatpush3.msra.mxu0 %v14230_v13  ;;  %v649_v25 = vpop.permute.xlu1 %648  ;;  %v803_v31 = vand.u32 4294901760, %v14246_v26  ;;  %v811_v35 = vsub.f32 %v14240_v17, %v810_v27 }
 0x328   :  { %v682_v32 = vsel %vm110_vm2, %v653_v28, %v673_v29  ;;  %v650_v33 = vmul.f32 %v649_v25, %v14072_v24  ;;  %12581 = vmatprep.subr.mxu0 %v18612_v1 }
 0x329   :  { %v14259_v34 = vand.u32 4294901760, %v682_v32  ;;  %v804_v44 = vsub.f32 %v14246_v26, %v803_v31  ;;  %v812_v40 = vand.u32 4294901760, %v811_v35 }
 0x32a   :  { %v670_v38 = vrot.slane %v650_v33, 4  ;;  %v34_v33 = vld [vmem:[%s18607_s2 + $0x70] sm:$0xff] }
 0x32b   :  { %v816_v36 = vsub.f32 %v682_v32, %v14259_v34  ;;  %12582 = vmatpush3.msra.mxu0 %v14259_v34  ;;  %v646_v37 = vpop.permute.xlu1 %645  ;;  %v805_v24 = vand.u32 4294901760, %v804_v44  ;;  %v33_v44 = vld [vmem:[%s18607_s2 + $0x68] sm:$0xff] }
 0x32c   :  { %v647_v39 = vmul.f32 %v646_v37, %v14095_v43  ;;  %12583 = vmatprep.subr.mxu0 %v18612_v1  ;;  %v14394_v20 = vand.u32 4294901760, %v33_v44 }
 0x32d   :  { %12591 = vmatpush3.msra.mxu1 %v805_v24  ;;  %v817_v41 = vand.u32 4294901760, %v816_v36 }
 0x32e   :  { %v681_v42 = vsel %vm110_vm2, %v647_v39, %v670_v38  ;;  %12592 = vmatprep.subr.mxu1 %v18612_v1  ;;  %v14403_v24 = vsub.f32 %v33_v44, %v14394_v20  ;;  %v31_v39 = vld [vmem:[%s18607_s2 + $0x58] sm:$0xff] }
 0x32f   :  { %v726_v46 = vand.u32 4294901760, %v681_v42  ;;  %12593 = vmatpush3.msra.mxu1 %v812_v40  ;;  %v818_v47 = vsub.f32 %v816_v36, %v817_v41 }
 0x330   :  { %12594 = vmatprep.subr.mxu1 %v18612_v1 }
 0x331   :  { %v823_v48 = vsub.f32 %v681_v42, %v726_v46  ;;  %12584 = vmatpush3.msra.mxu0 %v726_v46  ;;  %v819_v49 = vand.u32 4294901760, %v818_v47 }
 0x332   :  { %12601 = vmatprep.subr.mxu0 %v18612_v1  ;;  %12586 = vmatmul.mubr.f32.vlgmr.msra.gmra.mxu0 %v765_v45  ;;  %v14419_v45 = vand.u32 4294901760, %v31_v39 }
 0x333   :  { %12595 = vmatpush3.msra.mxu1 %v819_v49  ;;  %12602 = vmatpush3.msra.mxu0 %v14221_v4  ;;  %v824_v43 = vand.u32 4294901760, %v823_v48 }
 0x334   :  { %12603 = vmatprep.subr.mxu0 %v18612_v1  ;;  %12596 = vmatprep.subr.mxu1 %v18612_v1 }
 0x335   :  { %12604 = vmatpush3.msra.mxu0 %v14246_v26  ;;  %v825_v50 = vsub.f32 %v823_v48, %v824_v43  ;;  %12611 = vmatprep.mubr.msk.f32.mxu0 %vm13982_vm0, %v18612_v1 }
 0x336   :  { %12605 = vmatprep.subr.mxu0 %v18612_v1 }
 0x337   :  { %12606 = vmatpush3.msra.mxu0 %v14240_v17  ;;  %v826_v51 = vand.u32 4294901760, %v825_v50  ;;  %v1313_v17 = vand.u32 4294901760, %v14352_v14 }
 0x338   :  { %12607 = vmatprep.subr.mxu0 %v18612_v1 }
 0x339   :  { %12597 = vmatpush3.msra.mxu1 %v826_v51  ;;  %12608 = vmatpush3.msra.mxu0 %v816_v36  ;;  %v1314_v23 = vsub.f32 %v14352_v14, %v1313_v17  ;;  %v32_v36 = vld [vmem:[%s18607_s2 + $0x60] sm:$0xff]  ;;  %v29_v51 = vld [vmem:[%s18607_s2 + $0x48] sm:$0xff] }
 0x33a   :  { %12599 = vmatmul.mubr.f32.vlgmr.msra.gmra.mxu1 %v14224_v5  ;;  %12609 = vmatprep.subr.mxu0 %v18612_v1  ;;  %v14405_v38 = vand.u32 4294901760, %v32_v36 }
 0x33b   :  { %12614 = vmatprep.subr.mxu1 %v18612_v1  ;;  %12610 = vmatpush3.msra.mxu0 %v823_v48 }
 0x33c   :  { %12615 = vmatpush3.msra.mxu1 %v14216_v63  ;;  %12612 = vmatmul.mubr.f32.vlgmr.msra.gmra.mxu0 %v14237_v15  ;;  %v14417_v42 = vsub.f32 %v32_v36, %v14405_v38 }
 0x33d   :  { %12616 = vmatprep.subr.mxu1 %v18612_v1  ;;  %12627 = vmatprep.subr.mxu0 %v18612_v1 }
 0x33e   :  { %12617 = vmatpush3.msra.mxu1 %v14242_v21  ;;  %12628 = vmatpush3.msra.mxu0 %v796_v6  ;;  %v37_v6 = vld [vmem:[%s18607_s2 + $0x88] sm:$0xff]  ;;  %v1341_v49 = vand.u32 4294901760, %v14417_v42 }
 0x33f   :  { %12618 = vmatprep.subr.mxu1 %v18612_v1  ;;  %12629 = vmatprep.subr.mxu0 %v18612_v1  ;;  %v14342_v12 = vand.u32 4294901760, %v37_v6 }
 0x340   :  { %12619 = vmatpush3.msra.mxu1 %v14230_v13  ;;  %12630 = vmatpush3.msra.mxu0 %v803_v31 }
 0x341   :  { %12620 = vmatprep.subr.mxu1 %v18612_v1  ;;  %12631 = vmatprep.subr.mxu0 %v18612_v1  ;;  %v14349_v8 = vsub.f32 %v37_v6, %v14342_v12 }
 0x342   :  { %12621 = vmatpush3.msra.mxu1 %v14259_v34  ;;  %12632 = vmatpush3.msra.mxu0 %v810_v27  ;;  %v1315_v27 = vand.u32 4294901760, %v1314_v23 }
 0x343   :  { %12622 = vmatprep.subr.mxu1 %v18612_v1  ;;  %12633 = vmatprep.subr.mxu0 %v18612_v1  ;;  %v1306_v16 = vand.u32 4294901760, %v14349_v8 }
 0x344   :  { %12623 = vmatpush3.msra.mxu1 %v726_v46  ;;  %12624 = vmatprep.mubr.msk.f32.mxu1 %vm13982_vm0, %v18612_v1 }
 0x345   :  { %12634 = vmatpush3.msra.mxu0 %v817_v41  ;;  %12625 = vmatmul.mubr.f32.vlgmr.msra.gmra.mxu1 %v763_v30  ;;  %v1307_v22 = vsub.f32 %v14349_v8, %v1306_v16  ;;  %v1334_v41 = vand.u32 4294901760, %v14403_v24 }
 0x346   :  { %12635 = vmatprep.subr.mxu0 %v18612_v1  ;;  %12640 = vmatprep.subr.mxu1 %v18612_v1 }
 0x347   :  { %12636 = vmatpush3.msra.mxu0 %v824_v43  ;;  %12637 = vmatprep.mubr.msk.f32.mxu0 %vm13982_vm0, %v18612_v1  ;;  %v1308_v26 = vand.u32 4294901760, %v1307_v22  ;;  %v1335_v48 = vsub.f32 %v14403_v24, %v1334_v41  ;;  %v14431_v43 = vsub.f32 %v31_v39, %v14419_v45  ;;  %v23_v39 = vld [vmem:[%s18607_s2 + $0x18] sm:$0xff] }
 0x348   :  { %12641 = vmatpush3.msra.mxu1 %v14216_v63  ;;  %12638 = vmatmul.mubr.f32.vlgmr.msra.gmra.mxu0 %v14224_v5 }
 0x349   :  { %12642 = vmatprep.subr.mxu1 %v18612_v1  ;;  %12650 = vmatprep.mubr.msk.f32.mxu1 %vm13982_vm0, %v18612_v1 }
 0x34a   :  { %12643 = vmatpush3.msra.mxu1 %v14242_v21  ;;  %12653 = vmatprep.subr.mxu0 %v18612_v1 }
 0x34b   :  { %12644 = vmatprep.subr.mxu1 %v18612_v1  ;;  %12685 = vmatprep.mubr.msk.f32.mxu0 %vm13982_vm0, %v18612_v1 }
 0x34c   :  { %12645 = vmatpush3.msra.mxu1 %v14230_v13  ;;  %v14346_v13 = vand.u32 4294901760, %v35_v11  ;;  %12654 = vmatpush3.msra.mxu0 %v14342_v12 }
 0x34d   :  { %12646 = vmatprep.subr.mxu1 %v18612_v1  ;;  %12655 = vmatprep.subr.mxu0 %v18612_v1 }
 0x34e   :  { %12647 = vmatpush3.msra.mxu1 %v14259_v34  ;;  %v14355_v15 = vsub.f32 %v35_v11, %v14346_v13  ;;  %12656 = vmatpush3.msra.mxu0 %v14344_v9  ;;  %v14386_v34 = vand.u32 4294901760, %v34_v33 }
 0x34f   :  { %12648 = vmatprep.subr.mxu1 %v18612_v1  ;;  %12657 = vmatprep.subr.mxu0 %v18612_v1 }
 0x350   :  { %12649 = vmatpush3.msra.mxu1 %v726_v46  ;;  %v1320_v21 = vand.u32 4294901760, %v14355_v15  ;;  %12658 = vmatpush3.msra.mxu0 %v14346_v13  ;;  %v14392_v35 = vsub.f32 %v34_v33, %v14386_v34  ;;  %v30_v46 = vld [vmem:[%s18607_s2 + $0x50] sm:$0xff] }
 0x351   :  { %12651 = vmatmul.mubr.f32.vlgmr.msra.gmra.mxu1 %v14224_v5  ;;  %12688 = vmatprep.subr.mxu1 %v18612_v1  ;;  %v14434_v50 = vand.u32 4294901760, %v30_v46 }
 0x352   :  { %12720 = vmatprep.mubr.msk.f32.mxu1 %vm13982_vm0, %v18612_v1  ;;  %v1321_v18 = vsub.f32 %v14355_v15, %v1320_v21  ;;  %12659 = vmatprep.subr.mxu0 %v18612_v1  ;;  %v1327_v37 = vand.u32 4294901760, %v14392_v35 }
 0x353   :  { %12689 = vmatpush3.msra.mxu1 %v1308_v26  ;;  %12660 = vmatpush3.msra.mxu0 %v14386_v34 }
 0x354   :  { %v1322_v28 = vand.u32 4294901760, %v1321_v18  ;;  %12690 = vmatprep.subr.mxu1 %v18612_v1  ;;  %12661 = vmatprep.subr.mxu0 %v18612_v1  ;;  %v1328_v40 = vsub.f32 %v14392_v35, %v1327_v37  ;;  %v25_v18 = vld [vmem:[%s18607_s2 + $0x28] sm:$0xff] }
 0x355   :  { %12691 = vmatpush3.msra.mxu1 %v1315_v27  ;;  %12662 = vmatpush3.msra.mxu0 %v14394_v20 }
 0x356   :  { %12692 = vmatprep.subr.mxu1 %v18612_v1  ;;  %12663 = vmatprep.subr.mxu0 %v18612_v1  ;;  %v1329_v47 = vand.u32 4294901760, %v1328_v40 }
 0x357   :  { %12693 = vmatpush3.msra.mxu1 %v1322_v28  ;;  %12664 = vmatpush3.msra.mxu0 %v14405_v38 }
 0x358   :  { %12694 = vmatprep.subr.mxu1 %v18612_v1  ;;  %12665 = vmatprep.subr.mxu0 %v18612_v1 }
 0x359   :  { %12666 = vmatpush3.msra.mxu0 %v14419_v45  ;;  %12695 = vmatpush3.msra.mxu1 %v1329_v47 }
 0x35a   :  { %12667 = vmatprep.subr.mxu0 %v18612_v1  ;;  %12696 = vmatprep.subr.mxu1 %v18612_v1 }
 0x35b   :  { %12668 = vmatpush3.msra.mxu0 %v14434_v50 }
 0x35c   :  { %12669 = vmatprep.subr.mxu0 %v18612_v1 }
 0x3f2   :  { %v767_v52 = vpop.f32.mrf.mxu0 }
 0x3f4   :  { %v12587_v53 = vpop.f32.mrf.mxu0 }
 0x3f5   :  { %v1342_v53 = vsub.f32 %v14417_v42, %v1341_v49 }
 0x3fa   :  { %v863_v54 = vpop.f32.mrf.mxu1 }
 0x3fb   :  { %v864_v58 = vadd.f32 %v863_v54, %v767_v52  ;;  %v1336_v52 = vand.u32 4294901760, %v1335_v48  ;;  %v1348_v54 = vand.u32 4294901760, %v14431_v43  ;;  %v14535_v48 = vand.u32 4294901760, %v23_v39 }
 0x3fc   :  { %v12600_v55 = vpop.f32.mrf.mxu1  ;;  %v945_v56 = vpop.f32.mrf.mxu0 }
 0x3fd   :  { %v946_v62 = vadd.f32 %v945_v56, %v864_v58  ;;  %v14444_v55 = vand.u32 4294901760, %v29_v51  ;;  %v14448_v56 = vsub.f32 %v30_v46, %v14434_v50  ;;  %12697 = vmatpush3.msra.mxu1 %v1336_v52  ;;  %v1349_v58 = vsub.f32 %v14431_v43, %v1348_v54  ;;  %v22_v52 = vld [vmem:[%s18607_s2 + $0x10] sm:$0xff] }
 0x3fe   :  { %v12613_v57 = vpop.f32.mrf.mxu0  ;;  %12698 = vmatprep.subr.mxu1 %v18612_v1 }
 0x3ff   :  { %v28_v57 = vld [vmem:[%s18607_s2 + $0x40] sm:$0xff]  ;;  %12670 = vmatpush3.msra.mxu0 %v14444_v55 }
 0x400   :  { %12671 = vmatprep.subr.mxu0 %v18612_v1 }
 0x405   :  { %v1023_v7 = vpop.f32.mrf.mxu1 }
 0x406   :  { %v1024_v0 = vadd.f32 %v1023_v7, %v946_v62  ;;  %v1343_v7 = vand.u32 4294901760, %v1342_v53  ;;  %v1355_v62 = vand.u32 4294901760, %v14448_v56 }
 0x407   :  { %v12626_v60 = vpop.f32.mrf.mxu1 }
 0x408   :  { %v1109_v61 = vpop.f32.mrf.mxu0  ;;  %v14458_v60 = vsub.f32 %v29_v51, %v14444_v55  ;;  %12699 = vmatpush3.msra.mxu1 %v1343_v7  ;;  %v14546_v7 = vsub.f32 %v23_v39, %v14535_v48 }
 0x409   :  { %v1110_v2 = vadd.f32 %v1109_v61, %v1024_v0  ;;  %v14460_v61 = vand.u32 4294901760, %v28_v57  ;;  %v1350_v0 = vand.u32 4294901760, %v1349_v58  ;;  %12700 = vmatprep.subr.mxu1 %v18612_v1  ;;  %v14548_v58 = vand.u32 4294901760, %v22_v52 }
 0x40a   :  { %v12639_v63 = vpop.f32.mrf.mxu0 }
 0x40b   :  { %v27_v63 = vld [vmem:[%s18607_s2 + $0x38] sm:$0xff]  ;;  %12672 = vmatpush3.msra.mxu0 %v14460_v61  ;;  %12701 = vmatpush3.msra.mxu1 %v1350_v0 }
 0x40c   :  { %12673 = vmatprep.subr.mxu0 %v18612_v1  ;;  %12702 = vmatprep.subr.mxu1 %v18612_v1 }
 0x411   :  { %v1185_v3 = vpop.f32.mrf.mxu1 }
 0x412   :  { %v1186_v4 = vadd.f32 %v1185_v3, %v1110_v2  ;;  %v1362_v2 = vand.u32 4294901760, %v14458_v60  ;;  %v14471_v3 = vsub.f32 %v28_v57, %v14460_v61 }
 0x413   :  { %v12652_v5 = vpop.f32.mrf.mxu1 }
 0x414   :  { %v1189_v19 = vsel %vm110_vm2, %v1186_v4, 0.0  ;;  %v1356_v5 = vsub.f32 %v14448_v56, %v1355_v62  ;;  %v1363_v6 = vsub.f32 %v14458_v60, %v1362_v2  ;;  %v1369_v10 = vand.u32 4294901760, %v14471_v3 }
 0x415   :  { %1190 = vadd.xlane.f32.xlu0 %v1189_v19  ;;  %v26_v19 = vld [vmem:[%s18607_s2 + $0x30] sm:$0xff] }
 0x416   :  { %v14491_v22 = vand.u32 4294901760, %v26_v19  ;;  %v1357_v23 = vand.u32 4294901760, %v1356_v5  ;;  %v1364_v26 = vand.u32 4294901760, %v1363_v6  ;;  %v1370_v27 = vsub.f32 %v14471_v3, %v1369_v10 }
 0x417   :  { %v1404_v5 = vand.u32 4294901760, %v14546_v7 }
 0x418   :  { %12703 = vmatpush3.msra.mxu1 %v1357_v23 }
 0x419   :  { %12704 = vmatprep.subr.mxu1 %v18612_v1 }
 0x41a   :  { %12705 = vmatpush3.msra.mxu1 %v1364_v26 }
 0x41b   :  { %12706 = vmatprep.subr.mxu1 %v18612_v1 }
 0x42b   :  { %1203 = vperm.xlu0 %13836, %v14210_v59  }
 0x49e   :  { %v1191_v29 = vpop.xlane.xlu0 %1190 }
 0x49f   :  { %v1192_v30 = vmul.f32 0.0078125, %v1191_v29  ;;  %v14504_v29 = vsub.f32 %v26_v19, %v14491_v22  ;;  %v14561_v19 = vsub.f32 %v22_v52, %v14548_v58 }
 0x4a1   :  { %v14378_v25 = vsub.f32 %v1186_v4, %v1192_v30  ;;  %v14473_v4 = vand.u32 4294901760, %v27_v63  ;;  %v24_v30 = vld [vmem:[%s18607_s2 + $0x20] sm:$0xff]  ;;  %v1383_v33 = vand.u32 4294901760, %v14504_v29  ;;  %v1411_v26 = vand.u32 4294901760, %v14561_v19 }
 0x4a2   :  { %v14518_v44 = vand.u32 4294901760, %v24_v30 }
 0x4a3   :  { %v1194_v31 = vmul.f32 %v14378_v25, %v14378_v25  ;;  %v14489_v11 = vsub.f32 %v27_v63, %v14473_v4  ;;  %12674 = vmatpush3.msra.mxu0 %v14473_v4  ;;  %v1384_v46 = vsub.f32 %v14504_v29, %v1383_v33 }
 0x4a4   :  { %12675 = vmatprep.subr.mxu0 %v18612_v1  ;;  %v14533_v47 = vsub.f32 %v24_v30, %v14518_v44  ;;  %v1412_v30 = vsub.f32 %v14561_v19, %v1411_v26 }
 0x4a5   :  { %v1195_v32 = vsel %vm110_vm2, %v1194_v31, 0.0  ;;  %v1376_v28 = vand.u32 4294901760, %v14489_v11  ;;  %v1371_v31 = vand.u32 4294901760, %v1370_v27  ;;  %12676 = vmatpush3.msra.mxu0 %v14491_v22  ;;  %v1385_v53 = vand.u32 4294901760, %v1384_v46 }
 0x4a6   :  { %1196 = vadd.xlane.f32.xlu1 %v1195_v32  ;;  %12677 = vmatprep.subr.mxu0 %v18612_v1  ;;  %v1397_v57 = vand.u32 4294901760, %v14533_v47 }
 0x4a7   :  { %v1377_v32 = vsub.f32 %v14489_v11, %v1376_v28  ;;  %12707 = vmatpush3.msra.mxu1 %v1371_v31  ;;  %v1413_v31 = vand.u32 4294901760, %v1412_v30 }
 0x4a8   :  { %12708 = vmatprep.subr.mxu1 %v18612_v1  ;;  %v1398_v0 = vsub.f32 %v14533_v47, %v1397_v57 }
 0x4a9   :  { %v1378_v40 = vand.u32 4294901760, %v1377_v32 }
 0x4aa   :  { %v1399_v23 = vand.u32 4294901760, %v1398_v0 }
 0x4ab   :  { %12709 = vmatpush3.msra.mxu1 %v1378_v40 }
 0x4ac   :  { %12710 = vmatprep.subr.mxu1 %v18612_v1 }
 0x4ad   :  { %12711 = vmatpush3.msra.mxu1 %v1385_v53  ;;  %v1204_v53 = vpop.permute.xlu0 %1203 }
 0x4ae   :  { %12712 = vmatprep.subr.mxu1 %v18612_v1 }
 0x4b7   :  { %1208 = vperm.xlu1 %13837, %v14210_v59   ;;  %v14507_v59 = vand.u32 4294901760, %v25_v18 }
 0x4b9   :  { %v14522_v36 = vsub.f32 %v25_v18, %v14507_v59  ;;  %12678 = vmatpush3.msra.mxu0 %v14507_v59  ;;  %v1405_v18 = vsub.f32 %v14546_v7, %v1404_v5 }
 0x4ba   :  { %12679 = vmatprep.subr.mxu0 %v18612_v1 }
 0x4bb   :  { %v1390_v51 = vand.u32 4294901760, %v14522_v36  ;;  %12680 = vmatpush3.msra.mxu0 %v14518_v44  ;;  %v1406_v27 = vand.u32 4294901760, %v1405_v18 }
 0x4bc   :  { %12681 = vmatprep.subr.mxu0 %v18612_v1 }
 0x4bd   :  { %v1391_v63 = vsub.f32 %v14522_v36, %v1390_v51  ;;  %12682 = vmatpush3.msra.mxu0 %v14535_v48 }
 0x4be   :  { %12683 = vmatprep.subr.mxu0 %v18612_v1 }
 0x4bf   :  { %v1392_v6 = vand.u32 4294901760, %v1391_v63  ;;  %12684 = vmatpush3.msra.mxu0 %v14548_v58 }
 0x4c0   :  { %12723 = vmatprep.subr.mxu0 %v18612_v1 }
 0x4c1   :  { %12713 = vmatpush3.msra.mxu1 %v1392_v6 }
 0x4c2   :  { %12714 = vmatprep.subr.mxu1 %v18612_v1 }
 0x4c3   :  { %12715 = vmatpush3.msra.mxu1 %v1399_v23 }
 0x4c4   :  { %12716 = vmatprep.subr.mxu1 %v18612_v1 }
 0x4c5   :  { %12717 = vmatpush3.msra.mxu1 %v1406_v27 }
 0x4c6   :  { %12718 = vmatprep.subr.mxu1 %v18612_v1 }
 0x4c7   :  { %12719 = vmatpush3.msra.mxu1 %v1413_v31 }
 0x4c8   :  { %12758 = vmatprep.subr.mxu1 %v18612_v1 }
 0x52f   :  { %v1197_v32 = vpop.xlane.xlu1 %1196 }
 0x530   :  { %v1198_v39 = vmul.f32 0.0078125, %v1197_v32 }
 0x532   :  { %v1199_v40 = vadd.f32 1e-05, %v1198_v39 }
 0x533   :  { %v1209_v0 = vpop.permute.xlu1 %1208 }
 0x534   :  { %13867 = vrsqrt.f32 %v1199_v40 }
 0x541   :  { %v13868_v46 = vpop.eup %13867 }
 0x542   :  { %v1201_v52 = vmul.f32 %v13868_v46, %v14378_v25 }
 0x544   :  { %v1206_v63 = vmul.f32 %v1204_v53, %v1201_v52 }
 0x546   :  { %v1211_v6 = vadd.f32 %v1209_v0, %v1206_v63 }
 0x548   :  { %v14580_v23 = vand.u32 4294901760, %v1211_v6 }
 0x54a   :  { %v14583_v18 = vsub.f32 %v1211_v6, %v14580_v23  ;;  %12721 = vmatmul.mubr.f32.vlgmr.msra.gmra.mxu1 %v14580_v23 }
 0x54b   :  { %12759 = vmatpush3.msra.mxu1 %v14342_v12  ;;  %12790 = vmatprep.mubr.msk.f32.mxu1 %vm13982_vm0, %v18612_v1 }
 0x54c   :  { %v1295_v27 = vand.u32 4294901760, %v14583_v18  ;;  %12760 = vmatprep.subr.mxu1 %v18612_v1 }
 0x54d   :  { %12761 = vmatpush3.msra.mxu1 %v14344_v9 }
 0x54e   :  { %v1296_v25 = vsub.f32 %v14583_v18, %v1295_v27  ;;  %12762 = vmatprep.subr.mxu1 %v18612_v1 }
 0x54f   :  { %12763 = vmatpush3.msra.mxu1 %v14346_v13 }
 0x550   :  { %12764 = vmatprep.subr.mxu1 %v18612_v1  ;;  %v1297_v30 = vand.u32 4294901760, %v1296_v25 }
 0x551   :  { %12765 = vmatpush3.msra.mxu1 %v14386_v34 }
 0x552   :  { %12766 = vmatprep.subr.mxu1 %v18612_v1  ;;  %12686 = vmatmul.mubr.f32.vlgmr.msra.gmra.mxu0 %v1297_v30 }
 0x553   :  { %12724 = vmatpush3.msra.mxu0 %v14349_v8  ;;  %12767 = vmatpush3.msra.mxu1 %v14394_v20 }
 0x554   :  { %12725 = vmatprep.subr.mxu0 %v18612_v1  ;;  %12768 = vmatprep.subr.mxu1 %v18612_v1 }
 0x555   :  { %12726 = vmatpush3.msra.mxu0 %v14352_v14  ;;  %12769 = vmatpush3.msra.mxu1 %v14405_v38 }
 0x556   :  { %12727 = vmatprep.subr.mxu0 %v18612_v1  ;;  %12770 = vmatprep.subr.mxu1 %v18612_v1 }
 0x557   :  { %12728 = vmatpush3.msra.mxu0 %v14355_v15  ;;  %12771 = vmatpush3.msra.mxu1 %v14419_v45 }
 0x558   :  { %12729 = vmatprep.subr.mxu0 %v18612_v1  ;;  %12772 = vmatprep.subr.mxu1 %v18612_v1 }
 0x559   :  { %12730 = vmatpush3.msra.mxu0 %v14392_v35  ;;  %12773 = vmatpush3.msra.mxu1 %v14434_v50 }
 0x55a   :  { %12731 = vmatprep.subr.mxu0 %v18612_v1  ;;  %12774 = vmatprep.subr.mxu1 %v18612_v1 }
 0x55b   :  { %12732 = vmatpush3.msra.mxu0 %v14403_v24  ;;  %12775 = vmatpush3.msra.mxu1 %v14444_v55  ;;  %v18614_v24 = vmov 4  }
 0x55c   :  { %12733 = vmatprep.subr.mxu0 %v18612_v1  ;;  %12776 = vmatprep.subr.mxu1 %v18612_v1 }
 0x55d   :  { %12734 = vmatpush3.msra.mxu0 %v14417_v42  ;;  %12777 = vmatpush3.msra.mxu1 %v14460_v61  ;;  %v1864_v42 = vld [vmem:[%s18609_s4 + $0x30] sm:$0xff] }
 0x55e   :  { %12735 = vmatprep.subr.mxu0 %v18612_v1  ;;  %12778 = vmatprep.subr.mxu1 %v18612_v1 }
 0x55f   :  { %12736 = vmatpush3.msra.mxu0 %v14431_v43  ;;  %12779 = vmatpush3.msra.mxu1 %v14473_v4  ;;  %v1862_v43 = vld [vmem:[%s18609_s4 + $0x20] sm:$0xff] }
 0x560   :  { %12737 = vmatprep.subr.mxu0 %v18612_v1  ;;  %12780 = vmatprep.subr.mxu1 %v18612_v1 }
 0x561   :  { %12738 = vmatpush3.msra.mxu0 %v14448_v56  ;;  %12781 = vmatpush3.msra.mxu1 %v14491_v22 }
 0x562   :  { %12739 = vmatprep.subr.mxu0 %v18612_v1  ;;  %12782 = vmatprep.subr.mxu1 %v18612_v1 }
 0x563   :  { %12740 = vmatpush3.msra.mxu0 %v14458_v60  ;;  %12783 = vmatpush3.msra.mxu1 %v14507_v59  ;;  %v14787_v60 = vld [vmem:[%s18609_s4 + $0x50] sm:$0xff] }
 0x564   :  { %12741 = vmatprep.subr.mxu0 %v18612_v1  ;;  %12784 = vmatprep.subr.mxu1 %v18612_v1 }
 0x565   :  { %12742 = vmatpush3.msra.mxu0 %v14471_v3  ;;  %12785 = vmatpush3.msra.mxu1 %v14518_v44 }
 0x566   :  { %12743 = vmatprep.subr.mxu0 %v18612_v1  ;;  %12786 = vmatprep.subr.mxu1 %v18612_v1 }
 0x567   :  { %12744 = vmatpush3.msra.mxu0 %v14489_v11  ;;  %12787 = vmatpush3.msra.mxu1 %v14535_v48 }
 0x568   :  { %12745 = vmatprep.subr.mxu0 %v18612_v1  ;;  %12788 = vmatprep.subr.mxu1 %v18612_v1 }
 0x569   :  { %12746 = vmatpush3.msra.mxu0 %v14504_v29  ;;  %12789 = vmatpush3.msra.mxu1 %v14548_v58 }
 0x56a   :  { %12747 = vmatprep.subr.mxu0 %v18612_v1  ;;  %12791 = vmatmul.mubr.f32.vlgmr.msra.gmra.mxu1 %v1295_v27 }
 0x56b   :  { %12828 = vmatprep.subr.mxu1 %v18612_v1  ;;  %12748 = vmatpush3.msra.mxu0 %v14522_v36 }
 0x56c   :  { %12829 = vmatpush3.msra.mxu1 %v14342_v12  ;;  %12749 = vmatprep.subr.mxu0 %v18612_v1  ;;  %v1858_v12 = vld [vmem:[%s18609_s4] sm:$0xff] }
 0x56d   :  { %12830 = vmatprep.subr.mxu1 %v18612_v1  ;;  %12750 = vmatpush3.msra.mxu0 %v14533_v47 }
 0x56e   :  { %12831 = vmatpush3.msra.mxu1 %v14344_v9  ;;  %12751 = vmatprep.subr.mxu0 %v18612_v1  ;;  %v1907_v9 = vsel %vm1906_vm3, %v1858_v12, 0 }
 0x56f   :  { %12832 = vmatprep.subr.mxu1 %v18612_v1  ;;  %12752 = vmatpush3.msra.mxu0 %v14546_v7 }
 0x570   :  { %12833 = vmatpush3.msra.mxu1 %v14346_v13  ;;  %12753 = vmatprep.subr.mxu0 %v18612_v1  ;;  %v14745_v13 = vand.u32 4294901760, %v1907_v9 }
 0x571   :  { %12834 = vmatprep.subr.mxu1 %v18612_v1  ;;  %12754 = vmatpush3.msra.mxu0 %v14561_v19 }
 0x572   :  { %12755 = vmatprep.mubr.msk.f32.mxu0 %vm13982_vm0, %v18612_v1  ;;  %12835 = vmatpush3.msra.mxu1 %v14386_v34  ;;  %v14748_v8 = vsub.f32 %v1907_v9, %v14745_v13 }
 0x573   :  { %12756 = vmatmul.mubr.f32.vlgmr.msra.gmra.mxu0 %v14583_v18  ;;  %12793 = vmatprep.subr.mxu0 %v18612_v1 }
 0x574   :  { %12836 = vmatprep.subr.mxu1 %v18612_v1  ;;  %12794 = vmatpush3.msra.mxu0 %v1306_v16  ;;  %v1994_v14 = vand.u32 4294901760, %v14748_v8 }
 0x575   :  { %12837 = vmatpush3.msra.mxu1 %v14394_v20  ;;  %12795 = vmatprep.subr.mxu0 %v18612_v1  ;;  %v1860_v20 = vld [vmem:[%s18609_s4 + $0x10] sm:$0xff] }
 0x576   :  { %12838 = vmatprep.subr.mxu1 %v18612_v1  ;;  %12796 = vmatpush3.msra.mxu0 %v1313_v17  ;;  %v1995_v15 = vsub.f32 %v14748_v8, %v1994_v14  ;;  %v1911_v3 = vsel %vm1906_vm3, %v1860_v20, 0 }
 0x577   :  { %12839 = vmatpush3.msra.mxu1 %v14405_v38  ;;  %12797 = vmatprep.subr.mxu0 %v18612_v1  ;;  %v1859_v38 = vld [vmem:[%s18609_s4 + $0x8] sm:$0xff] }
 0x578   :  { %12840 = vmatprep.subr.mxu1 %v18612_v1  ;;  %12798 = vmatpush3.msra.mxu0 %v1320_v21  ;;  %v1996_v16 = vand.u32 4294901760, %v1995_v15 }
 0x579   :  { %12841 = vmatpush3.msra.mxu1 %v14419_v45  ;;  %12799 = vmatprep.subr.mxu0 %v18612_v1 }
 0x57a   :  { %12842 = vmatprep.subr.mxu1 %v18612_v1  ;;  %12800 = vmatpush3.msra.mxu0 %v1327_v37  ;;  %v1861_v37 = vld [vmem:[%s18609_s4 + $0x18] sm:$0xff] }
 0x57b   :  { %12843 = vmatpush3.msra.mxu1 %v14434_v50  ;;  %12801 = vmatprep.subr.mxu0 %v18612_v1  ;;  %v1863_v50 = vld [vmem:[%s18609_s4 + $0x28] sm:$0xff]  ;;  %v1913_v11 = vsel %vm1906_vm3, %v1861_v37, 0 }
 0x57c   :  { %12844 = vmatprep.subr.mxu1 %v18612_v1  ;;  %12802 = vmatpush3.msra.mxu0 %v1334_v41  ;;  %v1865_v41 = vld [vmem:[%s18609_s4 + $0x38] sm:$0xff]  ;;  %v14816_v36 = vand.u32 4294901760, %v1913_v11 }
 0x57d   :  { %12845 = vmatpush3.msra.mxu1 %v14444_v55  ;;  %12803 = vmatprep.subr.mxu0 %v18612_v1  ;;  %v1921_v39 = vsel %vm1906_vm3, %v1865_v41, 0 }
 0x57e   :  { %12846 = vmatprep.subr.mxu1 %v18612_v1  ;;  %12804 = vmatpush3.msra.mxu0 %v1341_v49  ;;  %v14842_v6 = vand.u32 4294901760, %v1921_v39 }
 0x57f   :  { %12847 = vmatpush3.msra.mxu1 %v14460_v61  ;;  %12805 = vmatprep.subr.mxu0 %v18612_v1  ;;  %v14793_v61 = vld [vmem:[%s18609_s4 + $0x78] sm:$0xff] }
 0x580   :  { %12848 = vmatprep.subr.mxu1 %v18612_v1  ;;  %12806 = vmatpush3.msra.mxu0 %v1348_v54  ;;  %v14781_v54 = vld [vmem:[%s18609_s4 + $0x58] sm:$0xff] }
 0x581   :  { %12849 = vmatpush3.msra.mxu1 %v14473_v4  ;;  %12807 = vmatprep.subr.mxu0 %v18612_v1 }
 0x582   :  { %12850 = vmatprep.subr.mxu1 %v18612_v1  ;;  %12808 = vmatpush3.msra.mxu0 %v1355_v62  ;;  %v14799_v62 = vld [vmem:[%s18609_s4 + $0x48] sm:$0xff] }
 0x583   :  { %12851 = vmatpush3.msra.mxu1 %v14491_v22  ;;  %12809 = vmatprep.subr.mxu0 %v18612_v1 }
 0x584   :  { %12852 = vmatprep.subr.mxu1 %v18612_v1  ;;  %12810 = vmatpush3.msra.mxu0 %v1362_v2  ;;  %v1909_v2 = vsel %vm1906_vm3, %v1859_v38, 0 }
 0x585   :  { %12853 = vmatpush3.msra.mxu1 %v14507_v59  ;;  %12811 = vmatprep.subr.mxu0 %v18612_v1  ;;  %v14804_v4 = vand.u32 4294901760, %v1909_v2 }
 0x586   :  { %12854 = vmatprep.subr.mxu1 %v18612_v1  ;;  %12812 = vmatpush3.msra.mxu0 %v1369_v10  ;;  %v14806_v10 = vand.u32 4294901760, %v1911_v3 }
 0x587   :  { %12855 = vmatpush3.msra.mxu1 %v14518_v44  ;;  %12813 = vmatprep.subr.mxu0 %v18612_v1  ;;  %v14811_v59 = vsub.f32 %v1909_v2, %v14804_v4 }
 0x588   :  { %12856 = vmatprep.subr.mxu1 %v18612_v1  ;;  %12814 = vmatpush3.msra.mxu0 %v1376_v28  ;;  %v1915_v28 = vsel %vm1906_vm3, %v1862_v43, 0  ;;  %v14814_v44 = vsub.f32 %v1911_v3, %v14806_v10 }
 0x589   :  { %12857 = vmatpush3.msra.mxu1 %v14535_v48  ;;  %12815 = vmatprep.subr.mxu0 %v18612_v1  ;;  %v14818_v48 = vand.u32 4294901760, %v1915_v28  ;;  %v2004_v7 = vand.u32 4294901760, %v14811_v59 }
 0x58a   :  { %12858 = vmatprep.subr.mxu1 %v18612_v1  ;;  %12816 = vmatpush3.msra.mxu0 %v1383_v33 }
 0x58b   :  { %12859 = vmatpush3.msra.mxu1 %v14548_v58  ;;  %12860 = vmatprep.mubr.msk.f32.mxu1 %vm13982_vm0, %v18612_v1  ;;  %v2014_v58 = vand.u32 4294901760, %v14814_v44  ;;  %v14830_v31 = vsub.f32 %v1915_v28, %v14818_v48  ;;  %v2005_v52 = vsub.f32 %v14811_v59, %v2004_v7 }
 0x58c   :  { %12817 = vmatprep.subr.mxu0 %v18612_v1  ;;  %12861 = vmatmul.mubr.f32.vlgmr.msra.gmra.mxu1 %v14580_v23 }
 0x58d   :  { %12818 = vmatpush3.msra.mxu0 %v1390_v51  ;;  %12825 = vmatprep.mubr.msk.f32.mxu0 %vm13982_vm0, %v18612_v1  ;;  %v1917_v51 = vsel %vm1906_vm3, %v1863_v50, 0  ;;  %v2015_v18 = vsub.f32 %v14814_v44, %v2014_v58  ;;  %v2034_v27 = vand.u32 4294901760, %v14830_v31 }
 0x58e   :  { %12819 = vmatprep.subr.mxu0 %v18612_v1  ;;  %12879 = vmatprep.mubr.f32.mxu1 %v14745_v13  ;;  %v14827_v19 = vand.u32 4294901760, %v1917_v51 }
 0x58f   :  { %12820 = vmatpush3.msra.mxu0 %v1397_v57  ;;  %13838 = vset.pattern.permute.xlu0 %v18614_v24  ;;  %v1919_v57 = vsel %vm1906_vm3, %v1864_v42, 0 }
 0x590   :  { %12821 = vmatprep.subr.mxu0 %v18612_v1  ;;  %13839 = vset.pattern.permute.xlu1 %v18614_v24  ;;  %v14832_v32 = vand.u32 4294901760, %v1919_v57  ;;  %v14840_v0 = vsub.f32 %v1917_v51, %v14827_v19  ;;  %v2673_v51 = vld [vmem:[%s18609_s4 + $0x140] sm:$0xff] }
 0x591   :  { %12822 = vmatpush3.msra.mxu0 %v1404_v5  ;;  %1883 = vperm.xlu0 %13838, %v1861_v37   ;;  %v14825_v5 = vsub.f32 %v1913_v11, %v14816_v36 }
 0x592   :  { %12823 = vmatprep.subr.mxu0 %v18612_v1  ;;  %1878 = vperm.xlu1 %13839, %v1860_v20   ;;  %v14849_v25 = vsub.f32 %v1919_v57, %v14832_v32  ;;  %v2678_v57 = vsel %vm1906_vm3, %v2673_v51, 0 }
 0x593   :  { %12824 = vmatpush3.msra.mxu0 %v1411_v26  ;;  %v2024_v63 = vand.u32 4294901760, %v14825_v5 }
 0x594   :  { %12826 = vmatmul.mubr.f32.vlgmr.msra.gmra.mxu0 %v14580_v23 }
 0x595   :  { %12865 = vmatprep.mubr.f32.mxu0 %v1996_v16  ;;  %1873 = vperm.xlu0 %13838, %v1859_v38   ;;  %v2025_v15 = vsub.f32 %v14825_v5, %v2024_v63  ;;  %v2044_v16 = vand.u32 4294901760, %v14840_v0 }
 0x596   :  { %1903 = vperm.xlu1 %13839, %v1865_v41  }
 0x597   :  { %v2026_v38 = vand.u32 4294901760, %v2025_v15  ;;  %v2045_v41 = vsub.f32 %v14840_v0, %v2044_v16 }
 0x599   :  { %1868 = vperm.xlu0 %13838, %v1858_v12   ;;  %v2006_v12 = vand.u32 4294901760, %v2005_v52  ;;  %v2046_v2 = vand.u32 4294901760, %v2045_v41  ;;  %v2676_v52 = vld [vmem:[%s18609_s4 + $0x158] sm:$0xff] }
 0x59a   :  { %1898 = vperm.xlu1 %13839, %v1864_v42  }
 0x59d   :  { %1888 = vperm.xlu0 %13838, %v1862_v43  }
 0x59e   :  { %1893 = vperm.xlu1 %13839, %v1863_v50  }
 0x5a2   :  { %3716 = vperm.xlu1 %13839, %v14781_v54  }
 0x5a6   :  { %3711 = vperm.xlu1 %13839, %v14787_v60  }
 0x5aa   :  { %3736 = vperm.xlu1 %13839, %v14793_v61  }
 0x5ae   :  { %3706 = vperm.xlu1 %13839, %v14799_v62  }
 0x60a   :  { %v1450_v17 = vpop.f32.mrf.mxu1 }
 0x60c   :  { %v12722_v21 = vpop.f32.mrf.mxu1 }
 0x60d   :  { %v2016_v21 = vand.u32 4294901760, %v2015_v18 }
 0x612   :  { %v1299_v34 = vpop.f32.mrf.mxu0 }
 0x613   :  { %v1451_v29 = vadd.f32 %v1450_v17, %v1299_v34  ;;  %v14859_v17 = vsub.f32 %v1921_v39, %v14842_v6  ;;  %v2035_v34 = vsub.f32 %v14830_v31, %v2034_v27 }
 0x614   :  { %v12687_v35 = vpop.f32.mrf.mxu0 }
 0x615   :  { %v2054_v35 = vand.u32 4294901760, %v14849_v25  ;;  %v2064_v42 = vand.u32 4294901760, %v14859_v17 }
 0x617   :  { %v2055_v43 = vsub.f32 %v14849_v25, %v2054_v35  ;;  %v2065_v3 = vsub.f32 %v14859_v17, %v2064_v42 }
 0x619   :  { %v2056_v11 = vand.u32 4294901760, %v2055_v43  ;;  %v2066_v28 = vand.u32 4294901760, %v2065_v3 }
 0x62a   :  { %v1643_v45 = vpop.f32.mrf.mxu1 }
 0x62c   :  { %v12792_v49 = vpop.f32.mrf.mxu1 }
 0x62d   :  { %v2036_v49 = vand.u32 4294901760, %v2035_v34 }
 0x633   :  { %v1554_v55 = vpop.f32.mrf.mxu0 }
 0x634   :  { %v1555_v47 = vadd.f32 %v1554_v55, %v1451_v29 }
 0x635   :  { %v12757_v56 = vpop.f32.mrf.mxu0 }
 0x636   :  { %v1644_v26 = vadd.f32 %v1643_v45, %v1555_v47  ;;  %v1857_v45 = vld [vmem:[%s18610_s1] sm:$0xf] }
 0x637   :  { %v2690_v55 = vsel %vm110_vm2, %v1857_v45, 0 }
 0x64c   :  { %v1849_v22 = vpop.f32.mrf.mxu1 }
 0x64e   :  { %v12862_v33 = vpop.f32.mrf.mxu1 }
 0x654   :  { %v1762_v40 = vpop.f32.mrf.mxu0 }
 0x655   :  { %v1763_v46 = vadd.f32 %v1762_v40, %v1644_v26  ;;  %v2674_v26 = vld [vmem:[%s18609_s4 + $0x148] sm:$0xff]  ;;  %v2675_v40 = vld [vmem:[%s18609_s4 + $0x150] sm:$0xff] }
 0x656   :  { %v12827_v53 = vpop.f32.mrf.mxu0 }
 0x657   :  { %v1850_v23 = vadd.f32 %v1849_v22, %v1763_v46  ;;  %v14895_v22 = vand.u32 4294901760, %v2690_v55  ;;  %v2684_v46 = vsel %vm1906_vm3, %v2675_v40, 0 }
 0x659   :  { %v1924_v30 = vsel %vm110_vm2, %v1850_v23, 0  ;;  %v14903_v29 = vsub.f32 %v2690_v55, %v14895_v22 }
 0x65a   :  { %v14852_v9 = vand.u32 4294901760, %v1924_v30 }
 0x65b   :  { %v14910_v33 = vand.u32 4294901760, %v14903_v29 }
 0x65c   :  { %18678 = vst [vmem:[#allocation2_spill] sm:$0xff] %v14852_v9  ;;  %v14866_v20 = vsub.f32 %v1924_v30, %v14852_v9  ;;  %12863 = vmatprep.subr.mxu0 %v14852_v9 }
 0x65d   :  { %12864 = vmatpush3.msra.mxu0 %v14852_v9  ;;  %v2832_v47 = vsub.f32 %v14903_v29, %v14910_v33 }
 0x65e   :  { %18679 = vst [vmem:[#allocation3_spill] sm:$0xff] %v14866_v20  ;;  %12866 = vmatmul.mubr.f32.vlgmr.msra.gmra.mxu0 %v2006_v12  ;;  %12891 = vmatprep.subr.mxu0 %v14866_v20  ;;  %v14872_v37 = vand.u32 4294901760, %v14866_v20 }
 0x65f   :  { %12892 = vmatpush3.msra.mxu0 %v14866_v20  ;;  %12868 = vmatprep.mubr.f32.mxu0 %v2016_v21  ;;  %v2833_v39 = vand.u32 4294901760, %v2832_v47  ;;  %v3753_v47 = vsel %vm1906_vm3, %v14793_v61, 0 }
 0x660   :  { %18680 = vst [vmem:[#allocation4_spill] sm:$0xff] %v14872_v37  ;;  %12919 = vmatprep.subr.mxu0 %v14872_v37  ;;  %v2106_v50 = vsub.f32 %v14866_v20, %v14872_v37  ;;  %v15100_v40 = vand.u32 4294901760, %v3753_v47 }
 0x662   :  { %12869 = vmatmul.mubr.f32.gmra.mxu0 %v2026_v38  ;;  %v14889_v56 = vand.u32 4294901760, %v2106_v50 }
 0x663   :  { %12871 = vmatprep.mubr.f32.mxu0 %v2036_v49 }
 0x664   :  { %18681 = vst [vmem:[#allocation5_spill] sm:$0xff] %v14889_v56  ;;  %12877 = vmatprep.subr.mxu1 %v14889_v56 }
 0x665   :  { %12878 = vmatpush3.msra.mxu1 %v14889_v56 }
 0x666   :  { %12872 = vmatmul.mubr.f32.gmra.mxu0 %v2046_v2  ;;  %12880 = vmatmul.mubr.f32.vlgmr.msra.gmra.mxu1 %v14804_v4 }
 0x667   :  { %12905 = vmatprep.subr.mxu1 %v14852_v9  ;;  %12874 = vmatprep.mubr.f32.mxu0 %v2056_v11 }
 0x668   :  { %12906 = vmatpush3.msra.mxu1 %v14852_v9  ;;  %12882 = vmatprep.mubr.f32.mxu1 %v14806_v10 }
 0x669   :  { %12933 = vmatprep.subr.mxu1 %v14852_v9 }
 0x66a   :  { %12875 = vmatmul.mubr.f32.gmra.mxu0 %v2066_v28  ;;  %12883 = vmatmul.mubr.f32.gmra.mxu1 %v14816_v36 }
 0x66b   :  { %12885 = vmatprep.mubr.f32.mxu1 %v14818_v48  ;;  %12893 = vmatprep.mubr.f32.mxu0 %v14748_v8  ;;  %v14940_v8 = vand.u32 4294901760, %v2678_v57 }
 0x66e   :  { %12886 = vmatmul.mubr.f32.gmra.mxu1 %v14827_v19  ;;  %12894 = vmatmul.mubr.f32.vlgmr.msra.gmra.mxu0 %v14811_v59 }
 0x66f   :  { %12920 = vmatpush3.msra.mxu0 %v14872_v37  ;;  %12888 = vmatprep.mubr.f32.mxu1 %v14832_v32 }
 0x670   :  { %12896 = vmatprep.mubr.f32.mxu0 %v14814_v44  ;;  %12947 = vmatprep.subr.mxu0 %v14895_v22  ;;  %v14958_v44 = vsub.f32 %v2678_v57, %v14940_v8 }
 0x672   :  { %12889 = vmatmul.mubr.f32.gmra.mxu1 %v14842_v6  ;;  %12897 = vmatmul.mubr.f32.gmra.mxu0 %v14825_v5 }
 0x673   :  { %12899 = vmatprep.mubr.f32.mxu0 %v14830_v31  ;;  %12907 = vmatprep.mubr.f32.mxu1 %v1994_v14  ;;  %v2681_v14 = vsel %vm1906_vm3, %v2674_v26, 0  ;;  %v2760_v31 = vand.u32 4294901760, %v14958_v44 }
 0x674   :  { %v14952_v59 = vand.u32 4294901760, %v2681_v14 }
 0x675   :  { %v2761_v18 = vsub.f32 %v14958_v44, %v2760_v31 }
 0x676   :  { %12900 = vmatmul.mubr.f32.gmra.mxu0 %v14840_v0  ;;  %12908 = vmatmul.mubr.f32.vlgmr.msra.gmra.mxu1 %v2004_v7  ;;  %v14960_v7 = vand.u32 4294901760, %v2684_v46  ;;  %v14967_v5 = vsub.f32 %v2681_v14, %v14952_v59 }
 0x677   :  { %12934 = vmatpush3.msra.mxu1 %v14852_v9  ;;  %12902 = vmatprep.mubr.f32.mxu0 %v14849_v25 }
 0x678   :  { %12910 = vmatprep.mubr.f32.mxu1 %v2014_v58  ;;  %12955 = vmatprep.subr.mxu1 %v2833_v39  ;;  %v2687_v58 = vsel %vm1906_vm3, %v2676_v52, 0  ;;  %v2770_v0 = vand.u32 4294901760, %v14967_v5 }
 0x679   :  { %v14969_v53 = vand.u32 4294901760, %v2687_v58 }
 0x67a   :  { %12903 = vmatmul.mubr.f32.gmra.mxu0 %v14859_v17  ;;  %12911 = vmatmul.mubr.f32.gmra.mxu1 %v2024_v63  ;;  %v14976_v63 = vsub.f32 %v2684_v46, %v14960_v7  ;;  %v2771_v25 = vsub.f32 %v14967_v5, %v2770_v0 }
 0x67b   :  { %12913 = vmatprep.mubr.f32.mxu1 %v2034_v27  ;;  %12921 = vmatprep.mubr.f32.mxu0 %v14745_v13  ;;  %v14985_v23 = vsub.f32 %v2687_v58, %v14969_v53 }
 0x67c   :  { %v2780_v27 = vand.u32 4294901760, %v14976_v63  ;;  %v2772_v15 = vand.u32 4294901760, %v2771_v25 }
 0x67d   :  { %v2790_v30 = vand.u32 4294901760, %v14985_v23 }
 0x67e   :  { %12914 = vmatmul.mubr.f32.gmra.mxu1 %v2044_v16  ;;  %12922 = vmatmul.mubr.f32.vlgmr.msra.gmra.mxu0 %v14804_v4  ;;  %v2781_v12 = vsub.f32 %v14976_v63, %v2780_v27 }
 0x67f   :  { %12916 = vmatprep.mubr.f32.mxu1 %v2054_v35  ;;  %12924 = vmatprep.mubr.f32.mxu0 %v14806_v10  ;;  %v3745_v35 = vsel %vm1906_vm3, %v14781_v54, 0 }
 0x680   :  { %12948 = vmatpush3.msra.mxu0 %v14895_v22  ;;  %v2782_v16 = vand.u32 4294901760, %v2781_v12  ;;  %v15052_v54 = vand.u32 4294901760, %v3745_v35 }
 0x681   :  { %12963 = vmatprep.subr.mxu0 %v14903_v29 }
 0x682   :  { %12917 = vmatmul.mubr.f32.gmra.mxu1 %v2064_v42  ;;  %12925 = vmatmul.mubr.f32.gmra.mxu0 %v14816_v36  ;;  %v15071_v3 = vsub.f32 %v3745_v35, %v15052_v54 }
 0x683   :  { %12927 = vmatprep.mubr.f32.mxu0 %v14818_v48  ;;  %12935 = vmatprep.mubr.f32.mxu1 %v14745_v13  ;;  %v2762_v13 = vand.u32 4294901760, %v2761_v18 }
 0x684   :  { %v3853_v26 = vand.u32 4294901760, %v15071_v3 }
 0x686   :  { %12928 = vmatmul.mubr.f32.gmra.mxu0 %v14827_v19  ;;  %12936 = vmatmul.mubr.f32.vlgmr.msra.gmra.mxu1 %v14804_v4  ;;  %v3691_v4 = vld [vmem:[%s18609_s4 + $0x40] sm:$0xff] }
 0x687   :  { %12930 = vmatprep.mubr.f32.mxu0 %v14832_v32  ;;  %12938 = vmatprep.mubr.f32.mxu1 %v14806_v10  ;;  %v2791_v10 = vsub.f32 %v14985_v23, %v2790_v30  ;;  %v3739_v17 = vsel %vm1906_vm3, %v3691_v4, 0  ;;  %v15187_v4 = vpop.permute.xlu0 %1883 }
 0x688   :  { %12956 = vmatpush3.msra.mxu1 %v2833_v39  ;;  %v15017_v34 = vand.u32 4294901760, %v3739_v17 }
 0x689   :  { %12971 = vmatprep.subr.mxu1 %v14895_v22  ;;  %v2792_v21 = vand.u32 4294901760, %v2791_v10 }
 0x68a   :  { %12931 = vmatmul.mubr.f32.gmra.mxu0 %v14842_v6  ;;  %12939 = vmatmul.mubr.f32.gmra.mxu1 %v14816_v36  ;;  %v3741_v36 = vsel %vm1906_vm3, %v14799_v62, 0  ;;  %v15034_v62 = vsub.f32 %v3739_v17, %v15017_v34 }
 0x68b   :  { %12941 = vmatprep.mubr.f32.mxu1 %v14818_v48  ;;  %12949 = vmatprep.mubr.f32.mxu0 %v2762_v13  ;;  %v3695_v48 = vld [vmem:[%s18609_s4 + $0x60] sm:$0xff]  ;;  %v1874_v17 = vpop.permute.xlu0 %1873 }
 0x68c   :  { %v3747_v38 = vsel %vm1906_vm3, %v3695_v48, 0  ;;  %v3823_v45 = vand.u32 4294901760, %v15034_v62 }
 0x68d   :  { %v15057_v49 = vand.u32 4294901760, %v3747_v38 }
 0x68e   :  { %12942 = vmatmul.mubr.f32.gmra.mxu1 %v14827_v19  ;;  %12950 = vmatmul.mubr.f32.vlgmr.msra.gmra.mxu0 %v2772_v15  ;;  %v15027_v19 = vand.u32 4294901760, %v3741_v36  ;;  %v3824_v28 = vsub.f32 %v15034_v62, %v3823_v45 }
 0x68f   :  { %12944 = vmatprep.mubr.f32.mxu1 %v14832_v32  ;;  %12952 = vmatprep.mubr.f32.mxu0 %v2782_v16  ;;  %v3743_v32 = vsel %vm1906_vm3, %v14787_v60, 0  ;;  %v3697_v60 = vld [vmem:[%s18609_s4 + $0x70] sm:$0xff] }
 0x690   :  { %12964 = vmatpush3.msra.mxu0 %v14903_v29  ;;  %v15042_v41 = vand.u32 4294901760, %v3743_v32  ;;  %v15050_v42 = vsub.f32 %v3741_v36, %v15027_v19  ;;  %v3751_v50 = vsel %vm1906_vm3, %v3697_v60, 0  ;;  %v15082_v29 = vsub.f32 %v3747_v38, %v15057_v49 }
 0x691   :  { %12979 = vmatprep.subr.mxu0 %v14910_v33  ;;  %v3825_v61 = vand.u32 4294901760, %v3824_v28 }
 0x692   :  { %12945 = vmatmul.mubr.f32.gmra.mxu1 %v14842_v6  ;;  %12953 = vmatmul.mubr.f32.gmra.mxu0 %v2792_v21  ;;  %v3696_v6 = vld [vmem:[%s18609_s4 + $0x68] sm:$0xff]  ;;  %v15065_v55 = vsub.f32 %v3743_v32, %v15042_v41  ;;  %v3833_v2 = vand.u32 4294901760, %v15050_v42  ;;  %v3863_v14 = vand.u32 4294901760, %v15082_v29 }
 0x693   :  { %12957 = vmatprep.mubr.f32.mxu1 %v14940_v8  ;;  %12965 = vmatprep.mubr.f32.mxu0 %v14958_v44  ;;  %v3749_v43 = vsel %vm1906_vm3, %v3696_v6, 0  ;;  %v3854_v44 = vsub.f32 %v15071_v3, %v3853_v26 }
 0x694   :  { %v15073_v11 = vand.u32 4294901760, %v3749_v43  ;;  %v3843_v51 = vand.u32 4294901760, %v15065_v55  ;;  %v3834_v57 = vsub.f32 %v15050_v42, %v3833_v2 }
 0x696   :  { %12958 = vmatmul.mubr.f32.vlgmr.msra.gmra.mxu1 %v14952_v59  ;;  %12966 = vmatmul.mubr.f32.vlgmr.msra.gmra.mxu0 %v14967_v5  ;;  %v15098_v39 = vsub.f32 %v3749_v43, %v15073_v11  ;;  %v3835_v52 = vand.u32 4294901760, %v3834_v57  ;;  %v3892_v5 = vsub.f32 %v3753_v47, %v15100_v40 }
 0x697   :  { %12980 = vmatpush3.msra.mxu0 %v14910_v33  ;;  %12960 = vmatprep.mubr.f32.mxu1 %v14960_v7  ;;  %v15084_v33 = vand.u32 4294901760, %v3751_v50 }
 0x698   :  { %12995 = vmatprep.subr.mxu0 %v14852_v9  ;;  %12968 = vmatprep.mubr.f32.mxu0 %v14976_v63  ;;  %v3873_v58 = vand.u32 4294901760, %v15098_v39 }
 0x699   :  { %12972 = vmatpush3.msra.mxu1 %v14895_v22  ;;  %v15106_v46 = vsub.f32 %v3751_v50, %v15084_v33 }
 0x69a   :  { %12961 = vmatmul.mubr.f32.gmra.mxu1 %v14969_v53  ;;  %12969 = vmatmul.mubr.f32.gmra.mxu0 %v14985_v23  ;;  %v3855_v23 = vand.u32 4294901760, %v3854_v44  ;;  %v3874_v18 = vsub.f32 %v15098_v39, %v3873_v58 }
 0x69b   :  { %12973 = vmatprep.mubr.f32.mxu1 %v2760_v31  ;;  %12981 = vmatprep.mubr.f32.mxu0 %v14940_v8  ;;  %v3864_v31 = vsub.f32 %v15082_v29, %v3863_v14  ;;  %v3883_v63 = vand.u32 4294901760, %v15106_v46 }
 0x69c   :  { %12987 = vmatprep.subr.mxu1 %v14895_v22 }
 0x69d   :  { %v3884_v25 = vsub.f32 %v15106_v46, %v3883_v63 }
 0x69e   :  { %12974 = vmatmul.mubr.f32.vlgmr.msra.gmra.mxu1 %v2770_v0  ;;  %12982 = vmatmul.mubr.f32.vlgmr.msra.gmra.mxu0 %v14952_v59 }
 0x69f   :  { %12988 = vmatpush3.msra.mxu1 %v14895_v22  ;;  %12996 = vmatpush3.msra.mxu0 %v14852_v9  ;;  %v3844_v22 = vsub.f32 %v15065_v55, %v3843_v51  ;;  %v3885_v13 = vand.u32 4294901760, %v3884_v25 }
 0x6a0   :  { %13009 = vmatprep.subr.mxu1 %v14889_v56  ;;  %13023 = vmatprep.subr.mxu0 %v14866_v20 }
 0x6a1   :  { %12976 = vmatprep.mubr.f32.mxu1 %v2780_v27  ;;  %12984 = vmatprep.mubr.f32.mxu0 %v14960_v7  ;;  %v3845_v0 = vand.u32 4294901760, %v3844_v22  ;;  %v3893_v27 = vand.u32 4294901760, %v3892_v5 }
 0x6a2   :  { %12977 = vmatmul.mubr.f32.gmra.mxu1 %v2790_v30  ;;  %12985 = vmatmul.mubr.f32.gmra.mxu0 %v14969_v53 }
 0x6a3   :  { %12989 = vmatprep.mubr.f32.mxu1 %v14940_v8  ;;  %12997 = vmatprep.mubr.f32.mxu0 %v3825_v61  ;;  %v3865_v8 = vand.u32 4294901760, %v3864_v31  ;;  %v3894_v30 = vsub.f32 %v3892_v5, %v3893_v27 }
 0x6a5   :  { %v3895_v12 = vand.u32 4294901760, %v3894_v30 }
 0x6a6   :  { %12990 = vmatmul.mubr.f32.vlgmr.msra.gmra.mxu1 %v14952_v59  ;;  %12998 = vmatmul.mubr.f32.vlgmr.msra.gmra.mxu0 %v3835_v52  ;;  %v3875_v59 = vand.u32 4294901760, %v3874_v18 }
 0x6a7   :  { %13010 = vmatpush3.msra.mxu1 %v14889_v56  ;;  %13024 = vmatpush3.msra.mxu0 %v14866_v20 }
 0x6a8   :  { %13037 = vmatprep.subr.mxu1 %v14852_v9  ;;  %13051 = vmatprep.subr.mxu0 %v14872_v37 }
 0x6a9   :  { %12992 = vmatprep.mubr.f32.mxu1 %v14960_v7  ;;  %13000 = vmatprep.mubr.f32.mxu0 %v3845_v0  ;;  %v15183_v7 = vpop.permute.xlu1 %1878 }
 0x6aa   :  { %12993 = vmatmul.mubr.f32.gmra.mxu1 %v14969_v53  ;;  %13001 = vmatmul.mubr.f32.gmra.mxu0 %v3855_v23 }
 0x6ab   :  { %13003 = vmatprep.mubr.f32.mxu0 %v3865_v8  ;;  %13011 = vmatprep.mubr.f32.mxu1 %v15017_v34 }
 0x6ad   :  { %v15185_v53 = vpop.permute.xlu1 %1903 }
 0x6ae   :  { %13004 = vmatmul.mubr.f32.gmra.mxu0 %v3875_v59  ;;  %13012 = vmatmul.mubr.f32.vlgmr.msra.gmra.mxu1 %v15027_v19 }
 0x6af   :  { %13038 = vmatpush3.msra.mxu1 %v14852_v9  ;;  %13006 = vmatprep.mubr.f32.mxu0 %v3885_v13 }
 0x6b0   :  { %13065 = vmatprep.subr.mxu1 %v14852_v9  ;;  %13014 = vmatprep.mubr.f32.mxu1 %v15042_v41 }
 0x6b1   :  { %v15191_v16 = vpop.permute.xlu1 %1898 }
 0x6b2   :  { %13007 = vmatmul.mubr.f32.gmra.mxu0 %v3895_v12  ;;  %13015 = vmatmul.mubr.f32.gmra.mxu1 %v15052_v54 }
 0x6b3   :  { %13017 = vmatprep.mubr.f32.mxu1 %v15057_v49  ;;  %13025 = vmatprep.mubr.f32.mxu0 %v15034_v62 }
 0x6b5   :  { %v1894_v62 = vpop.permute.xlu1 %1893 }
 0x6b6   :  { %13018 = vmatmul.mubr.f32.gmra.mxu1 %v15073_v11  ;;  %13026 = vmatmul.mubr.f32.vlgmr.msra.gmra.mxu0 %v15050_v42 }
 0x6b7   :  { %13052 = vmatpush3.msra.mxu0 %v14872_v37  ;;  %13020 = vmatprep.mubr.f32.mxu1 %v15084_v33 }
 0x6b8   :  { %13028 = vmatprep.mubr.f32.mxu0 %v15065_v55 }
 0x6ba   :  { %13021 = vmatmul.mubr.f32.gmra.mxu1 %v15100_v40  ;;  %13029 = vmatmul.mubr.f32.gmra.mxu0 %v15071_v3 }
 0x6bb   :  { %13031 = vmatprep.mubr.f32.mxu0 %v15082_v29  ;;  %13039 = vmatprep.mubr.f32.mxu1 %v3823_v45 }
 0x6be   :  { %13032 = vmatmul.mubr.f32.gmra.mxu0 %v15098_v39  ;;  %13040 = vmatmul.mubr.f32.vlgmr.msra.gmra.mxu1 %v3833_v2 }
 0x6bf   :  { %13066 = vmatpush3.msra.mxu1 %v14852_v9  ;;  %13034 = vmatprep.mubr.f32.mxu0 %v15106_v46 }
 0x6c0   :  { %13042 = vmatprep.mubr.f32.mxu1 %v3843_v51 }
 0x6c2   :  { %13035 = vmatmul.mubr.f32.gmra.mxu0 %v3892_v5  ;;  %13043 = vmatmul.mubr.f32.gmra.mxu1 %v3853_v26 }
 0x6c3   :  { %13045 = vmatprep.mubr.f32.mxu1 %v3863_v14  ;;  %13053 = vmatprep.mubr.f32.mxu0 %v15017_v34 }
 0x6c6   :  { %13046 = vmatmul.mubr.f32.gmra.mxu1 %v3873_v58  ;;  %13054 = vmatmul.mubr.f32.vlgmr.msra.gmra.mxu0 %v15027_v19 }
 0x6c7   :  { %13048 = vmatprep.mubr.f32.mxu1 %v3883_v63  ;;  %13056 = vmatprep.mubr.f32.mxu0 %v15042_v41 }
 0x6ca   :  { %13049 = vmatmul.mubr.f32.gmra.mxu1 %v3893_v27  ;;  %13057 = vmatmul.mubr.f32.gmra.mxu0 %v15052_v54 }
 0x6cb   :  { %13059 = vmatprep.mubr.f32.mxu0 %v15057_v49  ;;  %13067 = vmatprep.mubr.f32.mxu1 %v15017_v34 }
 0x6ce   :  { %13060 = vmatmul.mubr.f32.gmra.mxu0 %v15073_v11  ;;  %13068 = vmatmul.mubr.f32.vlgmr.msra.gmra.mxu1 %v15027_v19 }
 0x6cf   :  { %13062 = vmatprep.mubr.f32.mxu0 %v15084_v33  ;;  %13070 = vmatprep.mubr.f32.mxu1 %v15042_v41 }
 0x6d2   :  { %13063 = vmatmul.mubr.f32.gmra.mxu0 %v15100_v40  ;;  %13071 = vmatmul.mubr.f32.gmra.mxu1 %v15052_v54 }
 0x6d3   :  { %13073 = vmatprep.mubr.f32.mxu1 %v15057_v49 }
 0x6d6   :  { %13074 = vmatmul.mubr.f32.gmra.mxu1 %v15073_v11 }
 0x6d7   :  { %13076 = vmatprep.mubr.f32.mxu1 %v15084_v33 }
 0x6da   :  { %13077 = vmatmul.mubr.f32.gmra.mxu1 %v15100_v40 }
 0x71e   :  { %v12867_v15 = vpop.f32.mrf.mxu0 }
 0x71f   :  { %v2009_v34 = vadd.f32 %v12867_v15, %v1874_v17 }
 0x720   :  { %v15189_v10 = vpop.f32.mrf.mxu0 }
 0x722   :  { %v15193_v21 = vpop.f32.mrf.mxu0 }
 0x724   :  { %v15195_v36 = vpop.f32.mrf.mxu0 }
 0x726   :  { %v12873_v48 = vpop.f32.mrf.mxu0  ;;  %v12881_v19 = vpop.f32.mrf.mxu1 }
 0x727   :  { %v2151_v32 = vadd.f32 %v12881_v19, %v2009_v34  ;;  %v2049_v60 = vadd.f32 %v12873_v48, %v1894_v62 }
 0x728   :  { %v15197_v35 = vpop.f32.mrf.mxu0  ;;  %v15199_v38 = vpop.f32.mrf.mxu1 }
 0x72a   :  { %v15201_v6 = vpop.f32.mrf.mxu0  ;;  %v15203_v41 = vpop.f32.mrf.mxu1 }
 0x72c   :  { %v15205_v42 = vpop.f32.mrf.mxu0  ;;  %v15207_v54 = vpop.f32.mrf.mxu1 }
 0x72e   :  { %v12887_v45 = vpop.f32.mrf.mxu1  ;;  %v12895_v49 = vpop.f32.mrf.mxu0 }
 0x72f   :  { %v2175_v43 = vadd.f32 %v12887_v45, %v2049_v60  ;;  %v2268_v50 = vadd.f32 %v12895_v49, %v2151_v32 }
 0x730   :  { %v15209_v55 = vpop.f32.mrf.mxu1  ;;  %v15211_v2 = vpop.f32.mrf.mxu0 }
 0x732   :  { %v15213_v3 = vpop.f32.mrf.mxu1  ;;  %v15215_v11 = vpop.f32.mrf.mxu0 }
 0x734   :  { %v15217_v28 = vpop.f32.mrf.mxu1  ;;  %v15219_v29 = vpop.f32.mrf.mxu0 }
 0x735   :  { %18682 = vst [vmem:[#allocation6_spill] sm:$0xff] %v15217_v28 }
 0x736   :  { %v12901_v33 = vpop.f32.mrf.mxu0  ;;  %v12909_v47 = vpop.f32.mrf.mxu1 }
 0x737   :  { %v2296_v51 = vadd.f32 %v12901_v33, %v2175_v43  ;;  %v15221_v57 = vadd.f32 %v12909_v47, %v2268_v50  ;;  %v15271_v33 = vpop.permute.xlu1 %3716 }
 0x738   :  { %v15223_v26 = vpop.f32.mrf.mxu0  ;;  %v15225_v39 = vpop.f32.mrf.mxu1  ;;  %18690 = vst [vmem:[#allocation14_spill] sm:$0xff] %v15271_v33  ;;  %v2029_v33 = vadd.f32 %v15193_v21, %v15187_v4 }
 0x73a   :  { %v15227_v40 = vpop.f32.mrf.mxu0  ;;  %v15229_v61 = vpop.f32.mrf.mxu1 }
 0x73c   :  { %v15231_v14 = vpop.f32.mrf.mxu0  ;;  %v15233_v46 = vpop.f32.mrf.mxu1 }
 0x73d   :  { %18683 = vst [vmem:[#allocation7_spill] sm:$0xff] %v15231_v14  ;;  %18684 = vst [vmem:[#allocation8_spill] sm:$0xff] %v15233_v46 }
 0x73e   :  { %v12915_v22 = vpop.f32.mrf.mxu1  ;;  %v12923_v52 = vpop.f32.mrf.mxu0 }
 0x73f   :  { %v15235_v44 = vadd.f32 %v12915_v22, %v2296_v51  ;;  %v1869_v22 = vpop.permute.xlu0 %1868 }
 0x740   :  { %v15237_v58 = vpop.f32.mrf.mxu1  ;;  %v15239_v5 = vpop.f32.mrf.mxu0  ;;  %v1999_v20 = vadd.f32 %v15189_v10, %v1869_v22 }
 0x742   :  { %v15241_v31 = vpop.f32.mrf.mxu1  ;;  %v15243_v63 = vpop.f32.mrf.mxu0  ;;  %v2145_v14 = vadd.f32 %v15199_v38, %v1999_v20 }
 0x744   :  { %v15245_v0 = vpop.f32.mrf.mxu1  ;;  %v15247_v23 = vpop.f32.mrf.mxu0 }
 0x745   :  { %18685 = vst [vmem:[#allocation9_spill] sm:$0xff] %v15245_v0  ;;  %18686 = vst [vmem:[#allocation10_spill] sm:$0xff] %v15247_v23 }
 0x746   :  { %v12929_v18 = vpop.f32.mrf.mxu0  ;;  %v12937_v27 = vpop.f32.mrf.mxu1 }
 0x748   :  { %v15249_v8 = vpop.f32.mrf.mxu0  ;;  %v15251_v25 = vpop.f32.mrf.mxu1 }
 0x74a   :  { %v15253_v59 = vpop.f32.mrf.mxu0  ;;  %v15255_v30 = vpop.f32.mrf.mxu1 }
 0x74c   :  { %v15257_v13 = vpop.f32.mrf.mxu0  ;;  %v15259_v12 = vpop.f32.mrf.mxu1 }
 0x74d   :  { %18687 = vst [vmem:[#allocation11_spill] sm:$0xff] %v15257_v13  ;;  %18688 = vst [vmem:[#allocation12_spill] sm:$0xff] %v15259_v12  ;;  %v1889_v13 = vpop.permute.xlu0 %1888  ;;  %v15278_v12 = vpop.permute.xlu1 %3711 }
 0x74e   :  { %v15261_v15 = vpop.f32.mrf.mxu1  ;;  %v12951_v17 = vpop.f32.mrf.mxu0  ;;  %18691 = vst [vmem:[#allocation15_spill] sm:$0xff] %v15278_v12  ;;  %v2039_v10 = vadd.f32 %v15197_v35, %v1889_v13 }
 0x750   :  { %v15263_v34 = vpop.f32.mrf.mxu1  ;;  %v2764_v48 = vpop.f32.mrf.mxu0  ;;  %v2169_v4 = vadd.f32 %v15209_v55, %v2039_v10 }
 0x752   :  { %v15265_v19 = vpop.f32.mrf.mxu1  ;;  %v12954_v32 = vpop.f32.mrf.mxu0 }
 0x754   :  { %v15267_v62 = vpop.f32.mrf.mxu1  ;;  %v15269_v60 = vpop.f32.mrf.mxu0 }
 0x755   :  { %18689 = vst [vmem:[#allocation13_spill] sm:$0xff] %v15267_v62 }
 0x756   :  { %v12959_v45 = vpop.f32.mrf.mxu1  ;;  %v12967_v49 = vpop.f32.mrf.mxu0 }
 0x757   :  { %v2877_v1 = vadd.f32 %v12959_v45, %v12951_v17 }
 0x758   :  { %v2870_v43 = vpop.f32.mrf.mxu1  ;;  %v2962_v50 = vpop.f32.mrf.mxu0 }
 0x759   :  { %v2871_v56 = vadd.f32 %v2870_v43, %v2764_v48  ;;  %v2970_v0 = vadd.f32 %v12967_v49, %v2877_v1  ;;  %v2069_v48 = vadd.f32 %v15201_v6, %v15185_v53  ;;  %v2261_v43 = vadd.f32 %v15211_v2, %v2145_v14 }
 0x75a   :  { %v12962_v47 = vpop.f32.mrf.mxu1  ;;  %v12970_v51 = vpop.f32.mrf.mxu0  ;;  %v2163_v49 = vadd.f32 %v15203_v41, %v2029_v33  ;;  %v2289_v2 = vadd.f32 %v15223_v26, %v2169_v4 }
 0x75b   :  { %v2889_v23 = vadd.f32 %v12962_v47, %v12954_v32  ;;  %v2963_v46 = vadd.f32 %v2962_v50, %v2871_v56  ;;  %v2384_v20 = vadd.f32 %v15225_v39, %v2261_v43  ;;  %v15291_v56 = vpop.permute.xlu1 %3736  ;;  %v2187_v35 = vadd.f32 %v15213_v3, %v2069_v48 }
 0x75c   :  { %v15273_v24 = vpop.f32.mrf.mxu1  ;;  %v15275_v37 = vpop.f32.mrf.mxu0  ;;  %v2282_v6 = vadd.f32 %v15215_v11, %v2163_v49  ;;  %v2544_v39 = vadd.f32 %v12929_v18, %v15235_v44  ;;  %v2416_v3 = vadd.f32 %v15237_v58, %v2289_v2 }
 0x75d   :  { %v2984_v1 = vadd.f32 %v12970_v51, %v2889_v23  ;;  %v2514_v14 = vadd.f32 %v15239_v5, %v2384_v20 }
 0x75e   :  { %v12975_v9 = vpop.f32.mrf.mxu1  ;;  %v12983_v62 = vpop.f32.mrf.mxu0  ;;  %v2658_v26 = vadd.f32 %v15261_v15, %v2544_v39  ;;  %v2538_v18 = vadd.f32 %v15249_v8, %v2416_v3 }
 0x75f   :  { %v3066_v28 = vadd.f32 %v12975_v9, %v2970_v0  ;;  %v2520_v9 = vadd.f32 %v12923_v52, %v15221_v57  ;;  %v2310_v52 = vadd.f32 %v15227_v40, %v2187_v35  ;;  %v2628_v11 = vadd.f32 %v15251_v25, %v2514_v14  ;;  %v3707_v15 = vpop.permute.xlu1 %3706  ;;  %v18693_v14 = vld [vmem:[#allocation8_spill] sm:$0xff] }
 0x760   :  { %v3057_v17 = vpop.f32.mrf.mxu1  ;;  %v3155_v45 = vpop.f32.mrf.mxu0 }
 0x761   :  { %v3058_v32 = vadd.f32 %v3057_v17, %v2963_v46  ;;  %v3162_v53 = vadd.f32 %v12983_v62, %v3066_v28  ;;  %v2634_v46 = vadd.f32 %v12937_v27, %v2520_v9  ;;  %v2408_v28 = vadd.f32 %v15229_v61, %v2282_v6 }
 0x762   :  { %v12978_v22 = vpop.f32.mrf.mxu1  ;;  %v12986_v12 = vpop.f32.mrf.mxu0  ;;  %v2440_v50 = vadd.f32 %v15241_v31, %v2310_v52  ;;  %v2883_v31 = vadd.f32 %v15273_v24, %v15269_v60 }
 0x763   :  { %v3082_v38 = vadd.f32 %v12978_v22, %v2984_v1  ;;  %v3156_v0 = vadd.f32 %v3155_v45, %v3058_v32  ;;  %v2532_v44 = vadd.f32 %v15243_v63, %v2408_v28 }
 0x764   :  { %v3073_v21 = vpop.f32.mrf.mxu1  ;;  %v15297_v41 = vpop.f32.mrf.mxu0  ;;  %v2556_v25 = vadd.f32 %v15253_v59, %v2440_v50  ;;  %v2019_v59 = vadd.f32 %v15195_v36, %v15183_v7  ;;  %v2977_v32 = vadd.f32 %v15275_v37, %v2883_v31  ;;  %v18692_v37 = vld [vmem:[#allocation6_spill] sm:$0xff]  ;;  %v18634_v50 = vmov 2131351028  }
 0x765   :  { %v3174_v5 = vadd.f32 %v12986_v12, %v3082_v38  ;;  %v2646_v47 = vadd.f32 %v15255_v30, %v2532_v44  ;;  %v2652_v12 = vadd.f32 %v15263_v34, %v2538_v18  ;;  %v18624_v18 = vmov 2102212464  }
 0x766   :  { %v12991_v55 = vpop.f32.mrf.mxu1  ;;  %v12999_v27 = vpop.f32.mrf.mxu0  ;;  %v2670_v30 = vadd.f32 %v15265_v19, %v2556_v25  ;;  %v2157_v1 = vadd.f32 %v15207_v54, %v2019_v59  ;;  %v2059_v19 = vadd.f32 %v15205_v42, %v15191_v16  ;;  %v3074_v9 = vadd.f32 %v3073_v21, %v2977_v32  ;;  %v18695_v16 = vld [vmem:[#allocation10_spill] sm:$0xff] }
 0x767   :  { %v3252_v57 = vadd.f32 %v12991_v55, %v3162_v53  ;;  %v3838_v17 = vadd.f32 %v12999_v27, %v3707_v15  ;;  %v18632_v27 = vmov 920167782   ;;  %v18630_v15 = vmov 1326507024  }
 0x768   :  { %v3245_v23 = vpop.f32.mrf.mxu1  ;;  %v2275_v20 = vadd.f32 %v15219_v29, %v2157_v1  ;;  %v2181_v2 = vadd.f32 %v18692_v37, %v2059_v19  ;;  %v15349_v52 = vadd.f32 %v15297_v41, %v3074_v9 }
 0x769   :  { %v3268_v13 = vmul.f32 %v3252_v57, %v2634_v46  ;;  %v3246_v62 = vadd.f32 %v3245_v23, %v3156_v0  ;;  %v18694_v0 = vld [vmem:[#allocation7_spill] sm:$0xff] }
 0x76a   :  { %v12994_v40 = vpop.f32.mrf.mxu1  ;;  %v2400_v55 = vadd.f32 %v18693_v14, %v2275_v20  ;;  %v15343_v57 = vadd.f32 %v18694_v0, %v2181_v2 }
 0x76b   :  { %v15308_v33 = vadd.f32 %v3268_v13, %v2658_v26  ;;  %v3267_v61 = vmul.f32 %v3246_v62, %v2628_v11  ;;  %v3264_v58 = vadd.f32 %v12994_v40, %v3174_v5  ;;  %v18638_v26 = vmov 683565275  }
 0x76c   :  { %v15313_v51 = vpop.f32.mrf.mxu1  ;;  %v15346_v42 = vadd.f32 %v18695_v16, %v2400_v55  ;;  %v18628_v13 = vmov 2475754826  }
 0x76d   :  { %v3379_v63 = vand.u32 2147483647, %v15308_v33  ;;  %v3382_v8 = vand.u32 2139095040, %v15308_v33  ;;  %v15319_v45 = vadd.f32 %v3267_v61, %v2652_v12  ;;  %v3270_v48 = vmul.f32 %v3264_v58, %v2646_v47 }
 0x76e   :  { %v13013_v10 = vpop.f32.mrf.mxu1 }
 0x76f   :  { %v3383_v34 = vshrl.u32 %v3382_v8, 23  ;;  %v15324_v43 = vadd.f32 %v13013_v10, %v3838_v17  ;;  %v3386_v24 = vand.u32 8388607, %v3379_v63  ;;  %v18627_v60 = vand.u32 2147483647, %v15319_v45 }
 0x770   :  { %v3278_v22 = vand.u32 2139095040, %v15319_v45  ;;  %v15332_v4 = vadd.f32 %v3270_v48, %v2670_v30 }
 0x771   :  { %v11725_v49 = vadd.s32 4294967169, %v3383_v34  ;;  %v3282_v36 = vand.u32 8388607, %v18627_v60  ;;  %v3387_v38 = vor.u32 8388608, %v3386_v24 }
 0x772   :  { %v3279_v7 = vshrl.u32 %v3278_v22, 23  ;;  %v3590_v54 = vand.u32 2139095040, %v15332_v4 }
 0x773   :  { %v3389_v53 = vadd.s32 1, %v11725_v49  ;;  %v3283_v6 = vor.u32 8388608, %v3282_v36  ;;  %v15351_v28 = vshll.u32 %v3387_v38, 8 }
 0x774   :  { %v11721_v35 = vadd.s32 4294967169, %v3279_v7  ;;  %v3591_v11 = vshrl.u32 %v3590_v54, 23 }
 0x775   :  { %vm3390_vm4 = vcmp.gt.s32.totalorder %v3389_v53, 0  ;;  %v15353_v3 = vshll.u32 %v3283_v6, 8 }
 0x776   :  { %v3391_v39 = vsel %vm3390_vm4, %v3389_v53, 0  ;;  %v3285_v46 = vadd.s32 1, %v11721_v35  ;;  %v11733_v38 = vadd.s32 4294967169, %v3591_v11 }
 0x777   :  { %v3392_v29 = vshrl.u32 %v3391_v39, 5  ;;  %v3393_v21 = vand.u32 31, %v3391_v39 }
 0x778   :  { %vm3286_vm5 = vcmp.gt.s32.totalorder %v3285_v46, 0 }
 0x779   :  { %v3394_v23 = vsub.s32 32, %v3393_v21  ;;  %v3396_v5 = vshll.u32 %v18638_v26, %v3393_v21  ;;  %v3399_v62 = vshll.u32 %v18628_v13, %v3393_v21  ;;  %v3402_v44 = vshll.u32 %v18634_v50, %v3393_v21 }
 0x77a   :  { %v3405_v41 = vshll.u32 %v18624_v18, %v3393_v21  ;;  %v3408_v40 = vshll.u32 %v18632_v27, %v3393_v21  ;;  %vm3411_vm6 = vcmp.lt.s32.totalorder %v3392_v29, 1  ;;  %vm3412_vm7 = vcmp.lt.s32.totalorder %v3392_v29, 2 }
 0x77b   :  { %v3397_v61 = vshrl.u32 %v18628_v13, %v3394_v23  ;;  %v3400_v58 = vshrl.u32 %v18634_v50, %v3394_v23  ;;  %v3403_v25 = vshrl.u32 %v18624_v18, %v3394_v23  ;;  %v3395_v47 = vshrl.u32 %v18638_v26, %v3394_v23 }
 0x77c   :  { %v3406_v12 = vshrl.u32 %v18632_v27, %v3394_v23  ;;  %v3409_v31 = vshrl.u32 %v18630_v15, %v3394_v23  ;;  %vm3413_vm8 = vcmp.lt.s32.totalorder %v3392_v29, 3  ;;  %v3287_v10 = vsel %vm3286_vm5, %v3285_v46, 0 }
 0x77d   :  { %v3398_v8 = vor.u32 %v3397_v61, %v3396_v5  ;;  %v3401_v17 = vor.u32 %v3400_v58, %v3399_v62  ;;  %v3404_v48 = vor.u32 %v3403_v25, %v3402_v44  ;;  %vm3414_vm9 = vcmp.lt.s32.totalorder %v3392_v29, 4 }
 0x77e   :  { %v3407_v59 = vor.u32 %v3406_v12, %v3405_v41  ;;  %v3410_v30 = vor.u32 %v3409_v31, %v3408_v40  ;;  %v3289_v34 = vand.u32 31, %v3287_v10  ;;  %v3288_v54 = vshrl.u32 %v3287_v10, 5 }
 0x77f   :  { %v3415_v24 = vsel %vm3411_vm6, %v3395_v47, %v3398_v8  ;;  %v3416_v22 = vsel %vm3414_vm9, %v3404_v48, 2102212464  ;;  %v3419_v1 = vsel %vm3411_vm6, %v3398_v8, %v3401_v17  ;;  %v3423_v32 = vsel %vm3411_vm6, %v3401_v17, %v3404_v48 }
 0x780   :  { %v3417_v49 = vsel %vm3413_vm8, %v3401_v17, %v3416_v22  ;;  %v3420_v7 = vsel %vm3414_vm9, %v3407_v59, 920167782  ;;  %v3424_v36 = vsel %vm3414_vm9, %v3410_v30, 1326507024  ;;  %v3290_v19 = vsub.s32 32, %v3289_v34 }
 0x781   :  { %v3418_v20 = vsel %vm3412_vm7, %v3415_v24, %v3417_v49  ;;  %v3421_v9 = vsel %vm3413_vm8, %v3404_v48, %v3420_v7  ;;  %v3425_v53 = vsel %vm3413_vm8, %v3407_v59, %v3424_v36  ;;  %v3292_v37 = vshll.u32 %v18638_v26, %v3289_v34 }
 0x782   :  { %v3422_v35 = vsel %vm3412_vm7, %v3419_v1, %v3421_v9  ;;  %v3426_v6 = vsel %vm3412_vm7, %v3423_v32, %v3425_v53  ;;  %v3434_v46 = vmul.u32 %v15351_v28, %v3418_v20  ;;  %v3293_v0 = vshrl.u32 %v18628_v13, %v3290_v19  ;;  %v15408_v20 = vpop.f32.mrf.mxu0  ;;  %v18696_v53 = vld [vmem:[#allocation9_spill] sm:$0xff] }
 0x783   :  { %v15378_v2 = vmul.u32.u64.low %v15351_v28, %v3426_v6  ;;  %v15379_v14 = vmul.u32.u64.high %v15351_v28, %v3426_v6, %v15378_v2  ;;  %v15382_v55 = vmul.u32.u64.low %v15351_v28, %v3422_v35  ;;  %v15383_v39 = vmul.u32.u64.high %v15351_v28, %v3422_v35, %v15382_v55 }
 0x784   :  { %v3295_v16 = vshll.u32 %v18628_v13, %v3289_v34  ;;  %v3296_v29 = vshrl.u32 %v18634_v50, %v3290_v19  ;;  %v3298_v21 = vshll.u32 %v18634_v50, %v3289_v34  ;;  %v3299_v11 = vshrl.u32 %v18624_v18, %v3290_v19 }
 0x785   :  { %v3301_v23 = vshll.u32 %v18624_v18, %v3289_v34  ;;  %v3302_v5 = vshrl.u32 %v18632_v27, %v3290_v19  ;;  %v3294_v62 = vor.u32 %v3293_v0, %v3292_v37  ;;  %v3304_v41 = vshll.u32 %v18632_v27, %v3289_v34  ;;  %v18697_v37 = vld [vmem:[#allocation12_spill] sm:$0xff] }
 0x786   :  { %v3297_v44 = vor.u32 %v3296_v29, %v3295_v16  ;;  %v3305_v28 = vshrl.u32 %v18630_v15, %v3290_v19  ;;  %vm3436_vm10 = vc.u32 %v15379_v14, %v15382_v55  ;;  %v3437_v40 = vadd.s32 1, %v15383_v39  ;;  %v18698_v29 = vld [vmem:[#allocation11_spill] sm:$0xff] }
 0x787   :  { %v3291_v61 = vshrl.u32 %v18638_v26, %v3290_v19  ;;  %v3300_v58 = vor.u32 %v3299_v11, %v3298_v21  ;;  %v3303_v25 = vor.u32 %v3302_v5, %v3301_v23  ;;  %vm3307_vm11 = vcmp.lt.s32.totalorder %v3288_v54, 1  ;;  %v18699_v23 = vld [vmem:[#allocation13_spill] sm:$0xff] }
 0x788   :  { %v3306_v47 = vor.u32 %v3305_v28, %v3304_v41  ;;  %vm3308_vm12 = vcmp.lt.s32.totalorder %v3288_v54, 2  ;;  %v3438_v12 = vsel %vm3436_vm10, %v3437_v40, %v15383_v39  ;;  %vm3309_vm13 = vcmp.lt.s32.totalorder %v3288_v54, 3 }
 0x789   :  { %vm3310_vm14 = vcmp.lt.s32.totalorder %v3288_v54, 4  ;;  %v3315_v31 = vsel %vm3307_vm11, %v3294_v62, %v3297_v44  ;;  %v3439_v8 = vadd.s32 %v3438_v12, %v3434_v46  ;;  %v3319_v10 = vsel %vm3307_vm11, %v3297_v44, %v3300_v58 }
 0x78a   :  { %v3312_v17 = vsel %vm3310_vm14, %v3300_v58, 2102212464  ;;  %v3316_v48 = vsel %vm3310_vm14, %v3303_v25, 920167782  ;;  %v3311_v59 = vsel %vm3307_vm11, %v3291_v61, %v3294_v62  ;;  %v3320_v34 = vsel %vm3310_vm14, %v3306_v47, 1326507024 }
 0x78b   :  { %v3317_v30 = vsel %vm3309_vm13, %v3300_v58, %v3316_v48  ;;  %v3597_v24 = vadd.s32 1, %v11733_v38  ;;  %v3440_v22 = vadd.s32 536870912, %v3439_v8  ;;  %v3313_v1 = vsel %vm3309_vm13, %v3297_v44, %v3312_v17 }
 0x78c   :  { %v3318_v32 = vsel %vm3308_vm12, %v3315_v31, %v3317_v30  ;;  %v3321_v49 = vsel %vm3309_vm13, %v3303_v25, %v3320_v34  ;;  %v3258_v9 = vadd.f32 %v15313_v51, %v15349_v52  ;;  %v2432_v38 = vadd.f32 %v18696_v53, %v15343_v57  ;;  %v15425_v52 = vpop.f32.mrf.mxu0 }
 0x78d   :  { %v3322_v7 = vsel %vm3308_vm12, %v3319_v10, %v3321_v49  ;;  %v15404_v36 = vmul.u32.u64.low %v15353_v3, %v3318_v32  ;;  %v15405_v19 = vmul.u32.u64.high %v15353_v3, %v3318_v32, %v15404_v36  ;;  %vm3598_vm15 = vcmp.gt.s32.totalorder %v3597_v24, 0 }
 0x78e   :  { %v15415_v35 = vmul.u32.u64.low %v15353_v3, %v3322_v7  ;;  %v15416_v6 = vmul.u32.u64.high %v15353_v3, %v3322_v7, %v15415_v35  ;;  %v2640_v2 = vadd.f32 %v18697_v37, %v15346_v42  ;;  %v15420_v39 = vshrl.u32 %v3440_v22, 30  ;;  %v15436_v40 = vpop.f32.mrf.mxu0 }
 0x78f   :  { %v3314_v46 = vsel %vm3308_vm12, %v3311_v59, %v3313_v1  ;;  %v3599_v0 = vsel %vm3598_vm15, %v3597_v24, 0  ;;  %v2550_v21 = vadd.f32 %v18698_v29, %v2432_v38  ;;  %v3333_v51 = vadd.s32 1, %v15405_v19 }
 0x790   :  { %v3601_v16 = vand.u32 31, %v3599_v0  ;;  %v3269_v57 = vmul.f32 %v3258_v9, %v2640_v2  ;;  %v3330_v11 = vmul.u32 %v15353_v3, %v3314_v46  ;;  %vm3332_vm1 = vc.u32 %v15416_v6, %v15404_v36  ;;  %v15449_v59 = vpop.f32.mrf.mxu0 }
 0x791   :  { %v2664_v42 = vadd.f32 %v18699_v23, %v2550_v21  ;;  %v3442_v5 = vshll.u32 %v15420_v39, 30  ;;  %v3334_v54 = vsel %vm3332_vm1, %v3333_v51, %v15405_v19  ;;  %v3587_v44 = vand.u32 2147483647, %v15332_v4  ;;  %v15467_v23 = vpop.f32.mrf.mxu1 }
 0x792   :  { %v3335_v62 = vadd.s32 %v3334_v54, %v3330_v11  ;;  %v3602_v41 = vsub.s32 32, %v3601_v16  ;;  %v3600_v17 = vshrl.u32 %v3599_v0, 5  ;;  %v3607_v30 = vshll.u32 %v18628_v13, %v3601_v16  ;;  %v15459_v37 = vpop.f32.mrf.mxu0 }
 0x793   :  { %v15434_v28 = vadd.f32 %v3269_v57, %v2664_v42  ;;  %v15438_v58 = vsub.s32 %v3439_v8, %v3442_v5  ;;  %v3594_v3 = vand.u32 8388607, %v3587_v44  ;;  %v3604_v8 = vshll.u32 %v18638_v26, %v3601_v16 }
 0x794   :  { %v3336_v61 = vadd.s32 536870912, %v3335_v62  ;;  %v3605_v25 = vshrl.u32 %v18628_v13, %v3602_v41  ;;  %v3608_v47 = vshrl.u32 %v18634_v50, %v3602_v41  ;;  %v3614_v12 = vshrl.u32 %v18632_v27, %v3602_v41  ;;  %v15469_v42 = vpop.f32.mrf.mxu0 }
 0x795   :  { %v3611_v48 = vshrl.u32 %v18624_v18, %v3602_v41  ;;  %v3486_v10 = vand.u32 2139095040, %v15434_v28  ;;  %v3613_v34 = vshll.u32 %v18624_v18, %v3601_v16  ;;  %v3617_v24 = vshrl.u32 %v18630_v15, %v3602_v41 }
 0x796   :  { %v15445_v31 = vshrl.u32 %v3336_v61, 30  ;;  %v3445_v22 = vsub.s32 0, %v15438_v58  ;;  %v3610_v32 = vshll.u32 %v18634_v50, %v3601_v16  ;;  %v3616_v49 = vshll.u32 %v18632_v27, %v3601_v16 }
 0x797   :  { %v3606_v7 = vor.u32 %v3605_v25, %v3604_v8  ;;  %v3609_v19 = vor.u32 %v3608_v47, %v3607_v30  ;;  %v3615_v9 = vor.u32 %v3614_v12, %v3613_v34  ;;  %v3487_v35 = vshrl.u32 %v3486_v10, 23  ;;  %v15481_v34 = vpop.f32.mrf.mxu1 }
 0x798   :  { %v3338_v1 = vshll.u32 %v15445_v31, 30  ;;  %v3612_v53 = vor.u32 %v3611_v48, %v3610_v32  ;;  %v3618_v38 = vor.u32 %v3617_v24, %v3616_v49  ;;  %v11726_v46 = vmin.u32 %v3445_v22, %v15438_v58  ;;  %v15483_v24 = vpop.f32.mrf.mxu0 }
 0x799   :  { %v3595_v0 = vor.u32 8388608, %v3594_v3  ;;  %vm3619_vm2 = vcmp.lt.s32.totalorder %v3600_v17, 1  ;;  %vm3622_vm4 = vcmp.lt.s32.totalorder %v3600_v17, 4  ;;  %vm3621_vm5 = vcmp.lt.s32.totalorder %v3600_v17, 3 }
 0x79a   :  { %v15461_v2 = vsub.s32 %v3335_v62, %v3338_v1  ;;  %v3627_v29 = vsel %vm3619_vm2, %v3606_v7, %v3609_v19  ;;  %v3628_v21 = vsel %vm3622_vm4, %v3615_v9, 920167782  ;;  %v3631_v51 = vsel %vm3619_vm2, %v3609_v19, %v3612_v53 }
 0x79b   :  { %v3629_v16 = vsel %vm3621_vm5, %v3612_v53, %v3628_v21  ;;  %v3632_v57 = vsel %vm3622_vm4, %v3618_v38, 1326507024  ;;  %v11729_v11 = vadd.s32 4294967169, %v3487_v35  ;;  %vm3620_vm6 = vcmp.lt.s32.totalorder %v3600_v17, 2 }
 0x79c   :  { %v3341_v5 = vsub.s32 0, %v15461_v2  ;;  %v3624_v54 = vsel %vm3622_vm4, %v3612_v53, 2102212464  ;;  %v3633_v62 = vsel %vm3621_vm5, %v3615_v9, %v3632_v57  ;;  %v3447_v61 = vclz %v11726_v46 }
 0x79d   :  { %v3603_v3 = vshrl.u32 %v18638_v26, %v3602_v41  ;;  %v3630_v25 = vsel %vm3620_vm6, %v3627_v29, %v3629_v16  ;;  %v3635_v47 = vshll.u32 %v3595_v0, 8  ;;  %v3634_v12 = vsel %vm3620_vm6, %v3631_v51, %v3633_v62 }
 0x79e   :  { %v3625_v10 = vsel %vm3621_vm5, %v3609_v19, %v3624_v54  ;;  %v11722_v22 = vmin.u32 %v3341_v5, %v15461_v2  ;;  %v3493_v32 = vadd.s32 1, %v11729_v11  ;;  %v11727_v49 = vadd.s32 4294967294, %v3447_v61  ;;  %v13027_v19 = vpop.f32.mrf.mxu0 }
 0x79f   :  { %v3623_v48 = vsel %vm3619_vm2, %v3603_v3, %v3606_v7  ;;  %v15478_v8 = vmul.u32.u64.low %v3635_v47, %v3634_v12  ;;  %v15479_v30 = vmul.u32.u64.high %v3635_v47, %v3634_v12, %v15478_v8  ;;  %v15491_v7 = vpop.f32.mrf.mxu1  ;;  %v18626_v21 = vand.u32 2147483647, %v15434_v28 }
 0x7a0   :  { %v15486_v1 = vmul.u32.u64.low %v3635_v47, %v3630_v25  ;;  %v15487_v41 = vmul.u32.u64.high %v3635_v47, %v3630_v25, %v15486_v1  ;;  %v3626_v9 = vsel %vm3620_vm6, %v3623_v48, %v3625_v10  ;;  %vm3494_vm7 = vcmp.gt.s32.totalorder %v3493_v32, 0  ;;  %18700 = vst [vmem:[#allocation6_spill] sm:$0xff] %v15491_v7 }
 0x7a1   :  { %v3343_v53 = vclz %v11722_v22  ;;  %v3495_v35 = vsel %vm3494_vm7, %v3493_v32, 0  ;;  %vm11728_vm9 = vcmp.lt.s32.totalorder %v11727_v49, 0  ;;  %v3642_v46 = vmul.u32 %v3635_v47, %v3626_v9  ;;  %v15501_v51 = vpop.f32.mrf.mxu1 }
 0x7a2   :  { %vm3644_vm8 = vc.u32 %v15479_v30, %v15486_v1  ;;  %v3645_v38 = vadd.s32 1, %v15487_v41  ;;  %v3497_v0 = vand.u32 31, %v3495_v35  ;;  %v15499_v17 = vadd.f32 %v13027_v19, %v15324_v43 }
 0x7a3   :  { %v15503_v57 = vsel %vm11728_vm9, 0, %v11727_v49  ;;  %v11723_v11 = vadd.s32 4294967294, %v3343_v53  ;;  %v3490_v62 = vand.u32 8388607, %v18626_v21  ;;  %v15512_v47 = vpop.f32.mrf.mxu1  ;;  %v3496_v22 = vshrl.u32 %v3495_v35, 5 }
 0x7a4   :  { %v3646_v29 = vsel %vm3644_vm8, %v3645_v38, %v15487_v41  ;;  %v3498_v5 = vsub.s32 32, %v3497_v0  ;;  %v3455_v61 = vsub.s32 4294967266, %v15503_v57  ;;  %v3509_v48 = vshll.u32 %v18624_v18, %v3497_v0 }
 0x7a5   :  { %v3647_v16 = vadd.s32 %v3646_v29, %v3642_v46  ;;  %vm11724_vm10 = vcmp.lt.s32.totalorder %v11723_v11, 0  ;;  %v3500_v41 = vshll.u32 %v18638_v26, %v3497_v0  ;;  %v3503_v32 = vshll.u32 %v18628_v13, %v3497_v0 }
 0x7a6   :  { %v3501_v25 = vshrl.u32 %v18628_v13, %v3498_v5  ;;  %v3504_v43 = vshrl.u32 %v18634_v50, %v3498_v5  ;;  %v3507_v12 = vshrl.u32 %v18624_v18, %v3498_v5  ;;  %v3510_v10 = vshrl.u32 %v18632_v27, %v3498_v5  ;;  %v15527_v18 = vpop.f32.mrf.mxu1 }
 0x7a7   :  { %v3648_v54 = vadd.s32 536870912, %v3647_v16  ;;  %v3506_v49 = vshll.u32 %v18634_v50, %v3497_v0  ;;  %v3512_v19 = vshll.u32 %v18632_v27, %v3497_v0  ;;  %v3513_v53 = vshrl.u32 %v18630_v15, %v3498_v5 }
 0x7a8   :  { %v3511_v9 = vor.u32 %v3510_v10, %v3509_v48  ;;  %v15523_v38 = vsel %vm11724_vm10, 0, %v11723_v11  ;;  %v3502_v29 = vor.u32 %v3501_v25, %v3500_v41  ;;  %v3491_v13 = vor.u32 8388608, %v3490_v62 }
 0x7a9   :  { %v15508_v3 = vshrl.u32 %v3648_v54, 30  ;;  %v3505_v54 = vor.u32 %v3504_v43, %v3503_v32  ;;  %v3508_v35 = vor.u32 %v3507_v12, %v3506_v49  ;;  %v3514_v21 = vor.u32 %v3513_v53, %v3512_v19  ;;  %v15536_v12 = vpop.f32.mrf.mxu1 }
 0x7aa   :  { %vm3518_vm11 = vcmp.lt.s32.totalorder %v3496_v22, 4  ;;  %v3435_v48 = vadd.s32 %v15382_v55, %v15379_v14  ;;  %v3351_v0 = vsub.s32 4294967266, %v15523_v38  ;;  %vm3515_vm12 = vcmp.lt.s32.totalorder %v3496_v22, 1 }
 0x7ab   :  { %v3650_v8 = vshll.u32 %v15508_v3, 30  ;;  %v3524_v11 = vsel %vm3518_vm11, %v3511_v9, 920167782  ;;  %vm3517_vm13 = vcmp.lt.s32.totalorder %v3496_v22, 3  ;;  %v3523_v43 = vsel %vm3515_vm12, %v3502_v29, %v3505_v54  ;;  %v13041_v50 = vpop.f32.mrf.mxu1 }
 0x7ac   :  { %v3451_v10 = vsub.s32 32, %v15503_v57  ;;  %v3525_v62 = vsel %vm3517_vm13, %v3508_v35, %v3524_v11  ;;  %v3528_v14 = vsel %vm3518_vm11, %v3514_v21, 1326507024  ;;  %vm3516_vm14 = vcmp.lt.s32.totalorder %v3496_v22, 2 }
 0x7ad   :  { %v15525_v46 = vsub.s32 %v3647_v16, %v3650_v8  ;;  %v3456_v16 = vadd.s32 127, %v3455_v61  ;;  %v3527_v8 = vsel %vm3515_vm12, %v3505_v54, %v3508_v35  ;;  %v3520_v41 = vsel %vm3518_vm11, %v3508_v35, 2102212464 }
 0x7ae   :  { %v3531_v61 = vshll.u32 %v3491_v13, 8  ;;  %v3352_v32 = vadd.s32 127, %v3351_v0  ;;  %v3526_v49 = vsel %vm3516_vm14, %v3523_v43, %v3525_v62  ;;  %v3529_v19 = vsel %vm3517_vm13, %v3511_v9, %v3528_v14 }
 0x7af   :  { %v3653_v60 = vsub.s32 0, %v15525_v46  ;;  %v3457_v53 = vshll.u32 %v3456_v16, 23  ;;  %v3347_v15 = vsub.s32 32, %v15523_v38  ;;  %v3530_v27 = vsel %vm3516_vm14, %v3527_v8, %v3529_v19 }
 0x7b0   :  { %v15550_v35 = vmul.u32.u64.low %v3531_v61, %v3530_v27  ;;  %v15551_v13 = vmul.u32.u64.high %v3531_v61, %v3530_v27, %v15550_v35  ;;  %v15555_v0 = vmul.u32.u64.low %v3531_v61, %v3526_v49  ;;  %v15556_v9 = vmul.u32.u64.high %v3531_v61, %v3526_v49, %v15555_v0 }
 0x7b1   :  { %v11734_v25 = vmin.u32 %v3653_v60, %v15525_v46  ;;  %v3499_v60 = vshrl.u32 %v18638_v26, %v3498_v5  ;;  %v3331_v5 = vadd.s32 %v15404_v36, %v15416_v6  ;;  %v3453_v16 = vshrl.u32 %v3435_v48, %v3451_v10 }
 0x7b2   :  { %v3353_v43 = vshll.u32 %v3352_v32, 23  ;;  %v15560_v8 = vadd.f32 %v13041_v50, %v15499_v17  ;;  %v3452_v36 = vshll.u32 %v15438_v58, %v15503_v57  ;;  %v3458_v6 = vor.u32 4788187, %v3457_v53 }
 0x7b3   :  { %v3655_v55 = vclz %v11734_v25  ;;  %v3519_v21 = vsel %vm3515_vm12, %v3499_v60, %v3502_v29  ;;  %v3521_v25 = vsel %vm3517_vm13, %v3505_v54, %v3520_v41  ;;  %v3643_v29 = vadd.s32 %v15486_v1, %v15479_v30 }
 0x7b4   :  { %v3522_v14 = vsel %vm3516_vm14, %v3519_v21, %v3521_v25  ;;  %vm3540_vm1 = vc.u32 %v15551_v13, %v15555_v0  ;;  %v3541_v17 = vadd.s32 1, %v15556_v9  ;;  %v3454_v41 = vor.u32 %v3453_v16, %v3452_v36 }
 0x7b5   :  { %v11735_v11 = vadd.s32 4294967294, %v3655_v55  ;;  %v3349_v55 = vshrl.u32 %v3331_v5, %v3347_v15  ;;  %v3348_v30 = vshll.u32 %v15461_v2, %v15523_v38  ;;  %v3354_v1 = vor.u32 4788187, %v3353_v43  ;;  %v4502_v15 = vld [vmem:[%s18609_s4 + $0x160] sm:$0xff] }
 0x7b6   :  { %v3538_v22 = vmul.u32 %v3531_v61, %v3522_v14  ;;  %v3542_v58 = vsel %vm3540_vm1, %v3541_v17, %v15556_v9  ;;  %vm4526_vm2 = vcmask 261120   ;;  %v3461_v53 = vcvt.s32.f32 %v3454_v41 }
 0x7b7   :  { %vm11736_vm15 = vcmp.lt.s32.totalorder %v11735_v11, 0  ;;  %v3350_v49 = vor.u32 %v3349_v55, %v3348_v30  ;;  %v4528_v21 = vsel %vm4526_vm2, %v4502_v15, 0  ;;  %v3355_v2 = vand.u32 2147483647, %v3354_v1  ;;  %v15675_v15 = vld [vmem:[%s18609_s4 + $0x98] sm:$0xff] }
 0x7b8   :  { %v3658_v62 = vsel %vm11736_vm15, 0, %v11735_v11  ;;  %v3543_v57 = vadd.s32 %v3542_v58, %v3538_v22  ;;  %v15578_v25 = vand.u32 4294901760, %v4528_v21  ;;  %vm3589_vm4 = vcmp.lt.s32.totalorder %v15332_v4, 0  ;;  %v1854_v58 = vld [vmem:[%s18609_s4 + $0x1e8] sm:$0xff] }
 0x7b9   :  { %v3659_v54 = vsub.s32 32, %v3658_v62  ;;  %v3663_v27 = vsub.s32 4294967266, %v3658_v62  ;;  %v3660_v48 = vshll.u32 %v15525_v46, %v3658_v62  ;;  %v3459_v46 = vand.u32 2147483647, %v3458_v6 }
 0x7ba   :  { %v3544_v11 = vadd.s32 536870912, %v3543_v57  ;;  %v3357_v9 = vcvt.s32.f32 %v3350_v49  ;;  %v15583_v43 = vsub.f32 %v4528_v21, %v15578_v25  ;;  %13101 = vmatprep.mubr.f32.mxu1 %v15578_v25  ;;  %vm15592_vm5 = vcmp.le.f32.partialorder %v3587_v44, 0.7853982 }
 0x7bb   :  { %v3661_v10 = vshrl.u32 %v3643_v29, %v3659_v54  ;;  %v3664_v50 = vadd.s32 127, %v3663_v27  ;;  %v3462_v5 = vmul.f32 %v3461_v53, %v3459_v46  ;;  %v3673_v27 = vsub.s32 4, %v15508_v3 }
 0x7bc   :  { %v15580_v35 = vshrl.u32 %v3544_v11, 30  ;;  %v3358_v29 = vmul.f32 %v3357_v9, %v3355_v2  ;;  %v4610_v14 = vand.u32 4294901760, %v15583_v43  ;;  %vm3381_vm6 = vcmp.lt.s32.totalorder %v15308_v33, 0  ;;  %v1855_v2 = vld [vmem:[%s18609_s4 + $0x1f0] sm:$0xff] }
 0x7bd   :  { %v3662_v32 = vor.u32 %v3661_v10, %v3660_v48  ;;  %v3665_v60 = vshll.u32 %v3664_v50, 23  ;;  %v3463_v6 = vxor.u32 2147483648, %v3462_v5  ;;  %v3674_v30 = vsel %vm3589_vm4, %v3673_v27, %v15508_v3  ;;  %v1856_v3 = vld [vmem:[%s18609_s4 + $0x1f8] sm:$0xff] }
 0x7be   :  { %v3546_v62 = vshll.u32 %v15580_v35, 30  ;;  %v4611_v10 = vsub.f32 %v15583_v43, %v4610_v14  ;;  %v3359_v41 = vxor.u32 2147483648, %v3358_v29  ;;  %vm3277_vm7 = vcmp.lt.s32.totalorder %v15319_v45, 0 }
 0x7bf   :  { %v3666_v19 = vor.u32 4788187, %v3665_v60  ;;  %v3669_v61 = vcvt.s32.f32 %v3662_v32  ;;  %v3464_v22 = vsel %vm3381_vm6, %v3463_v6, %v3462_v5  ;;  %v3676_v32 = vsel %vm15592_vm5, 0, %v3674_v30 }
 0x7c0   :  { %v3547_v36 = vsub.s32 %v3543_v57, %v3546_v62  ;;  %v4612_v1 = vand.u32 4294901760, %v4611_v10  ;;  %vm15617_vm8 = vcmp.le.f32.partialorder %v3379_v63, 0.7853982  ;;  %v3360_v57 = vsel %vm3277_vm7, %v3359_v41, %v3358_v29 }
 0x7c1   :  { %v3667_v38 = vand.u32 2147483647, %v3666_v19  ;;  %v3467_v46 = vsel %vm15617_vm8, %v15308_v33, %v3464_v22  ;;  %v18636_v19 = vmov 0   ;;  %v18705_v53 = vand.u32 2147483647, %v15319_v45  ;;  %v13950_v22 = vld [vmem:[%s18609_s4 + $0x70] sm:$0xff] }
 0x7c2   :  { %v3549_v17 = vsub.s32 0, %v3547_v36  ;;  %13087 = vmatprep.mubr.f32.mxu0 %v4612_v1  ;;  %13840 = vset.pattern.permute.xlu0 %v18636_v19  ;;  %v3680_v11 = vadd.s32 3, %v3676_v32  ;;  %v3361_v62 = vsub.s32 4, %v15445_v31  ;;  %vm3679_vm14 = vweird.f32 %v15332_v4 }
 0x7c3   :  { %v3670_v16 = vmul.f32 %v3669_v61, %v3667_v38  ;;  %13842 = vset.pattern.permute.xlu1 %v18636_v19  ;;  %vm15630_vm9 = vcmp.le.f32.partialorder %v18705_v53, 0.7853982  ;;  %4523 = vperm.xlu0 %13840, %v1856_v3   ;;  %v3539_v61 = vadd.s32 %v15555_v0, %v15551_v13  ;;  %v13951_v53 = vld [vmem:[%s18609_s4 + $0x68] sm:$0xff]  ;;  %vm3485_vm15 = vcmp.lt.s32.totalorder %v15434_v28, 0 }
 0x7c4   :  { %v11730_v44 = vmin.u32 %v3549_v17, %v3547_v36  ;;  %4513 = vperm.xlu1 %13842, %v1854_v58   ;;  %v3363_v21 = vsel %vm15630_vm9, %v15319_v45, %v3360_v57  ;;  %v3681_v29 = vand.u32 3, %v3680_v11  ;;  %v3362_v30 = vsel %vm3277_vm7, %v3361_v62, %v15445_v31 }
 0x7c5   :  { %v3671_v54 = vxor.u32 2147483648, %v3670_v16  ;;  %v3364_v58 = vsel %vm15630_vm9, 0, %v3362_v30 }
 0x7c6   :  { %v3551_v60 = vclz %v11730_v44  ;;  %vm3686_vm11 = vcmp.eq.s32.totalorder %v3681_v29, 2  ;;  %vm3683_vm12 = vcmp.eq.s32.totalorder %v3681_v29, 0  ;;  %vm3682_vm13 = vcmp.lt.s32.totalorder %v3681_v29, 2 }
 0x7c7   :  { %v3672_v48 = vsel %vm3589_vm4, %v3671_v54, %v3670_v16  ;;  %v3465_v16 = vsub.s32 4, %v15420_v39  ;;  %4518 = vperm.xlu0 %13840, %v1855_v2   ;;  %v18708_v54 = vmov 4  }
 0x7c8   :  { %v3675_v50 = vsel %vm15592_vm5, %v15332_v4, %v3672_v48  ;;  %v11731_v49 = vadd.s32 4294967294, %v3551_v60  ;;  %13843 = vset.pattern.permute.xlu1 %v18708_v54  ;;  %v13949_v48 = vld [vmem:[%s18609_s4 + $0x40] sm:$0xff]  ;;  %v3368_v4 = vadd.s32 3, %v3364_v58 }
 0x7c9   :  { %13869 = vcosq.f32 %v3675_v50  ;;  %3701 = vperm.xlu1 %13843, %v13949_v48   ;;  %v3466_v41 = vsel %vm3381_vm6, %v3465_v16, %v15420_v39  ;;  %v18709_v16 = vand.u32 2147483647, %v15434_v28 }
 0x7ca   :  { %13871 = vsinq.f32 %v3675_v50  ;;  %vm11732_vm10 = vcmp.lt.s32.totalorder %v11731_v49, 0  ;;  %v1853_v50 = vld [vmem:[%s18609_s4 + $0x1e0] sm:$0xff]  ;;  %v3468_v31 = vsel %vm15617_vm8, 0, %v3466_v41 }
 0x7cb   :  { %13873 = vcosq.f32 %v3467_v46  ;;  %v3554_v38 = vsel %vm11732_vm10, 0, %v11731_v49  ;;  %13841 = vset.pattern.permute.xlu0 %v18708_v54  ;;  %vm15687_vm1 = vcmp.le.f32.partialorder %v18709_v16, 0.7853982  ;;  %vm3471_vm10 = vweird.f32 %v15308_v33 }
 0x7cc   :  { %13875 = vsinq.f32 %v3467_v46  ;;  %v3555_v5 = vsub.s32 32, %v3554_v38  ;;  %v3559_v9 = vsub.s32 4294967266, %v3554_v38  ;;  %v3556_v27 = vshll.u32 %v3547_v36, %v3554_v38  ;;  %3731 = vperm.xlu0 %13841, %v13950_v22  }
 0x7cd   :  { %13877 = vcosq.f32 %v3363_v21  ;;  %13844 = vset.pattern.permute.xlu1 %v18636_v19 }
 0x7ce   :  { %13879 = vsinq.f32 %v3363_v21  ;;  %v3557_v6 = vshrl.u32 %v3539_v61, %v3555_v5  ;;  %v3560_v55 = vadd.s32 127, %v3559_v9  ;;  %4508 = vperm.xlu1 %13844, %v1853_v50   ;;  %v3472_v21 = vadd.s32 3, %v3468_v31 }
 0x7cf   :  { %v3569_v61 = vsub.s32 4, %v15580_v35  ;;  %v3369_v50 = vand.u32 3, %v3368_v4 }
 0x7d0   :  { %v3558_v0 = vor.u32 %v3557_v6, %v3556_v27  ;;  %v3561_v10 = vshll.u32 %v3560_v55, 23  ;;  %3726 = vperm.xlu0 %13841, %v13951_v53   ;;  %v13952_v27 = vld [vmem:[%s18609_s4 + $0x60] sm:$0xff] }
 0x7d1   :  { %v3570_v41 = vsel %vm3485_vm15, %v3569_v61, %v15580_v35  ;;  %vm3371_vm6 = vcmp.eq.s32.totalorder %v3369_v50, 0  ;;  %vm3374_vm7 = vcmp.eq.s32.totalorder %v3369_v50, 2  ;;  %vm3370_vm9 = vcmp.lt.s32.totalorder %v3369_v50, 2 }
 0x7d2   :  { %v3562_v44 = vor.u32 4788187, %v3561_v10  ;;  %v3565_v3 = vcvt.s32.f32 %v3558_v0  ;;  %13845 = vset.pattern.permute.xlu1 %v18708_v54  ;;  %v3473_v0 = vand.u32 3, %v3472_v21  ;;  %v3572_v35 = vsel %vm15687_vm1, 0, %v3570_v41 }
 0x7d3   :  { %5602 = vperm.xlu1 %13845, %v15675_v15   ;;  %v3576_v53 = vadd.s32 3, %v3572_v35 }
 0x7d4   :  { %v3563_v60 = vand.u32 2147483647, %v3562_v44  ;;  %3721 = vperm.xlu0 %13841, %v13952_v27   ;;  %v4503_v44 = vld [vmem:[%s18609_s4 + $0x168] sm:$0xff]  ;;  %vm3475_vm4 = vcmp.eq.s32.totalorder %v3473_v0, 0  ;;  %vm3478_vm5 = vcmp.eq.s32.totalorder %v3473_v0, 2  ;;  %vm3474_vm8 = vcmp.lt.s32.totalorder %v3473_v0, 2 }
 0x7d5   :  { %v4531_v31 = vsel %vm4526_vm2, %v4503_v44, 0  ;;  %v3577_v16 = vand.u32 3, %v3576_v53 }
 0x7d6   :  { %v13870_v13 = vpop.eup %13869  ;;  %v3566_v49 = vmul.f32 %v3565_v3, %v3563_v60  ;;  %v15738_v4 = vand.u32 4294901760, %v4531_v31 }
 0x7d7   :  { %v13872_v17 = vpop.eup %13871  ;;  %v3687_v36 = vxor.u32 2147483648, %v13870_v13 }
 0x7d8   :  { %v3684_v1 = vxor.u32 2147483648, %v13872_v17  ;;  %v13874_v63 = vpop.eup %13873  ;;  %v3567_v2 = vxor.u32 2147483648, %v3566_v49 }
 0x7d9   :  { %v3688_v32 = vsel %vm3686_vm11, %v3687_v36, %v13872_v17  ;;  %v13876_v38 = vpop.eup %13875  ;;  %v3479_v10 = vxor.u32 2147483648, %v13874_v63  ;;  %vm3367_vm11 = vweird.f32 %v15319_v45 }
 0x7da   :  { %v3685_v39 = vsel %vm3683_vm12, %v13870_v13, %v3684_v1  ;;  %v13878_v9 = vpop.eup %13877  ;;  %v3568_v29 = vsel %vm3485_vm15, %v3567_v2, %v3566_v49  ;;  %v15706_v13 = vld [vmem:[%s18609_s4 + $0x90] sm:$0xff]  ;;  %v3476_v17 = vxor.u32 2147483648, %v13876_v38  ;;  %v4505_v49 = vld [vmem:[%s18609_s4 + $0x178] sm:$0xff]  ;;  %vm3582_vm12 = vcmp.eq.s32.totalorder %v3577_v16, 2 }
 0x7db   :  { %v3689_v57 = vsel %vm3682_vm13, %v3685_v39, %v3688_v32  ;;  %v13880_v6 = vpop.eup %13879  ;;  %v3571_v55 = vsel %vm15687_vm1, %v15434_v28, %v3568_v29  ;;  %5597 = vperm.xlu1 %13845, %v15706_v13   ;;  %v3375_v1 = vxor.u32 2147483648, %v13878_v9  ;;  %v4504_v32 = vld [vmem:[%s18609_s4 + $0x170] sm:$0xff]  ;;  %v15723_v39 = vld [vmem:[%s18609_s4 + $0xb8] sm:$0xff]  ;;  %v3480_v3 = vsel %vm3478_vm5, %v3479_v10, %v13876_v38 }
 0x7dc   :  { %v3690_v46 = vsel %vm3679_vm14, nan, %v3689_v57  ;;  %13881 = vcosq.f32 %v3571_v55  ;;  %v3372_v30 = vxor.u32 2147483648, %v13880_v6  ;;  %v3477_v60 = vsel %vm3475_vm4, %v13874_v63, %v3476_v17  ;;  %v15736_v63 = vld [vmem:[%s18609_s4 + $0x88] sm:$0xff] }
 0x7dd   :  { %v15670_v11 = vand.u32 4294901760, %v3690_v46  ;;  %13883 = vsinq.f32 %v3571_v55  ;;  %v3376_v57 = vsel %vm3374_vm7, %v3375_v1, %v13880_v6  ;;  %v3481_v21 = vsel %vm3474_vm8, %v3477_v60, %v3480_v3 }
 0x7de   :  { %v3373_v58 = vsel %vm3371_vm6, %v13878_v9, %v3372_v30  ;;  %v4537_v61 = vsel %vm4526_vm2, %v4505_v49, 0  ;;  %v3482_v9 = vsel %vm3471_vm10, nan, %v3481_v21  ;;  %v15747_v29 = vsub.f32 %v4531_v31, %v15738_v4 }
 0x7df   :  { %13079 = vmatprep.subr.mxu0 %v15670_v11  ;;  %v15683_v5 = vsub.f32 %v3690_v46, %v15670_v11  ;;  %5622 = vperm.xlu1 %13845, %v15723_v39   ;;  %v4534_v46 = vsel %vm4526_vm2, %v4504_v32, 0  ;;  %v3377_v2 = vsel %vm3370_vm9, %v3373_v58, %v3376_v57  ;;  %v15749_v27 = vand.u32 4294901760, %v4537_v61 }
 0x7e0   :  { %13080 = vmatpush3.msra.mxu0 %v15670_v11  ;;  %v15741_v38 = vand.u32 4294901760, %v4534_v46  ;;  %v3378_v62 = vsel %vm3367_vm11, nan, %v3377_v2  ;;  %v15754_v10 = vand.u32 4294901760, %v3482_v9  ;;  %vm3579_vm13 = vcmp.eq.s32.totalorder %v3577_v16, 0 }
 0x7e1   :  { %v15701_v48 = vand.u32 4294901760, %v15683_v5  ;;  %v15756_v17 = vand.u32 4294901760, %v3378_v62  ;;  %v4620_v41 = vand.u32 4294901760, %v15747_v29  ;;  %vm3578_vm14 = vcmp.lt.s32.totalorder %v3577_v16, 2 }
 0x7e2   :  { %v15752_v55 = vsub.f32 %v4534_v46, %v15741_v38  ;;  %vm3575_vm15 = vweird.f32 %v15434_v28 }
 0x7e3   :  { %v4676_v36 = vsub.f32 %v15683_v5, %v15701_v48  ;;  %5592 = vperm.xlu1 %13845, %v15736_v63   ;;  %v4621_v60 = vsub.f32 %v15747_v29, %v4620_v41  ;;  %v4695_v31 = vsub.f32 %v3378_v62, %v15756_v17 }
 0x7e4   :  { %v4630_v1 = vand.u32 4294901760, %v15752_v55 }
 0x7e5   :  { %v4677_v22 = vand.u32 4294901760, %v4676_v36  ;;  %v15760_v36 = vsub.f32 %v4537_v61, %v15749_v27  ;;  %v4622_v46 = vand.u32 4294901760, %v4621_v60  ;;  %v15784_v21 = vand.u32 4294901760, %v4695_v31 }
 0x7e6   :  { %v4631_v58 = vsub.f32 %v15752_v55, %v4630_v1 }
 0x7e7   :  { %13093 = vmatprep.subr.mxu1 %v4677_v22  ;;  %v4640_v3 = vand.u32 4294901760, %v15760_v36 }
 0x7e8   :  { %13094 = vmatpush3.msra.mxu1 %v4677_v22  ;;  %v4688_v22 = vsub.f32 %v3482_v9, %v15754_v10  ;;  %v4632_v2 = vand.u32 4294901760, %v4631_v58  ;;  %v5583_v58 = vld [vmem:[%s18609_s4 + $0xb0] sm:$0xff] }
 0x7e9   :  { %v13882_v6 = vpop.eup %13881  ;;  %v4641_v53 = vsub.f32 %v15760_v36, %v4640_v3 }
 0x7ea   :  { %v13884_v0 = vpop.eup %13883  ;;  %v3583_v50 = vxor.u32 2147483648, %v13882_v6  ;;  %v15777_v57 = vand.u32 4294901760, %v4688_v22 }
 0x7eb   :  { %v3580_v33 = vxor.u32 2147483648, %v13884_v0  ;;  %v4642_v62 = vand.u32 4294901760, %v4641_v53 }
 0x7ec   :  { %v3584_v45 = vsel %vm3582_vm12, %v3583_v50, %v13884_v0  ;;  %v4690_v9 = vsub.f32 %v4688_v22, %v15777_v57  ;;  %v5577_v50 = vld [vmem:[%s18609_s4 + $0x80] sm:$0xff] }
 0x7ed   :  { %v3581_v30 = vsel %vm3579_vm13, %v13882_v6, %v3580_v33  ;;  %v4697_v6 = vsub.f32 %v4695_v31, %v15784_v21 }
 0x7ee   :  { %v3585_v44 = vsel %vm3578_vm14, %v3581_v30, %v3584_v45  ;;  %v4691_v0 = vand.u32 4294901760, %v4690_v9  ;;  %v5625_v45 = vsel %vm1906_vm3, %v5577_v50, 0 }
 0x7ef   :  { %v3586_v32 = vsel %vm3575_vm15, nan, %v3585_v44  ;;  %v4698_v33 = vand.u32 4294901760, %v4697_v6  ;;  %v15802_v30 = vand.u32 4294901760, %v5625_v45 }
 0x7f0   :  { %v15765_v35 = vand.u32 4294901760, %v3586_v32 }
 0x7f1   :  { %v15821_v60 = vsub.f32 %v5625_v45, %v15802_v30 }
 0x7f2   :  { %13081 = vmatprep.subr.mxu0 %v15765_v35  ;;  %v4681_v28 = vsub.f32 %v3586_v32, %v15765_v35  ;;  %v5631_v32 = vsel %vm1906_vm3, %v15675_v15, 0 }
 0x7f3   :  { %13082 = vmatpush3.msra.mxu0 %v15765_v35  ;;  %v5709_v53 = vand.u32 4294901760, %v15821_v60 }
 0x7f4   :  { %13083 = vmatprep.subr.mxu0 %v15754_v10  ;;  %v4682_v49 = vand.u32 4294901760, %v4681_v28 }
 0x7f5   :  { %13084 = vmatpush3.msra.mxu0 %v15754_v10 }
 0x7f6   :  { %13085 = vmatprep.subr.mxu0 %v15756_v17  ;;  %v4683_v61 = vsub.f32 %v4681_v28, %v4682_v49 }
 0x7f7   :  { %13086 = vmatpush3.msra.mxu0 %v15756_v17 }
 0x7f8   :  { %13088 = vmatmul.mubr.f32.vlgmr.msra.gmra.mxu0 %v4622_v46  ;;  %13107 = vmatprep.subr.mxu0 %v15683_v5  ;;  %v4684_v16 = vand.u32 4294901760, %v4683_v61 }
 0x7f9   :  { %13108 = vmatpush3.msra.mxu0 %v15683_v5  ;;  %13090 = vmatprep.mubr.f32.mxu0 %v4632_v2  ;;  %v5627_v5 = vsel %vm1906_vm3, %v15736_v63, 0  ;;  %v5629_v63 = vsel %vm1906_vm3, %v15706_v13, 0  ;;  %v5637_v2 = vsel %vm1906_vm3, %v5583_v58, 0 }
 0x7fa   :  { %13095 = vmatprep.subr.mxu1 %v4684_v16  ;;  %13109 = vmatprep.subr.mxu0 %v4681_v28  ;;  %v15806_v44 = vand.u32 4294901760, %v5627_v5  ;;  %v15831_v15 = vand.u32 4294901760, %v5629_v63  ;;  %v15868_v6 = vand.u32 4294901760, %v5637_v2 }
 0x7fb   :  { %13096 = vmatpush3.msra.mxu1 %v4684_v16  ;;  %13110 = vmatpush3.msra.mxu0 %v4681_v28  ;;  %v15838_v28 = vand.u32 4294901760, %v5631_v32 }
 0x7fc   :  { %13091 = vmatmul.mubr.f32.gmra.mxu0 %v4642_v62  ;;  %13097 = vmatprep.subr.mxu1 %v4691_v0  ;;  %v15829_v13 = vsub.f32 %v5627_v5, %v15806_v44  ;;  %v15853_v9 = vsub.f32 %v5629_v63, %v15831_v15  ;;  %v15896_v5 = vsub.f32 %v5637_v2, %v15868_v6  ;;  %v18715_v2 = vld [vmem:[#allocation4_spill] sm:$0xff] }
 0x7fd   :  { %13111 = vmatprep.subr.mxu0 %v4688_v22  ;;  %13098 = vmatpush3.msra.mxu1 %v4691_v0  ;;  %v5639_v0 = vsel %vm1906_vm3, %v15723_v39, 0 }
 0x7fe   :  { %13112 = vmatpush3.msra.mxu0 %v4688_v22  ;;  %13099 = vmatprep.subr.mxu1 %v4698_v33  ;;  %v5581_v22 = vld [vmem:[%s18609_s4 + $0xa0] sm:$0xff]  ;;  %v5719_v61 = vand.u32 4294901760, %v15829_v13  ;;  %v5729_v50 = vand.u32 4294901760, %v15853_v9 }
 0x7ff   :  { %13113 = vmatprep.subr.mxu0 %v4695_v31  ;;  %13100 = vmatpush3.msra.mxu1 %v4698_v33  ;;  %v18713_v33 = vld [vmem:[#allocation3_spill] sm:$0xff] }
 0x800   :  { %13114 = vmatpush3.msra.mxu0 %v4695_v31  ;;  %13115 = vmatprep.mubr.f32.mxu0 %v15583_v43  ;;  %v5633_v31 = vsel %vm1906_vm3, %v5581_v22, 0  ;;  %v5710_v43 = vsub.f32 %v15821_v60, %v5709_v53  ;;  %v5730_v63 = vsub.f32 %v15853_v9, %v5729_v50 }
 0x801   :  { %13102 = vmatmul.mubr.f32.vlgmr.msra.gmra.mxu1 %v15738_v4  ;;  %13116 = vmatmul.mubr.f32.vlgmr.msra.gmra.mxu0 %v15747_v29  ;;  %v15842_v46 = vand.u32 4294901760, %v5633_v31 }
 0x802   :  { %13121 = vmatprep.subr.mxu1 %v15670_v11  ;;  %13135 = vmatprep.subr.mxu0 %v15701_v48 }
 0x803   :  { %13122 = vmatpush3.msra.mxu1 %v15670_v11  ;;  %13136 = vmatpush3.msra.mxu0 %v15701_v48  ;;  %v5582_v48 = vld [vmem:[%s18609_s4 + $0xa8] sm:$0xff]  ;;  %v15866_v62 = vsub.f32 %v5633_v31, %v15842_v46  ;;  %v18714_v31 = vld [vmem:[#allocation5_spill] sm:$0xff] }
 0x804   :  { %13123 = vmatprep.subr.mxu1 %v15765_v35  ;;  %13137 = vmatprep.subr.mxu0 %v4682_v49 }
 0x805   :  { %13104 = vmatprep.mubr.f32.mxu1 %v15741_v38  ;;  %13118 = vmatprep.mubr.f32.mxu0 %v15752_v55  ;;  %v5749_v45 = vand.u32 4294901760, %v15866_v62 }
 0x806   :  { %13124 = vmatpush3.msra.mxu1 %v15765_v35  ;;  %13138 = vmatpush3.msra.mxu0 %v4682_v49  ;;  %v5635_v49 = vsel %vm1906_vm3, %v5582_v48, 0 }
 0x807   :  { %13105 = vmatmul.mubr.f32.gmra.mxu1 %v15749_v27  ;;  %13119 = vmatmul.mubr.f32.gmra.mxu0 %v15760_v36  ;;  %v15861_v16 = vand.u32 4294901760, %v5635_v49  ;;  %v5750_v36 = vsub.f32 %v15866_v62, %v5749_v45 }
 0x808   :  { %13125 = vmatprep.subr.mxu1 %v15754_v10  ;;  %13139 = vmatprep.subr.mxu0 %v15777_v57 }
 0x809   :  { %13126 = vmatpush3.msra.mxu1 %v15754_v10  ;;  %13140 = vmatpush3.msra.mxu0 %v15777_v57  ;;  %v15859_v57 = vsub.f32 %v5631_v32, %v15838_v28  ;;  %v15888_v29 = vsub.f32 %v5635_v49, %v15861_v16  ;;  %v5731_v32 = vand.u32 4294901760, %v5730_v63  ;;  %v5751_v58 = vand.u32 4294901760, %v5750_v36 }
 0x80a   :  { %13127 = vmatprep.subr.mxu1 %v15756_v17  ;;  %13141 = vmatprep.subr.mxu0 %v15784_v21 }
 0x80b   :  { %13128 = vmatpush3.msra.mxu1 %v15756_v17  ;;  %13129 = vmatprep.mubr.f32.mxu1 %v4610_v14  ;;  %v18712_v14 = vld [vmem:[#allocation2_spill] sm:$0xff]  ;;  %v5739_v39 = vand.u32 4294901760, %v15859_v57 }
 0x80c   :  { %13142 = vmatpush3.msra.mxu0 %v15784_v21  ;;  %13143 = vmatprep.mubr.f32.mxu0 %v15578_v25  ;;  %v5720_v21 = vsub.f32 %v15829_v13, %v5719_v61 }
 0x80d   :  { %13130 = vmatmul.mubr.f32.vlgmr.msra.gmra.mxu1 %v4620_v41  ;;  %13144 = vmatmul.mubr.f32.vlgmr.msra.gmra.mxu0 %v15738_v4  ;;  %v15890_v41 = vand.u32 4294901760, %v5639_v0  ;;  %v5740_v55 = vsub.f32 %v15859_v57, %v5739_v39 }
 0x80e   :  { %13149 = vmatprep.subr.mxu1 %v15670_v11  ;;  %13163 = vmatprep.subr.mxu0 %v18712_v14  ;;  %v5721_v22 = vand.u32 4294901760, %v5720_v21 }
 0x80f   :  { %13150 = vmatpush3.msra.mxu1 %v15670_v11  ;;  %13164 = vmatpush3.msra.mxu0 %v18712_v14  ;;  %v5711_v11 = vand.u32 4294901760, %v5710_v43 }
 0x810   :  { %13151 = vmatprep.subr.mxu1 %v15765_v35  ;;  %13191 = vmatprep.subr.mxu0 %v18713_v33 }
 0x811   :  { %13132 = vmatprep.mubr.f32.mxu1 %v4630_v1  ;;  %13146 = vmatprep.mubr.f32.mxu0 %v15741_v38  ;;  %v5759_v1 = vand.u32 4294901760, %v15888_v29 }
 0x812   :  { %13152 = vmatpush3.msra.mxu1 %v15765_v35  ;;  %13147 = vmatmul.mubr.f32.gmra.mxu0 %v15749_v27  ;;  %v15914_v35 = vsub.f32 %v5639_v0, %v15890_v41 }
 0x813   :  { %13133 = vmatmul.mubr.f32.gmra.mxu1 %v4640_v3  ;;  %13153 = vmatprep.subr.mxu1 %v15754_v10  ;;  %v5769_v3 = vand.u32 4294901760, %v15896_v5 }
 0x814   :  { %13154 = vmatpush3.msra.mxu1 %v15754_v10  ;;  %13157 = vmatprep.mubr.f32.mxu1 %v15578_v25  ;;  %v5741_v10 = vand.u32 4294901760, %v5740_v55  ;;  %v5760_v25 = vsub.f32 %v15888_v29, %v5759_v1  ;;  %v5779_v48 = vand.u32 4294901760, %v15914_v35 }
 0x815   :  { %13155 = vmatprep.subr.mxu1 %v15756_v17  ;;  %13165 = vmatprep.mubr.f32.mxu0 %v5711_v11  ;;  %v5770_v49 = vsub.f32 %v15896_v5, %v5769_v3 }
 0x816   :  { %13156 = vmatpush3.msra.mxu1 %v15756_v17  ;;  %13166 = vmatmul.mubr.f32.vlgmr.msra.gmra.mxu0 %v5721_v22  ;;  %v5780_v17 = vsub.f32 %v15914_v35, %v5779_v48 }
 0x817   :  { %13158 = vmatmul.mubr.f32.vlgmr.msra.gmra.mxu1 %v15738_v4  ;;  %13177 = vmatprep.subr.mxu1 %v18714_v31  ;;  %v5761_v4 = vand.u32 4294901760, %v5760_v25  ;;  %v5771_v0 = vand.u32 4294901760, %v5770_v49 }
 0x818   :  { %13192 = vmatpush3.msra.mxu0 %v18713_v33  ;;  %13178 = vmatpush3.msra.mxu1 %v18714_v31  ;;  %v5781_v43 = vand.u32 4294901760, %v5780_v17 }
 0x819   :  { %13219 = vmatprep.subr.mxu0 %v18715_v2  ;;  %13205 = vmatprep.subr.mxu1 %v18712_v14 }
 0x81a   :  { %13160 = vmatprep.mubr.f32.mxu1 %v15741_v38  ;;  %13168 = vmatprep.mubr.f32.mxu0 %v5731_v32  ;;  %v4089_v38 = vpop.f32.mrf.mxu0 }
 0x81b   :  { %13161 = vmatmul.mubr.f32.gmra.mxu1 %v15749_v27  ;;  %13169 = vmatmul.mubr.f32.gmra.mxu0 %v5741_v10 }
 0x81c   :  { %13171 = vmatprep.mubr.f32.mxu0 %v5751_v58  ;;  %13179 = vmatprep.mubr.f32.mxu1 %v15802_v30  ;;  %v15982_v27 = vpop.f32.mrf.mxu0 }
 0x81f   :  { %13172 = vmatmul.mubr.f32.gmra.mxu0 %v5761_v4  ;;  %13180 = vmatmul.mubr.f32.vlgmr.msra.gmra.mxu1 %v15806_v44 }
 0x820   :  { %13206 = vmatpush3.msra.mxu1 %v18712_v14  ;;  %13174 = vmatprep.mubr.f32.mxu0 %v5771_v0 }
 0x821   :  { %13233 = vmatprep.subr.mxu1 %v18712_v14  ;;  %13182 = vmatprep.mubr.f32.mxu1 %v15831_v15 }
 0x823   :  { %13175 = vmatmul.mubr.f32.gmra.mxu0 %v5781_v43  ;;  %13183 = vmatmul.mubr.f32.gmra.mxu1 %v15838_v28 }
 0x824   :  { %13185 = vmatprep.mubr.f32.mxu1 %v15842_v46  ;;  %13193 = vmatprep.mubr.f32.mxu0 %v15821_v60 }
 0x827   :  { %13186 = vmatmul.mubr.f32.gmra.mxu1 %v15861_v16  ;;  %13194 = vmatmul.mubr.f32.vlgmr.msra.gmra.mxu0 %v15829_v13 }
 0x828   :  { %13220 = vmatpush3.msra.mxu0 %v18715_v2  ;;  %13188 = vmatprep.mubr.f32.mxu1 %v15868_v6 }
 0x829   :  { %13196 = vmatprep.mubr.f32.mxu0 %v15853_v9 }
 0x82b   :  { %13189 = vmatmul.mubr.f32.gmra.mxu1 %v15890_v41  ;;  %13197 = vmatmul.mubr.f32.gmra.mxu0 %v15859_v57 }
 0x82c   :  { %13207 = vmatprep.mubr.f32.mxu1 %v5709_v53  ;;  %13199 = vmatprep.mubr.f32.mxu0 %v15866_v62 }
 0x82f   :  { %13208 = vmatmul.mubr.f32.vlgmr.msra.gmra.mxu1 %v5719_v61  ;;  %13200 = vmatmul.mubr.f32.gmra.mxu0 %v15888_v29 }
 0x830   :  { %13234 = vmatpush3.msra.mxu1 %v18712_v14  ;;  %13210 = vmatprep.mubr.f32.mxu1 %v5729_v50 }
 0x831   :  { %13202 = vmatprep.mubr.f32.mxu0 %v15896_v5 }
 0x833   :  { %13211 = vmatmul.mubr.f32.gmra.mxu1 %v5739_v39  ;;  %13203 = vmatmul.mubr.f32.gmra.mxu0 %v15914_v35 }
 0x834   :  { %13213 = vmatprep.mubr.f32.mxu1 %v5749_v45  ;;  %13221 = vmatprep.mubr.f32.mxu0 %v15802_v30 }
 0x837   :  { %13214 = vmatmul.mubr.f32.gmra.mxu1 %v5759_v1  ;;  %13222 = vmatmul.mubr.f32.vlgmr.msra.gmra.mxu0 %v15806_v44 }
 0x838   :  { %13216 = vmatprep.mubr.f32.mxu1 %v5769_v3  ;;  %13224 = vmatprep.mubr.f32.mxu0 %v15831_v15 }
 0x83b   :  { %13217 = vmatmul.mubr.f32.gmra.mxu1 %v5779_v48  ;;  %13225 = vmatmul.mubr.f32.gmra.mxu0 %v15838_v28 }
 0x83c   :  { %13235 = vmatprep.mubr.f32.mxu1 %v15802_v30  ;;  %13227 = vmatprep.mubr.f32.mxu0 %v15842_v46  ;;  %v15984_v30 = vpop.f32.mrf.mxu0 }
 0x83d   :  { %18716 = vst [vmem:[#allocation8_spill] sm:$0xff] %v15984_v30 }
 0x83e   :  { %v13033_v60 = vpop.f32.mrf.mxu0  ;;  %v4524_v5 = vpop.permute.xlu0 %4523 }
 0x83f   :  { %13236 = vmatmul.mubr.f32.vlgmr.msra.gmra.mxu1 %v15806_v44  ;;  %13228 = vmatmul.mubr.f32.gmra.mxu0 %v15861_v16  ;;  %v15986_v44 = vpop.f32.mrf.mxu1  ;;  %v4514_v25 = vpop.permute.xlu1 %4513 }
 0x840   :  { %13238 = vmatprep.mubr.f32.mxu1 %v15831_v15  ;;  %13230 = vmatprep.mubr.f32.mxu0 %v15868_v6  ;;  %v15990_v15 = vpop.f32.mrf.mxu0 }
 0x841   :  { %v15988_v13 = vpop.f32.mrf.mxu1 }
 0x842   :  { %v4519_v55 = vpop.permute.xlu0 %4518 }
 0x843   :  { %13239 = vmatmul.mubr.f32.gmra.mxu1 %v15838_v28  ;;  %13231 = vmatmul.mubr.f32.gmra.mxu0 %v15890_v41  ;;  %v15992_v28 = vpop.f32.mrf.mxu1 }
 0x844   :  { %13241 = vmatprep.mubr.f32.mxu1 %v15842_v46  ;;  %18717 = vst [vmem:[#allocation7_spill] sm:$0xff] %v15992_v28  ;;  %v15994_v46 = vpop.f32.mrf.mxu0  ;;  %v3702_v19 = vpop.permute.xlu1 %3701 }
 0x845   :  { %v13047_v53 = vpop.f32.mrf.mxu1  ;;  %v3828_v31 = vadd.f32 %v15408_v20, %v3702_v19 }
 0x846   :  { %v15996_v61 = vpop.f32.mrf.mxu0 }
 0x847   :  { %13242 = vmatmul.mubr.f32.gmra.mxu1 %v15861_v16  ;;  %18718 = vst [vmem:[#allocation10_spill] sm:$0xff] %v15996_v61  ;;  %v15998_v9 = vpop.f32.mrf.mxu1  ;;  %v3732_v32 = vpop.permute.xlu0 %3731 }
 0x848   :  { %13244 = vmatprep.mubr.f32.mxu1 %v15868_v6  ;;  %v16000_v57 = vpop.f32.mrf.mxu0 }
 0x849   :  { %v16002_v16 = vpop.f32.mrf.mxu1  ;;  %v4509_v28 = vpop.permute.xlu1 %4508 }
 0x84a   :  { %v16004_v62 = vpop.f32.mrf.mxu0 }
 0x84b   :  { %13245 = vmatmul.mubr.f32.gmra.mxu1 %v15890_v41  ;;  %v16006_v6 = vpop.f32.mrf.mxu1  ;;  %v3727_v17 = vpop.permute.xlu0 %3726 }
 0x84c   :  { %18719 = vst [vmem:[#allocation9_spill] sm:$0xff] %v16006_v6  ;;  %v16008_v21 = vpop.f32.mrf.mxu0  ;;  %v3878_v33 = vadd.f32 %v15449_v59, %v3727_v17  ;;  %v3974_v6 = vadd.f32 %v15467_v23, %v3828_v31 }
 0x84d   :  { %v16010_v50 = vpop.f32.mrf.mxu1 }
 0x84e   :  { %v16012_v39 = vpop.f32.mrf.mxu0  ;;  %v4004_v61 = vadd.f32 %v15501_v51, %v3878_v33 }
 0x84f   :  { %18720 = vst [vmem:[#allocation12_spill] sm:$0xff] %v16012_v39  ;;  %v16014_v29 = vpop.f32.mrf.mxu1  ;;  %v3722_v14 = vpop.permute.xlu0 %3721 }
 0x850   :  { %v16016_v41 = vpop.f32.mrf.mxu0  ;;  %v3868_v39 = vadd.f32 %v15459_v37, %v3722_v14  ;;  %v4125_v19 = vadd.f32 %v13033_v60, %v4004_v61 }
 0x851   :  { %v16018_v45 = vpop.f32.mrf.mxu1 }
 0x852   :  { %18721 = vst [vmem:[#allocation11_spill] sm:$0xff] %v16018_v45  ;;  %v16020_v11 = vpop.f32.mrf.mxu0  ;;  %v4090_v45 = vadd.f32 %v4089_v38, %v3974_v6  ;;  %v3998_v20 = vadd.f32 %v15512_v47, %v3868_v39  ;;  %v4253_v31 = vadd.f32 %v13047_v53, %v4125_v19  ;;  %v3898_v47 = vadd.f32 %v15469_v42, %v15291_v56 }
 0x853   :  { %v16022_v22 = vpop.f32.mrf.mxu1  ;;  %v3888_v42 = vadd.f32 %v15483_v24, %v3732_v32  ;;  %v18729_v32 = vld [vmem:[#allocation15_spill] sm:$0xff] }
 0x854   :  { %18722 = vst [vmem:[#allocation13_spill] sm:$0xff] %v16022_v22  ;;  %v16024_v63 = vpop.f32.mrf.mxu0  ;;  %v4213_v37 = vadd.f32 %v15986_v44, %v4090_v45  ;;  %v4118_v14 = vadd.f32 %v15990_v15, %v3998_v20  ;;  %v4373_v39 = vadd.f32 %v16016_v41, %v4253_v31  ;;  %v4016_v45 = vadd.f32 %v15527_v18, %v3898_v47 }
 0x855   :  { %18723 = vst [vmem:[#allocation16_spill] sm:$0xff] %v16024_v63  ;;  %v16026_v1 = vpop.f32.mrf.mxu1 }
 0x856   :  { %v16028_v35 = vpop.f32.mrf.mxu0  ;;  %v4245_v44 = vadd.f32 %v15998_v9, %v4118_v14 }
 0x857   :  { %18724 = vst [vmem:[#allocation17_spill] sm:$0xff] %v16028_v35  ;;  %v16030_v3 = vpop.f32.mrf.mxu1 }
 0x858   :  { %18725 = vst [vmem:[#allocation18_spill] sm:$0xff] %v16030_v3 }
 0x859   :  { %v16032_v58 = vpop.f32.mrf.mxu1 }
 0x85a   :  { %18726 = vst [vmem:[#allocation19_spill] sm:$0xff] %v16032_v58 }
 0x85b   :  { %v16034_v4 = vpop.f32.mrf.mxu1 }
 0x85c   :  { %18727 = vst [vmem:[#allocation20_spill] sm:$0xff] %v16034_v4 }
 0x861   :  { %v18735_v14 = vld [vmem:[#allocation19_spill] sm:$0xff] }
 0x8b8   :  { %v13089_v36 = vpop.f32.mrf.mxu0 }
 0x8b9   :  { %v4625_v22 = vadd.f32 %v13089_v36, %v4514_v25 }
 0x8ba   :  { %v4614_v10 = vpop.f32.mrf.mxu0 }
 0x8bb   :  { %v4615_v30 = vadd.f32 %v4614_v10, %v4509_v28  ;;  %v18728_v28 = vld [vmem:[#allocation14_spill] sm:$0xff] }
 0x8bc   :  { %v13092_v48 = vpop.f32.mrf.mxu0 }
 0x8bd   :  { %v4645_v63 = vadd.f32 %v13092_v48, %v4524_v5  ;;  %v3858_v5 = vadd.f32 %v15425_v52, %v18728_v28 }
 0x8be   :  { %v4634_v49 = vpop.f32.mrf.mxu0 }
 0x8bf   :  { %v3992_v60 = vadd.f32 %v15481_v34, %v3858_v5  ;;  %v4635_v53 = vadd.f32 %v4634_v49, %v4519_v55  ;;  %v4367_v55 = vadd.f32 %v16020_v11, %v4245_v44 }
 0x8c1   :  { %v13103_v0 = vpop.f32.mrf.mxu1  ;;  %v13117_v43 = vpop.f32.mrf.mxu0  ;;  %v4111_v56 = vadd.f32 %v15982_v27, %v3992_v60  ;;  %v4487_v27 = vadd.f32 %v16026_v1, %v4373_v39  ;;  %v18731_v1 = vld [vmem:[#allocation11_spill] sm:$0xff] }
 0x8c2   :  { %v4742_v3 = vadd.f32 %v13103_v0, %v4625_v22  ;;  %v18730_v0 = vld [vmem:[#allocation6_spill] sm:$0xff] }
 0x8c3   :  { %v4735_v26 = vpop.f32.mrf.mxu1  ;;  %v4833_v2 = vpop.f32.mrf.mxu0 }
 0x8c4   :  { %v4736_v17 = vadd.f32 %v4735_v26, %v4615_v30  ;;  %v4841_v25 = vadd.f32 %v13117_v43, %v4742_v3 }
 0x8c6   :  { %v4834_v51 = vadd.f32 %v4833_v2, %v4736_v17  ;;  %v4343_v2 = vadd.f32 %v16004_v62, %v4213_v37  ;;  %v4139_v62 = vadd.f32 %v15994_v46, %v4016_v45  ;;  %v4010_v46 = vadd.f32 %v15536_v12, %v3888_v42  ;;  %v18733_v17 = vld [vmem:[#allocation16_spill] sm:$0xff] }
 0x8c7   :  { %v13106_v54 = vpop.f32.mrf.mxu1  ;;  %v13120_v35 = vpop.f32.mrf.mxu0 }
 0x8c8   :  { %v4754_v23 = vadd.f32 %v13106_v54, %v4645_v63  ;;  %v4349_v54 = vadd.f32 %v16000_v57, %v15560_v8  ;;  %v4237_v63 = vadd.f32 %v15988_v13, %v4111_v56  ;;  %v4457_v41 = vadd.f32 %v16014_v29, %v4343_v2 }
 0x8c9   :  { %v4747_v4 = vpop.f32.mrf.mxu1  ;;  %v4847_v58 = vpop.f32.mrf.mxu0  ;;  %v4269_v10 = vadd.f32 %v16002_v16, %v4139_v62 }
 0x8ca   :  { %v4855_v26 = vadd.f32 %v13120_v35, %v4754_v23  ;;  %v4463_v8 = vadd.f32 %v16010_v50, %v4349_v54  ;;  %v4748_v57 = vadd.f32 %v4747_v4, %v4635_v53  ;;  %v3848_v50 = vadd.f32 %v15436_v40, %v18729_v32  ;;  %v18734_v23 = vld [vmem:[#allocation8_spill] sm:$0xff] }
 0x8cb   :  { %v4361_v48 = vadd.f32 %v16008_v21, %v4237_v63  ;;  %v4385_v40 = vadd.f32 %v18733_v17, %v4269_v10  ;;  %v18738_v53 = vld [vmem:[#allocation12_spill] sm:$0xff]  ;;  %v18741_v63 = vld [vmem:[#allocation17_spill] sm:$0xff] }
 0x8cc   :  { %v4848_v49 = vadd.f32 %v4847_v58, %v4748_v57  ;;  %v3986_v43 = vadd.f32 %v18730_v0, %v3848_v50  ;;  %v18740_v57 = vld [vmem:[#allocation13_spill] sm:$0xff]  ;;  %v18742_v50 = vmov 683565275   ;;  %v18746_v0 = vmov 920167782  }
 0x8cd   :  { %v13131_v59 = vpop.f32.mrf.mxu1  ;;  %v13145_v36 = vpop.f32.mrf.mxu0  ;;  %v4475_v20 = vadd.f32 %v18731_v1, %v4361_v48  ;;  %v4499_v31 = vadd.f32 %v18735_v14, %v4385_v40  ;;  %v18743_v48 = vmov 2475754826   ;;  %v18747_v40 = vmov 1326507024  }
 0x8ce   :  { %v4940_v33 = vadd.f32 %v13131_v59, %v4841_v25  ;;  %v18732_v59 = vld [vmem:[#allocation18_spill] sm:$0xff]  ;;  %v4104_v37 = vadd.f32 %v18734_v23, %v3986_v43 }
 0x8cf   :  { %v4931_v7 = vpop.f32.mrf.mxu1  ;;  %v5038_v6 = vpop.f32.mrf.mxu0  ;;  %v4481_v19 = vadd.f32 %v18732_v59, %v4367_v55 }
 0x8d0   :  { %v4932_v30 = vadd.f32 %v4931_v7, %v4834_v51  ;;  %v5045_v61 = vadd.f32 %v13145_v36, %v4940_v33  ;;  %v18736_v51 = vld [vmem:[#allocation10_spill] sm:$0xff] }
 0x8d1   :  { %v4132_v33 = vadd.f32 %v18736_v51, %v4010_v46 }
 0x8d2   :  { %v13148_v34 = vpop.f32.mrf.mxu0  ;;  %v5039_v9 = vadd.f32 %v5038_v6, %v4932_v30 }
 0x8d3   :  { %v13134_v38 = vpop.f32.mrf.mxu1 }
 0x8d4   :  { %v4956_v52 = vadd.f32 %v13134_v38, %v4855_v26  ;;  %v5050_v12 = vpop.f32.mrf.mxu0  ;;  %v18737_v26 = vld [vmem:[#allocation7_spill] sm:$0xff] }
 0x8d5   :  { %v4947_v15 = vpop.f32.mrf.mxu1  ;;  %v4229_v30 = vadd.f32 %v18737_v26, %v4104_v37 }
 0x8d6   :  { %v5057_v35 = vadd.f32 %v13148_v34, %v4956_v52  ;;  %v4948_v36 = vadd.f32 %v4947_v15, %v4848_v49  ;;  %v18739_v52 = vld [vmem:[#allocation9_spill] sm:$0xff] }
 0x8d7   :  { %v13159_v7 = vpop.f32.mrf.mxu1  ;;  %v4261_v39 = vadd.f32 %v18739_v52, %v4132_v33 }
 0x8d8   :  { %v5138_v22 = vadd.f32 %v13159_v7, %v5045_v61  ;;  %v5051_v60 = vadd.f32 %v5050_v12, %v4948_v36  ;;  %v4355_v61 = vadd.f32 %v18738_v53, %v4229_v30 }
 0x8d9   :  { %v5131_v18 = vpop.f32.mrf.mxu1  ;;  %v16095_v55 = vadd.f32 %v18741_v63, %v4261_v39 }
 0x8da   :  { %v5154_v24 = vmul.f32 %v5138_v22, %v4463_v8  ;;  %v5132_v3 = vadd.f32 %v5131_v18, %v5039_v9  ;;  %v4469_v9 = vadd.f32 %v18740_v57, %v4355_v61 }
 0x8db   :  { %v13162_v13 = vpop.f32.mrf.mxu1 }
 0x8dc   :  { %v16068_v11 = vadd.f32 %v5154_v24, %v4487_v27  ;;  %v5153_v29 = vmul.f32 %v5132_v3, %v4457_v41  ;;  %v5150_v4 = vadd.f32 %v13162_v13, %v5057_v35  ;;  %v18744_v13 = vmov 2131351028  }
 0x8dd   :  { %v5143_v47 = vpop.f32.mrf.mxu1 }
 0x8de   :  { %v5265_v16 = vand.u32 2147483647, %v16068_v11  ;;  %v5268_v21 = vand.u32 2139095040, %v16068_v11  ;;  %v16076_v25 = vadd.f32 %v5153_v29, %v4481_v19  ;;  %v5156_v58 = vmul.f32 %v5150_v4, %v4475_v20 }
 0x8df   :  { %v5144_v56 = vadd.f32 %v5143_v47, %v5051_v60  ;;  %v18745_v29 = vmov 2102212464  }
 0x8e0   :  { %v5269_v28 = vshrl.u32 %v5268_v21, 23  ;;  %v5272_v5 = vand.u32 8388607, %v5265_v16  ;;  %v5161_v38 = vand.u32 2147483647, %v16076_v25  ;;  %v5164_v6 = vand.u32 2139095040, %v16076_v25 }
 0x8e1   :  { %v16086_v44 = vadd.f32 %v5156_v58, %v4499_v31  ;;  %v16101_v3 = vmul.f32 %v5144_v56, %v4469_v9 }
 0x8e2   :  { %v11741_v54 = vadd.s32 4294967169, %v5269_v28  ;;  %v5165_v15 = vshrl.u32 %v5164_v6, 23  ;;  %v5168_v2 = vand.u32 8388607, %v5161_v38  ;;  %v5273_v42 = vor.u32 8388608, %v5272_v5 }
 0x8e3   :  { %v5476_v8 = vand.u32 2139095040, %v16086_v44 }
 0x8e4   :  { %v5275_v45 = vadd.s32 1, %v11741_v54  ;;  %v11737_v34 = vadd.s32 4294967169, %v5165_v15  ;;  %v5169_v7 = vor.u32 8388608, %v5168_v2  ;;  %v16097_v35 = vshll.u32 %v5273_v42, 8 }
 0x8e5   :  { %v5477_v24 = vshrl.u32 %v5476_v8, 23 }
 0x8e6   :  { %vm5276_vm1 = vcmp.gt.s32.totalorder %v5275_v45, 0  ;;  %v5171_v62 = vadd.s32 1, %v11737_v34  ;;  %v16099_v27 = vshll.u32 %v5169_v7, 8 }
 0x8e7   :  { %v5277_v22 = vsel %vm5276_vm1, %v5275_v45, 0  ;;  %v11749_v2 = vadd.s32 4294967169, %v5477_v24 }
 0x8e8   :  { %v5278_v41 = vshrl.u32 %v5277_v22, 5  ;;  %v5279_v18 = vand.u32 31, %v5277_v22  ;;  %vm5172_vm4 = vcmp.gt.s32.totalorder %v5171_v62, 0 }
 0x8e9   :  { %v5173_v23 = vsel %vm5172_vm4, %v5171_v62, 0 }
 0x8ea   :  { %v5280_v32 = vsub.s32 32, %v5279_v18  ;;  %v5282_v10 = vshll.u32 %v18742_v50, %v5279_v18  ;;  %v5285_v46 = vshll.u32 %v18743_v48, %v5279_v18  ;;  %v5288_v49 = vshll.u32 %v18744_v13, %v5279_v18 }
 0x8eb   :  { %v5291_v4 = vshll.u32 %v18745_v29, %v5279_v18  ;;  %v5294_v43 = vshll.u32 %v18746_v0, %v5279_v18  ;;  %vm5297_vm5 = vcmp.lt.s32.totalorder %v5278_v41, 1  ;;  %vm5298_vm6 = vcmp.lt.s32.totalorder %v5278_v41, 2 }
 0x8ec   :  { %v5283_v1 = vshrl.u32 %v18743_v48, %v5280_v32  ;;  %v5286_v20 = vshrl.u32 %v18744_v13, %v5280_v32  ;;  %v5289_v59 = vshrl.u32 %v18745_v29, %v5280_v32  ;;  %v5281_v19 = vshrl.u32 %v18742_v50, %v5280_v32 }
 0x8ed   :  { %v5292_v17 = vshrl.u32 %v18746_v0, %v5280_v32  ;;  %v5295_v36 = vshrl.u32 %v18747_v40, %v5280_v32  ;;  %vm5299_vm7 = vcmp.lt.s32.totalorder %v5278_v41, 3  ;;  %vm5300_vm8 = vcmp.lt.s32.totalorder %v5278_v41, 4 }
 0x8ee   :  { %v5284_v21 = vor.u32 %v5283_v1, %v5282_v10  ;;  %v5287_v12 = vor.u32 %v5286_v20, %v5285_v46  ;;  %v5290_v58 = vor.u32 %v5289_v59, %v5288_v49  ;;  %v5175_v31 = vand.u32 31, %v5173_v23 }
 0x8ef   :  { %v5293_v37 = vor.u32 %v5292_v17, %v5291_v4  ;;  %v5296_v14 = vor.u32 %v5295_v36, %v5294_v43  ;;  %v5174_v52 = vshrl.u32 %v5173_v23, 5  ;;  %v5483_v23 = vadd.s32 1, %v11749_v2 }
 0x8f0   :  { %v5301_v51 = vsel %vm5297_vm5, %v5281_v19, %v5284_v21  ;;  %v5302_v33 = vsel %vm5300_vm8, %v5290_v58, 2102212464  ;;  %v5305_v28 = vsel %vm5297_vm5, %v5284_v21, %v5287_v12  ;;  %v5309_v5 = vsel %vm5297_vm5, %v5287_v12, %v5290_v58 }
 0x8f1   :  { %v5303_v6 = vsel %vm5299_vm7, %v5287_v12, %v5302_v33  ;;  %v5306_v47 = vsel %vm5300_vm8, %v5293_v37, 920167782  ;;  %v5310_v26 = vsel %vm5300_vm8, %v5296_v14, 1326507024  ;;  %v5176_v30 = vsub.s32 32, %v5175_v31  ;;  %v18748_v33 = vld [vmem:[#allocation20_spill] sm:$0xff] }
 0x8f2   :  { %v5304_v60 = vsel %vm5298_vm6, %v5301_v51, %v5303_v6  ;;  %v5307_v54 = vsel %vm5299_vm7, %v5290_v58, %v5306_v47  ;;  %v5311_v15 = vsel %vm5299_vm7, %v5293_v37, %v5310_v26  ;;  %v5178_v39 = vshll.u32 %v18742_v50, %v5175_v31 }
 0x8f3   :  { %v5308_v53 = vsel %vm5298_vm6, %v5305_v28, %v5307_v54  ;;  %v5312_v61 = vsel %vm5298_vm6, %v5309_v5, %v5311_v15  ;;  %v5320_v7 = vmul.u32 %v16097_v35, %v5304_v60  ;;  %v5179_v8 = vshrl.u32 %v18743_v48, %v5176_v30 }
 0x8f4   :  { %v16126_v45 = vmul.u32.u64.low %v16097_v35, %v5312_v61  ;;  %v16127_v56 = vmul.u32.u64.high %v16097_v35, %v5312_v61, %v16126_v45  ;;  %v16130_v42 = vmul.u32.u64.low %v16097_v35, %v5308_v53  ;;  %v16131_v34 = vmul.u32.u64.high %v16097_v35, %v5308_v53, %v16130_v42 }
 0x8f5   :  { %v5181_v57 = vshll.u32 %v18743_v48, %v5175_v31  ;;  %v5182_v9 = vshrl.u32 %v18744_v13, %v5176_v30  ;;  %v5184_v22 = vshll.u32 %v18744_v13, %v5175_v31  ;;  %v5185_v62 = vshrl.u32 %v18745_v29, %v5176_v30 }
 0x8f6   :  { %v5187_v63 = vshll.u32 %v18745_v29, %v5175_v31  ;;  %v5188_v41 = vshrl.u32 %v18746_v0, %v5176_v30  ;;  %v5180_v18 = vor.u32 %v5179_v8, %v5178_v39  ;;  %v5190_v32 = vshll.u32 %v18746_v0, %v5175_v31 }
 0x8f7   :  { %v5183_v24 = vor.u32 %v5182_v9, %v5181_v57  ;;  %v5191_v35 = vshrl.u32 %v18747_v40, %v5176_v30  ;;  %vm5322_vm9 = vc.u32 %v16127_v56, %v16130_v42  ;;  %v5323_v10 = vadd.s32 1, %v16131_v34 }
 0x8f8   :  { %v5177_v46 = vshrl.u32 %v18742_v50, %v5176_v30  ;;  %v5186_v49 = vor.u32 %v5185_v62, %v5184_v22  ;;  %v5189_v4 = vor.u32 %v5188_v41, %v5187_v63  ;;  %vm5193_vm10 = vcmp.lt.s32.totalorder %v5174_v52, 1 }
 0x8f9   :  { %v5192_v43 = vor.u32 %v5191_v35, %v5190_v32  ;;  %vm5194_vm11 = vcmp.lt.s32.totalorder %v5174_v52, 2  ;;  %v5324_v1 = vsel %vm5322_vm9, %v5323_v10, %v16131_v34  ;;  %vm5195_vm12 = vcmp.lt.s32.totalorder %v5174_v52, 3 }
 0x8fa   :  { %vm5196_vm13 = vcmp.lt.s32.totalorder %v5174_v52, 4  ;;  %v5201_v20 = vsel %vm5193_vm10, %v5180_v18, %v5183_v24  ;;  %v5325_v59 = vadd.s32 %v5324_v1, %v5320_v7  ;;  %v5205_v36 = vsel %vm5193_vm10, %v5183_v24, %v5186_v49 }
 0x8fb   :  { %v5198_v19 = vsel %vm5196_vm13, %v5186_v49, 2102212464  ;;  %v5202_v17 = vsel %vm5196_vm13, %v5189_v4, 920167782  ;;  %v5197_v21 = vsel %vm5193_vm10, %v5177_v46, %v5180_v18  ;;  %v5206_v58 = vsel %vm5196_vm13, %v5192_v43, 1326507024 }
 0x8fc   :  { %v5203_v12 = vsel %vm5195_vm12, %v5186_v49, %v5202_v17  ;;  %v5326_v37 = vadd.s32 536870912, %v5325_v59  ;;  %v5199_v14 = vsel %vm5195_vm12, %v5183_v24, %v5198_v19  ;;  %v5207_v51 = vsel %vm5195_vm12, %v5189_v4, %v5206_v58 }
 0x8fd   :  { %v5204_v31 = vsel %vm5194_vm11, %v5201_v20, %v5203_v12  ;;  %v4493_v28 = vadd.f32 %v18748_v33, %v16095_v55  ;;  %v5208_v5 = vsel %vm5194_vm11, %v5205_v36, %v5207_v51  ;;  %vm5484_vm14 = vcmp.gt.s32.totalorder %v5483_v23, 0 }
 0x8fe   :  { %v16154_v6 = vmul.u32.u64.low %v16099_v27, %v5204_v31  ;;  %v16155_v47 = vmul.u32.u64.high %v16099_v27, %v5204_v31, %v16154_v6  ;;  %v16158_v26 = vshrl.u32 %v5326_v37, 30  ;;  %v5200_v54 = vsel %vm5194_vm11, %v5197_v21, %v5199_v14 }
 0x8ff   :  { %v16161_v30 = vmul.u32.u64.low %v16099_v27, %v5208_v5  ;;  %v16162_v60 = vmul.u32.u64.high %v16099_v27, %v5208_v5, %v16161_v30  ;;  %v5473_v15 = vand.u32 2147483647, %v16086_v44  ;;  %v5485_v2 = vsel %vm5484_vm14, %v5483_v23, 0 }
 0x900   :  { %v16167_v55 = vadd.f32 %v16101_v3, %v4493_v28  ;;  %v5328_v53 = vshll.u32 %v16158_v26, 30  ;;  %v5487_v61 = vand.u32 31, %v5485_v2  ;;  %v5219_v39 = vadd.s32 1, %v16155_v47 }
 0x901   :  { %v5216_v34 = vmul.u32 %v16099_v27, %v5200_v54  ;;  %vm5218_vm15 = vc.u32 %v16162_v60, %v16154_v6  ;;  %v5480_v7 = vand.u32 8388607, %v5473_v15  ;;  %v5321_v63 = vadd.s32 %v16130_v42, %v16127_v56 }
 0x902   :  { %v5329_v45 = vsub.s32 %v5325_v59, %v5328_v53  ;;  %v5220_v52 = vsel %vm5218_vm15, %v5219_v39, %v16155_v47  ;;  %v5372_v8 = vand.u32 2139095040, %v16167_v55  ;;  %v5488_v9 = vsub.s32 32, %v5487_v61 }
 0x903   :  { %v5221_v57 = vadd.s32 %v5220_v52, %v5216_v34  ;;  %v5351_v27 = vsub.s32 4, %v16158_v26  ;;  %v5481_v41 = vor.u32 8388608, %v5480_v7  ;;  %v5486_v49 = vshrl.u32 %v5485_v2, 5 }
 0x904   :  { %v5331_v3 = vsub.s32 0, %v5329_v45  ;;  %v5373_v18 = vshrl.u32 %v5372_v8, 23  ;;  %v5491_v32 = vshrl.u32 %v18743_v48, %v5488_v9  ;;  %v5494_v35 = vshrl.u32 %v18744_v13, %v5488_v9 }
 0x905   :  { %v5222_v62 = vadd.s32 536870912, %v5221_v57  ;;  %v5500_v10 = vshrl.u32 %v18746_v0, %v5488_v9  ;;  %v5490_v4 = vshll.u32 %v18742_v50, %v5487_v61  ;;  %v5497_v43 = vshrl.u32 %v18745_v29, %v5488_v9 }
 0x906   :  { %v11742_v22 = vmin.u32 %v5331_v3, %v5329_v45  ;;  %v5493_v56 = vshll.u32 %v18743_v48, %v5487_v61  ;;  %v5499_v42 = vshll.u32 %v18745_v29, %v5487_v61  ;;  %v5503_v20 = vshrl.u32 %v18747_v40, %v5488_v9 }
 0x907   :  { %v16184_v46 = vshrl.u32 %v5222_v62, 30  ;;  %v5496_v19 = vshll.u32 %v18744_v13, %v5487_v61  ;;  %v5502_v17 = vshll.u32 %v18746_v0, %v5487_v61  ;;  %v11745_v36 = vadd.s32 4294967169, %v5373_v18 }
 0x908   :  { %v5333_v24 = vclz %v11742_v22  ;;  %v5492_v21 = vor.u32 %v5491_v32, %v5490_v4  ;;  %v5495_v12 = vor.u32 %v5494_v35, %v5493_v56  ;;  %v5501_v58 = vor.u32 %v5500_v10, %v5499_v42 }
 0x909   :  { %v5224_v59 = vshll.u32 %v16184_v46, 30  ;;  %v5498_v14 = vor.u32 %v5497_v43, %v5496_v19  ;;  %v5504_v31 = vor.u32 %v5503_v20, %v5502_v17  ;;  %v5489_v28 = vshrl.u32 %v18742_v50, %v5488_v9 }
 0x90a   :  { %v11743_v1 = vadd.s32 4294967294, %v5333_v24  ;;  %vm5505_vm4 = vcmp.lt.s32.totalorder %v5486_v49, 1  ;;  %vm5507_vm5 = vcmp.lt.s32.totalorder %v5486_v49, 3  ;;  %vm5508_vm6 = vcmp.lt.s32.totalorder %v5486_v49, 4  ;;  %v6388_v24 = vld [vmem:[%s18609_s4 + $0x180] sm:$0xff] }
 0x90b   :  { %v16194_v37 = vsub.s32 %v5221_v57, %v5224_v59  ;;  %v5513_v2 = vsel %vm5505_vm4, %v5492_v21, %v5495_v12  ;;  %v5514_v53 = vsel %vm5508_vm6, %v5501_v58, 920167782  ;;  %vm5506_vm7 = vcmp.lt.s32.totalorder %v5486_v49, 2 }
 0x90c   :  { %vm11744_vm1 = vcmp.lt.s32.totalorder %v11743_v1, 0  ;;  %v5515_v61 = vsel %vm5507_vm5, %v5498_v14, %v5514_v53  ;;  %v5517_v39 = vsel %vm5505_vm4, %v5495_v12, %v5498_v14  ;;  %v5518_v34 = vsel %vm5508_vm6, %v5504_v31, 1326507024 }
 0x90d   :  { %v5336_v23 = vsel %vm11744_vm1, 0, %v11743_v1  ;;  %v5227_v47 = vsub.s32 0, %v16194_v37  ;;  %v5510_v8 = vsel %vm5508_vm6, %v5498_v14, 2102212464  ;;  %vm5267_vm8 = vcmp.lt.s32.totalorder %v16068_v11, 0 }
 0x90e   :  { %v5337_v51 = vsub.s32 32, %v5336_v23  ;;  %v5341_v33 = vsub.s32 4294967266, %v5336_v23  ;;  %v5338_v5 = vshll.u32 %v5329_v45, %v5336_v23  ;;  %v5519_v45 = vsel %vm5507_vm5, %v5501_v58, %v5518_v34 }
 0x90f   :  { %v11738_v3 = vmin.u32 %v5227_v47, %v16194_v37  ;;  %v5516_v57 = vsel %vm5506_vm7, %v5513_v2, %v5515_v61  ;;  %v5521_v9 = vshll.u32 %v5481_v41, 8  ;;  %v5352_v62 = vsel %vm5267_vm8, %v5351_v27, %v16158_v26 }
 0x910   :  { %v5339_v30 = vshrl.u32 %v5321_v63, %v5337_v51  ;;  %v5342_v54 = vadd.s32 127, %v5341_v33  ;;  %v5509_v63 = vsel %vm5505_vm4, %v5489_v28, %v5492_v21  ;;  %v5520_v18 = vsel %vm5506_vm7, %v5517_v39, %v5519_v45 }
 0x911   :  { %v5511_v35 = vsel %vm5507_vm5, %v5495_v12, %v5510_v8  ;;  %v16214_v10 = vmul.u32.u64.low %v5521_v9, %v5520_v18  ;;  %v16215_v4 = vmul.u32.u64.high %v5521_v9, %v5520_v18, %v16214_v10  ;;  %v5379_v26 = vadd.s32 1, %v11745_v36 }
 0x912   :  { %v5340_v52 = vor.u32 %v5339_v30, %v5338_v5  ;;  %v5343_v7 = vshll.u32 %v5342_v54, 23  ;;  %v16217_v43 = vmul.u32.u64.low %v5521_v9, %v5516_v57  ;;  %v16218_v1 = vmul.u32.u64.high %v5521_v9, %v5516_v57, %v16217_v43 }
 0x913   :  { %vm16223_vm9 = vcmp.le.f32.partialorder %v5265_v16, 0.7853982  ;;  %v5229_v56 = vclz %v11738_v3  ;;  %v16228_v42 = vsel %vm4526_vm2, %v6388_v24, 0  ;;  %v5512_v59 = vsel %vm5506_vm7, %v5509_v63, %v5511_v35 }
 0x914   :  { %v5344_v22 = vor.u32 4788187, %v5343_v7  ;;  %v5347_v32 = vcvt.s32.f32 %v5340_v52  ;;  %vm5380_vm10 = vcmp.gt.s32.totalorder %v5379_v26, 0  ;;  %v16232_v19 = vand.u32 4294901760, %v16228_v42 }
 0x915   :  { %v5354_v17 = vsel %vm16223_vm9, 0, %v5352_v62  ;;  %v5369_v36 = vand.u32 2147483647, %v16167_v55  ;;  %vm5530_vm11 = vc.u32 %v16215_v4, %v16217_v43  ;;  %v5531_v21 = vadd.s32 1, %v16218_v1 }
 0x916   :  { %v5345_v41 = vand.u32 2147483647, %v5344_v22  ;;  %v5381_v12 = vsel %vm5380_vm10, %v5379_v26, 0  ;;  %13269 = vmatprep.mubr.f32.mxu1 %v16232_v19  ;;  %v11739_v49 = vadd.s32 4294967294, %v5229_v56  ;;  %v5528_v58 = vmul.u32 %v5521_v9, %v5512_v59 }
 0x917   :  { %v5383_v23 = vand.u32 31, %v5381_v12  ;;  %v5358_v31 = vadd.s32 3, %v5354_v17  ;;  %v5532_v51 = vsel %vm5530_vm11, %v5531_v21, %v16218_v1  ;;  %v5376_v5 = vand.u32 8388607, %v5369_v36 }
 0x918   :  { %v5348_v20 = vmul.f32 %v5347_v32, %v5345_v41  ;;  %v5533_v28 = vadd.s32 %v5532_v51, %v5528_v58  ;;  %vm11740_vm12 = vcmp.lt.s32.totalorder %v11739_v49, 0  ;;  %v16261_v3 = vshrl.u32 %v5381_v12, 5 }
 0x919   :  { %v5384_v47 = vsub.s32 32, %v5383_v23  ;;  %v16249_v54 = vand.u32 3, %v5358_v31  ;;  %v5377_v53 = vor.u32 8388608, %v5376_v5  ;;  %v16255_v34 = vsel %vm11740_vm12, 0, %v11739_v49 }
 0x91a   :  { %v5349_v16 = vxor.u32 2147483648, %v5348_v20  ;;  %v5534_v30 = vadd.s32 536870912, %v5533_v28  ;;  %v5395_v7 = vshll.u32 %v18745_v29, %v5383_v23  ;;  %v5386_v57 = vshll.u32 %v18742_v50, %v5383_v23 }
 0x91b   :  { %v5387_v61 = vshrl.u32 %v18743_v48, %v5384_v47  ;;  %v5390_v39 = vshrl.u32 %v18744_v13, %v5384_v47  ;;  %v5393_v52 = vshrl.u32 %v18745_v29, %v5384_v47  ;;  %v5396_v8 = vshrl.u32 %v18746_v0, %v5384_v47 }
 0x91c   :  { %v5350_v14 = vsel %vm5267_vm8, %v5349_v16, %v5348_v20  ;;  %v16251_v2 = vshrl.u32 %v5534_v30, 30  ;;  %v5389_v9 = vshll.u32 %v18743_v48, %v5383_v23  ;;  %v5392_v22 = vshll.u32 %v18744_v13, %v5383_v23 }
 0x91d   :  { %v5353_v33 = vsel %vm16223_vm9, %v16068_v11, %v5350_v14  ;;  %v5397_v62 = vor.u32 %v5396_v8, %v5395_v7  ;;  %v5398_v63 = vshll.u32 %v18746_v0, %v5383_v23  ;;  %v5399_v18 = vshrl.u32 %v18747_v40, %v5384_v47  ;;  %v16322_v8 = vpop.f32.mrf.mxu0 }
 0x91e   :  { %13885 = vcosq.f32 %v5353_v33  ;;  %v5536_v45 = vshll.u32 %v16251_v2, 30  ;;  %v5217_v24 = vadd.s32 %v16154_v6, %v16162_v60  ;;  %v5388_v35 = vor.u32 %v5387_v61, %v5386_v57 }
 0x91f   :  { %13887 = vsinq.f32 %v5353_v33  ;;  %v5391_v10 = vor.u32 %v5390_v39, %v5389_v9  ;;  %vm5361_vm13 = vcmp.eq.s32.totalorder %v16249_v54, 0  ;;  %vm5364_vm14 = vcmp.eq.s32.totalorder %v16249_v54, 2 }
 0x920   :  { %v16270_v32 = vsub.s32 %v5533_v28, %v5536_v45  ;;  %v5394_v41 = vor.u32 %v5393_v52, %v5392_v22  ;;  %v5400_v1 = vor.u32 %v5399_v18, %v5398_v63  ;;  %vm5360_vm15 = vcmp.lt.s32.totalorder %v16249_v54, 2  ;;  %v16324_v45 = vpop.f32.mrf.mxu1 }
 0x921   :  { %v5237_v26 = vsub.s32 4294967266, %v16255_v34  ;;  %vm5404_vm1 = vcmp.lt.s32.totalorder %v16261_v3, 4  ;;  %v16278_v56 = vshll.u32 %v5377_v53, 8  ;;  %vm5357_vm4 = vweird.f32 %v16068_v11 }
 0x922   :  { %v5539_v27 = vsub.s32 0, %v16270_v32  ;;  %v5233_v6 = vsub.s32 32, %v16255_v34  ;;  %v5529_v60 = vadd.s32 %v16217_v43, %v16215_v4  ;;  %vm5401_vm5 = vcmp.lt.s32.totalorder %v16261_v3, 1 }
 0x923   :  { %v5410_v20 = vsel %vm5404_vm1, %v5397_v62, 920167782  ;;  %vm5403_vm6 = vcmp.lt.s32.totalorder %v16261_v3, 3  ;;  %v5409_v17 = vsel %vm5401_vm5, %v5388_v35, %v5391_v10  ;;  %v16293_v16 = vsub.f32 %v16228_v42, %v16232_v19 }
 0x924   :  { %v11750_v59 = vmin.u32 %v5539_v27, %v16270_v32  ;;  %v5385_v21 = vshrl.u32 %v18742_v50, %v5384_v47  ;;  %v5411_v4 = vsel %vm5403_vm6, %v5394_v41, %v5410_v20  ;;  %v5413_v43 = vsel %vm5401_vm5, %v5391_v10, %v5394_v41 }
 0x925   :  { %v5414_v12 = vsel %vm5404_vm1, %v5400_v1, 1326507024  ;;  %v5238_v58 = vadd.s32 127, %v5237_v26  ;;  %vm5402_vm7 = vcmp.lt.s32.totalorder %v16261_v3, 2  ;;  %v5406_v42 = vsel %vm5404_vm1, %v5394_v41, 2102212464  ;;  %v16340_v41 = vpop.f32.mrf.mxu1 }
 0x926   :  { %v5541_v23 = vclz %v11750_v59  ;;  %v5405_v51 = vsel %vm5401_vm5, %v5385_v21, %v5388_v35  ;;  %v5412_v33 = vsel %vm5402_vm7, %v5409_v17, %v5411_v4  ;;  %v5415_v28 = vsel %vm5403_vm6, %v5397_v62, %v5414_v12 }
 0x927   :  { %v5416_v30 = vsel %vm5402_vm7, %v5413_v43, %v5415_v28  ;;  %v6491_v53 = vand.u32 4294901760, %v16293_v16  ;;  %v5407_v39 = vsel %vm5403_vm6, %v5391_v10, %v5406_v42  ;;  %v5239_v63 = vshll.u32 %v5238_v58, 23  ;;  %v16338_v10 = vpop.f32.mrf.mxu0  ;;  %v16354_v12 = vpop.f32.mrf.mxu1 }
 0x928   :  { %v11751_v47 = vadd.s32 4294967294, %v5541_v23  ;;  %v16319_v52 = vmul.u32.u64.low %v16278_v56, %v5416_v30  ;;  %v16320_v7 = vmul.u32.u64.high %v16278_v56, %v5416_v30, %v16319_v52  ;;  %v5408_v54 = vsel %vm5402_vm7, %v5405_v51, %v5407_v39 }
 0x929   :  { %v16329_v9 = vmul.u32.u64.low %v16278_v56, %v5412_v33  ;;  %v16330_v22 = vmul.u32.u64.high %v16278_v56, %v5412_v33, %v16329_v9  ;;  %v6492_v35 = vsub.f32 %v16293_v16, %v6491_v53  ;;  %v5235_v20 = vshrl.u32 %v5217_v24, %v5233_v6  ;;  %v16350_v17 = vpop.f32.mrf.mxu0 }
 0x92a   :  { %vm11752_vm8 = vcmp.lt.s32.totalorder %v11751_v47, 0  ;;  %v5424_v3 = vmul.u32 %v16278_v56, %v5408_v54  ;;  %v5240_v24 = vor.u32 4788187, %v5239_v63  ;;  %v13997_v42 = vmov 1  }
 0x92b   :  { %v13886_v49 = vpop.eup %13885  ;;  %v5544_v18 = vsel %vm11752_vm8, 0, %v11751_v47  ;;  %vm5426_vm9 = vc.u32 %v16320_v7, %v16329_v9  ;;  %v6493_v59 = vand.u32 4294901760, %v6492_v35  ;;  %v5427_v11 = vadd.s32 1, %v16330_v22  ;;  %13846 = vset.pattern.permute.xlu0 %v13997_v42  ;;  %13848 = vset.pattern.permute.xlu1 %v13997_v42 }
 0x92c   :  { %v13888_v14 = vpop.eup %13887  ;;  %v5365_v31 = vxor.u32 2147483648, %v13886_v49  ;;  %v5545_v26 = vsub.s32 32, %v5544_v18  ;;  %v5549_v27 = vsub.s32 4294967266, %v5544_v18  ;;  %v5546_v21 = vshll.u32 %v16270_v32, %v5544_v18  ;;  %v16360_v32 = vpop.f32.mrf.mxu0 }
 0x92d   :  { %v5362_v5 = vxor.u32 2147483648, %v13888_v14  ;;  %13255 = vmatprep.mubr.f32.mxu0 %v6493_v59  ;;  %v5428_v23 = vsel %vm5426_vm9, %v5427_v11, %v16330_v22  ;;  %v5241_v33 = vand.u32 2147483647, %v5240_v24  ;;  %v18751_v39 = vmov 4   ;;  %v13956_v22 = vld [vmem:[%s18609_s4 + $0x80] sm:$0xff] }
 0x92e   :  { %v5366_v61 = vsel %vm5364_vm14, %v5365_v31, %v13888_v14  ;;  %v5547_v4 = vshrl.u32 %v5529_v60, %v5545_v26  ;;  %v5550_v43 = vadd.s32 127, %v5549_v27  ;;  %v5429_v60 = vadd.s32 %v5428_v23, %v5424_v3  ;;  %v13953_v14 = vld [vmem:[%s18609_s4 + $0x1f8] sm:$0xff]  ;;  %v16368_v31 = vpop.f32.mrf.mxu1  ;;  %v16370_v47 = vpop.f32.mrf.mxu0  ;;  %v13959_v23 = vld [vmem:[%s18609_s4 + $0xa8] sm:$0xff] }
 0x92f   :  { %v5363_v57 = vsel %vm5361_vm13, %v13886_v49, %v5362_v5  ;;  %v5234_v49 = vshll.u32 %v16194_v37, %v16255_v34  ;;  %6405 = vperm.xlu0 %13846, %v13953_v14   ;;  %v13954_v37 = vld [vmem:[%s18609_s4 + $0x1e8] sm:$0xff]  ;;  %vm5475_vm10 = vcmp.lt.s32.totalorder %v16086_v44, 0  ;;  %v5559_v27 = vsub.s32 4, %v16251_v2  ;;  %v16424_v14 = vld [vmem:[%s18609_s4 + $0xd8] sm:$0xff] }
 0x930   :  { %v5367_v62 = vsel %vm5360_vm15, %v5363_v57, %v5366_v61  ;;  %v5548_v6 = vor.u32 %v5547_v4, %v5546_v21  ;;  %v5551_v58 = vshll.u32 %v5550_v43, 23  ;;  %6397 = vperm.xlu1 %13848, %v13954_v37   ;;  %v5430_v51 = vadd.s32 536870912, %v5429_v60  ;;  %v13955_v61 = vld [vmem:[%s18609_s4 + $0x1f0] sm:$0xff]  ;;  %v16384_v26 = vpop.f32.mrf.mxu0 }
 0x931   :  { %v16344_v1 = vsel %vm5357_vm4, nan, %v5367_v62  ;;  %v5236_v34 = vor.u32 %v5235_v20, %v5234_v49  ;;  %v16381_v62 = vpop.f32.mrf.mxu1  ;;  %vm16391_vm11 = vcmp.le.f32.partialorder %v5473_v15, 0.7853982  ;;  %v13957_v21 = vld [vmem:[%s18609_s4 + $0xb0] sm:$0xff]  ;;  %v13958_v15 = vld [vmem:[%s18609_s4 + $0x1e0] sm:$0xff]  ;;  %v16408_v49 = vpop.permute.xlu1 %5602  ;;  %vm5163_vm12 = vcmp.lt.s32.totalorder %v16076_v25, 0 }
 0x932   :  { %v5552_v56 = vor.u32 4788187, %v5551_v58  ;;  %v5555_v5 = vcvt.s32.f32 %v5548_v6  ;;  %v16372_v30 = vshrl.u32 %v5430_v51, 30  ;;  %v16410_v24 = vpop.f32.mrf.mxu0  ;;  %v5560_v6 = vsel %vm5475_vm10, %v5559_v27, %v16251_v2 }
 0x933   :  { %6401 = vperm.xlu0 %13846, %v13955_v61   ;;  %v5243_v52 = vcvt.s32.f32 %v5236_v34  ;;  %v16400_v4 = vpop.f32.mrf.mxu1  ;;  %v5562_v37 = vsel %vm16391_vm11, 0, %v5560_v6  ;;  %vm16436_vm13 = vcmp.le.f32.partialorder %v5161_v38, 0.7853982  ;;  %v16451_v38 = vld [vmem:[%s18609_s4 + $0xd0] sm:$0xff]  ;;  %vm5565_vm5 = vweird.f32 %v16086_v44 }
 0x934   :  { %v5553_v28 = vand.u32 2147483647, %v5552_v56  ;;  %13849 = vset.pattern.permute.xlu1 %v18751_v39  ;;  %v5432_v63 = vshll.u32 %v16372_v30, 30  ;;  %v16431_v34 = vpop.f32.mrf.mxu0  ;;  %vm5371_vm6 = vcmp.lt.s32.totalorder %v16167_v55, 0  ;;  %vm16499_vm7 = vcmp.le.f32.partialorder %v5369_v36, 0.7853982 }
 0x935   :  { %5587 = vperm.xlu1 %13849, %v13956_v22   ;;  %v5244_v18 = vmul.f32 %v5243_v52, %v5241_v33  ;;  %v5598_v51 = vpop.permute.xlu1 %5597  ;;  %v5566_v52 = vadd.s32 3, %v5562_v37 }
 0x936   :  { %v5556_v57 = vmul.f32 %v5555_v5, %v5553_v28  ;;  %v5433_v54 = vsub.s32 %v5429_v60, %v5432_v63  ;;  %v13960_v28 = vld [vmem:[%s18609_s4 + $0xa0] sm:$0xff]  ;;  %v13195_v22 = vpop.f32.mrf.mxu0  ;;  %v5425_v63 = vadd.s32 %v16329_v9, %v16320_v7 }
 0x937   :  { %13847 = vset.pattern.permute.xlu0 %v18751_v39  ;;  %v5245_v3 = vxor.u32 2147483648, %v5244_v18  ;;  %v5567_v20 = vand.u32 3, %v5566_v52 }
 0x938   :  { %v5557_v35 = vxor.u32 2147483648, %v5556_v57  ;;  %5617 = vperm.xlu0 %13847, %v13957_v21   ;;  %v5435_v11 = vsub.s32 0, %v5433_v54  ;;  %v16464_v6 = vpop.f32.mrf.mxu0 }
 0x939   :  { %13850 = vset.pattern.permute.xlu1 %v13997_v42  ;;  %v16418_v42 = vpop.f32.mrf.mxu1  ;;  %v5246_v2 = vsel %vm5163_vm12, %v5245_v3, %v5244_v18  ;;  %v5247_v3 = vsub.s32 4, %v16184_v46  ;;  %vm5572_vm15 = vcmp.eq.s32.totalorder %v5567_v20, 2  ;;  %vm5568_vm1 = vcmp.lt.s32.totalorder %v5567_v20, 2 }
 0x93a   :  { %v5558_v59 = vsel %vm5475_vm10, %v5557_v35, %v5556_v57  ;;  %6393 = vperm.xlu1 %13850, %v13958_v15   ;;  %v11746_v58 = vmin.u32 %v5435_v11, %v5433_v54  ;;  %v5249_v61 = vsel %vm16436_vm13, %v16076_v25, %v5246_v2  ;;  %v16459_v11 = vld [vmem:[%s18609_s4 + $0xf8] sm:$0xff]  ;;  %v16461_v15 = vpop.permute.xlu1 %5622  ;;  %vm5569_vm4 = vcmp.eq.s32.totalorder %v5567_v20, 0  ;;  %v16477_v52 = vpop.f32.mrf.mxu0 }
 0x93b   :  { %v5561_v43 = vsel %vm16391_vm11, %v16086_v44, %v5558_v59  ;;  %v16443_v5 = vpop.f32.mrf.mxu1  ;;  %v5455_v44 = vsub.s32 4, %v16372_v30  ;;  %vm5253_vm11 = vweird.f32 %v16076_v25 }
 0x93c   :  { %13889 = vcosq.f32 %v5561_v43  ;;  %5612 = vperm.xlu0 %13847, %v13959_v23   ;;  %v5437_v60 = vclz %v11746_v58 }
 0x93d   :  { %13891 = vsinq.f32 %v5561_v43  ;;  %v13209_v27 = vpop.f32.mrf.mxu1 }
 0x93e   :  { %13851 = vset.pattern.permute.xlu1 %v18751_v39  ;;  %v11747_v56 = vadd.s32 4294967294, %v5437_v60  ;;  %13893 = vcosq.f32 %v5249_v61 }
 0x93f   :  { %7483 = vperm.xlu1 %13851, %v16424_v14   ;;  %13895 = vsinq.f32 %v5249_v61  ;;  %v16467_v60 = vpop.f32.mrf.mxu1 }
 0x940   :  { %5607 = vperm.xlu0 %13847, %v13960_v28   ;;  %vm11748_vm14 = vcmp.lt.s32.totalorder %v11747_v56, 0  ;;  %v5248_v28 = vsel %vm5163_vm12, %v5247_v3, %v16184_v46 }
 0x941   :  { %v5440_v57 = vsel %vm11748_vm14, 0, %v11747_v56  ;;  %v16472_v56 = vld [vmem:[%s18609_s4 + $0xc8] sm:$0xff] }
 0x942   :  { %v5441_v18 = vsub.s32 32, %v5440_v57  ;;  %v5445_v35 = vsub.s32 4294967266, %v5440_v57  ;;  %v5442_v59 = vshll.u32 %v5433_v54, %v5440_v57 }
 0x943   :  { %7478 = vperm.xlu1 %13851, %v16451_v38  }
 0x944   :  { %v5443_v21 = vshrl.u32 %v5425_v63, %v5441_v18  ;;  %v5446_v43 = vadd.s32 127, %v5445_v35  ;;  %v5734_v35 = vadd.f32 %v16360_v32, %v5598_v51  ;;  %v5989_v32 = vpop.f32.mrf.mxu0 }
 0x946   :  { %v5444_v9 = vor.u32 %v5443_v21, %v5442_v59  ;;  %v5447_v58 = vshll.u32 %v5446_v43, 23  ;;  %v5593_v59 = vpop.permute.xlu1 %5592  ;;  %v5872_v3 = vadd.f32 %v16368_v31, %v5734_v35  ;;  %v6389_v35 = vld [vmem:[%s18609_s4 + $0x188] sm:$0xff] }
 0x947   :  { %7503 = vperm.xlu1 %13851, %v16459_v11   ;;  %v5724_v43 = vadd.f32 %v16322_v8, %v5593_v59 }
 0x948   :  { %v5448_v37 = vor.u32 4788187, %v5447_v58  ;;  %v5451_v18 = vcvt.s32.f32 %v5444_v9  ;;  %v16483_v58 = vpop.f32.mrf.mxu1 }
 0x949   :  { %v13890_v7 = vpop.eup %13889  ;;  %v5866_v9 = vadd.f32 %v16324_v45, %v5724_v43 }
 0x94a   :  { %v13892_v54 = vpop.eup %13891  ;;  %v5573_v23 = vxor.u32 2147483648, %v13890_v7  ;;  %v5449_v63 = vand.u32 2147483647, %v5448_v37 }
 0x94b   :  { %v5570_v2 = vxor.u32 2147483648, %v13892_v54  ;;  %7473 = vperm.xlu1 %13851, %v16472_v56   ;;  %v5983_v31 = vadd.f32 %v13195_v22, %v5866_v9  ;;  %v13894_v33 = vpop.eup %13893  ;;  %v6391_v9 = vld [vmem:[%s18609_s4 + $0x198] sm:$0xff] }
 0x94c   :  { %v5574_v61 = vsel %vm5572_vm15, %v5573_v23, %v13892_v54  ;;  %v5452_v20 = vmul.f32 %v5451_v18, %v5449_v63  ;;  %v5250_v54 = vsel %vm16436_vm13, 0, %v5248_v28  ;;  %v5990_v23 = vadd.f32 %v5989_v32, %v5872_v3  ;;  %v13896_v36 = vpop.eup %13895 }
 0x94d   :  { %v5571_v57 = vsel %vm5569_vm4, %v13890_v7, %v5570_v2  ;;  %v6114_v2 = vpop.f32.mrf.mxu1  ;;  %v5254_v37 = vadd.s32 3, %v5250_v54  ;;  %v16514_v63 = vadd.f32 %v13209_v27, %v5983_v31  ;;  %v5456_v18 = vsel %vm5371_vm6, %v5455_v44, %v16372_v30  ;;  %v6390_v27 = vld [vmem:[%s18609_s4 + $0x190] sm:$0xff] }
 0x94e   :  { %v5575_v21 = vsel %vm5568_vm1, %v5571_v57, %v5574_v61  ;;  %v5453_v51 = vxor.u32 2147483648, %v5452_v20  ;;  %v16506_v61 = vadd.f32 %v6114_v2, %v5990_v23  ;;  %v5258_v43 = vxor.u32 2147483648, %v13896_v36 }
 0x94f   :  { %v5576_v46 = vsel %vm5565_vm5, nan, %v5575_v21  ;;  %v5255_v21 = vand.u32 3, %v5254_v37  ;;  %v5458_v3 = vsel %vm16499_vm7, 0, %v5456_v18  ;;  %v6412_v30 = vsel %vm4526_vm2, %v6389_v35, 0 }
 0x950   :  { %v16488_v7 = vand.u32 4294901760, %v5576_v46  ;;  %v5454_v28 = vsel %vm5371_vm6, %v5453_v51, %v5452_v20  ;;  %18758 = vst [vmem:[#allocation14_spill] sm:$0xff] %v16506_v61  ;;  %v6415_v54 = vsel %vm4526_vm2, %v6390_v27, 0  ;;  %v5462_v23 = vadd.s32 3, %v5458_v3 }
 0x951   :  { %v5457_v22 = vsel %vm16499_vm7, %v16167_v55, %v5454_v28  ;;  %vm5257_vm8 = vcmp.eq.s32.totalorder %v5255_v21, 0  ;;  %vm5260_vm9 = vcmp.eq.s32.totalorder %v5255_v21, 2  ;;  %v16534_v44 = vand.u32 4294901760, %v6412_v30 }
 0x952   :  { %13247 = vmatprep.subr.mxu0 %v16488_v7  ;;  %v16495_v8 = vsub.f32 %v5576_v46, %v16488_v7  ;;  %13897 = vcosq.f32 %v5457_v22  ;;  %v5261_v46 = vxor.u32 2147483648, %v13894_v33  ;;  %v5259_v32 = vsel %vm5257_vm8, %v13894_v33, %v5258_v43 }
 0x953   :  { %13248 = vmatpush3.msra.mxu0 %v16488_v7  ;;  %13899 = vsinq.f32 %v5457_v22  ;;  %vm5256_vm10 = vcmp.lt.s32.totalorder %v5255_v21, 2  ;;  %v16536_v31 = vand.u32 4294901760, %v6415_v54  ;;  %v6418_v2 = vsel %vm4526_vm2, %v6391_v9, 0 }
 0x954   :  { %v16512_v57 = vand.u32 4294901760, %v16495_v8  ;;  %v5262_v51 = vsel %vm5260_vm9, %v5261_v46, %v13896_v36  ;;  %v5463_v45 = vand.u32 3, %v5462_v23  ;;  %v16540_v28 = vsub.f32 %v6412_v30, %v16534_v44 }
 0x955   :  { %v5263_v37 = vsel %vm5256_vm10, %v5259_v32, %v5262_v51  ;;  %v16543_v22 = vand.u32 4294901760, %v6418_v2  ;;  %v16546_v36 = vsub.f32 %v6415_v54, %v16536_v31  ;;  %vm5461_vm15 = vweird.f32 %v16167_v55 }
 0x956   :  { %v6557_v59 = vsub.f32 %v16495_v8, %v16512_v57  ;;  %v5264_v33 = vsel %vm5253_vm11, nan, %v5263_v37  ;;  %vm5468_vm12 = vcmp.eq.s32.totalorder %v5463_v45, 2  ;;  %v6501_v46 = vand.u32 4294901760, %v16540_v28 }
 0x957   :  { %vm5465_vm13 = vcmp.eq.s32.totalorder %v5463_v45, 0  ;;  %v16555_v27 = vsub.f32 %v6418_v2, %v16543_v22  ;;  %vm5464_vm14 = vcmp.lt.s32.totalorder %v5463_v45, 2  ;;  %v6511_v30 = vand.u32 4294901760, %v16546_v36 }
 0x958   :  { %v6558_v20 = vand.u32 4294901760, %v6557_v59  ;;  %v16549_v59 = vand.u32 4294901760, %v16344_v1  ;;  %v6502_v23 = vsub.f32 %v16540_v28, %v6501_v46 }
 0x959   :  { %v18645_v2 = vand.u32 4294901760, %v16555_v27  ;;  %v6512_v45 = vsub.f32 %v16546_v36, %v6511_v30 }
 0x95a   :  { %13261 = vmatprep.subr.mxu1 %v6558_v20  ;;  %v6569_v9 = vsub.f32 %v16344_v1, %v16549_v59 }
 0x95b   :  { %13262 = vmatpush3.msra.mxu1 %v6558_v20  ;;  %v16552_v20 = vand.u32 4294901760, %v5264_v33 }
 0x95c   :  { %v16573_v1 = vand.u32 4294901760, %v6569_v9 }
 0x95d   :  { %v6576_v37 = vsub.f32 %v5264_v33, %v16552_v20  ;;  %v6522_v33 = vsub.f32 %v16555_v27, %v18645_v2  ;;  %v7458_v2 = vld [vmem:[%s18609_s4 + $0xc0] sm:$0xff] }
 0x95f   :  { %v13898_v18 = vpop.eup %13897 }
 0x960   :  { %v13900_v35 = vpop.eup %13899  ;;  %v5469_v21 = vxor.u32 2147483648, %v13898_v18 }
 0x961   :  { %v5466_v43 = vxor.u32 2147483648, %v13900_v35 }
 0x962   :  { %v5470_v25 = vsel %vm5468_vm12, %v5469_v21, %v13900_v35  ;;  %v16580_v21 = vand.u32 4294901760, %v6576_v37 }
 0x963   :  { %v5467_v3 = vsel %vm5465_vm13, %v13898_v18, %v5466_v43  ;;  %v6503_v18 = vand.u32 4294901760, %v6502_v23  ;;  %v6513_v43 = vand.u32 4294901760, %v6512_v45 }
 0x964   :  { %v5471_v54 = vsel %vm5464_vm14, %v5467_v3, %v5470_v25  ;;  %v6571_v3 = vsub.f32 %v6569_v9, %v16573_v1  ;;  %v6578_v23 = vsub.f32 %v6576_v37, %v16580_v21 }
 0x965   :  { %v5472_v32 = vsel %vm5461_vm15, nan, %v5471_v54 }
 0x966   :  { %v16561_v51 = vand.u32 4294901760, %v5472_v32  ;;  %v6572_v45 = vand.u32 4294901760, %v6571_v3  ;;  %v7464_v3 = vld [vmem:[%s18609_s4 + $0xf0] sm:$0xff] }
 0x968   :  { %13249 = vmatprep.subr.mxu0 %v16561_v51  ;;  %v6562_v55 = vsub.f32 %v5472_v32, %v16561_v51  ;;  %v6523_v32 = vand.u32 4294901760, %v6522_v33  ;;  %v7506_v33 = vsel %vm1906_vm3, %v7458_v2, 0  ;;  %v7462_v2 = vld [vmem:[%s18609_s4 + $0xe0] sm:$0xff] }
 0x969   :  { %13250 = vmatpush3.msra.mxu0 %v16561_v51 }
 0x96a   :  { %13251 = vmatprep.subr.mxu0 %v16549_v59  ;;  %v6563_v35 = vand.u32 4294901760, %v6562_v55 }
 0x96b   :  { %13252 = vmatpush3.msra.mxu0 %v16549_v59 }
 0x96c   :  { %13253 = vmatprep.subr.mxu0 %v16552_v20  ;;  %v6564_v25 = vsub.f32 %v6562_v55, %v6563_v35 }
 0x96d   :  { %13254 = vmatpush3.msra.mxu0 %v16552_v20 }
 0x96e   :  { %13256 = vmatmul.mubr.f32.vlgmr.msra.gmra.mxu0 %v6503_v18  ;;  %13275 = vmatprep.subr.mxu0 %v16495_v8  ;;  %v6565_v54 = vand.u32 4294901760, %v6564_v25  ;;  %v6579_v18 = vand.u32 4294901760, %v6578_v23  ;;  %v7514_v25 = vsel %vm1906_vm3, %v7462_v2, 0 }
 0x96f   :  { %13276 = vmatpush3.msra.mxu0 %v16495_v8  ;;  %13258 = vmatprep.mubr.f32.mxu0 %v6513_v43  ;;  %v7508_v8 = vsel %vm1906_vm3, %v16472_v56, 0  ;;  %v7510_v56 = vsel %vm1906_vm3, %v16451_v38, 0 }
 0x970   :  { %13263 = vmatprep.subr.mxu1 %v6565_v54  ;;  %13277 = vmatprep.subr.mxu0 %v6562_v55 }
 0x971   :  { %13264 = vmatpush3.msra.mxu1 %v6565_v54  ;;  %13278 = vmatpush3.msra.mxu0 %v6562_v55  ;;  %v16598_v55 = vand.u32 4294901760, %v7506_v33 }
 0x972   :  { %13259 = vmatmul.mubr.f32.gmra.mxu0 %v6523_v32  ;;  %13265 = vmatprep.subr.mxu1 %v6572_v45 }
 0x973   :  { %13279 = vmatprep.subr.mxu0 %v6569_v9  ;;  %13266 = vmatpush3.msra.mxu1 %v6572_v45  ;;  %v16617_v43 = vsub.f32 %v7506_v33, %v16598_v55  ;;  %v7518_v45 = vsel %vm1906_vm3, %v7464_v3, 0  ;;  %v18761_v3 = vand.u32 4294901760, %v16555_v27 }
 0x974   :  { %13280 = vmatpush3.msra.mxu0 %v6569_v9  ;;  %13267 = vmatprep.subr.mxu1 %v6579_v18  ;;  %v16602_v9 = vand.u32 4294901760, %v7508_v8 }
 0x975   :  { %13281 = vmatprep.subr.mxu0 %v6576_v37  ;;  %13268 = vmatpush3.msra.mxu1 %v6579_v18  ;;  %v18647_v23 = vand.u32 4294901760, %v16617_v43 }
 0x976   :  { %13282 = vmatpush3.msra.mxu0 %v6576_v37  ;;  %13283 = vmatprep.mubr.f32.mxu0 %v16293_v16  ;;  %v7512_v37 = vsel %vm1906_vm3, %v16424_v14, 0  ;;  %v16625_v38 = vsub.f32 %v7508_v8, %v16602_v9  ;;  %v16627_v14 = vand.u32 4294901760, %v7510_v56 }
 0x977   :  { %13270 = vmatmul.mubr.f32.vlgmr.msra.gmra.mxu1 %v16534_v44  ;;  %13284 = vmatmul.mubr.f32.vlgmr.msra.gmra.mxu0 %v16540_v28  ;;  %v16634_v54 = vand.u32 4294901760, %v7512_v37  ;;  %v7591_v16 = vsub.f32 %v16617_v43, %v18647_v23 }
 0x978   :  { %13289 = vmatprep.subr.mxu1 %v16488_v7  ;;  %13303 = vmatprep.subr.mxu0 %v16512_v57  ;;  %v18646_v18 = vand.u32 4294901760, %v16625_v38  ;;  %v16649_v33 = vsub.f32 %v7510_v56, %v16627_v14  ;;  %v7520_v56 = vsel %vm1906_vm3, %v16459_v11, 0 }
 0x979   :  { %13290 = vmatpush3.msra.mxu1 %v16488_v7  ;;  %13304 = vmatpush3.msra.mxu0 %v16512_v57  ;;  %v7463_v57 = vld [vmem:[%s18609_s4 + $0xe8] sm:$0xff] }
 0x97a   :  { %13291 = vmatprep.subr.mxu1 %v16561_v51  ;;  %13305 = vmatprep.subr.mxu0 %v6563_v35  ;;  %v7516_v32 = vsel %vm1906_vm3, %v7463_v57, 0  ;;  %v16664_v57 = vand.u32 4294901760, %v7518_v45 }
 0x97b   :  { %13272 = vmatprep.mubr.f32.mxu1 %v16536_v31  ;;  %13286 = vmatprep.mubr.f32.mxu0 %v16546_v36  ;;  %v16657_v8 = vand.u32 4294901760, %v7516_v32 }
 0x97c   :  { %13292 = vmatpush3.msra.mxu1 %v16561_v51  ;;  %13306 = vmatpush3.msra.mxu0 %v6563_v35  ;;  %v16638_v35 = vand.u32 4294901760, %v7514_v25 }
 0x97d   :  { %13273 = vmatmul.mubr.f32.gmra.mxu1 %v16543_v22  ;;  %13287 = vmatmul.mubr.f32.gmra.mxu0 %v16555_v27  ;;  %v16684_v28 = vsub.f32 %v7516_v32, %v16657_v8 }
 0x97e   :  { %13293 = vmatprep.subr.mxu1 %v16549_v59  ;;  %13307 = vmatprep.subr.mxu0 %v16573_v1  ;;  %v16662_v2 = vsub.f32 %v7514_v25, %v16638_v35  ;;  %v18760_v25 = vld [vmem:[#allocation3_spill] sm:$0xff] }
 0x97f   :  { %13294 = vmatpush3.msra.mxu1 %v16549_v59  ;;  %13308 = vmatpush3.msra.mxu0 %v16573_v1  ;;  %v16655_v1 = vsub.f32 %v7512_v37, %v16634_v54  ;;  %v7610_v37 = vand.u32 4294901760, %v16649_v33 }
 0x980   :  { %13295 = vmatprep.subr.mxu1 %v16552_v20  ;;  %13309 = vmatprep.subr.mxu0 %v16580_v21 }
 0x981   :  { %13296 = vmatpush3.msra.mxu1 %v16552_v20  ;;  %13297 = vmatprep.mubr.f32.mxu1 %v6491_v53  ;;  %v18759_v53 = vld [vmem:[#allocation2_spill] sm:$0xff]  ;;  %v18648_v11 = vand.u32 4294901760, %v16655_v1  ;;  %v7611_v23 = vsub.f32 %v16649_v33, %v7610_v37 }
 0x982   :  { %13310 = vmatpush3.msra.mxu0 %v16580_v21  ;;  %13311 = vmatprep.mubr.f32.mxu0 %v16232_v19  ;;  %v7601_v21 = vsub.f32 %v16625_v38, %v18646_v18  ;;  %v16692_v18 = vsub.f32 %v7518_v45, %v16664_v57  ;;  %v18762_v45 = vand.u32 4294901760, %v16662_v2 }
 0x983   :  { %13298 = vmatmul.mubr.f32.vlgmr.msra.gmra.mxu1 %v6501_v46  ;;  %13312 = vmatmul.mubr.f32.vlgmr.msra.gmra.mxu0 %v16534_v44  ;;  %v16686_v46 = vand.u32 4294901760, %v7520_v56  ;;  %v7621_v36 = vsub.f32 %v16655_v1, %v18648_v11  ;;  %v18764_v11 = vld [vmem:[#allocation4_spill] sm:$0xff] }
 0x984   :  { %13317 = vmatprep.subr.mxu1 %v16488_v7  ;;  %13331 = vmatprep.subr.mxu0 %v18759_v53  ;;  %v7602_v32 = vand.u32 4294901760, %v7601_v21  ;;  %v7631_v27 = vsub.f32 %v16662_v2, %v18762_v45  ;;  %v7612_v21 = vand.u32 4294901760, %v7611_v23 }
 0x985   :  { %13318 = vmatpush3.msra.mxu1 %v16488_v7  ;;  %13332 = vmatpush3.msra.mxu0 %v18759_v53  ;;  %v7592_v7 = vand.u32 4294901760, %v7591_v16  ;;  %v7650_v16 = vand.u32 4294901760, %v16692_v18 }
 0x986   :  { %13319 = vmatprep.subr.mxu1 %v16561_v51  ;;  %13359 = vmatprep.subr.mxu0 %v18760_v25  ;;  %v7632_v45 = vand.u32 4294901760, %v7631_v27 }
 0x987   :  { %13300 = vmatprep.mubr.f32.mxu1 %v6511_v30  ;;  %13314 = vmatprep.mubr.f32.mxu0 %v16536_v31  ;;  %v7640_v30 = vand.u32 4294901760, %v16684_v28 }
 0x988   :  { %13320 = vmatpush3.msra.mxu1 %v16561_v51  ;;  %13315 = vmatmul.mubr.f32.gmra.mxu0 %v16543_v22  ;;  %v16710_v51 = vsub.f32 %v7520_v56, %v16686_v46  ;;  %v18763_v56 = vld [vmem:[#allocation5_spill] sm:$0xff] }
 0x989   :  { %13301 = vmatmul.mubr.f32.gmra.mxu1 %v18761_v3  ;;  %13321 = vmatprep.subr.mxu1 %v16549_v59 }
 0x98a   :  { %13322 = vmatpush3.msra.mxu1 %v16549_v59  ;;  %13325 = vmatprep.mubr.f32.mxu1 %v16232_v19  ;;  %v7622_v59 = vand.u32 4294901760, %v7621_v36  ;;  %v7641_v19 = vsub.f32 %v16684_v28, %v7640_v30  ;;  %v7660_v3 = vand.u32 4294901760, %v16710_v51  ;;  %v18767_v36 = vand.u32 4294901760, %v16655_v1 }
 0x98b   :  { %13323 = vmatprep.subr.mxu1 %v16552_v20  ;;  %13333 = vmatprep.mubr.f32.mxu0 %v7592_v7  ;;  %v7651_v7 = vsub.f32 %v16692_v18, %v7650_v16 }
 0x98c   :  { %13324 = vmatpush3.msra.mxu1 %v16552_v20  ;;  %13334 = vmatmul.mubr.f32.vlgmr.msra.gmra.mxu0 %v7602_v32  ;;  %v7661_v20 = vsub.f32 %v16710_v51, %v7660_v3 }
 0x98d   :  { %13326 = vmatmul.mubr.f32.vlgmr.msra.gmra.mxu1 %v16534_v44  ;;  %13345 = vmatprep.subr.mxu1 %v18763_v56  ;;  %v7642_v44 = vand.u32 4294901760, %v7641_v19  ;;  %v7652_v23 = vand.u32 4294901760, %v7651_v7 }
 0x98e   :  { %13360 = vmatpush3.msra.mxu0 %v18760_v25  ;;  %13346 = vmatpush3.msra.mxu1 %v18763_v56  ;;  %v7662_v32 = vand.u32 4294901760, %v7661_v20 }
 0x98f   :  { %13387 = vmatprep.subr.mxu0 %v18764_v11  ;;  %13373 = vmatprep.subr.mxu1 %v18759_v53 }
 0x990   :  { %13328 = vmatprep.mubr.f32.mxu1 %v16536_v31  ;;  %13336 = vmatprep.mubr.f32.mxu0 %v7612_v21  ;;  %v18765_v31 = vand.u32 4294901760, %v16617_v43 }
 0x991   :  { %13329 = vmatmul.mubr.f32.gmra.mxu1 %v16543_v22  ;;  %13337 = vmatmul.mubr.f32.gmra.mxu0 %v7622_v59  ;;  %v18766_v22 = vand.u32 4294901760, %v16625_v38 }
 0x992   :  { %13339 = vmatprep.mubr.f32.mxu0 %v7632_v45  ;;  %13347 = vmatprep.mubr.f32.mxu1 %v16598_v55 }
 0x995   :  { %13340 = vmatmul.mubr.f32.gmra.mxu0 %v7642_v44  ;;  %13348 = vmatmul.mubr.f32.vlgmr.msra.gmra.mxu1 %v16602_v9 }
 0x996   :  { %13374 = vmatpush3.msra.mxu1 %v18759_v53  ;;  %13342 = vmatprep.mubr.f32.mxu0 %v7652_v23 }
 0x997   :  { %13401 = vmatprep.subr.mxu1 %v18759_v53  ;;  %13350 = vmatprep.mubr.f32.mxu1 %v16627_v14 }
 0x999   :  { %13343 = vmatmul.mubr.f32.gmra.mxu0 %v7662_v32  ;;  %13351 = vmatmul.mubr.f32.gmra.mxu1 %v16634_v54 }
 0x99a   :  { %13353 = vmatprep.mubr.f32.mxu1 %v16638_v35  ;;  %13361 = vmatprep.mubr.f32.mxu0 %v16617_v43  ;;  %v18768_v43 = vand.u32 4294901760, %v16662_v2 }
 0x99d   :  { %13354 = vmatmul.mubr.f32.gmra.mxu1 %v16657_v8  ;;  %13362 = vmatmul.mubr.f32.vlgmr.msra.gmra.mxu0 %v16625_v38 }
 0x99e   :  { %13388 = vmatpush3.msra.mxu0 %v18764_v11  ;;  %13356 = vmatprep.mubr.f32.mxu1 %v16664_v57 }
 0x99f   :  { %13364 = vmatprep.mubr.f32.mxu0 %v16649_v33 }
 0x9a1   :  { %13357 = vmatmul.mubr.f32.gmra.mxu1 %v16686_v46  ;;  %13365 = vmatmul.mubr.f32.gmra.mxu0 %v16655_v1 }
 0x9a2   :  { %13375 = vmatprep.mubr.f32.mxu1 %v18765_v31  ;;  %13367 = vmatprep.mubr.f32.mxu0 %v16662_v2 }
 0x9a5   :  { %13376 = vmatmul.mubr.f32.vlgmr.msra.gmra.mxu1 %v18766_v22  ;;  %13368 = vmatmul.mubr.f32.gmra.mxu0 %v16684_v28 }
 0x9a6   :  { %13402 = vmatpush3.msra.mxu1 %v18759_v53  ;;  %13378 = vmatprep.mubr.f32.mxu1 %v7610_v37 }
 0x9a7   :  { %13370 = vmatprep.mubr.f32.mxu0 %v16692_v18 }
 0x9a9   :  { %13379 = vmatmul.mubr.f32.gmra.mxu1 %v18767_v36  ;;  %13371 = vmatmul.mubr.f32.gmra.mxu0 %v16710_v51 }
 0x9aa   :  { %13381 = vmatprep.mubr.f32.mxu1 %v18768_v43  ;;  %13389 = vmatprep.mubr.f32.mxu0 %v16598_v55  ;;  %v6406_v51 = vpop.permute.xlu0 %6405 }
 0x9ab   :  { %v6398_v32 = vpop.permute.xlu1 %6397 }
 0x9ad   :  { %13382 = vmatmul.mubr.f32.gmra.mxu1 %v7640_v30  ;;  %13390 = vmatmul.mubr.f32.vlgmr.msra.gmra.mxu0 %v16602_v9 }
 0x9ae   :  { %13384 = vmatprep.mubr.f32.mxu1 %v7650_v16  ;;  %13392 = vmatprep.mubr.f32.mxu0 %v16627_v14  ;;  %v6402_v19 = vpop.permute.xlu0 %6401 }
 0x9b0   :  { %v5588_v25 = vpop.permute.xlu1 %5587 }
 0x9b1   :  { %13385 = vmatmul.mubr.f32.gmra.mxu1 %v7660_v3  ;;  %13393 = vmatmul.mubr.f32.gmra.mxu0 %v16634_v54  ;;  %v5714_v40 = vadd.f32 %v16338_v10, %v5588_v25  ;;  %v5784_v10 = vadd.f32 %v16410_v24, %v16461_v15 }
 0x9b2   :  { %13403 = vmatprep.mubr.f32.mxu1 %v16598_v55  ;;  %13395 = vmatprep.mubr.f32.mxu0 %v16638_v35  ;;  %v13201_v55 = vpop.f32.mrf.mxu0 }
 0x9b3   :  { %v5618_v44 = vpop.permute.xlu0 %5617 }
 0x9b5   :  { %13404 = vmatmul.mubr.f32.vlgmr.msra.gmra.mxu1 %v16602_v9  ;;  %13396 = vmatmul.mubr.f32.gmra.mxu0 %v16657_v8  ;;  %v16778_v9 = vpop.f32.mrf.mxu0 }
 0x9b6   :  { %13406 = vmatprep.mubr.f32.mxu1 %v16627_v14  ;;  %13398 = vmatprep.mubr.f32.mxu0 %v16664_v57  ;;  %v16782_v14 = vpop.f32.mrf.mxu1 }
 0x9b7   :  { %v16780_v38 = vpop.f32.mrf.mxu0  ;;  %v5613_v43 = vpop.permute.xlu0 %5612 }
 0x9b8   :  { %v5764_v0 = vadd.f32 %v16370_v47, %v5613_v43 }
 0x9b9   :  { %13407 = vmatmul.mubr.f32.gmra.mxu1 %v16634_v54  ;;  %13399 = vmatmul.mubr.f32.gmra.mxu0 %v16686_v46  ;;  %v16784_v18 = vpop.f32.mrf.mxu0  ;;  %v16786_v54 = vpop.f32.mrf.mxu1 }
 0x9ba   :  { %13409 = vmatprep.mubr.f32.mxu1 %v16638_v35  ;;  %18769 = vst [vmem:[#allocation15_spill] sm:$0xff] %v16784_v18  ;;  %v5890_v61 = vadd.f32 %v16381_v62, %v5764_v0 }
 0x9bb   :  { %v16788_v33 = vpop.f32.mrf.mxu0  ;;  %v16790_v35 = vpop.f32.mrf.mxu1 }
 0x9bc   :  { %v5608_v29 = vpop.permute.xlu0 %5607 }
 0x9bd   :  { %13410 = vmatmul.mubr.f32.gmra.mxu1 %v16657_v8  ;;  %v16792_v1 = vpop.f32.mrf.mxu0  ;;  %v16794_v8 = vpop.f32.mrf.mxu1 }
 0x9be   :  { %13412 = vmatprep.mubr.f32.mxu1 %v16664_v57  ;;  %18770 = vst [vmem:[#allocation6_spill] sm:$0xff] %v16794_v8  ;;  %v6394_v8 = vpop.permute.xlu1 %6393 }
 0x9bf   :  { %v16796_v2 = vpop.f32.mrf.mxu0  ;;  %v16798_v57 = vpop.f32.mrf.mxu1 }
 0x9c1   :  { %13413 = vmatmul.mubr.f32.gmra.mxu1 %v16686_v46  ;;  %v16800_v37 = vpop.f32.mrf.mxu0  ;;  %v16802_v28 = vpop.f32.mrf.mxu1 }
 0x9c2   :  { %18771 = vst [vmem:[#allocation11_spill] sm:$0xff] %v16800_v37 }
 0x9c3   :  { %v16804_v46 = vpop.f32.mrf.mxu0  ;;  %v16806_v30 = vpop.f32.mrf.mxu1 }
 0x9c5   :  { %v16808_v27 = vpop.f32.mrf.mxu0  ;;  %v16810_v16 = vpop.f32.mrf.mxu1 }
 0x9c6   :  { %18772 = vst [vmem:[#allocation18_spill] sm:$0xff] %v16810_v16  ;;  %v5860_v16 = vadd.f32 %v16340_v41, %v5714_v40  ;;  %v6011_v41 = vadd.f32 %v13201_v55, %v5890_v61 }
 0x9c7   :  { %v16812_v21 = vpop.f32.mrf.mxu0  ;;  %v16814_v59 = vpop.f32.mrf.mxu1 }
 0x9c9   :  { %v16816_v3 = vpop.f32.mrf.mxu0  ;;  %v16818_v45 = vpop.f32.mrf.mxu1 }
 0x9ca   :  { %18773 = vst [vmem:[#allocation16_spill] sm:$0xff] %v16816_v3  ;;  %v5744_v3 = vadd.f32 %v16350_v17, %v16408_v49  ;;  %v5976_v17 = vadd.f32 %v16464_v6, %v5860_v16 }
 0x9cb   :  { %v16820_v23 = vpop.f32.mrf.mxu1 }
 0x9cc   :  { %18774 = vst [vmem:[#allocation8_spill] sm:$0xff] %v16820_v23  ;;  %v6099_v15 = vadd.f32 %v16467_v60, %v5976_v17 }
 0x9cd   :  { %v16822_v36 = vpop.f32.mrf.mxu1 }
 0x9ce   :  { %18775 = vst [vmem:[#allocation19_spill] sm:$0xff] %v16822_v36  ;;  %v5754_v36 = vadd.f32 %v16384_v26, %v5608_v29  ;;  %v5902_v26 = vadd.f32 %v16418_v42, %v5784_v10  ;;  %v6235_v42 = vadd.f32 %v16788_v33, %v16514_v63 }
 0x9d0   :  { %v6025_v6 = vadd.f32 %v16780_v38, %v5902_v26  ;;  %v5774_v38 = vadd.f32 %v16431_v34, %v5618_v44 }
 0x9d2   :  { %v6155_v16 = vadd.f32 %v16790_v35, %v6025_v6  ;;  %v5896_v35 = vadd.f32 %v16443_v5, %v5774_v38 }
 0xa2e   :  { %v13257_v7 = vpop.f32.mrf.mxu0 }
 0xa2f   :  { %v6506_v50 = vadd.f32 %v13257_v7, %v6398_v32  ;;  %v5878_v7 = vadd.f32 %v16354_v12, %v5744_v3  ;;  %v5884_v32 = vadd.f32 %v16400_v4, %v5754_v36  ;;  %v6139_v12 = vadd.f32 %v16782_v14, %v6011_v41 }
 0xa30   :  { %v6495_v20 = vpop.f32.mrf.mxu0 }
 0xa31   :  { %v6496_v47 = vadd.f32 %v6495_v20, %v6394_v8  ;;  %v5997_v24 = vadd.f32 %v16477_v52, %v5878_v7  ;;  %v6229_v52 = vadd.f32 %v16792_v1, %v6099_v15  ;;  %v6259_v14 = vadd.f32 %v16804_v46, %v6139_v12 }
 0xa32   :  { %v13260_v31 = vpop.f32.mrf.mxu0 }
 0xa33   :  { %v6526_v43 = vadd.f32 %v13260_v31, %v6406_v51  ;;  %v6373_v20 = vadd.f32 %v16814_v59, %v6259_v14  ;;  %v6271_v31 = vadd.f32 %v16812_v21, %v6155_v16  ;;  %v18776_v21 = vld [vmem:[#allocation15_spill] sm:$0xff]  ;;  %v18782_v14 = vld [vmem:[#allocation16_spill] sm:$0xff] }
 0xa34   :  { %v6515_v22 = vpop.f32.mrf.mxu0 }
 0xa37   :  { %v13271_v11 = vpop.f32.mrf.mxu1  ;;  %v13285_v56 = vpop.f32.mrf.mxu0 }
 0xa38   :  { %v6623_v23 = vadd.f32 %v13271_v11, %v6506_v50  ;;  %v6004_v50 = vadd.f32 %v16778_v9, %v5884_v32  ;;  %v6018_v32 = vadd.f32 %v18776_v21, %v5896_v35 }
 0xa39   :  { %v6616_v53 = vpop.f32.mrf.mxu1  ;;  %v6714_v39 = vpop.f32.mrf.mxu0 }
 0xa3a   :  { %v6617_v29 = vadd.f32 %v6616_v53, %v6496_v47  ;;  %v6722_v62 = vadd.f32 %v13285_v56, %v6623_v23  ;;  %v6131_v60 = vadd.f32 %v16786_v54, %v6004_v50  ;;  %v6343_v54 = vadd.f32 %v16802_v28, %v6229_v52 }
 0xa3c   :  { %v6715_v4 = vadd.f32 %v6714_v39, %v6617_v29  ;;  %v6516_v39 = vadd.f32 %v6515_v22, %v6402_v19  ;;  %v6253_v46 = vadd.f32 %v16808_v27, %v6131_v60 }
 0xa3d   :  { %v13274_v13 = vpop.f32.mrf.mxu1  ;;  %v13288_v48 = vpop.f32.mrf.mxu0 }
 0xa3e   :  { %v6635_v18 = vadd.f32 %v13274_v13, %v6526_v43  ;;  %v6123_v13 = vadd.f32 %v16483_v58, %v5997_v24  ;;  %v6367_v27 = vadd.f32 %v16818_v45, %v6253_v46  ;;  %v18779_v24 = vld [vmem:[#allocation11_spill] sm:$0xff] }
 0xa3f   :  { %v6628_v37 = vpop.f32.mrf.mxu1  ;;  %v6728_v25 = vpop.f32.mrf.mxu0 }
 0xa40   :  { %v6736_v55 = vadd.f32 %v13288_v48, %v6635_v18  ;;  %v6349_v48 = vadd.f32 %v16798_v57, %v6235_v42  ;;  %v6629_v18 = vadd.f32 %v6628_v37, %v6516_v39  ;;  %v6247_v1 = vadd.f32 %v16796_v2, %v6123_v13  ;;  %v18781_v13 = vld [vmem:[#allocation18_spill] sm:$0xff] }
 0xa42   :  { %v6729_v37 = vadd.f32 %v6728_v25, %v6629_v18  ;;  %v6361_v28 = vadd.f32 %v16806_v30, %v6247_v1  ;;  %v18777_v25 = vld [vmem:[#allocation8_spill] sm:$0xff]  ;;  %v18783_v18 = vmov 683565275  }
 0xa43   :  { %v13299_v40 = vpop.f32.mrf.mxu1  ;;  %v13313_v0 = vpop.f32.mrf.mxu0  ;;  %v6385_v17 = vadd.f32 %v18777_v25, %v6271_v31 }
 0xa44   :  { %v6821_v11 = vadd.f32 %v13299_v40, %v6722_v62  ;;  %v18778_v62 = vld [vmem:[#allocation14_spill] sm:$0xff] }
 0xa45   :  { %v6812_v49 = vpop.f32.mrf.mxu1  ;;  %v6919_v53 = vpop.f32.mrf.mxu0  ;;  %v6241_v15 = vadd.f32 %v18779_v24, %v18778_v62 }
 0xa46   :  { %v6813_v56 = vadd.f32 %v6812_v49, %v6715_v4  ;;  %v6926_v8 = vadd.f32 %v13313_v0, %v6821_v11  ;;  %v18780_v4 = vld [vmem:[#allocation6_spill] sm:$0xff] }
 0xa47   :  { %v6147_v11 = vadd.f32 %v18780_v4, %v6018_v32  ;;  %v6355_v52 = vadd.f32 %v18781_v13, %v6241_v15 }
 0xa48   :  { %v13316_v3 = vpop.f32.mrf.mxu0  ;;  %v6920_v58 = vadd.f32 %v6919_v53, %v6813_v56 }
 0xa49   :  { %v13302_v61 = vpop.f32.mrf.mxu1  ;;  %v16881_v39 = vadd.f32 %v18782_v14, %v6147_v11 }
 0xa4a   :  { %v6837_v51 = vadd.f32 %v13302_v61, %v6736_v55  ;;  %v6931_v43 = vpop.f32.mrf.mxu0 }
 0xa4b   :  { %v6828_v9 = vpop.f32.mrf.mxu1 }
 0xa4c   :  { %v6938_v23 = vadd.f32 %v13316_v3, %v6837_v51  ;;  %v6829_v10 = vadd.f32 %v6828_v9, %v6729_v37 }
 0xa4d   :  { %v13327_v63 = vpop.f32.mrf.mxu1 }
 0xa4e   :  { %v7019_v33 = vadd.f32 %v13327_v63, %v6926_v8  ;;  %v6932_v26 = vadd.f32 %v6931_v43, %v6829_v10 }
 0xa4f   :  { %v7012_v19 = vpop.f32.mrf.mxu1 }
 0xa50   :  { %v7035_v34 = vmul.f32 %v7019_v33, %v6349_v48  ;;  %v7013_v44 = vadd.f32 %v7012_v19, %v6920_v58  ;;  %v18784_v33 = vmov 2475754826   ;;  %v18786_v19 = vmov 2102212464  }
 0xa51   :  { %v13330_v57 = vpop.f32.mrf.mxu1 }
 0xa52   :  { %v16857_v22 = vadd.f32 %v7035_v34, %v6373_v20  ;;  %v7034_v36 = vmul.f32 %v7013_v44, %v6343_v54  ;;  %v7031_v2 = vadd.f32 %v13330_v57, %v6938_v23  ;;  %v18785_v54 = vmov 2131351028  }
 0xa53   :  { %v7024_v29 = vpop.f32.mrf.mxu1  ;;  %v18787_v23 = vmov 920167782  }
 0xa54   :  { %v7146_v59 = vand.u32 2147483647, %v16857_v22  ;;  %v7149_v47 = vand.u32 2139095040, %v16857_v22  ;;  %v16863_v7 = vadd.f32 %v7034_v36, %v6367_v27  ;;  %v7037_v5 = vmul.f32 %v7031_v2, %v6361_v28 }
 0xa55   :  { %v7025_v61 = vadd.f32 %v7024_v29, %v6932_v26  ;;  %v18788_v36 = vmov 1326507024  }
 0xa56   :  { %v7150_v40 = vshrl.u32 %v7149_v47, 23  ;;  %v7153_v41 = vand.u32 8388607, %v7146_v59  ;;  %v7042_v30 = vand.u32 2147483647, %v16863_v7  ;;  %v7045_v45 = vand.u32 2139095040, %v16863_v7 }
 0xa57   :  { %v16871_v0 = vadd.f32 %v7037_v5, %v6385_v17  ;;  %v16887_v63 = vmul.f32 %v7025_v61, %v6355_v52 }
 0xa58   :  { %v11757_v49 = vadd.s32 4294967169, %v7150_v40  ;;  %v7046_v50 = vshrl.u32 %v7045_v45, 23  ;;  %v7049_v12 = vand.u32 8388607, %v7042_v30  ;;  %v7154_v53 = vor.u32 8388608, %v7153_v41 }
 0xa59   :  { %v7357_v56 = vand.u32 2139095040, %v16871_v0 }
 0xa5a   :  { %v7156_v6 = vadd.s32 1, %v11757_v49  ;;  %v11753_v42 = vadd.s32 4294967169, %v7046_v50  ;;  %v7050_v55 = vor.u32 8388608, %v7049_v12  ;;  %v16883_v38 = vshll.u32 %v7154_v53, 8 }
 0xa5b   :  { %v7358_v3 = vshrl.u32 %v7357_v56, 23 }
 0xa5c   :  { %vm7157_vm1 = vcmp.gt.s32.totalorder %v7156_v6, 0  ;;  %v7052_v9 = vadd.s32 1, %v11753_v42  ;;  %v16885_v16 = vshll.u32 %v7050_v55, 8 }
 0xa5d   :  { %v7158_v60 = vsel %vm7157_vm1, %v7156_v6, 0  ;;  %v11765_v15 = vadd.s32 4294967169, %v7358_v3 }
 0xa5e   :  { %v7159_v8 = vshrl.u32 %v7158_v60, 5  ;;  %v7160_v51 = vand.u32 31, %v7158_v60  ;;  %vm7053_vm4 = vcmp.gt.s32.totalorder %v7052_v9, 0 }
 0xa5f   :  { %v7054_v47 = vsel %vm7053_vm4, %v7052_v9, 0 }
 0xa60   :  { %v7161_v48 = vsub.s32 32, %v7160_v51  ;;  %v7163_v58 = vshll.u32 %v18783_v18, %v7160_v51  ;;  %v7166_v1 = vshll.u32 %v18784_v33, %v7160_v51  ;;  %v7169_v46 = vshll.u32 %v18785_v54, %v7160_v51 }
 0xa61   :  { %v7172_v20 = vshll.u32 %v18786_v19, %v7160_v51  ;;  %v7175_v34 = vshll.u32 %v18787_v23, %v7160_v51  ;;  %vm7178_vm5 = vcmp.lt.s32.totalorder %v7159_v8, 1  ;;  %vm7179_vm6 = vcmp.lt.s32.totalorder %v7159_v8, 2 }
 0xa62   :  { %v7164_v44 = vshrl.u32 %v18784_v33, %v7161_v48  ;;  %v7167_v35 = vshrl.u32 %v18785_v54, %v7161_v48  ;;  %v7170_v31 = vshrl.u32 %v18786_v19, %v7161_v48  ;;  %v7162_v57 = vshrl.u32 %v18783_v18, %v7161_v48 }
 0xa63   :  { %v7173_v37 = vshrl.u32 %v18787_v23, %v7161_v48  ;;  %v7176_v2 = vshrl.u32 %v18788_v36, %v7161_v48  ;;  %vm7180_vm7 = vcmp.lt.s32.totalorder %v7159_v8, 3  ;;  %vm7181_vm8 = vcmp.lt.s32.totalorder %v7159_v8, 4 }
 0xa64   :  { %v7165_v28 = vor.u32 %v7164_v44, %v7163_v58  ;;  %v7168_v27 = vor.u32 %v7167_v35, %v7166_v1  ;;  %v7171_v10 = vor.u32 %v7170_v31, %v7169_v46  ;;  %v7056_v21 = vand.u32 31, %v7054_v47 }
 0xa65   :  { %v7174_v43 = vor.u32 %v7173_v37, %v7172_v20  ;;  %v7177_v5 = vor.u32 %v7176_v2, %v7175_v34  ;;  %v7055_v4 = vshrl.u32 %v7054_v47, 5  ;;  %v7364_v47 = vadd.s32 1, %v11765_v15 }
 0xa66   :  { %v7182_v32 = vsel %vm7178_vm5, %v7162_v57, %v7165_v28  ;;  %v7183_v25 = vsel %vm7181_vm8, %v7171_v10, 2102212464  ;;  %v7186_v17 = vsel %vm7178_vm5, %v7165_v28, %v7168_v27  ;;  %v7190_v40 = vsel %vm7178_vm5, %v7168_v27, %v7171_v10 }
 0xa67   :  { %v7184_v41 = vsel %vm7180_vm7, %v7168_v27, %v7183_v25  ;;  %v7187_v45 = vsel %vm7181_vm8, %v7174_v43, 920167782  ;;  %v7191_v29 = vsel %vm7181_vm8, %v7177_v5, 1326507024  ;;  %v7057_v26 = vsub.s32 32, %v7056_v21  ;;  %v18789_v25 = vld [vmem:[#allocation19_spill] sm:$0xff] }
 0xa68   :  { %v7185_v49 = vsel %vm7179_vm6, %v7182_v32, %v7184_v41  ;;  %v7188_v62 = vsel %vm7180_vm7, %v7171_v10, %v7187_v45  ;;  %v7192_v24 = vsel %vm7180_vm7, %v7174_v43, %v7191_v29  ;;  %v7059_v11 = vshll.u32 %v18783_v18, %v7056_v21 }
 0xa69   :  { %v7189_v50 = vsel %vm7179_vm6, %v7186_v17, %v7188_v62  ;;  %v7193_v12 = vsel %vm7179_vm6, %v7190_v40, %v7192_v24  ;;  %v7201_v55 = vmul.u32 %v16883_v38, %v7185_v49  ;;  %v7060_v56 = vshrl.u32 %v18784_v33, %v7057_v26 }
 0xa6a   :  { %v16912_v6 = vmul.u32.u64.low %v16883_v38, %v7193_v12  ;;  %v16913_v61 = vmul.u32.u64.high %v16883_v38, %v7193_v12, %v16912_v6  ;;  %v16916_v53 = vmul.u32.u64.low %v16883_v38, %v7189_v50  ;;  %v16917_v42 = vmul.u32.u64.high %v16883_v38, %v7189_v50, %v16916_v53 }
 0xa6b   :  { %v7062_v13 = vshll.u32 %v18784_v33, %v7056_v21  ;;  %v7063_v52 = vshrl.u32 %v18785_v54, %v7057_v26  ;;  %v7065_v60 = vshll.u32 %v18785_v54, %v7056_v21  ;;  %v7066_v9 = vshrl.u32 %v18786_v19, %v7057_v26 }
 0xa6c   :  { %v7068_v14 = vshll.u32 %v18786_v19, %v7056_v21  ;;  %v7069_v8 = vshrl.u32 %v18787_v23, %v7057_v26  ;;  %v7061_v51 = vor.u32 %v7060_v56, %v7059_v11  ;;  %v7071_v48 = vshll.u32 %v18787_v23, %v7056_v21 }
 0xa6d   :  { %v7064_v3 = vor.u32 %v7063_v52, %v7062_v13  ;;  %v7072_v38 = vshrl.u32 %v18788_v36, %v7057_v26  ;;  %vm7203_vm9 = vc.u32 %v16913_v61, %v16916_v53  ;;  %v7204_v58 = vadd.s32 1, %v16917_v42 }
 0xa6e   :  { %v7058_v1 = vshrl.u32 %v18783_v18, %v7057_v26  ;;  %v7067_v46 = vor.u32 %v7066_v9, %v7065_v60  ;;  %v7070_v20 = vor.u32 %v7069_v8, %v7068_v14  ;;  %vm7074_vm10 = vcmp.lt.s32.totalorder %v7055_v4, 1 }
 0xa6f   :  { %v7073_v34 = vor.u32 %v7072_v38, %v7071_v48  ;;  %vm7075_vm11 = vcmp.lt.s32.totalorder %v7055_v4, 2  ;;  %v7205_v44 = vsel %vm7203_vm9, %v7204_v58, %v16917_v42  ;;  %vm7076_vm12 = vcmp.lt.s32.totalorder %v7055_v4, 3 }
 0xa70   :  { %vm7077_vm13 = vcmp.lt.s32.totalorder %v7055_v4, 4  ;;  %v7082_v35 = vsel %vm7074_vm10, %v7061_v51, %v7064_v3  ;;  %v7206_v31 = vadd.s32 %v7205_v44, %v7201_v55  ;;  %v7086_v2 = vsel %vm7074_vm10, %v7064_v3, %v7067_v46 }
 0xa71   :  { %v7079_v57 = vsel %vm7077_vm13, %v7067_v46, 2102212464  ;;  %v7083_v37 = vsel %vm7077_vm13, %v7070_v20, 920167782  ;;  %v7078_v28 = vsel %vm7074_vm10, %v7058_v1, %v7061_v51  ;;  %v7087_v10 = vsel %vm7077_vm13, %v7073_v34, 1326507024 }
 0xa72   :  { %v7084_v27 = vsel %vm7076_vm12, %v7067_v46, %v7083_v37  ;;  %v7207_v43 = vadd.s32 536870912, %v7206_v31  ;;  %v7080_v5 = vsel %vm7076_vm12, %v7064_v3, %v7079_v57  ;;  %v7088_v32 = vsel %vm7076_vm12, %v7070_v20, %v7087_v10 }
 0xa73   :  { %v7085_v21 = vsel %vm7075_vm11, %v7082_v35, %v7084_v27  ;;  %v6379_v17 = vadd.f32 %v18789_v25, %v16881_v39  ;;  %v7089_v40 = vsel %vm7075_vm11, %v7086_v2, %v7088_v32  ;;  %vm7365_vm14 = vcmp.gt.s32.totalorder %v7364_v47, 0 }
 0xa74   :  { %v16940_v41 = vmul.u32.u64.low %v16885_v16, %v7085_v21  ;;  %v16941_v45 = vmul.u32.u64.high %v16885_v16, %v7085_v21, %v16940_v41  ;;  %v16944_v29 = vshrl.u32 %v7207_v43, 30  ;;  %v7081_v62 = vsel %vm7075_vm11, %v7078_v28, %v7080_v5 }
 0xa75   :  { %v16947_v26 = vmul.u32.u64.low %v16885_v16, %v7089_v40  ;;  %v16948_v49 = vmul.u32.u64.high %v16885_v16, %v7089_v40, %v16947_v26  ;;  %v7354_v24 = vand.u32 2147483647, %v16871_v0  ;;  %v7366_v15 = vsel %vm7365_vm14, %v7364_v47, 0 }
 0xa76   :  { %v16953_v39 = vadd.f32 %v16887_v63, %v6379_v17  ;;  %v7209_v50 = vshll.u32 %v16944_v29, 30  ;;  %v7368_v12 = vand.u32 31, %v7366_v15  ;;  %v7100_v11 = vadd.s32 1, %v16941_v45 }
 0xa77   :  { %v7097_v42 = vmul.u32 %v16885_v16, %v7081_v62  ;;  %vm7099_vm15 = vc.u32 %v16948_v49, %v16940_v41  ;;  %v7361_v55 = vand.u32 8388607, %v7354_v24  ;;  %v7202_v14 = vadd.s32 %v16916_v53, %v16913_v61 }
 0xa78   :  { %v7210_v6 = vsub.s32 %v7206_v31, %v7209_v50  ;;  %v7101_v4 = vsel %vm7099_vm15, %v7100_v11, %v16941_v45  ;;  %v7253_v56 = vand.u32 2139095040, %v16953_v39  ;;  %v7369_v52 = vsub.s32 32, %v7368_v12 }
 0xa79   :  { %v7102_v13 = vadd.s32 %v7101_v4, %v7097_v42  ;;  %v7232_v16 = vsub.s32 4, %v16944_v29  ;;  %v7362_v8 = vor.u32 8388608, %v7361_v55  ;;  %v7367_v46 = vshrl.u32 %v7366_v15, 5 }
 0xa7a   :  { %v7212_v63 = vsub.s32 0, %v7210_v6  ;;  %v7254_v51 = vshrl.u32 %v7253_v56, 23  ;;  %v7372_v48 = vshrl.u32 %v18784_v33, %v7369_v52  ;;  %v7375_v38 = vshrl.u32 %v18785_v54, %v7369_v52 }
 0xa7b   :  { %v7103_v9 = vadd.s32 536870912, %v7102_v13  ;;  %v7381_v58 = vshrl.u32 %v18787_v23, %v7369_v52  ;;  %v7371_v20 = vshll.u32 %v18783_v18, %v7368_v12  ;;  %v7378_v34 = vshrl.u32 %v18786_v19, %v7369_v52 }
 0xa7c   :  { %v11758_v60 = vmin.u32 %v7212_v63, %v7210_v6  ;;  %v7374_v61 = vshll.u32 %v18784_v33, %v7368_v12  ;;  %v7380_v53 = vshll.u32 %v18786_v19, %v7368_v12  ;;  %v7384_v35 = vshrl.u32 %v18788_v36, %v7369_v52 }
 0xa7d   :  { %v16970_v1 = vshrl.u32 %v7103_v9, 30  ;;  %v7377_v57 = vshll.u32 %v18785_v54, %v7368_v12  ;;  %v7383_v37 = vshll.u32 %v18787_v23, %v7368_v12  ;;  %v11761_v2 = vadd.s32 4294967169, %v7254_v51 }
 0xa7e   :  { %v7214_v3 = vclz %v11758_v60  ;;  %v7373_v28 = vor.u32 %v7372_v48, %v7371_v20  ;;  %v7376_v27 = vor.u32 %v7375_v38, %v7374_v61  ;;  %v7382_v10 = vor.u32 %v7381_v58, %v7380_v53 }
 0xa7f   :  { %v7105_v31 = vshll.u32 %v16970_v1, 30  ;;  %v7379_v5 = vor.u32 %v7378_v34, %v7377_v57  ;;  %v7385_v21 = vor.u32 %v7384_v35, %v7383_v37  ;;  %v7370_v17 = vshrl.u32 %v18783_v18, %v7369_v52 }
 0xa80   :  { %v11759_v44 = vadd.s32 4294967294, %v7214_v3  ;;  %vm7386_vm4 = vcmp.lt.s32.totalorder %v7367_v46, 1  ;;  %vm7388_vm5 = vcmp.lt.s32.totalorder %v7367_v46, 3  ;;  %vm7389_vm6 = vcmp.lt.s32.totalorder %v7367_v46, 4  ;;  %v8269_v3 = vld [vmem:[%s18609_s4 + $0x1a0] sm:$0xff] }
 0xa81   :  { %v16980_v43 = vsub.s32 %v7102_v13, %v7105_v31  ;;  %v7394_v15 = vsel %vm7386_vm4, %v7373_v28, %v7376_v27  ;;  %v7395_v50 = vsel %vm7389_vm6, %v7382_v10, 920167782  ;;  %vm7387_vm7 = vcmp.lt.s32.totalorder %v7367_v46, 2 }
 0xa82   :  { %vm11760_vm1 = vcmp.lt.s32.totalorder %v11759_v44, 0  ;;  %v7396_v12 = vsel %vm7388_vm5, %v7379_v5, %v7395_v50  ;;  %v7398_v11 = vsel %vm7386_vm4, %v7376_v27, %v7379_v5  ;;  %v7399_v42 = vsel %vm7389_vm6, %v7385_v21, 1326507024 }
 0xa83   :  { %v7217_v47 = vsel %vm11760_vm1, 0, %v11759_v44  ;;  %v7108_v45 = vsub.s32 0, %v16980_v43  ;;  %v7391_v56 = vsel %vm7389_vm6, %v7379_v5, 2102212464  ;;  %vm7148_vm8 = vcmp.lt.s32.totalorder %v16857_v22, 0 }
 0xa84   :  { %v7218_v32 = vsub.s32 32, %v7217_v47  ;;  %v7222_v25 = vsub.s32 4294967266, %v7217_v47  ;;  %v7219_v40 = vshll.u32 %v7210_v6, %v7217_v47  ;;  %v7400_v6 = vsel %vm7388_vm5, %v7382_v10, %v7399_v42 }
 0xa85   :  { %v11754_v63 = vmin.u32 %v7108_v45, %v16980_v43  ;;  %v7397_v13 = vsel %vm7387_vm7, %v7394_v15, %v7396_v12  ;;  %v7402_v52 = vshll.u32 %v7362_v8, 8  ;;  %v7233_v9 = vsel %vm7148_vm8, %v7232_v16, %v16944_v29 }
 0xa86   :  { %v7220_v26 = vshrl.u32 %v7202_v14, %v7218_v32  ;;  %v7223_v62 = vadd.s32 127, %v7222_v25  ;;  %v7390_v14 = vsel %vm7386_vm4, %v7370_v17, %v7373_v28  ;;  %v7401_v51 = vsel %vm7387_vm7, %v7398_v11, %v7400_v6 }
 0xa87   :  { %v7392_v38 = vsel %vm7388_vm5, %v7376_v27, %v7391_v56  ;;  %v17000_v58 = vmul.u32.u64.low %v7402_v52, %v7401_v51  ;;  %v17001_v20 = vmul.u32.u64.high %v7402_v52, %v7401_v51, %v17000_v58  ;;  %v7260_v29 = vadd.s32 1, %v11761_v2 }
 0xa88   :  { %v7221_v4 = vor.u32 %v7220_v26, %v7219_v40  ;;  %v7224_v55 = vshll.u32 %v7223_v62, 23  ;;  %v17003_v34 = vmul.u32.u64.low %v7402_v52, %v7397_v13  ;;  %v17004_v44 = vmul.u32.u64.high %v7402_v52, %v7397_v13, %v17003_v34 }
 0xa89   :  { %vm17009_vm9 = vcmp.le.f32.partialorder %v7146_v59, 0.7853982  ;;  %v7110_v61 = vclz %v11754_v63  ;;  %v17014_v53 = vsel %vm4526_vm2, %v8269_v3, 0  ;;  %v7393_v31 = vsel %vm7387_vm7, %v7390_v14, %v7392_v38 }
 0xa8a   :  { %v7225_v60 = vor.u32 4788187, %v7224_v55  ;;  %v7228_v48 = vcvt.s32.f32 %v7221_v4  ;;  %vm7261_vm10 = vcmp.gt.s32.totalorder %v7260_v29, 0  ;;  %v17018_v57 = vand.u32 4294901760, %v17014_v53 }
 0xa8b   :  { %v7235_v37 = vsel %vm17009_vm9, 0, %v7233_v9  ;;  %v7250_v2 = vand.u32 2147483647, %v16953_v39  ;;  %vm7411_vm11 = vc.u32 %v17001_v20, %v17003_v34  ;;  %v7412_v28 = vadd.s32 1, %v17004_v44 }
 0xa8c   :  { %v7226_v8 = vand.u32 2147483647, %v7225_v60  ;;  %v7262_v27 = vsel %vm7261_vm10, %v7260_v29, 0  ;;  %13437 = vmatprep.mubr.f32.mxu1 %v17018_v57  ;;  %v11755_v46 = vadd.s32 4294967294, %v7110_v61  ;;  %v7409_v10 = vmul.u32 %v7402_v52, %v7393_v31 }
 0xa8d   :  { %v7264_v47 = vand.u32 31, %v7262_v27  ;;  %v7239_v21 = vadd.s32 3, %v7235_v37  ;;  %v7413_v32 = vsel %vm7411_vm11, %v7412_v28, %v17004_v44  ;;  %v7257_v40 = vand.u32 8388607, %v7250_v2 }
 0xa8e   :  { %v7229_v35 = vmul.f32 %v7228_v48, %v7226_v8  ;;  %v7414_v17 = vadd.s32 %v7413_v32, %v7409_v10  ;;  %vm11756_vm12 = vcmp.lt.s32.totalorder %v11755_v46, 0  ;;  %v17047_v63 = vshrl.u32 %v7262_v27, 5 }
 0xa8f   :  { %v7265_v45 = vsub.s32 32, %v7264_v47  ;;  %v17035_v62 = vand.u32 3, %v7239_v21  ;;  %v7258_v50 = vor.u32 8388608, %v7257_v40  ;;  %v17041_v42 = vsel %vm11756_vm12, 0, %v11755_v46 }
 0xa90   :  { %v7230_v59 = vxor.u32 2147483648, %v7229_v35  ;;  %v7415_v26 = vadd.s32 536870912, %v7414_v17  ;;  %v7276_v55 = vshll.u32 %v18786_v19, %v7264_v47  ;;  %v7267_v13 = vshll.u32 %v18783_v18, %v7264_v47 }
 0xa91   :  { %v7268_v12 = vshrl.u32 %v18784_v33, %v7265_v45  ;;  %v7271_v11 = vshrl.u32 %v18785_v54, %v7265_v45  ;;  %v7274_v4 = vshrl.u32 %v18786_v19, %v7265_v45  ;;  %v7277_v56 = vshrl.u32 %v18787_v23, %v7265_v45 }
 0xa92   :  { %v7231_v5 = vsel %vm7148_vm8, %v7230_v59, %v7229_v35  ;;  %v17037_v15 = vshrl.u32 %v7415_v26, 30  ;;  %v7270_v52 = vshll.u32 %v18784_v33, %v7264_v47  ;;  %v7273_v60 = vshll.u32 %v18785_v54, %v7264_v47 }
 0xa93   :  { %v7234_v25 = vsel %vm17009_vm9, %v16857_v22, %v7231_v5  ;;  %v7278_v9 = vor.u32 %v7277_v56, %v7276_v55  ;;  %v7279_v14 = vshll.u32 %v18787_v23, %v7264_v47  ;;  %v7280_v51 = vshrl.u32 %v18788_v36, %v7265_v45  ;;  %v17108_v56 = vpop.f32.mrf.mxu0 }
 0xa94   :  { %13901 = vcosq.f32 %v7234_v25  ;;  %v7417_v6 = vshll.u32 %v17037_v15, 30  ;;  %v7098_v3 = vadd.s32 %v16940_v41, %v16948_v49  ;;  %v7269_v38 = vor.u32 %v7268_v12, %v7267_v13 }
 0xa95   :  { %13903 = vsinq.f32 %v7234_v25  ;;  %v7272_v58 = vor.u32 %v7271_v11, %v7270_v52  ;;  %vm7242_vm13 = vcmp.eq.s32.totalorder %v17035_v62, 0  ;;  %vm7245_vm14 = vcmp.eq.s32.totalorder %v17035_v62, 2 }
 0xa96   :  { %v17056_v48 = vsub.s32 %v7414_v17, %v7417_v6  ;;  %v7275_v8 = vor.u32 %v7274_v4, %v7273_v60  ;;  %v7281_v44 = vor.u32 %v7280_v51, %v7279_v14  ;;  %vm7241_vm15 = vcmp.lt.s32.totalorder %v17035_v62, 2  ;;  %v17110_v6 = vpop.f32.mrf.mxu1 }
 0xa97   :  { %v7118_v29 = vsub.s32 4294967266, %v17041_v42  ;;  %vm7285_vm1 = vcmp.lt.s32.totalorder %v17047_v63, 4  ;;  %v17064_v61 = vshll.u32 %v7258_v50, 8  ;;  %vm7238_vm4 = vweird.f32 %v16857_v22 }
 0xa98   :  { %v7420_v16 = vsub.s32 0, %v17056_v48  ;;  %v7114_v41 = vsub.s32 32, %v17041_v42  ;;  %v7410_v49 = vadd.s32 %v17003_v34, %v17001_v20  ;;  %vm7282_vm5 = vcmp.lt.s32.totalorder %v17047_v63, 1 }
 0xa99   :  { %v7291_v35 = vsel %vm7285_vm1, %v7278_v9, 920167782  ;;  %vm7284_vm6 = vcmp.lt.s32.totalorder %v17047_v63, 3  ;;  %v7290_v37 = vsel %vm7282_vm5, %v7269_v38, %v7272_v58  ;;  %v17079_v59 = vsub.f32 %v17014_v53, %v17018_v57 }
 0xa9a   :  { %v11766_v31 = vmin.u32 %v7420_v16, %v17056_v48  ;;  %v7266_v28 = vshrl.u32 %v18783_v18, %v7265_v45  ;;  %v7292_v20 = vsel %vm7284_vm6, %v7275_v8, %v7291_v35  ;;  %v7294_v34 = vsel %vm7282_vm5, %v7272_v58, %v7275_v8 }
 0xa9b   :  { %v7295_v27 = vsel %vm7285_vm1, %v7281_v44, 1326507024  ;;  %v7119_v10 = vadd.s32 127, %v7118_v29  ;;  %vm7283_vm7 = vcmp.lt.s32.totalorder %v17047_v63, 2  ;;  %v7287_v53 = vsel %vm7285_vm1, %v7275_v8, 2102212464  ;;  %v17126_v8 = vpop.f32.mrf.mxu1 }
 0xa9c   :  { %v7422_v47 = vclz %v11766_v31  ;;  %v7286_v32 = vsel %vm7282_vm5, %v7266_v28, %v7269_v38  ;;  %v7293_v25 = vsel %vm7283_vm7, %v7290_v37, %v7292_v20  ;;  %v7296_v17 = vsel %vm7284_vm6, %v7278_v9, %v7295_v27 }
 0xa9d   :  { %v7297_v26 = vsel %vm7283_vm7, %v7294_v34, %v7296_v17  ;;  %v8372_v50 = vand.u32 4294901760, %v17079_v59  ;;  %v7288_v11 = vsel %vm7284_vm6, %v7272_v58, %v7287_v53  ;;  %v7120_v14 = vshll.u32 %v7119_v10, 23  ;;  %v17124_v58 = vpop.f32.mrf.mxu0  ;;  %v17140_v27 = vpop.f32.mrf.mxu1 }
 0xa9e   :  { %v11767_v45 = vadd.s32 4294967294, %v7422_v47  ;;  %v17105_v4 = vmul.u32.u64.low %v17064_v61, %v7297_v26  ;;  %v17106_v55 = vmul.u32.u64.high %v17064_v61, %v7297_v26, %v17105_v4  ;;  %v7289_v62 = vsel %vm7283_vm7, %v7286_v32, %v7288_v11 }
 0xa9f   :  { %v17115_v52 = vmul.u32.u64.low %v17064_v61, %v7293_v25  ;;  %v17116_v60 = vmul.u32.u64.high %v17064_v61, %v7293_v25, %v17115_v52  ;;  %v8373_v38 = vsub.f32 %v17079_v59, %v8372_v50  ;;  %v7116_v35 = vshrl.u32 %v7098_v3, %v7114_v41  ;;  %v17136_v37 = vpop.f32.mrf.mxu0 }
 0xaa0   :  { %vm11768_vm8 = vcmp.lt.s32.totalorder %v11767_v45, 0  ;;  %v7305_v63 = vmul.u32 %v17064_v61, %v7289_v62  ;;  %v7121_v3 = vor.u32 4788187, %v7120_v14  ;;  %v13998_v53 = vmov 2  }
 0xaa1   :  { %v13902_v46 = vpop.eup %13901  ;;  %v7425_v51 = vsel %vm11768_vm8, 0, %v11767_v45  ;;  %vm7307_vm9 = vc.u32 %v17106_v55, %v17115_v52  ;;  %v8374_v31 = vand.u32 4294901760, %v8373_v38  ;;  %v7308_v22 = vadd.s32 1, %v17116_v60  ;;  %13852 = vset.pattern.permute.xlu0 %v13998_v53  ;;  %13854 = vset.pattern.permute.xlu1 %v13998_v53 }
 0xaa2   :  { %v13904_v5 = vpop.eup %13903  ;;  %v7246_v21 = vxor.u32 2147483648, %v13902_v46  ;;  %v7426_v29 = vsub.s32 32, %v7425_v51  ;;  %v7430_v16 = vsub.s32 4294967266, %v7425_v51  ;;  %v7427_v28 = vshll.u32 %v17056_v48, %v7425_v51  ;;  %v17146_v48 = vpop.f32.mrf.mxu0 }
 0xaa3   :  { %v7243_v40 = vxor.u32 2147483648, %v13904_v5  ;;  %13423 = vmatprep.mubr.f32.mxu0 %v8374_v31  ;;  %v7309_v47 = vsel %vm7307_vm9, %v7308_v22, %v17116_v60  ;;  %v7122_v25 = vand.u32 2147483647, %v7121_v3  ;;  %v18792_v11 = vmov 4   ;;  %v13964_v60 = vld [vmem:[%s18609_s4 + $0xc0] sm:$0xff] }
 0xaa4   :  { %v7247_v12 = vsel %vm7245_vm14, %v7246_v21, %v13904_v5  ;;  %v7428_v20 = vshrl.u32 %v7410_v49, %v7426_v29  ;;  %v7431_v34 = vadd.s32 127, %v7430_v16  ;;  %v7310_v49 = vadd.s32 %v7309_v47, %v7305_v63  ;;  %v13961_v5 = vld [vmem:[%s18609_s4 + $0x1f8] sm:$0xff]  ;;  %v17154_v21 = vpop.f32.mrf.mxu1  ;;  %v17156_v45 = vpop.f32.mrf.mxu0  ;;  %v13967_v47 = vld [vmem:[%s18609_s4 + $0xe8] sm:$0xff] }
 0xaa5   :  { %v7244_v13 = vsel %vm7242_vm13, %v13902_v46, %v7243_v40  ;;  %v7115_v46 = vshll.u32 %v16980_v43, %v17041_v42  ;;  %8286 = vperm.xlu0 %13852, %v13961_v5   ;;  %v13962_v43 = vld [vmem:[%s18609_s4 + $0x1e8] sm:$0xff]  ;;  %vm7356_vm10 = vcmp.lt.s32.totalorder %v16871_v0, 0  ;;  %v7440_v16 = vsub.s32 4, %v17037_v15  ;;  %v17210_v5 = vld [vmem:[%s18609_s4 + $0x118] sm:$0xff] }
 0xaa6   :  { %v7248_v9 = vsel %vm7241_vm15, %v7244_v13, %v7247_v12  ;;  %v7429_v41 = vor.u32 %v7428_v20, %v7427_v28  ;;  %v7432_v10 = vshll.u32 %v7431_v34, 23  ;;  %8278 = vperm.xlu1 %13854, %v13962_v43   ;;  %v7311_v32 = vadd.s32 536870912, %v7310_v49  ;;  %v13963_v12 = vld [vmem:[%s18609_s4 + $0x1f0] sm:$0xff]  ;;  %v17170_v29 = vpop.f32.mrf.mxu0 }
 0xaa7   :  { %v17130_v44 = vsel %vm7238_vm4, nan, %v7248_v9  ;;  %v7117_v42 = vor.u32 %v7116_v35, %v7115_v46  ;;  %v17167_v9 = vpop.f32.mrf.mxu1  ;;  %vm17177_vm11 = vcmp.le.f32.partialorder %v7354_v24, 0.7853982  ;;  %v13965_v28 = vld [vmem:[%s18609_s4 + $0xf0] sm:$0xff]  ;;  %v13966_v24 = vld [vmem:[%s18609_s4 + $0x1e0] sm:$0xff]  ;;  %v17194_v46 = vpop.permute.xlu1 %7483  ;;  %vm7044_vm12 = vcmp.lt.s32.totalorder %v16863_v7, 0 }
 0xaa8   :  { %v7433_v61 = vor.u32 4788187, %v7432_v10  ;;  %v7436_v40 = vcvt.s32.f32 %v7429_v41  ;;  %v17158_v26 = vshrl.u32 %v7311_v32, 30  ;;  %v17196_v3 = vpop.f32.mrf.mxu0  ;;  %v7441_v41 = vsel %vm7356_vm10, %v7440_v16, %v17037_v15 }
 0xaa9   :  { %8282 = vperm.xlu0 %13852, %v13963_v12   ;;  %v7124_v4 = vcvt.s32.f32 %v7117_v42  ;;  %v17186_v20 = vpop.f32.mrf.mxu1  ;;  %v7443_v43 = vsel %vm17177_vm11, 0, %v7441_v41  ;;  %vm17222_vm13 = vcmp.le.f32.partialorder %v7042_v30, 0.7853982  ;;  %v17237_v30 = vld [vmem:[%s18609_s4 + $0x110] sm:$0xff]  ;;  %vm7446_vm5 = vweird.f32 %v16871_v0 }
 0xaaa   :  { %v7434_v17 = vand.u32 2147483647, %v7433_v61  ;;  %13855 = vset.pattern.permute.xlu1 %v18792_v11  ;;  %v7313_v14 = vshll.u32 %v17158_v26, 30  ;;  %v17217_v42 = vpop.f32.mrf.mxu0  ;;  %vm7252_vm6 = vcmp.lt.s32.totalorder %v16953_v39, 0  ;;  %vm17285_vm7 = vcmp.le.f32.partialorder %v7250_v2, 0.7853982 }
 0xaab   :  { %7468 = vperm.xlu1 %13855, %v13964_v60   ;;  %v7125_v51 = vmul.f32 %v7124_v4, %v7122_v25  ;;  %v7479_v32 = vpop.permute.xlu1 %7478  ;;  %v7447_v4 = vadd.s32 3, %v7443_v43 }
 0xaac   :  { %v7437_v13 = vmul.f32 %v7436_v40, %v7434_v17  ;;  %v7314_v62 = vsub.s32 %v7310_v49, %v7313_v14  ;;  %v13968_v17 = vld [vmem:[%s18609_s4 + $0xe0] sm:$0xff]  ;;  %v13363_v60 = vpop.f32.mrf.mxu0  ;;  %v7306_v14 = vadd.s32 %v17115_v52, %v17106_v55 }
 0xaad   :  { %13853 = vset.pattern.permute.xlu0 %v18792_v11  ;;  %v7126_v63 = vxor.u32 2147483648, %v7125_v51  ;;  %v7448_v35 = vand.u32 3, %v7447_v4 }
 0xaae   :  { %v7438_v38 = vxor.u32 2147483648, %v7437_v13  ;;  %7498 = vperm.xlu0 %13853, %v13965_v28   ;;  %v7316_v22 = vsub.s32 0, %v7314_v62  ;;  %v17250_v41 = vpop.f32.mrf.mxu0 }
 0xaaf   :  { %13856 = vset.pattern.permute.xlu1 %v13998_v53  ;;  %v17204_v53 = vpop.f32.mrf.mxu1  ;;  %v7127_v15 = vsel %vm7044_vm12, %v7126_v63, %v7125_v51  ;;  %v7128_v63 = vsub.s32 4, %v16970_v1  ;;  %vm7453_vm15 = vcmp.eq.s32.totalorder %v7448_v35, 2  ;;  %vm7449_vm1 = vcmp.lt.s32.totalorder %v7448_v35, 2 }
 0xab0   :  { %v7439_v31 = vsel %vm7356_vm10, %v7438_v38, %v7437_v13  ;;  %8274 = vperm.xlu1 %13856, %v13966_v24   ;;  %v11762_v10 = vmin.u32 %v7316_v22, %v7314_v62  ;;  %v7130_v12 = vsel %vm17222_vm13, %v16863_v7, %v7127_v15  ;;  %v17245_v22 = vld [vmem:[%s18609_s4 + $0x138] sm:$0xff]  ;;  %v17247_v24 = vpop.permute.xlu1 %7503  ;;  %vm7450_vm4 = vcmp.eq.s32.totalorder %v7448_v35, 0  ;;  %v17263_v4 = vpop.f32.mrf.mxu0 }
 0xab1   :  { %v7442_v34 = vsel %vm17177_vm11, %v16871_v0, %v7439_v31  ;;  %v17229_v40 = vpop.f32.mrf.mxu1  ;;  %v7336_v0 = vsub.s32 4, %v17158_v26  ;;  %vm7134_vm11 = vweird.f32 %v16863_v7 }
 0xab2   :  { %13905 = vcosq.f32 %v7442_v34  ;;  %7493 = vperm.xlu0 %13853, %v13967_v47   ;;  %v7318_v49 = vclz %v11762_v10 }
 0xab3   :  { %13907 = vsinq.f32 %v7442_v34  ;;  %v13377_v16 = vpop.f32.mrf.mxu1 }
 0xab4   :  { %13857 = vset.pattern.permute.xlu1 %v18792_v11  ;;  %v11763_v61 = vadd.s32 4294967294, %v7318_v49  ;;  %13909 = vcosq.f32 %v7130_v12 }
 0xab5   :  { %9364 = vperm.xlu1 %13857, %v17210_v5   ;;  %13911 = vsinq.f32 %v7130_v12  ;;  %v17253_v49 = vpop.f32.mrf.mxu1 }
 0xab6   :  { %7488 = vperm.xlu0 %13853, %v13968_v17   ;;  %vm11764_vm14 = vcmp.lt.s32.totalorder %v11763_v61, 0  ;;  %v7129_v17 = vsel %vm7044_vm12, %v7128_v63, %v16970_v1 }
 0xab7   :  { %v7321_v13 = vsel %vm11764_vm14, 0, %v11763_v61  ;;  %v17258_v61 = vld [vmem:[%s18609_s4 + $0x108] sm:$0xff] }
 0xab8   :  { %v7322_v51 = vsub.s32 32, %v7321_v13  ;;  %v7326_v38 = vsub.s32 4294967266, %v7321_v13  ;;  %v7323_v31 = vshll.u32 %v7314_v62, %v7321_v13 }
 0xab9   :  { %9359 = vperm.xlu1 %13857, %v17237_v30  }
 0xaba   :  { %v7324_v28 = vshrl.u32 %v7306_v14, %v7322_v51  ;;  %v7327_v34 = vadd.s32 127, %v7326_v38  ;;  %v7615_v38 = vadd.f32 %v17146_v48, %v7479_v32  ;;  %v7870_v48 = vpop.f32.mrf.mxu0 }
 0xabc   :  { %v7325_v52 = vor.u32 %v7324_v28, %v7323_v31  ;;  %v7328_v10 = vshll.u32 %v7327_v34, 23  ;;  %v7474_v31 = vpop.permute.xlu1 %7473  ;;  %v7753_v63 = vadd.f32 %v17154_v21, %v7615_v38  ;;  %v8270_v38 = vld [vmem:[%s18609_s4 + $0x1a8] sm:$0xff] }
 0xabd   :  { %9384 = vperm.xlu1 %13857, %v17245_v22   ;;  %v7605_v34 = vadd.f32 %v17108_v56, %v7474_v31 }
 0xabe   :  { %v7329_v43 = vor.u32 4788187, %v7328_v10  ;;  %v7332_v51 = vcvt.s32.f32 %v7325_v52  ;;  %v17269_v10 = vpop.f32.mrf.mxu1 }
 0xabf   :  { %v13906_v55 = vpop.eup %13905  ;;  %v7747_v52 = vadd.f32 %v17110_v6, %v7605_v34 }
 0xac0   :  { %v13908_v62 = vpop.eup %13907  ;;  %v7454_v47 = vxor.u32 2147483648, %v13906_v55  ;;  %v7330_v14 = vand.u32 2147483647, %v7329_v43 }
 0xac1   :  { %v7451_v15 = vxor.u32 2147483648, %v13908_v62  ;;  %9354 = vperm.xlu1 %13857, %v17258_v61   ;;  %v7864_v21 = vadd.f32 %v13363_v60, %v7747_v52  ;;  %v13910_v25 = vpop.eup %13909  ;;  %v8272_v52 = vld [vmem:[%s18609_s4 + $0x1b8] sm:$0xff] }
 0xac2   :  { %v7455_v12 = vsel %vm7453_vm15, %v7454_v47, %v13908_v62  ;;  %v7333_v35 = vmul.f32 %v7332_v51, %v7330_v14  ;;  %v7131_v62 = vsel %vm17222_vm13, 0, %v7129_v17  ;;  %v7871_v47 = vadd.f32 %v7870_v48, %v7753_v63  ;;  %v13912_v2 = vpop.eup %13911 }
 0xac3   :  { %v7452_v13 = vsel %vm7450_vm4, %v13906_v55, %v7451_v15  ;;  %v7995_v15 = vpop.f32.mrf.mxu1  ;;  %v7135_v43 = vadd.s32 3, %v7131_v62  ;;  %v17300_v14 = vadd.f32 %v13377_v16, %v7864_v21  ;;  %v7337_v51 = vsel %vm7252_vm6, %v7336_v0, %v17158_v26  ;;  %v8271_v16 = vld [vmem:[%s18609_s4 + $0x1b0] sm:$0xff] }
 0xac4   :  { %v7456_v28 = vsel %vm7449_vm1, %v7452_v13, %v7455_v12  ;;  %v7334_v32 = vxor.u32 2147483648, %v7333_v35  ;;  %v17292_v12 = vadd.f32 %v7995_v15, %v7871_v47  ;;  %v7139_v34 = vxor.u32 2147483648, %v13912_v2 }
 0xac5   :  { %v7457_v1 = vsel %vm7446_vm5, nan, %v7456_v28  ;;  %v7136_v28 = vand.u32 3, %v7135_v43  ;;  %v7339_v63 = vsel %vm17285_vm7, 0, %v7337_v51  ;;  %v8293_v26 = vsel %vm4526_vm2, %v8270_v38, 0 }
 0xac6   :  { %v17274_v55 = vand.u32 4294901760, %v7457_v1  ;;  %v7335_v17 = vsel %vm7252_vm6, %v7334_v32, %v7333_v35  ;;  %18799 = vst [vmem:[#allocation10_spill] sm:$0xff] %v17292_v12  ;;  %v8296_v62 = vsel %vm4526_vm2, %v8271_v16, 0  ;;  %v7343_v47 = vadd.s32 3, %v7339_v63 }
 0xac7   :  { %v7338_v60 = vsel %vm17285_vm7, %v16953_v39, %v7335_v17  ;;  %vm7138_vm8 = vcmp.eq.s32.totalorder %v7136_v28, 0  ;;  %vm7141_vm9 = vcmp.eq.s32.totalorder %v7136_v28, 2  ;;  %v17320_v0 = vand.u32 4294901760, %v8293_v26 }
 0xac8   :  { %13415 = vmatprep.subr.mxu0 %v17274_v55  ;;  %v17281_v56 = vsub.f32 %v7457_v1, %v17274_v55  ;;  %13913 = vcosq.f32 %v7338_v60  ;;  %v7142_v1 = vxor.u32 2147483648, %v13910_v25  ;;  %v7140_v48 = vsel %vm7138_vm8, %v13910_v25, %v7139_v34 }
 0xac9   :  { %13416 = vmatpush3.msra.mxu0 %v17274_v55  ;;  %13915 = vsinq.f32 %v7338_v60  ;;  %vm7137_vm10 = vcmp.lt.s32.totalorder %v7136_v28, 2  ;;  %v17322_v21 = vand.u32 4294901760, %v8296_v62  ;;  %v8299_v15 = vsel %vm4526_vm2, %v8272_v52, 0 }
 0xaca   :  { %v17298_v13 = vand.u32 4294901760, %v17281_v56  ;;  %v7143_v32 = vsel %vm7141_vm9, %v7142_v1, %v13912_v2  ;;  %v7344_v6 = vand.u32 3, %v7343_v47  ;;  %v17326_v17 = vsub.f32 %v8293_v26, %v17320_v0 }
 0xacb   :  { %v7144_v43 = vsel %vm7137_vm10, %v7140_v48, %v7143_v32  ;;  %v17329_v60 = vand.u32 4294901760, %v8299_v15  ;;  %v17332_v2 = vsub.f32 %v8296_v62, %v17322_v21  ;;  %vm7342_vm15 = vweird.f32 %v16953_v39 }
 0xacc   :  { %v8438_v31 = vsub.f32 %v17281_v56, %v17298_v13  ;;  %v7145_v25 = vsel %vm7134_vm11, nan, %v7144_v43  ;;  %vm7349_vm12 = vcmp.eq.s32.totalorder %v7344_v6, 2  ;;  %v8382_v1 = vand.u32 4294901760, %v17326_v17 }
 0xacd   :  { %vm7346_vm13 = vcmp.eq.s32.totalorder %v7344_v6, 0  ;;  %v17341_v16 = vsub.f32 %v8299_v15, %v17329_v60  ;;  %vm7345_vm14 = vcmp.lt.s32.totalorder %v7344_v6, 2  ;;  %v8392_v26 = vand.u32 4294901760, %v17332_v2 }
 0xace   :  { %v8439_v35 = vand.u32 4294901760, %v8438_v31  ;;  %v17335_v31 = vand.u32 4294901760, %v17130_v44  ;;  %v8383_v47 = vsub.f32 %v17326_v17, %v8382_v1 }
 0xacf   :  { %v18660_v15 = vand.u32 4294901760, %v17341_v16  ;;  %v8393_v6 = vsub.f32 %v17332_v2, %v8392_v26 }
 0xad0   :  { %13429 = vmatprep.subr.mxu1 %v8439_v35  ;;  %v8450_v52 = vsub.f32 %v17130_v44, %v17335_v31 }
 0xad1   :  { %13430 = vmatpush3.msra.mxu1 %v8439_v35  ;;  %v17338_v35 = vand.u32 4294901760, %v7145_v25 }
 0xad2   :  { %v17359_v44 = vand.u32 4294901760, %v8450_v52 }
 0xad3   :  { %v8457_v43 = vsub.f32 %v7145_v25, %v17338_v35  ;;  %v8403_v25 = vsub.f32 %v17341_v16, %v18660_v15  ;;  %v9339_v15 = vld [vmem:[%s18609_s4 + $0x100] sm:$0xff] }
 0xad5   :  { %v13914_v51 = vpop.eup %13913 }
 0xad6   :  { %v13916_v38 = vpop.eup %13915  ;;  %v7350_v28 = vxor.u32 2147483648, %v13914_v51 }
 0xad7   :  { %v7347_v34 = vxor.u32 2147483648, %v13916_v38 }
 0xad8   :  { %v7351_v7 = vsel %vm7349_vm12, %v7350_v28, %v13916_v38  ;;  %v17366_v28 = vand.u32 4294901760, %v8457_v43 }
 0xad9   :  { %v7348_v63 = vsel %vm7346_vm13, %v13914_v51, %v7347_v34  ;;  %v8384_v51 = vand.u32 4294901760, %v8383_v47  ;;  %v8394_v34 = vand.u32 4294901760, %v8393_v6 }
 0xada   :  { %v7352_v62 = vsel %vm7345_vm14, %v7348_v63, %v7351_v7  ;;  %v8452_v63 = vsub.f32 %v8450_v52, %v17359_v44  ;;  %v8459_v47 = vsub.f32 %v8457_v43, %v17366_v28 }
 0xadb   :  { %v7353_v48 = vsel %vm7342_vm15, nan, %v7352_v62 }
 0xadc   :  { %v17347_v32 = vand.u32 4294901760, %v7353_v48  ;;  %v8453_v6 = vand.u32 4294901760, %v8452_v63  ;;  %v9345_v63 = vld [vmem:[%s18609_s4 + $0x130] sm:$0xff] }
 0xade   :  { %13417 = vmatprep.subr.mxu0 %v17347_v32  ;;  %v8443_v39 = vsub.f32 %v7353_v48, %v17347_v32  ;;  %v8404_v48 = vand.u32 4294901760, %v8403_v25  ;;  %v9387_v25 = vsel %vm1906_vm3, %v9339_v15, 0  ;;  %v9343_v15 = vld [vmem:[%s18609_s4 + $0x120] sm:$0xff] }
 0xadf   :  { %13418 = vmatpush3.msra.mxu0 %v17347_v32 }
 0xae0   :  { %13419 = vmatprep.subr.mxu0 %v17335_v31  ;;  %v8444_v38 = vand.u32 4294901760, %v8443_v39 }
 0xae1   :  { %13420 = vmatpush3.msra.mxu0 %v17335_v31 }
 0xae2   :  { %13421 = vmatprep.subr.mxu0 %v17338_v35  ;;  %v8445_v7 = vsub.f32 %v8443_v39, %v8444_v38 }
 0xae3   :  { %13422 = vmatpush3.msra.mxu0 %v17338_v35 }
 0xae4   :  { %13424 = vmatmul.mubr.f32.vlgmr.msra.gmra.mxu0 %v8384_v51  ;;  %13443 = vmatprep.subr.mxu0 %v17281_v56  ;;  %v8446_v62 = vand.u32 4294901760, %v8445_v7  ;;  %v8460_v51 = vand.u32 4294901760, %v8459_v47  ;;  %v9395_v7 = vsel %vm1906_vm3, %v9343_v15, 0 }
 0xae5   :  { %13444 = vmatpush3.msra.mxu0 %v17281_v56  ;;  %13426 = vmatprep.mubr.f32.mxu0 %v8394_v34  ;;  %v9389_v56 = vsel %vm1906_vm3, %v17258_v61, 0  ;;  %v9391_v61 = vsel %vm1906_vm3, %v17237_v30, 0 }
 0xae6   :  { %13431 = vmatprep.subr.mxu1 %v8446_v62  ;;  %13445 = vmatprep.subr.mxu0 %v8443_v39 }
 0xae7   :  { %13432 = vmatpush3.msra.mxu1 %v8446_v62  ;;  %13446 = vmatpush3.msra.mxu0 %v8443_v39  ;;  %v17384_v39 = vand.u32 4294901760, %v9387_v25 }
 0xae8   :  { %13427 = vmatmul.mubr.f32.gmra.mxu0 %v8404_v48  ;;  %13433 = vmatprep.subr.mxu1 %v8453_v6 }
 0xae9   :  { %13447 = vmatprep.subr.mxu0 %v8450_v52  ;;  %13434 = vmatpush3.msra.mxu1 %v8453_v6  ;;  %v17403_v34 = vsub.f32 %v9387_v25, %v17384_v39  ;;  %v9399_v6 = vsel %vm1906_vm3, %v9345_v63, 0  ;;  %v18802_v63 = vand.u32 4294901760, %v17341_v16 }
 0xaea   :  { %13448 = vmatpush3.msra.mxu0 %v8450_v52  ;;  %13435 = vmatprep.subr.mxu1 %v8460_v51  ;;  %v17388_v52 = vand.u32 4294901760, %v9389_v56 }
 0xaeb   :  { %13449 = vmatprep.subr.mxu0 %v8457_v43  ;;  %13436 = vmatpush3.msra.mxu1 %v8460_v51  ;;  %v18662_v47 = vand.u32 4294901760, %v17403_v34 }
 0xaec   :  { %13450 = vmatpush3.msra.mxu0 %v8457_v43  ;;  %13451 = vmatprep.mubr.f32.mxu0 %v17079_v59  ;;  %v9393_v43 = vsel %vm1906_vm3, %v17210_v5, 0  ;;  %v17411_v30 = vsub.f32 %v9389_v56, %v17388_v52  ;;  %v17413_v5 = vand.u32 4294901760, %v9391_v61 }
 0xaed   :  { %13438 = vmatmul.mubr.f32.vlgmr.msra.gmra.mxu1 %v17320_v0  ;;  %13452 = vmatmul.mubr.f32.vlgmr.msra.gmra.mxu0 %v17326_v17  ;;  %v17420_v62 = vand.u32 4294901760, %v9393_v43  ;;  %v9472_v59 = vsub.f32 %v17403_v34, %v18662_v47 }
 0xaee   :  { %13457 = vmatprep.subr.mxu1 %v17274_v55  ;;  %13471 = vmatprep.subr.mxu0 %v17298_v13  ;;  %v18661_v51 = vand.u32 4294901760, %v17411_v30  ;;  %v17435_v25 = vsub.f32 %v9391_v61, %v17413_v5  ;;  %v9401_v61 = vsel %vm1906_vm3, %v17245_v22, 0 }
 0xaef   :  { %13458 = vmatpush3.msra.mxu1 %v17274_v55  ;;  %13472 = vmatpush3.msra.mxu0 %v17298_v13  ;;  %v9344_v13 = vld [vmem:[%s18609_s4 + $0x128] sm:$0xff] }
 0xaf0   :  { %13459 = vmatprep.subr.mxu1 %v17347_v32  ;;  %13473 = vmatprep.subr.mxu0 %v8444_v38  ;;  %v9397_v48 = vsel %vm1906_vm3, %v9344_v13, 0  ;;  %v17450_v13 = vand.u32 4294901760, %v9399_v6 }
 0xaf1   :  { %13440 = vmatprep.mubr.f32.mxu1 %v17322_v21  ;;  %13454 = vmatprep.mubr.f32.mxu0 %v17332_v2  ;;  %v17443_v56 = vand.u32 4294901760, %v9397_v48 }
 0xaf2   :  { %13460 = vmatpush3.msra.mxu1 %v17347_v32  ;;  %13474 = vmatpush3.msra.mxu0 %v8444_v38  ;;  %v17424_v38 = vand.u32 4294901760, %v9395_v7 }
 0xaf3   :  { %13441 = vmatmul.mubr.f32.gmra.mxu1 %v17329_v60  ;;  %13455 = vmatmul.mubr.f32.gmra.mxu0 %v17341_v16  ;;  %v17470_v17 = vsub.f32 %v9397_v48, %v17443_v56 }
 0xaf4   :  { %13461 = vmatprep.subr.mxu1 %v17335_v31  ;;  %13475 = vmatprep.subr.mxu0 %v17359_v44  ;;  %v17448_v15 = vsub.f32 %v9395_v7, %v17424_v38  ;;  %v18801_v7 = vld [vmem:[#allocation3_spill] sm:$0xff] }
 0xaf5   :  { %13462 = vmatpush3.msra.mxu1 %v17335_v31  ;;  %13476 = vmatpush3.msra.mxu0 %v17359_v44  ;;  %v17441_v44 = vsub.f32 %v9393_v43, %v17420_v62  ;;  %v9491_v43 = vand.u32 4294901760, %v17435_v25 }
 0xaf6   :  { %13463 = vmatprep.subr.mxu1 %v17338_v35  ;;  %13477 = vmatprep.subr.mxu0 %v17366_v28 }
 0xaf7   :  { %13464 = vmatpush3.msra.mxu1 %v17338_v35  ;;  %13465 = vmatprep.mubr.f32.mxu1 %v8372_v50  ;;  %v18800_v50 = vld [vmem:[#allocation2_spill] sm:$0xff]  ;;  %v18663_v22 = vand.u32 4294901760, %v17441_v44  ;;  %v9492_v47 = vsub.f32 %v17435_v25, %v9491_v43 }
 0xaf8   :  { %13478 = vmatpush3.msra.mxu0 %v17366_v28  ;;  %13479 = vmatprep.mubr.f32.mxu0 %v17018_v57  ;;  %v9482_v28 = vsub.f32 %v17411_v30, %v18661_v51  ;;  %v17478_v51 = vsub.f32 %v9399_v6, %v17450_v13  ;;  %v18803_v6 = vand.u32 4294901760, %v17448_v15 }
 0xaf9   :  { %13466 = vmatmul.mubr.f32.vlgmr.msra.gmra.mxu1 %v8382_v1  ;;  %13480 = vmatmul.mubr.f32.vlgmr.msra.gmra.mxu0 %v17320_v0  ;;  %v17472_v1 = vand.u32 4294901760, %v9401_v61  ;;  %v9502_v2 = vsub.f32 %v17441_v44, %v18663_v22  ;;  %v18805_v22 = vld [vmem:[#allocation4_spill] sm:$0xff] }
 0xafa   :  { %13485 = vmatprep.subr.mxu1 %v17274_v55  ;;  %13499 = vmatprep.subr.mxu0 %v18800_v50  ;;  %v9483_v48 = vand.u32 4294901760, %v9482_v28  ;;  %v9512_v16 = vsub.f32 %v17448_v15, %v18803_v6  ;;  %v9493_v28 = vand.u32 4294901760, %v9492_v47 }
 0xafb   :  { %13486 = vmatpush3.msra.mxu1 %v17274_v55  ;;  %13500 = vmatpush3.msra.mxu0 %v18800_v50  ;;  %v9473_v55 = vand.u32 4294901760, %v9472_v59  ;;  %v9531_v59 = vand.u32 4294901760, %v17478_v51 }
 0xafc   :  { %13487 = vmatprep.subr.mxu1 %v17347_v32  ;;  %13527 = vmatprep.subr.mxu0 %v18801_v7  ;;  %v9513_v6 = vand.u32 4294901760, %v9512_v16 }
 0xafd   :  { %13468 = vmatprep.mubr.f32.mxu1 %v8392_v26  ;;  %13482 = vmatprep.mubr.f32.mxu0 %v17322_v21  ;;  %v9521_v26 = vand.u32 4294901760, %v17470_v17 }
 0xafe   :  { %13488 = vmatpush3.msra.mxu1 %v17347_v32  ;;  %13483 = vmatmul.mubr.f32.gmra.mxu0 %v17329_v60  ;;  %v17496_v32 = vsub.f32 %v9401_v61, %v17472_v1  ;;  %v18804_v61 = vld [vmem:[#allocation5_spill] sm:$0xff] }
 0xaff   :  { %13469 = vmatmul.mubr.f32.gmra.mxu1 %v18802_v63  ;;  %13489 = vmatprep.subr.mxu1 %v17335_v31 }
 0xb00   :  { %13490 = vmatpush3.msra.mxu1 %v17335_v31  ;;  %13493 = vmatprep.mubr.f32.mxu1 %v17018_v57  ;;  %v9503_v31 = vand.u32 4294901760, %v9502_v2  ;;  %v9522_v57 = vsub.f32 %v17470_v17, %v9521_v26  ;;  %v9541_v63 = vand.u32 4294901760, %v17496_v32 }
 0xb01   :  { %13491 = vmatprep.subr.mxu1 %v17338_v35  ;;  %13501 = vmatprep.mubr.f32.mxu0 %v9473_v55  ;;  %v9532_v55 = vsub.f32 %v17478_v51, %v9531_v59 }
 0xb02   :  { %13492 = vmatpush3.msra.mxu1 %v17338_v35  ;;  %13502 = vmatmul.mubr.f32.vlgmr.msra.gmra.mxu0 %v9483_v48  ;;  %v9542_v35 = vsub.f32 %v17496_v32, %v9541_v63 }
 0xb03   :  { %13494 = vmatmul.mubr.f32.vlgmr.msra.gmra.mxu1 %v17320_v0  ;;  %13513 = vmatprep.subr.mxu1 %v18804_v61  ;;  %v9523_v0 = vand.u32 4294901760, %v9522_v57  ;;  %v9533_v47 = vand.u32 4294901760, %v9532_v55 }
 0xb04   :  { %13528 = vmatpush3.msra.mxu0 %v18801_v7  ;;  %13514 = vmatpush3.msra.mxu1 %v18804_v61  ;;  %v9543_v7 = vand.u32 4294901760, %v9542_v35 }
 0xb05   :  { %13555 = vmatprep.subr.mxu0 %v18805_v22  ;;  %13541 = vmatprep.subr.mxu1 %v18800_v50 }
 0xb06   :  { %13496 = vmatprep.mubr.f32.mxu1 %v17322_v21  ;;  %13504 = vmatprep.mubr.f32.mxu0 %v9493_v28  ;;  %v18806_v21 = vand.u32 4294901760, %v17403_v34 }
 0xb07   :  { %13497 = vmatmul.mubr.f32.gmra.mxu1 %v17329_v60  ;;  %13505 = vmatmul.mubr.f32.gmra.mxu0 %v9503_v31  ;;  %v18807_v60 = vand.u32 4294901760, %v17411_v30 }
 0xb08   :  { %13507 = vmatprep.mubr.f32.mxu0 %v9513_v6  ;;  %13515 = vmatprep.mubr.f32.mxu1 %v17384_v39 }
 0xb0b   :  { %13508 = vmatmul.mubr.f32.gmra.mxu0 %v9523_v0  ;;  %13516 = vmatmul.mubr.f32.vlgmr.msra.gmra.mxu1 %v17388_v52 }
 0xb0c   :  { %13542 = vmatpush3.msra.mxu1 %v18800_v50  ;;  %13510 = vmatprep.mubr.f32.mxu0 %v9533_v47 }
 0xb0d   :  { %13569 = vmatprep.subr.mxu1 %v18800_v50  ;;  %13518 = vmatprep.mubr.f32.mxu1 %v17413_v5 }
 0xb0f   :  { %13511 = vmatmul.mubr.f32.gmra.mxu0 %v9543_v7  ;;  %13519 = vmatmul.mubr.f32.gmra.mxu1 %v17420_v62 }
 0xb10   :  { %13521 = vmatprep.mubr.f32.mxu1 %v17424_v38  ;;  %13529 = vmatprep.mubr.f32.mxu0 %v17403_v34  ;;  %v18809_v34 = vand.u32 4294901760, %v17448_v15 }
 0xb13   :  { %13522 = vmatmul.mubr.f32.gmra.mxu1 %v17443_v56  ;;  %13530 = vmatmul.mubr.f32.vlgmr.msra.gmra.mxu0 %v17411_v30 }
 0xb14   :  { %13556 = vmatpush3.msra.mxu0 %v18805_v22  ;;  %13524 = vmatprep.mubr.f32.mxu1 %v17450_v13  ;;  %v18808_v22 = vand.u32 4294901760, %v17441_v44 }
 0xb15   :  { %13532 = vmatprep.mubr.f32.mxu0 %v17435_v25 }
 0xb17   :  { %13525 = vmatmul.mubr.f32.gmra.mxu1 %v17472_v1  ;;  %13533 = vmatmul.mubr.f32.gmra.mxu0 %v17441_v44 }
 0xb18   :  { %13543 = vmatprep.mubr.f32.mxu1 %v18806_v21  ;;  %13535 = vmatprep.mubr.f32.mxu0 %v17448_v15 }
 0xb1b   :  { %13544 = vmatmul.mubr.f32.vlgmr.msra.gmra.mxu1 %v18807_v60  ;;  %13536 = vmatmul.mubr.f32.gmra.mxu0 %v17470_v17 }
 0xb1c   :  { %13570 = vmatpush3.msra.mxu1 %v18800_v50  ;;  %13546 = vmatprep.mubr.f32.mxu1 %v9491_v43 }
 0xb1d   :  { %13538 = vmatprep.mubr.f32.mxu0 %v17478_v51 }
 0xb1f   :  { %13547 = vmatmul.mubr.f32.gmra.mxu1 %v18808_v22  ;;  %13539 = vmatmul.mubr.f32.gmra.mxu0 %v17496_v32 }
 0xb20   :  { %13549 = vmatprep.mubr.f32.mxu1 %v18809_v34  ;;  %13557 = vmatprep.mubr.f32.mxu0 %v17384_v39  ;;  %v8287_v48 = vpop.permute.xlu0 %8286 }
 0xb21   :  { %v8279_v55 = vpop.permute.xlu1 %8278 }
 0xb23   :  { %13550 = vmatmul.mubr.f32.gmra.mxu1 %v9521_v26  ;;  %13558 = vmatmul.mubr.f32.vlgmr.msra.gmra.mxu0 %v17388_v52 }
 0xb24   :  { %13552 = vmatprep.mubr.f32.mxu1 %v9531_v59  ;;  %13560 = vmatprep.mubr.f32.mxu0 %v17413_v5  ;;  %v8283_v59 = vpop.permute.xlu0 %8282 }
 0xb26   :  { %v7469_v22 = vpop.permute.xlu1 %7468 }
 0xb27   :  { %13553 = vmatmul.mubr.f32.gmra.mxu1 %v9541_v63  ;;  %13561 = vmatmul.mubr.f32.gmra.mxu0 %v17420_v62  ;;  %v7595_v36 = vadd.f32 %v17124_v58, %v7469_v22  ;;  %v7665_v58 = vadd.f32 %v17196_v3, %v17247_v24 }
 0xb28   :  { %13571 = vmatprep.mubr.f32.mxu1 %v17384_v39  ;;  %13563 = vmatprep.mubr.f32.mxu0 %v17424_v38  ;;  %v13369_v39 = vpop.f32.mrf.mxu0 }
 0xb29   :  { %v7499_v57 = vpop.permute.xlu0 %7498 }
 0xb2b   :  { %13572 = vmatmul.mubr.f32.vlgmr.msra.gmra.mxu1 %v17388_v52  ;;  %13564 = vmatmul.mubr.f32.gmra.mxu0 %v17443_v56  ;;  %v17564_v52 = vpop.f32.mrf.mxu0 }
 0xb2c   :  { %13574 = vmatprep.mubr.f32.mxu1 %v17413_v5  ;;  %13566 = vmatprep.mubr.f32.mxu0 %v17450_v13  ;;  %v17568_v5 = vpop.f32.mrf.mxu1 }
 0xb2d   :  { %v17566_v30 = vpop.f32.mrf.mxu0  ;;  %v7494_v7 = vpop.permute.xlu0 %7493 }
 0xb2e   :  { %v7645_v23 = vadd.f32 %v17156_v45, %v7494_v7 }
 0xb2f   :  { %13575 = vmatmul.mubr.f32.gmra.mxu1 %v17420_v62  ;;  %13567 = vmatmul.mubr.f32.gmra.mxu0 %v17472_v1  ;;  %v17570_v51 = vpop.f32.mrf.mxu0  ;;  %v17572_v62 = vpop.f32.mrf.mxu1 }
 0xb30   :  { %13577 = vmatprep.mubr.f32.mxu1 %v17424_v38  ;;  %18810 = vst [vmem:[#allocation7_spill] sm:$0xff] %v17570_v51  ;;  %v7771_v12 = vadd.f32 %v17167_v9, %v7645_v23 }
 0xb31   :  { %v17574_v25 = vpop.f32.mrf.mxu0  ;;  %v17576_v38 = vpop.f32.mrf.mxu1 }
 0xb32   :  { %v7489_v19 = vpop.permute.xlu0 %7488 }
 0xb33   :  { %13578 = vmatmul.mubr.f32.gmra.mxu1 %v17443_v56  ;;  %v17578_v44 = vpop.f32.mrf.mxu0  ;;  %v17580_v56 = vpop.f32.mrf.mxu1 }
 0xb34   :  { %13580 = vmatprep.mubr.f32.mxu1 %v17450_v13  ;;  %18811 = vst [vmem:[#allocation12_spill] sm:$0xff] %v17580_v56  ;;  %v8275_v56 = vpop.permute.xlu1 %8274 }
 0xb35   :  { %v17582_v15 = vpop.f32.mrf.mxu0  ;;  %v17584_v13 = vpop.f32.mrf.mxu1 }
 0xb37   :  { %13581 = vmatmul.mubr.f32.gmra.mxu1 %v17472_v1  ;;  %v17586_v50 = vpop.f32.mrf.mxu0  ;;  %v17588_v43 = vpop.f32.mrf.mxu1 }
 0xb38   :  { %18812 = vst [vmem:[#allocation9_spill] sm:$0xff] %v17586_v50 }
 0xb39   :  { %v17590_v17 = vpop.f32.mrf.mxu0  ;;  %v17592_v1 = vpop.f32.mrf.mxu1 }
 0xb3b   :  { %v17594_v2 = vpop.f32.mrf.mxu0  ;;  %v17596_v26 = vpop.f32.mrf.mxu1 }
 0xb3c   :  { %18813 = vst [vmem:[#allocation13_spill] sm:$0xff] %v17596_v26  ;;  %v7741_v26 = vadd.f32 %v17126_v8, %v7595_v36  ;;  %v7892_v8 = vadd.f32 %v13369_v39, %v7771_v12 }
 0xb3d   :  { %v17598_v32 = vpop.f32.mrf.mxu0  ;;  %v17600_v16 = vpop.f32.mrf.mxu1 }
 0xb3f   :  { %v17602_v28 = vpop.f32.mrf.mxu0  ;;  %v17604_v61 = vpop.f32.mrf.mxu1 }
 0xb40   :  { %18814 = vst [vmem:[#allocation17_spill] sm:$0xff] %v17602_v28  ;;  %v7625_v28 = vadd.f32 %v17136_v37, %v17194_v46  ;;  %v7857_v37 = vadd.f32 %v17250_v41, %v7741_v26 }
 0xb41   :  { %v17606_v6 = vpop.f32.mrf.mxu1 }
 0xb42   :  { %18815 = vst [vmem:[#allocation20_spill] sm:$0xff] %v17606_v6  ;;  %v7980_v24 = vadd.f32 %v17253_v49, %v7857_v37 }
 0xb43   :  { %v17608_v47 = vpop.f32.mrf.mxu1 }
 0xb44   :  { %18816 = vst [vmem:[#allocation15_spill] sm:$0xff] %v17608_v47  ;;  %v7635_v47 = vadd.f32 %v17170_v29, %v7489_v19  ;;  %v7783_v29 = vadd.f32 %v17204_v53, %v7665_v58  ;;  %v8116_v53 = vadd.f32 %v17574_v25, %v17300_v14 }
 0xb46   :  { %v7906_v41 = vadd.f32 %v17566_v30, %v7783_v29  ;;  %v7655_v30 = vadd.f32 %v17217_v42, %v7499_v57 }
 0xba4   :  { %v13425_v31 = vpop.f32.mrf.mxu0 }
 0xba5   :  { %v8387_v18 = vadd.f32 %v13425_v31, %v8279_v55  ;;  %v7759_v31 = vadd.f32 %v17140_v27, %v7625_v28  ;;  %v7765_v55 = vadd.f32 %v17186_v20, %v7635_v47  ;;  %v8020_v27 = vadd.f32 %v17568_v5, %v7892_v8 }
 0xba6   :  { %v8376_v63 = vpop.f32.mrf.mxu0 }
 0xba7   :  { %v8377_v45 = vadd.f32 %v8376_v63, %v8275_v56  ;;  %v7878_v3 = vadd.f32 %v17263_v4, %v7759_v31  ;;  %v8110_v4 = vadd.f32 %v17578_v44, %v7980_v24  ;;  %v8140_v5 = vadd.f32 %v17590_v17, %v8020_v27 }
 0xba8   :  { %v13428_v0 = vpop.f32.mrf.mxu0 }
 0xba9   :  { %v8407_v7 = vadd.f32 %v13428_v0, %v8287_v48 }
 0xbaa   :  { %v8396_v35 = vpop.f32.mrf.mxu0 }
 0xbad   :  { %v13439_v21 = vpop.f32.mrf.mxu1  ;;  %v13453_v60 = vpop.f32.mrf.mxu0 }
 0xbae   :  { %v8504_v6 = vadd.f32 %v13439_v21, %v8387_v18  ;;  %v7885_v18 = vadd.f32 %v17564_v52, %v7765_v55 }
 0xbaf   :  { %v8497_v34 = vpop.f32.mrf.mxu1  ;;  %v8595_v11 = vpop.f32.mrf.mxu0 }
 0xbb0   :  { %v8498_v19 = vadd.f32 %v8497_v34, %v8377_v45  ;;  %v8603_v9 = vadd.f32 %v13453_v60, %v8504_v6  ;;  %v8012_v49 = vadd.f32 %v17572_v62, %v7885_v18  ;;  %v8036_v6 = vadd.f32 %v17576_v38, %v7906_v41 }
 0xbb1   :  { %v8224_v62 = vadd.f32 %v17588_v43, %v8110_v4  ;;  %v7777_v38 = vadd.f32 %v17229_v40, %v7655_v30 }
 0xbb2   :  { %v8596_v20 = vadd.f32 %v8595_v11, %v8498_v19  ;;  %v8397_v11 = vadd.f32 %v8396_v35, %v8283_v59  ;;  %v8134_v17 = vadd.f32 %v17594_v2, %v8012_v49  ;;  %v8254_v35 = vadd.f32 %v17600_v16, %v8140_v5  ;;  %v18823_v5 = vld [vmem:[#allocation17_spill] sm:$0xff] }
 0xbb3   :  { %v13442_v54 = vpop.f32.mrf.mxu1  ;;  %v13456_v33 = vpop.f32.mrf.mxu0  ;;  %v8152_v21 = vadd.f32 %v17598_v32, %v8036_v6  ;;  %v18817_v32 = vld [vmem:[#allocation7_spill] sm:$0xff] }
 0xbb4   :  { %v8516_v51 = vadd.f32 %v13442_v54, %v8407_v7  ;;  %v8004_v54 = vadd.f32 %v17269_v10, %v7878_v3  ;;  %v8248_v2 = vadd.f32 %v17604_v61, %v8134_v17  ;;  %v7899_v55 = vadd.f32 %v18817_v32, %v7777_v38  ;;  %v18820_v3 = vld [vmem:[#allocation9_spill] sm:$0xff] }
 0xbb5   :  { %v8509_v50 = vpop.f32.mrf.mxu1  ;;  %v8609_v22 = vpop.f32.mrf.mxu0 }
 0xbb6   :  { %v8617_v48 = vadd.f32 %v13456_v33, %v8516_v51  ;;  %v8230_v33 = vadd.f32 %v17584_v13, %v8116_v53  ;;  %v8510_v51 = vadd.f32 %v8509_v50, %v8397_v11  ;;  %v8128_v44 = vadd.f32 %v17582_v15, %v8004_v54  ;;  %v18822_v54 = vld [vmem:[#allocation13_spill] sm:$0xff] }
 0xbb8   :  { %v8610_v50 = vadd.f32 %v8609_v22, %v8510_v51  ;;  %v8242_v43 = vadd.f32 %v17592_v1, %v8128_v44  ;;  %v18818_v22 = vld [vmem:[#allocation20_spill] sm:$0xff]  ;;  %v18824_v51 = vmov 683565275  }
 0xbb9   :  { %v13467_v36 = vpop.f32.mrf.mxu1  ;;  %v13481_v23 = vpop.f32.mrf.mxu0  ;;  %v8266_v37 = vadd.f32 %v18818_v22, %v8152_v21 }
 0xbba   :  { %v8702_v56 = vadd.f32 %v13467_v36, %v8603_v9  ;;  %v18819_v9 = vld [vmem:[#allocation10_spill] sm:$0xff] }
 0xbbb   :  { %v8693_v46 = vpop.f32.mrf.mxu1  ;;  %v8800_v39 = vpop.f32.mrf.mxu0  ;;  %v8122_v24 = vadd.f32 %v18820_v3, %v18819_v9 }
 0xbbc   :  { %v8694_v26 = vadd.f32 %v8693_v46, %v8596_v20  ;;  %v8807_v28 = vadd.f32 %v13481_v23, %v8702_v56  ;;  %v18821_v20 = vld [vmem:[#allocation12_spill] sm:$0xff] }
 0xbbd   :  { %v8028_v56 = vadd.f32 %v18821_v20, %v7899_v55  ;;  %v8236_v4 = vadd.f32 %v18822_v54, %v8122_v24 }
 0xbbe   :  { %v13484_v0 = vpop.f32.mrf.mxu0  ;;  %v8801_v10 = vadd.f32 %v8800_v39, %v8694_v26 }
 0xbbf   :  { %v13470_v12 = vpop.f32.mrf.mxu1  ;;  %v17667_v11 = vadd.f32 %v18823_v5, %v8028_v56 }
 0xbc0   :  { %v8718_v63 = vadd.f32 %v13470_v12, %v8617_v48  ;;  %v8812_v7 = vpop.f32.mrf.mxu0 }
 0xbc1   :  { %v8709_v52 = vpop.f32.mrf.mxu1 }
 0xbc2   :  { %v8819_v47 = vadd.f32 %v13484_v0, %v8718_v63  ;;  %v8710_v58 = vadd.f32 %v8709_v52, %v8610_v50 }
 0xbc3   :  { %v13495_v14 = vpop.f32.mrf.mxu1 }
 0xbc4   :  { %v8900_v25 = vadd.f32 %v13495_v14, %v8807_v28  ;;  %v8813_v29 = vadd.f32 %v8812_v7, %v8710_v58 }
 0xbc5   :  { %v8893_v59 = vpop.f32.mrf.mxu1 }
 0xbc6   :  { %v8916_v42 = vmul.f32 %v8900_v25, %v8230_v33  ;;  %v8894_v57 = vadd.f32 %v8893_v59, %v8801_v10  ;;  %v18825_v25 = vmov 2475754826   ;;  %v18827_v59 = vmov 2102212464  }
 0xbc7   :  { %v13498_v13 = vpop.f32.mrf.mxu1 }
 0xbc8   :  { %v17643_v60 = vadd.f32 %v8916_v42, %v8254_v35  ;;  %v8915_v34 = vmul.f32 %v8894_v57, %v8224_v62  ;;  %v8912_v15 = vadd.f32 %v13498_v13, %v8819_v47  ;;  %v18826_v62 = vmov 2131351028  }
 0xbc9   :  { %v8905_v19 = vpop.f32.mrf.mxu1  ;;  %v18828_v47 = vmov 920167782  }
 0xbca   :  { %v9027_v16 = vand.u32 2147483647, %v17643_v60  ;;  %v9030_v45 = vand.u32 2139095040, %v17643_v60  ;;  %v17649_v31 = vadd.f32 %v8915_v34, %v8248_v2  ;;  %v8918_v40 = vmul.f32 %v8912_v15, %v8242_v43 }
 0xbcb   :  { %v8906_v12 = vadd.f32 %v8905_v19, %v8813_v29  ;;  %v18829_v34 = vmov 1326507024  }
 0xbcc   :  { %v9031_v36 = vshrl.u32 %v9030_v45, 23  ;;  %v9034_v8 = vand.u32 8388607, %v9027_v16  ;;  %v8923_v1 = vand.u32 2147483647, %v17649_v31  ;;  %v8926_v61 = vand.u32 2139095040, %v17649_v31 }
 0xbcd   :  { %v17657_v23 = vadd.f32 %v8918_v40, %v8266_v37  ;;  %v17673_v14 = vmul.f32 %v8906_v12, %v8236_v4 }
 0xbce   :  { %v11773_v46 = vadd.s32 4294967169, %v9031_v36  ;;  %v8927_v18 = vshrl.u32 %v8926_v61, 23  ;;  %v8930_v27 = vand.u32 8388607, %v8923_v1  ;;  %v9035_v39 = vor.u32 8388608, %v9034_v8 }
 0xbcf   :  { %v9238_v26 = vand.u32 2139095040, %v17657_v23 }
 0xbd0   :  { %v9037_v41 = vadd.s32 1, %v11773_v46  ;;  %v11769_v53 = vadd.s32 4294967169, %v8927_v18  ;;  %v8931_v48 = vor.u32 8388608, %v8930_v27  ;;  %v17669_v30 = vshll.u32 %v9035_v39, 8 }
 0xbd1   :  { %v9239_v0 = vshrl.u32 %v9238_v26, 23 }
 0xbd2   :  { %vm9038_vm3 = vcmp.gt.s32.totalorder %v9037_v41, 0  ;;  %v8933_v52 = vadd.s32 1, %v11769_v53  ;;  %v17671_v6 = vshll.u32 %v8931_v48, 8 }
 0xbd3   :  { %v9039_v49 = vsel %vm9038_vm3, %v9037_v41, 0  ;;  %v11781_v24 = vadd.s32 4294967169, %v9239_v0 }
 0xbd4   :  { %v9040_v28 = vshrl.u32 %v9039_v49, 5  ;;  %v9041_v63 = vand.u32 31, %v9039_v49  ;;  %vm8934_vm1 = vcmp.gt.s32.totalorder %v8933_v52, 0 }
 0xbd5   :  { %v8935_v45 = vsel %vm8934_vm1, %v8933_v52, 0 }
 0xbd6   :  { %v9042_v33 = vsub.s32 32, %v9041_v63  ;;  %v9044_v10 = vshll.u32 %v18824_v51, %v9041_v63  ;;  %v9047_v44 = vshll.u32 %v18825_v25, %v9041_v63  ;;  %v9050_v17 = vshll.u32 %v18826_v62, %v9041_v63 }
 0xbd7   :  { %v9053_v35 = vshll.u32 %v18827_v59, %v9041_v63  ;;  %v9056_v42 = vshll.u32 %v18828_v47, %v9041_v63  ;;  %vm9059_vm4 = vcmp.lt.s32.totalorder %v9040_v28, 1  ;;  %vm9060_vm5 = vcmp.lt.s32.totalorder %v9040_v28, 2 }
 0xbd8   :  { %v9045_v57 = vshrl.u32 %v18825_v25, %v9042_v33  ;;  %v9048_v38 = vshrl.u32 %v18826_v62, %v9042_v33  ;;  %v9051_v21 = vshrl.u32 %v18827_v59, %v9042_v33  ;;  %v9043_v13 = vshrl.u32 %v18824_v51, %v9042_v33 }
 0xbd9   :  { %v9054_v50 = vshrl.u32 %v18828_v47, %v9042_v33  ;;  %v9057_v15 = vshrl.u32 %v18829_v34, %v9042_v33  ;;  %vm9061_vm6 = vcmp.lt.s32.totalorder %v9040_v28, 3  ;;  %vm9062_vm7 = vcmp.lt.s32.totalorder %v9040_v28, 4 }
 0xbda   :  { %v9046_v43 = vor.u32 %v9045_v57, %v9044_v10  ;;  %v9049_v2 = vor.u32 %v9048_v38, %v9047_v44  ;;  %v9052_v58 = vor.u32 %v9051_v21, %v9050_v17  ;;  %v8937_v32 = vand.u32 31, %v8935_v45 }
 0xbdb   :  { %v9055_v7 = vor.u32 %v9054_v50, %v9053_v35  ;;  %v9058_v40 = vor.u32 %v9057_v15, %v9056_v42  ;;  %v8936_v20 = vshrl.u32 %v8935_v45, 5  ;;  %v9245_v45 = vadd.s32 1, %v11781_v24 }
 0xbdc   :  { %v9063_v55 = vsel %vm9059_vm4, %v9043_v13, %v9046_v43  ;;  %v9064_v22 = vsel %vm9062_vm7, %v9052_v58, 2102212464  ;;  %v9067_v37 = vsel %vm9059_vm4, %v9046_v43, %v9049_v2  ;;  %v9071_v36 = vsel %vm9059_vm4, %v9049_v2, %v9052_v58 }
 0xbdd   :  { %v9065_v8 = vsel %vm9061_vm6, %v9049_v2, %v9064_v22  ;;  %v9068_v61 = vsel %vm9062_vm7, %v9055_v7, 920167782  ;;  %v9072_v19 = vsel %vm9062_vm7, %v9058_v40, 1326507024  ;;  %v8938_v29 = vsub.s32 32, %v8937_v32  ;;  %v18830_v22 = vld [vmem:[#allocation15_spill] sm:$0xff] }
 0xbde   :  { %v9066_v46 = vsel %vm9060_vm5, %v9063_v55, %v9065_v8  ;;  %v9069_v9 = vsel %vm9061_vm6, %v9052_v58, %v9068_v61  ;;  %v9073_v3 = vsel %vm9061_vm6, %v9055_v7, %v9072_v19  ;;  %v8940_v56 = vshll.u32 %v18824_v51, %v8937_v32 }
 0xbdf   :  { %v9070_v18 = vsel %vm9060_vm5, %v9067_v37, %v9069_v9  ;;  %v9074_v27 = vsel %vm9060_vm5, %v9071_v36, %v9073_v3  ;;  %v9082_v48 = vmul.u32 %v17669_v30, %v9066_v46  ;;  %v8941_v26 = vshrl.u32 %v18825_v25, %v8938_v29 }
 0xbe0   :  { %v17698_v41 = vmul.u32.u64.low %v17669_v30, %v9074_v27  ;;  %v17699_v12 = vmul.u32.u64.high %v17669_v30, %v9074_v27, %v17698_v41  ;;  %v17702_v39 = vmul.u32.u64.low %v17669_v30, %v9070_v18  ;;  %v17703_v53 = vmul.u32.u64.high %v17669_v30, %v9070_v18, %v17702_v39 }
 0xbe1   :  { %v8943_v54 = vshll.u32 %v18825_v25, %v8937_v32  ;;  %v8944_v4 = vshrl.u32 %v18826_v62, %v8938_v29  ;;  %v8946_v49 = vshll.u32 %v18826_v62, %v8937_v32  ;;  %v8947_v52 = vshrl.u32 %v18827_v59, %v8938_v29 }
 0xbe2   :  { %v8949_v5 = vshll.u32 %v18827_v59, %v8937_v32  ;;  %v8950_v28 = vshrl.u32 %v18828_v47, %v8938_v29  ;;  %v8942_v63 = vor.u32 %v8941_v26, %v8940_v56  ;;  %v8952_v33 = vshll.u32 %v18828_v47, %v8937_v32 }
 0xbe3   :  { %v8945_v0 = vor.u32 %v8944_v4, %v8943_v54  ;;  %v8953_v30 = vshrl.u32 %v18829_v34, %v8938_v29  ;;  %vm9084_vm8 = vc.u32 %v17699_v12, %v17702_v39  ;;  %v9085_v10 = vadd.s32 1, %v17703_v53 }
 0xbe4   :  { %v8939_v44 = vshrl.u32 %v18824_v51, %v8938_v29  ;;  %v8948_v17 = vor.u32 %v8947_v52, %v8946_v49  ;;  %v8951_v35 = vor.u32 %v8950_v28, %v8949_v5  ;;  %vm8955_vm9 = vcmp.lt.s32.totalorder %v8936_v20, 1 }
 0xbe5   :  { %v8954_v42 = vor.u32 %v8953_v30, %v8952_v33  ;;  %vm8956_vm10 = vcmp.lt.s32.totalorder %v8936_v20, 2  ;;  %v9086_v57 = vsel %vm9084_vm8, %v9085_v10, %v17703_v53  ;;  %vm8957_vm11 = vcmp.lt.s32.totalorder %v8936_v20, 3 }
 0xbe6   :  { %vm8958_vm12 = vcmp.lt.s32.totalorder %v8936_v20, 4  ;;  %v8963_v38 = vsel %vm8955_vm9, %v8942_v63, %v8945_v0  ;;  %v9087_v21 = vadd.s32 %v9086_v57, %v9082_v48  ;;  %v8967_v15 = vsel %vm8955_vm9, %v8945_v0, %v8948_v17 }
 0xbe7   :  { %v8960_v13 = vsel %vm8958_vm12, %v8948_v17, 2102212464  ;;  %v8964_v50 = vsel %vm8958_vm12, %v8951_v35, 920167782  ;;  %v8959_v43 = vsel %vm8955_vm9, %v8939_v44, %v8942_v63  ;;  %v8968_v58 = vsel %vm8958_vm12, %v8954_v42, 1326507024 }
 0xbe8   :  { %v8965_v2 = vsel %vm8957_vm11, %v8948_v17, %v8964_v50  ;;  %v9088_v7 = vadd.s32 536870912, %v9087_v21  ;;  %v8961_v40 = vsel %vm8957_vm11, %v8945_v0, %v8960_v13  ;;  %v8969_v55 = vsel %vm8957_vm11, %v8951_v35, %v8968_v58 }
 0xbe9   :  { %v8966_v32 = vsel %vm8956_vm10, %v8963_v38, %v8965_v2  ;;  %v8260_v37 = vadd.f32 %v18830_v22, %v17667_v11  ;;  %v8970_v36 = vsel %vm8956_vm10, %v8967_v15, %v8969_v55  ;;  %vm9246_vm13 = vcmp.gt.s32.totalorder %v9245_v45, 0 }
 0xbea   :  { %v17726_v8 = vmul.u32.u64.low %v17671_v6, %v8966_v32  ;;  %v17727_v61 = vmul.u32.u64.high %v17671_v6, %v8966_v32, %v17726_v8  ;;  %v17730_v19 = vshrl.u32 %v9088_v7, 30  ;;  %v8962_v9 = vsel %vm8956_vm10, %v8959_v43, %v8961_v40 }
 0xbeb   :  { %v17733_v29 = vmul.u32.u64.low %v17671_v6, %v8970_v36  ;;  %v17734_v46 = vmul.u32.u64.high %v17671_v6, %v8970_v36, %v17733_v29  ;;  %v9235_v3 = vand.u32 2147483647, %v17657_v23  ;;  %v9247_v24 = vsel %vm9246_vm13, %v9245_v45, 0 }
 0xbec   :  { %v17739_v11 = vadd.f32 %v17673_v14, %v8260_v37  ;;  %v9090_v18 = vshll.u32 %v17730_v19, 30  ;;  %v9249_v27 = vand.u32 31, %v9247_v24  ;;  %v8981_v56 = vadd.s32 1, %v17727_v61 }
 0xbed   :  { %v8978_v53 = vmul.u32 %v17671_v6, %v8962_v9  ;;  %vm8980_vm14 = vc.u32 %v17734_v46, %v17726_v8  ;;  %v9242_v48 = vand.u32 8388607, %v9235_v3  ;;  %v9083_v5 = vadd.s32 %v17702_v39, %v17699_v12 }
 0xbee   :  { %v9091_v41 = vsub.s32 %v9087_v21, %v9090_v18  ;;  %v8982_v20 = vsel %vm8980_vm14, %v8981_v56, %v17727_v61  ;;  %v9134_v26 = vand.u32 2139095040, %v17739_v11  ;;  %v9250_v4 = vsub.s32 32, %v9249_v27 }
 0xbef   :  { %v8983_v54 = vadd.s32 %v8982_v20, %v8978_v53  ;;  %v9113_v6 = vsub.s32 4, %v17730_v19  ;;  %v9243_v28 = vor.u32 8388608, %v9242_v48  ;;  %v9248_v17 = vshrl.u32 %v9247_v24, 5 }
 0xbf0   :  { %v9093_v14 = vsub.s32 0, %v9091_v41  ;;  %v9135_v63 = vshrl.u32 %v9134_v26, 23  ;;  %v9253_v33 = vshrl.u32 %v18825_v25, %v9250_v4  ;;  %v9256_v30 = vshrl.u32 %v18826_v62, %v9250_v4 }
 0xbf1   :  { %v8984_v52 = vadd.s32 536870912, %v8983_v54  ;;  %v9262_v10 = vshrl.u32 %v18828_v47, %v9250_v4  ;;  %v9252_v35 = vshll.u32 %v18824_v51, %v9249_v27  ;;  %v9259_v42 = vshrl.u32 %v18827_v59, %v9250_v4 }
 0xbf2   :  { %v11774_v49 = vmin.u32 %v9093_v14, %v9091_v41  ;;  %v9255_v12 = vshll.u32 %v18825_v25, %v9249_v27  ;;  %v9261_v39 = vshll.u32 %v18827_v59, %v9249_v27  ;;  %v9265_v38 = vshrl.u32 %v18829_v34, %v9250_v4 }
 0xbf3   :  { %v17756_v44 = vshrl.u32 %v8984_v52, 30  ;;  %v9258_v13 = vshll.u32 %v18826_v62, %v9249_v27  ;;  %v9264_v50 = vshll.u32 %v18828_v47, %v9249_v27  ;;  %v11777_v15 = vadd.s32 4294967169, %v9135_v63 }
 0xbf4   :  { %v9095_v0 = vclz %v11774_v49  ;;  %v9254_v43 = vor.u32 %v9253_v33, %v9252_v35  ;;  %v9257_v2 = vor.u32 %v9256_v30, %v9255_v12  ;;  %v9263_v58 = vor.u32 %v9262_v10, %v9261_v39 }
 0xbf5   :  { %v8986_v21 = vshll.u32 %v17756_v44, 30  ;;  %v9260_v40 = vor.u32 %v9259_v42, %v9258_v13  ;;  %v9266_v32 = vor.u32 %v9265_v38, %v9264_v50  ;;  %v9251_v37 = vshrl.u32 %v18824_v51, %v9250_v4 }
 0xbf6   :  { %v11775_v57 = vadd.s32 4294967294, %v9095_v0  ;;  %vm9267_vm3 = vcmp.lt.s32.totalorder %v9248_v17, 1  ;;  %vm9269_vm1 = vcmp.lt.s32.totalorder %v9248_v17, 3  ;;  %vm9270_vm4 = vcmp.lt.s32.totalorder %v9248_v17, 4  ;;  %v10150_v0 = vld [vmem:[%s18609_s4 + $0x1c0] sm:$0xff] }
 0xbf7   :  { %v17766_v7 = vsub.s32 %v8983_v54, %v8986_v21  ;;  %v9275_v24 = vsel %vm9267_vm3, %v9254_v43, %v9257_v2  ;;  %v9276_v18 = vsel %vm9270_vm4, %v9263_v58, 920167782  ;;  %vm9268_vm5 = vcmp.lt.s32.totalorder %v9248_v17, 2 }
 0xbf8   :  { %vm11776_vm15 = vcmp.lt.s32.totalorder %v11775_v57, 0  ;;  %v9277_v27 = vsel %vm9269_vm1, %v9260_v40, %v9276_v18  ;;  %v9279_v56 = vsel %vm9267_vm3, %v9257_v2, %v9260_v40  ;;  %v9280_v53 = vsel %vm9270_vm4, %v9266_v32, 1326507024 }
 0xbf9   :  { %v9098_v45 = vsel %vm11776_vm15, 0, %v11775_v57  ;;  %v8989_v61 = vsub.s32 0, %v17766_v7  ;;  %v9272_v26 = vsel %vm9270_vm4, %v9260_v40, 2102212464  ;;  %vm9029_vm6 = vcmp.lt.s32.totalorder %v17643_v60, 0 }
 0xbfa   :  { %v9099_v55 = vsub.s32 32, %v9098_v45  ;;  %v9103_v22 = vsub.s32 4294967266, %v9098_v45  ;;  %v9100_v36 = vshll.u32 %v9091_v41, %v9098_v45  ;;  %v9281_v41 = vsel %vm9269_vm1, %v9263_v58, %v9280_v53 }
 0xbfb   :  { %v11770_v14 = vmin.u32 %v8989_v61, %v17766_v7  ;;  %v9278_v54 = vsel %vm9268_vm5, %v9275_v24, %v9277_v27  ;;  %v9283_v4 = vshll.u32 %v9243_v28, 8  ;;  %v9114_v52 = vsel %vm9029_vm6, %v9113_v6, %v17730_v19 }
 0xbfc   :  { %v9101_v29 = vshrl.u32 %v9083_v5, %v9099_v55  ;;  %v9104_v9 = vadd.s32 127, %v9103_v22  ;;  %v9271_v5 = vsel %vm9267_vm3, %v9251_v37, %v9254_v43  ;;  %v9282_v63 = vsel %vm9268_vm5, %v9279_v56, %v9281_v41  ;;  %v17832_v41 = vpop.f32.mrf.mxu0 }
 0xbfd   :  { %v9273_v30 = vsel %vm9269_vm1, %v9257_v2, %v9272_v26  ;;  %v17786_v10 = vmul.u32.u64.low %v9283_v4, %v9282_v63  ;;  %v17787_v35 = vmul.u32.u64.high %v9283_v4, %v9282_v63, %v17786_v10  ;;  %v9141_v19 = vadd.s32 1, %v11777_v15 }
 0xbfe   :  { %v9102_v20 = vor.u32 %v9101_v29, %v9100_v36  ;;  %v9105_v48 = vshll.u32 %v9104_v9, 23  ;;  %v17789_v42 = vmul.u32.u64.low %v9283_v4, %v9278_v54  ;;  %v17790_v57 = vmul.u32.u64.high %v9283_v4, %v9278_v54, %v17789_v42 }
 0xbff   :  { %vm17795_vm7 = vcmp.le.f32.partialorder %v9027_v16, 0.7853982  ;;  %v8991_v12 = vclz %v11770_v14  ;;  %v17800_v39 = vsel %vm4526_vm2, %v10150_v0, 0  ;;  %v9274_v21 = vsel %vm9268_vm5, %v9271_v5, %v9273_v30 }
 0xc00   :  { %v9106_v49 = vor.u32 4788187, %v9105_v48  ;;  %v9109_v33 = vcvt.s32.f32 %v9102_v20  ;;  %vm9142_vm8 = vcmp.gt.s32.totalorder %v9141_v19, 0  ;;  %v17804_v13 = vand.u32 4294901760, %v17800_v39 }
 0xc01   :  { %v9116_v50 = vsel %vm17795_vm7, 0, %v9114_v52  ;;  %v9131_v15 = vand.u32 2147483647, %v17739_v11  ;;  %vm9292_vm9 = vc.u32 %v17787_v35, %v17789_v42  ;;  %v9293_v43 = vadd.s32 1, %v17790_v57 }
 0xc02   :  { %v9107_v28 = vand.u32 2147483647, %v9106_v49  ;;  %v9143_v2 = vsel %vm9142_vm8, %v9141_v19, 0  ;;  %13605 = vmatprep.mubr.f32.mxu1 %v17804_v13  ;;  %v11771_v17 = vadd.s32 4294967294, %v8991_v12  ;;  %v9290_v58 = vmul.u32 %v9283_v4, %v9274_v21  ;;  %v17852_v12 = vpop.f32.mrf.mxu0 }
 0xc03   :  { %v9145_v45 = vand.u32 31, %v9143_v2  ;;  %v9120_v32 = vadd.s32 3, %v9116_v50  ;;  %v9294_v55 = vsel %vm9292_vm9, %v9293_v43, %v17790_v57  ;;  %v9138_v36 = vand.u32 8388607, %v9131_v15 }
 0xc04   :  { %v9110_v38 = vmul.f32 %v9109_v33, %v9107_v28  ;;  %v9295_v37 = vadd.s32 %v9294_v55, %v9290_v58  ;;  %vm11772_vm10 = vcmp.lt.s32.totalorder %v11771_v17, 0  ;;  %v17835_v54 = vshrl.u32 %v9143_v2, 5  ;;  %v17842_v33 = vpop.f32.mrf.mxu1 }
 0xc05   :  { %v9146_v61 = vsub.s32 32, %v9145_v45  ;;  %v17821_v9 = vand.u32 3, %v9120_v32  ;;  %v9139_v18 = vor.u32 8388608, %v9138_v36  ;;  %v17827_v53 = vsel %vm11772_vm10, 0, %v11771_v17  ;;  %v17884_v32 = vpop.f32.mrf.mxu0  ;;  %v17889_v36 = vpop.permute.xlu1 %9364 }
 0xc06   :  { %v9111_v16 = vxor.u32 2147483648, %v9110_v38  ;;  %v9296_v29 = vadd.s32 536870912, %v9295_v37  ;;  %v9157_v48 = vshll.u32 %v18827_v59, %v9145_v45  ;;  %v9148_v4 = vshll.u32 %v18824_v51, %v9145_v45  ;;  %v17867_v43 = vpop.f32.mrf.mxu1 }
 0xc07   :  { %v9149_v27 = vshrl.u32 %v18825_v25, %v9146_v61  ;;  %v9152_v56 = vshrl.u32 %v18826_v62, %v9146_v61  ;;  %v9155_v20 = vshrl.u32 %v18827_v59, %v9146_v61  ;;  %v9158_v26 = vshrl.u32 %v18828_v47, %v9146_v61 }
 0xc08   :  { %v9112_v40 = vsel %vm9029_vm6, %v9111_v16, %v9110_v38  ;;  %v17823_v24 = vshrl.u32 %v9296_v29, 30  ;;  %v9151_v49 = vshll.u32 %v18825_v25, %v9145_v45  ;;  %v9154_v52 = vshll.u32 %v18826_v62, %v9145_v45 }
 0xc09   :  { %v9115_v22 = vsel %vm17795_vm7, %v17643_v60, %v9112_v40  ;;  %v9159_v5 = vor.u32 %v9158_v26, %v9157_v48  ;;  %v9160_v63 = vshll.u32 %v18828_v47, %v9145_v45  ;;  %v9161_v0 = vshrl.u32 %v18829_v34, %v9146_v61 }
 0xc0a   :  { %13917 = vcosq.f32 %v9115_v22  ;;  %v9298_v14 = vshll.u32 %v17823_v24, 30  ;;  %v17846_v30 = vadd.s32 %v17726_v8, %v17734_v46  ;;  %v9150_v28 = vor.u32 %v9149_v27, %v9148_v4 }
 0xc0b   :  { %13919 = vsinq.f32 %v9115_v22  ;;  %v9153_v57 = vor.u32 %v9152_v56, %v9151_v49  ;;  %vm9123_vm11 = vcmp.eq.s32.totalorder %v17821_v9, 0  ;;  %vm9126_vm12 = vcmp.eq.s32.totalorder %v17821_v9, 2 }
 0xc0c   :  { %v17848_v10 = vsub.s32 %v9295_v37, %v9298_v14  ;;  %v9156_v19 = vor.u32 %v9155_v20, %v9154_v52  ;;  %v9162_v6 = vor.u32 %v9161_v0, %v9160_v63  ;;  %vm9122_vm13 = vcmp.lt.s32.totalorder %v17821_v9, 2  ;;  %v17897_v20 = vpop.f32.mrf.mxu1 }
 0xc0d   :  { %v8999_v38 = vsub.s32 4294967266, %v17827_v53  ;;  %vm9166_vm14 = vcmp.lt.s32.totalorder %v17835_v54, 4  ;;  %v17858_v8 = vshll.u32 %v9139_v18, 8  ;;  %vm9119_vm15 = vweird.f32 %v17643_v60 }
 0xc0e   :  { %v9301_v21 = vsub.s32 0, %v17848_v10  ;;  %v8995_v46 = vsub.s32 32, %v17827_v53  ;;  %v9291_v50 = vadd.s32 %v17789_v42, %v17787_v35  ;;  %vm9163_vm3 = vcmp.lt.s32.totalorder %v17835_v54, 1 }
 0xc0f   :  { %v9172_v16 = vsel %vm9166_vm14, %v9159_v5, 920167782  ;;  %vm9165_vm1 = vcmp.lt.s32.totalorder %v17835_v54, 3  ;;  %v9171_v17 = vsel %vm9163_vm3, %v9150_v28, %v9153_v57  ;;  %v17875_v58 = vsub.f32 %v17800_v39, %v17804_v13 }
 0xc10   :  { %v11782_v2 = vmin.u32 %v9301_v21, %v17848_v10  ;;  %v9147_v35 = vshrl.u32 %v18824_v51, %v9146_v61  ;;  %v9173_v42 = vsel %vm9165_vm1, %v9156_v19, %v9172_v16  ;;  %v9175_v45 = vsel %vm9163_vm3, %v9153_v57, %v9156_v19 }
 0xc11   :  { %v9176_v40 = vsel %vm9166_vm14, %v9162_v6, 1326507024  ;;  %v9000_v22 = vadd.s32 127, %v8999_v38  ;;  %vm9164_vm4 = vcmp.lt.s32.totalorder %v17835_v54, 2  ;;  %v9168_v39 = vsel %vm9166_vm14, %v9156_v19, 2102212464 }
 0xc12   :  { %v9303_v37 = vclz %v11782_v2  ;;  %v9167_v18 = vsel %vm9163_vm3, %v9147_v35, %v9150_v28  ;;  %v9174_v27 = vsel %vm9164_vm4, %v9171_v17, %v9173_v42  ;;  %v9177_v56 = vsel %vm9165_vm1, %v9159_v5, %v9176_v40  ;;  %v17910_v5 = vpop.f32.mrf.mxu0  ;;  %v17924_v2 = vpop.f32.mrf.mxu1 }
 0xc13   :  { %v9178_v14 = vsel %vm9164_vm4, %v9175_v45, %v9177_v56  ;;  %v10253_v4 = vand.u32 4294901760, %v17875_v58  ;;  %v9169_v52 = vsel %vm9165_vm1, %v9153_v57, %v9168_v39  ;;  %v9001_v21 = vshll.u32 %v9000_v22, 23  ;;  %v9360_v40 = vpop.permute.xlu1 %9359 }
 0xc14   :  { %v11783_v26 = vadd.s32 4294967294, %v9303_v37  ;;  %v17907_v63 = vmul.u32.u64.low %v17858_v8, %v9178_v14  ;;  %v17908_v0 = vmul.u32.u64.high %v17858_v8, %v9178_v14, %v17907_v63  ;;  %v9170_v45 = vsel %vm9164_vm4, %v9167_v18, %v9169_v52  ;;  %v17935_v22 = vpop.f32.mrf.mxu0  ;;  %v17942_v18 = vpop.f32.mrf.mxu1 }
 0xc15   :  { %v17915_v19 = vmul.u32.u64.low %v17858_v8, %v9174_v27  ;;  %v17916_v6 = vmul.u32.u64.high %v17858_v8, %v9174_v27, %v17915_v19  ;;  %v10254_v16 = vsub.f32 %v17875_v58, %v10253_v4  ;;  %v8997_v9 = vshrl.u32 %v17846_v30, %v8995_v46 }
 0xc16   :  { %vm11784_vm5 = vcmp.lt.s32.totalorder %v11783_v26, 0  ;;  %v9186_v54 = vmul.u32 %v17858_v8, %v9170_v45  ;;  %v9002_v30 = vor.u32 4788187, %v9001_v21  ;;  %v17955_v52 = vpop.f32.mrf.mxu1  ;;  %v13971_v21 = vld [vmem:[%s18609_s4 + $0x1f0] sm:$0xff]  ;;  %v13972_v45 = vld [vmem:[%s18609_s4 + $0x100] sm:$0xff]  ;;  %vm9237_vm7 = vcmp.lt.s32.totalorder %v17657_v23, 0 }
 0xc17   :  { %v13918_v55 = vpop.eup %13917  ;;  %v9306_v57 = vsel %vm11784_vm5, 0, %v11783_v26  ;;  %vm9188_vm6 = vc.u32 %v17908_v0, %v17915_v19  ;;  %v17953_v14 = vpop.permute.xlu1 %9384  ;;  %vm17980_vm8 = vcmp.le.f32.partialorder %v9235_v3, 0.7853982  ;;  %v13974_v3 = vld [vmem:[%s18609_s4 + $0x1e0] sm:$0xff]  ;;  %vm8925_vm9 = vcmp.lt.s32.totalorder %v17649_v31, 0 }
 0xc18   :  { %v13920_v61 = vpop.eup %13919  ;;  %v9127_v29 = vxor.u32 2147483648, %v13918_v55  ;;  %v9307_v35 = vsub.s32 32, %v9306_v57  ;;  %v9311_v42 = vsub.s32 4294967266, %v9306_v57  ;;  %v9308_v37 = vshll.u32 %v17848_v10, %v9306_v57 }
 0xc19   :  { %v9124_v48 = vxor.u32 2147483648, %v13920_v61  ;;  %v9003_v63 = vand.u32 2147483647, %v9002_v30  ;;  %v18833_v57 = vmov 4   ;;  %vm18017_vm10 = vcmp.le.f32.partialorder %v8923_v1, 0.7853982 }
 0xc1a   :  { %v9128_v49 = vsel %vm9126_vm12, %v9127_v29, %v13920_v61  ;;  %v9309_v39 = vshrl.u32 %v9291_v50, %v9307_v35  ;;  %v9312_v60 = vadd.s32 127, %v9311_v42  ;;  %v9189_v61 = vadd.s32 1, %v17916_v6  ;;  %v13969_v50 = vld [vmem:[%s18609_s4 + $0x1f8] sm:$0xff] }
 0xc1b   :  { %v9125_v28 = vsel %vm9123_vm11, %v13918_v55, %v9124_v48  ;;  %v10255_v55 = vand.u32 4294901760, %v10254_v16  ;;  %v8996_v29 = vshll.u32 %v17766_v7, %v17827_v53  ;;  %v13999_v48 = vmov 3   ;;  %v13970_v7 = vld [vmem:[%s18609_s4 + $0x1e8] sm:$0xff]  ;;  %v17951_v53 = vpop.f32.mrf.mxu0 }
 0xc1c   :  { %v9129_v38 = vsel %vm9122_vm13, %v9125_v28, %v9128_v49  ;;  %v9310_v46 = vor.u32 %v9309_v39, %v9308_v37  ;;  %v9313_v27 = vshll.u32 %v9312_v60, 23  ;;  %v9190_v56 = vsel %vm9188_vm6, %v9189_v61, %v17916_v6  ;;  %13858 = vset.pattern.permute.xlu0 %v13999_v48  ;;  %13860 = vset.pattern.permute.xlu1 %v13999_v48  ;;  %v9355_v60 = vpop.permute.xlu1 %9354 }
 0xc1d   :  { %v17928_v17 = vsel %vm9119_vm15, nan, %v9129_v38  ;;  %13591 = vmatprep.mubr.f32.mxu0 %v10255_v55  ;;  %v9191_v10 = vadd.s32 %v9190_v56, %v9186_v54  ;;  %10167 = vperm.xlu0 %13858, %v13969_v50   ;;  %v8998_v8 = vor.u32 %v8997_v9, %v8996_v29  ;;  %v17963_v16 = vpop.f32.mrf.mxu0  ;;  %v17969_v55 = vpop.f32.mrf.mxu1  ;;  %v9321_v61 = vsub.s32 4, %v17823_v24 }
 0xc1e   :  { %10159 = vperm.xlu1 %13860, %v13970_v7   ;;  %v9314_v26 = vor.u32 4788187, %v9313_v27  ;;  %v9317_v6 = vcvt.s32.f32 %v9310_v46  ;;  %v9496_v54 = vadd.f32 %v17910_v5, %v9360_v40  ;;  %v9486_v46 = vadd.f32 %v17832_v41, %v9355_v60 }
 0xc1f   :  { %v9192_v49 = vadd.s32 536870912, %v9191_v10  ;;  %v9005_v35 = vcvt.s32.f32 %v8998_v8  ;;  %v17975_v30 = vpop.f32.mrf.mxu0  ;;  %v17995_v40 = vpop.f32.mrf.mxu1  ;;  %v9187_v60 = vadd.s32 %v17915_v19, %v17908_v0  ;;  %vm9327_vm15 = vweird.f32 %v17657_v23 }
 0xc20   :  { %v9315_v28 = vand.u32 2147483647, %v9314_v26  ;;  %v9628_v7 = vadd.f32 %v17842_v33, %v9486_v46  ;;  %vm9133_vm3 = vcmp.lt.s32.totalorder %v17739_v11, 0  ;;  %vm18047_vm1 = vcmp.le.f32.partialorder %v9131_v15, 0.7853982 }
 0xc21   :  { %v17957_v38 = vshrl.u32 %v9192_v49, 30  ;;  %10163 = vperm.xlu0 %13858, %v13971_v21   ;;  %v9006_v37 = vmul.f32 %v9005_v35, %v9003_v63  ;;  %v13531_v26 = vpop.f32.mrf.mxu0  ;;  %v18002_v49 = vadd.f32 %v17924_v2, %v9496_v54  ;;  %v13975_v63 = vld [vmem:[%s18609_s4 + $0x128] sm:$0xff]  ;;  %v13545_v33 = vpop.f32.mrf.mxu1  ;;  %v18836_v21 = vmov 0  }
 0xc22   :  { %13861 = vset.pattern.permute.xlu1 %v18833_v57  ;;  %v9318_v42 = vmul.f32 %v9317_v6, %v9315_v28  ;;  %v9745_v28 = vadd.f32 %v13531_v26, %v9628_v7  ;;  %v9546_v59 = vadd.f32 %v17963_v16, %v17953_v14 }
 0xc23   :  { %9349 = vperm.xlu1 %13861, %v13972_v45   ;;  %v9194_v9 = vshll.u32 %v17957_v38, 30  ;;  %v9007_v50 = vxor.u32 2147483648, %v9006_v37  ;;  %v13976_v45 = vld [vmem:[%s18609_s4 + $0x120] sm:$0xff] }
 0xc24   :  { %v9319_v39 = vxor.u32 2147483648, %v9318_v42  ;;  %v18013_v2 = vadd.f32 %v13545_v33, %v9745_v28 }
 0xc25   :  { %v9195_v29 = vsub.s32 %v9191_v10, %v9194_v9  ;;  %13859 = vset.pattern.permute.xlu0 %v18833_v57  ;;  %v13973_v10 = vld [vmem:[%s18609_s4 + $0x130] sm:$0xff] }
 0xc26   :  { %v9320_v56 = vsel %vm9237_vm7, %v9319_v39, %v9318_v42  ;;  %9379 = vperm.xlu0 %13859, %v13973_v10   ;;  %v9009_v10 = vsub.s32 4, %v17756_v44 }
 0xc27   :  { %13862 = vset.pattern.permute.xlu1 %v13999_v48  ;;  %v9323_v5 = vsel %vm17980_vm8, %v17657_v23, %v9320_v56  ;;  %v9197_v41 = vsub.s32 0, %v9195_v29  ;;  %v9322_v48 = vsel %vm9237_vm7, %v9321_v61, %v17823_v24  ;;  %v9008_v24 = vsel %vm8925_vm9, %v9007_v50, %v9006_v37 }
 0xc28   :  { %10155 = vperm.xlu1 %13862, %v13974_v3   ;;  %13921 = vcosq.f32 %v9323_v5  ;;  %v9324_v57 = vsel %vm17980_vm8, 0, %v9322_v48  ;;  %v9011_v9 = vsel %vm18017_vm10, %v17649_v31, %v9008_v24  ;;  %v9010_v19 = vsel %vm8925_vm9, %v9009_v10, %v17756_v44  ;;  %v10152_v10 = vld [vmem:[%s18609_s4 + $0x1d0] sm:$0xff] }
 0xc29   :  { %13923 = vsinq.f32 %v9323_v5  ;;  %v11778_v8 = vmin.u32 %v9197_v41, %v9195_v29  ;;  %v9328_v37 = vadd.s32 3, %v9324_v57  ;;  %v9217_v44 = vsub.s32 4, %v17957_v38 }
 0xc2a   :  { %9374 = vperm.xlu0 %13859, %v13975_v63   ;;  %13925 = vcosq.f32 %v9011_v9  ;;  %vm9015_vm7 = vweird.f32 %v17649_v31 }
 0xc2b   :  { %v9199_v6 = vclz %v11778_v8  ;;  %v9329_v54 = vand.u32 3, %v9328_v37  ;;  %13927 = vsinq.f32 %v9011_v9 }
 0xc2c   :  { %13863 = vset.pattern.permute.xlu1 %v18836_v21 }
 0xc2d   :  { %v11779_v35 = vadd.s32 4294967294, %v9199_v6  ;;  %vm9334_vm12 = vcmp.eq.s32.totalorder %v9329_v54, 2  ;;  %vm9331_vm13 = vcmp.eq.s32.totalorder %v9329_v54, 0  ;;  %vm9330_vm14 = vcmp.lt.s32.totalorder %v9329_v54, 2  ;;  %v10151_v54 = vld [vmem:[%s18609_s4 + $0x1c8] sm:$0xff] }
 0xc2e   :  { %9369 = vperm.xlu0 %13859, %v13976_v45  }
 0xc2f   :  { %vm11780_vm11 = vcmp.lt.s32.totalorder %v11779_v35, 0 }
 0xc30   :  { %v9202_v39 = vsel %vm11780_vm11, 0, %v11779_v35  ;;  %vm9223_vm11 = vweird.f32 %v17739_v11 }
 0xc31   :  { %v9203_v61 = vsub.s32 32, %v9202_v39  ;;  %v9207_v1 = vsub.s32 4294967266, %v9202_v39  ;;  %v9204_v46 = vshll.u32 %v9195_v29, %v9202_v39 }
 0xc32   :  { %13864 = vset.pattern.permute.xlu0 %v18836_v21  ;;  %v9012_v21 = vsel %vm18017_vm10, 0, %v9010_v19 }
 0xc33   :  { %v9205_v27 = vshrl.u32 %v9187_v60, %v9203_v61  ;;  %v9208_v56 = vadd.s32 127, %v9207_v1  ;;  %v9016_v23 = vadd.s32 3, %v9012_v21  ;;  %v9218_v61 = vsel %vm9133_vm3, %v9217_v44, %v17957_v38 }
 0xc34   :  { %v10174_v38 = vsel %vm4526_vm2, %v10151_v54, 0  ;;  %v18089_v44 = vand.u32 4294901760, %v17928_v17 }
 0xc35   :  { %v13922_v5 = vpop.eup %13921  ;;  %v9206_v41 = vor.u32 %v9205_v27, %v9204_v46  ;;  %v9209_v3 = vshll.u32 %v9208_v56, 23  ;;  %v9017_v1 = vand.u32 3, %v9016_v23 }
 0xc36   :  { %v13924_v50 = vpop.eup %13923  ;;  %v9335_v7 = vxor.u32 2147483648, %v13922_v5 }
 0xc37   :  { %v9332_v48 = vxor.u32 2147483648, %v13924_v50  ;;  %v9210_v0 = vor.u32 4788187, %v9209_v3  ;;  %v9213_v63 = vcvt.s32.f32 %v9206_v41  ;;  %v13926_v45 = vpop.eup %13925  ;;  %vm9019_vm4 = vcmp.eq.s32.totalorder %v9017_v1, 0 }
 0xc38   :  { %v9336_v8 = vsel %vm9334_vm12, %v9335_v7, %v13924_v50  ;;  %v13928_v60 = vpop.eup %13927  ;;  %v9023_v27 = vxor.u32 2147483648, %v13926_v45  ;;  %vm9022_vm5 = vcmp.eq.s32.totalorder %v9017_v1, 2  ;;  %v10177_v41 = vsel %vm4526_vm2, %v10152_v10, 0 }
 0xc39   :  { %v9333_v29 = vsel %vm9331_vm13, %v13922_v5, %v9332_v48  ;;  %v9211_v26 = vand.u32 2147483647, %v9210_v0  ;;  %v9020_v46 = vxor.u32 2147483648, %v13928_v60  ;;  %v9220_v5 = vsel %vm18047_vm1, 0, %v9218_v61  ;;  %v10153_v48 = vld [vmem:[%s18609_s4 + $0x1d8] sm:$0xff] }
 0xc3a   :  { %v9337_v28 = vsel %vm9330_vm14, %v9333_v29, %v9336_v8  ;;  %v9024_v50 = vsel %vm9022_vm5, %v9023_v27, %v13928_v60  ;;  %v9224_v7 = vadd.s32 3, %v9220_v5  ;;  %v18074_v0 = vand.u32 4294901760, %v10174_v38 }
 0xc3b   :  { %v9338_v6 = vsel %vm9327_vm15, nan, %v9337_v28  ;;  %v9214_v33 = vmul.f32 %v9213_v63, %v9211_v26  ;;  %v9021_v3 = vsel %vm9019_vm4, %v13926_v45, %v9020_v46  ;;  %vm9018_vm6 = vcmp.lt.s32.totalorder %v9017_v1, 2 }
 0xc3c   :  { %v18037_v24 = vand.u32 4294901760, %v9338_v6  ;;  %v18076_v19 = vand.u32 4294901760, %v10177_v41  ;;  %v9025_v8 = vsel %vm9018_vm6, %v9021_v3, %v9024_v50  ;;  %v10180_v29 = vsel %vm4526_vm2, %v10153_v48, 0 }
 0xc3d   :  { %v9215_v57 = vxor.u32 2147483648, %v9214_v33  ;;  %v9225_v26 = vand.u32 3, %v9224_v7  ;;  %v18081_v63 = vsub.f32 %v10174_v38, %v18074_v0  ;;  %v18086_v21 = vand.u32 4294901760, %v10180_v29 }
 0xc3e   :  { %13583 = vmatprep.subr.mxu0 %v18037_v24  ;;  %v18043_v35 = vsub.f32 %v9338_v6, %v18037_v24  ;;  %v9026_v6 = vsel %vm9015_vm7, nan, %v9025_v8  ;;  %v10331_v1 = vsub.f32 %v17928_v17, %v18089_v44 }
 0xc3f   :  { %v9216_v42 = vsel %vm9133_vm3, %v9215_v57, %v9214_v33  ;;  %13584 = vmatpush3.msra.mxu0 %v18037_v24  ;;  %v18084_v33 = vsub.f32 %v10177_v41, %v18076_v19  ;;  %vm9230_vm8 = vcmp.eq.s32.totalorder %v9225_v26, 2  ;;  %v18091_v9 = vand.u32 4294901760, %v9026_v6 }
 0xc40   :  { %v9219_v37 = vsel %vm18047_vm1, %v17739_v11, %v9216_v42  ;;  %v18056_v39 = vand.u32 4294901760, %v18043_v35  ;;  %vm9227_vm9 = vcmp.eq.s32.totalorder %v9225_v26, 0  ;;  %v10263_v42 = vand.u32 4294901760, %v18081_v63 }
 0xc41   :  { %13929 = vcosq.f32 %v9219_v37  ;;  %vm9226_vm10 = vcmp.lt.s32.totalorder %v9225_v26, 2  ;;  %v10273_v60 = vand.u32 4294901760, %v18084_v33  ;;  %v18096_v61 = vsub.f32 %v10180_v29, %v18086_v21 }
 0xc42   :  { %13931 = vsinq.f32 %v9219_v37  ;;  %v10319_v15 = vsub.f32 %v18043_v35, %v18056_v39  ;;  %v10264_v27 = vsub.f32 %v18081_v63, %v10263_v42  ;;  %v10332_v17 = vand.u32 4294901760, %v10331_v1 }
 0xc43   :  { %v10274_v10 = vsub.f32 %v18084_v33, %v10273_v60  ;;  %v10283_v5 = vand.u32 4294901760, %v18096_v61 }
 0xc44   :  { %v10320_v56 = vand.u32 4294901760, %v10319_v15  ;;  %v10265_v38 = vand.u32 4294901760, %v10264_v27  ;;  %v10333_v8 = vsub.f32 %v10331_v1, %v10332_v17 }
 0xc45   :  { %v10275_v50 = vand.u32 4294901760, %v10274_v10  ;;  %v10284_v7 = vsub.f32 %v18096_v61, %v10283_v5 }
 0xc46   :  { %13597 = vmatprep.subr.mxu1 %v10320_v56 }
 0xc47   :  { %13598 = vmatpush3.msra.mxu1 %v10320_v56  ;;  %v10338_v56 = vsub.f32 %v9026_v6, %v18091_v9  ;;  %v10334_v6 = vand.u32 4294901760, %v10333_v8 }
 0xc49   :  { %v10339_v3 = vand.u32 4294901760, %v10338_v56 }
 0xc4b   :  { %v10340_v26 = vsub.f32 %v10338_v56, %v10339_v3 }
 0xc4e   :  { %v13930_v28 = vpop.eup %13929 }
 0xc4f   :  { %v13932_v57 = vpop.eup %13931  ;;  %v9231_v45 = vxor.u32 2147483648, %v13930_v28 }
 0xc50   :  { %v9228_v23 = vxor.u32 2147483648, %v13932_v57 }
 0xc51   :  { %v9232_v31 = vsel %vm9230_vm8, %v9231_v45, %v13932_v57  ;;  %v10341_v57 = vand.u32 4294901760, %v10340_v26 }
 0xc52   :  { %v9229_v37 = vsel %vm9227_vm9, %v13930_v28, %v9228_v23  ;;  %v10285_v28 = vand.u32 4294901760, %v10284_v7 }
 0xc53   :  { %v9233_v15 = vsel %vm9226_vm10, %v9229_v37, %v9232_v31 }
 0xc54   :  { %v9234_v54 = vsel %vm9223_vm11, nan, %v9233_v15 }
 0xc55   :  { %v18101_v46 = vand.u32 4294901760, %v9234_v54 }
 0xc57   :  { %13585 = vmatprep.subr.mxu0 %v18101_v46  ;;  %v10324_v11 = vsub.f32 %v9234_v54, %v18101_v46 }
 0xc58   :  { %13586 = vmatpush3.msra.mxu0 %v18101_v46 }
 0xc59   :  { %13587 = vmatprep.subr.mxu0 %v18089_v44  ;;  %v10325_v41 = vand.u32 4294901760, %v10324_v11 }
 0xc5a   :  { %13588 = vmatpush3.msra.mxu0 %v18089_v44 }
 0xc5b   :  { %13589 = vmatprep.subr.mxu0 %v18091_v9  ;;  %v10326_v48 = vsub.f32 %v10324_v11, %v10325_v41 }
 0xc5c   :  { %13590 = vmatpush3.msra.mxu0 %v18091_v9 }
 0xc5d   :  { %13611 = vmatprep.subr.mxu0 %v18043_v35  ;;  %13592 = vmatmul.mubr.f32.vlgmr.msra.gmra.mxu0 %v10265_v38  ;;  %v10327_v29 = vand.u32 4294901760, %v10326_v48 }
 0xc5e   :  { %13612 = vmatpush3.msra.mxu0 %v18043_v35  ;;  %13594 = vmatprep.mubr.f32.mxu0 %v10275_v50  ;;  %v18841_v35 = vmov 0.0  }
 0xc5f   :  { %13599 = vmatprep.subr.mxu1 %v10327_v29  ;;  %13613 = vmatprep.subr.mxu0 %v10324_v11 }
 0xc60   :  { %13600 = vmatpush3.msra.mxu1 %v10327_v29  ;;  %13614 = vmatpush3.msra.mxu0 %v10324_v11 }
 0xc61   :  { %13601 = vmatprep.subr.mxu1 %v10334_v6  ;;  %13615 = vmatprep.subr.mxu0 %v10331_v1 }
 0xc62   :  { %13595 = vmatmul.mubr.f32.gmra.mxu0 %v10285_v28  ;;  %13602 = vmatpush3.msra.mxu1 %v10334_v6 }
 0xc63   :  { %13616 = vmatpush3.msra.mxu0 %v10331_v1  ;;  %13603 = vmatprep.subr.mxu1 %v10341_v57 }
 0xc64   :  { %13617 = vmatprep.subr.mxu0 %v10338_v56  ;;  %13604 = vmatpush3.msra.mxu1 %v10341_v57 }
 0xc65   :  { %13618 = vmatpush3.msra.mxu0 %v10338_v56  ;;  %13606 = vmatmul.mubr.f32.vlgmr.msra.gmra.mxu1 %v18074_v0 }
 0xc66   :  { %13619 = vmatprep.mubr.f32.mxu0 %v17875_v58  ;;  %13625 = vmatprep.subr.mxu1 %v18037_v24 }
 0xc67   :  { %13639 = vmatprep.subr.mxu0 %v18056_v39  ;;  %13620 = vmatmul.mubr.f32.vlgmr.msra.gmra.mxu0 %v18081_v63 }
 0xc68   :  { %13626 = vmatpush3.msra.mxu1 %v18037_v24  ;;  %13640 = vmatpush3.msra.mxu0 %v18056_v39 }
 0xc69   :  { %13627 = vmatprep.subr.mxu1 %v18101_v46  ;;  %13641 = vmatprep.subr.mxu0 %v10325_v41 }
 0xc6a   :  { %13608 = vmatprep.mubr.f32.mxu1 %v18076_v19  ;;  %13628 = vmatpush3.msra.mxu1 %v18101_v46 }
 0xc6b   :  { %13642 = vmatpush3.msra.mxu0 %v10325_v41  ;;  %13609 = vmatmul.mubr.f32.gmra.mxu1 %v18086_v21 }
 0xc6c   :  { %13629 = vmatprep.subr.mxu1 %v18089_v44  ;;  %13643 = vmatprep.subr.mxu0 %v10332_v17 }
 0xc6d   :  { %13630 = vmatpush3.msra.mxu1 %v18089_v44  ;;  %13644 = vmatpush3.msra.mxu0 %v10332_v17 }
 0xc6e   :  { %13631 = vmatprep.subr.mxu1 %v18091_v9  ;;  %13645 = vmatprep.subr.mxu0 %v10339_v3 }
 0xc6f   :  { %13622 = vmatprep.mubr.f32.mxu0 %v18084_v33  ;;  %13632 = vmatpush3.msra.mxu1 %v18091_v9 }
 0xc70   :  { %13633 = vmatprep.mubr.f32.mxu1 %v10253_v4  ;;  %13646 = vmatpush3.msra.mxu0 %v10339_v3  ;;  %v18172_v4 = vpop.f32.mrf.mxu0 }
 0xc71   :  { %13623 = vmatmul.mubr.f32.gmra.mxu0 %v18096_v61  ;;  %13634 = vmatmul.mubr.f32.vlgmr.msra.gmra.mxu1 %v10263_v42 }
 0xc72   :  { %13653 = vmatprep.subr.mxu1 %v18037_v24  ;;  %13636 = vmatprep.mubr.f32.mxu1 %v10273_v60  ;;  %v18176_v39 = vpop.f32.mrf.mxu0 }
 0xc73   :  { %13654 = vmatpush3.msra.mxu1 %v18037_v24  ;;  %13647 = vmatprep.mubr.f32.mxu0 %v17804_v13  ;;  %v18174_v24 = vpop.f32.mrf.mxu1 }
 0xc74   :  { %13655 = vmatprep.subr.mxu1 %v18101_v46  ;;  %13667 = vmatprep.subr.mxu0 %v18841_v35 }
 0xc75   :  { %13656 = vmatpush3.msra.mxu1 %v18101_v46  ;;  %13648 = vmatmul.mubr.f32.vlgmr.msra.gmra.mxu0 %v18074_v0  ;;  %v18180_v63 = vpop.f32.mrf.mxu1 }
 0xc76   :  { %13637 = vmatmul.mubr.f32.gmra.mxu1 %v10283_v5  ;;  %13657 = vmatprep.subr.mxu1 %v18089_v44 }
 0xc77   :  { %13658 = vmatpush3.msra.mxu1 %v18089_v44  ;;  %13650 = vmatprep.mubr.f32.mxu0 %v18076_v19  ;;  %v18185_v44 = vpop.f32.mrf.mxu1 }
 0xc78   :  { %13659 = vmatprep.subr.mxu1 %v18091_v9  ;;  %13661 = vmatprep.mubr.f32.mxu1 %v17804_v13 }
 0xc79   :  { %13660 = vmatpush3.msra.mxu1 %v18091_v9  ;;  %13651 = vmatmul.mubr.f32.gmra.mxu0 %v18086_v21  ;;  %v13551_v37 = vpop.f32.mrf.mxu1 }
 0xc7a   :  { %13662 = vmatmul.mubr.f32.vlgmr.msra.gmra.mxu1 %v18074_v0  ;;  %13675 = vmatprep.mubr.msk.f32.mxu0 %vm13982_vm0, %v18841_v35 }
 0xc7b   :  { %13664 = vmatprep.mubr.f32.mxu1 %v18076_v19  ;;  %13678 = vmatprep.subr.mxu1 %v18841_v35  ;;  %v18182_v19 = vpop.f32.mrf.mxu0  ;;  %v9892_v54 = vpop.f32.mrf.mxu1 }
 0xc7d   :  { %v13537_v23 = vpop.f32.mrf.mxu0  ;;  %v18196_v56 = vpop.f32.mrf.mxu1 }
 0xc7e   :  { %13665 = vmatmul.mubr.f32.gmra.mxu1 %v18086_v21 }
 0xc7f   :  { %13686 = vmatprep.mubr.msk.f32.mxu1 %vm13982_vm0, %v18841_v35  ;;  %v9765_v15 = vpop.f32.mrf.mxu0  ;;  %v18198_v10 = vpop.f32.mrf.mxu1 }
 0xc81   :  { %v18200_v5 = vpop.f32.mrf.mxu1 }
 0xc98   :  { %v10168_v58 = vpop.permute.xlu0 %10167 }
 0xc99   :  { %v10160_v28 = vpop.permute.xlu1 %10159 }
 0xc9c   :  { %v18170_v13 = vpop.permute.xlu0 %10163 }
 0xca1   :  { %v18178_v0 = vpop.permute.xlu0 %9379 }
 0xca5   :  { %v9375_v33 = vpop.permute.xlu0 %9374 }
 0xca6   :  { %v9526_v21 = vadd.f32 %v17935_v22, %v9375_v33  ;;  %v13540_v22 = vpop.f32.mrf.mxu0 }
 0xca8   :  { %v9652_v45 = vadd.f32 %v17942_v18, %v9526_v21  ;;  %v18194_v27 = vpop.f32.mrf.mxu0 }
 0xca9   :  { %v9370_v9 = vpop.permute.xlu0 %9369 }
 0xcaa   :  { %v9516_v31 = vadd.f32 %v17951_v53, %v9370_v9  ;;  %v9773_v42 = vadd.f32 %v13537_v23, %v9652_v45  ;;  %v13559_v18 = vpop.f32.mrf.mxu0  ;;  %v9350_v45 = vpop.permute.xlu1 %9349 }
 0xcac   :  { %v9646_v60 = vadd.f32 %v17955_v52, %v9516_v31  ;;  %v18190_v61 = vadd.f32 %v13551_v37, %v9773_v42  ;;  %v9990_v53 = vpop.f32.mrf.mxu0  ;;  %v18204_v52 = vpop.f32.mrf.mxu1  ;;  %v9476_v42 = vadd.f32 %v17852_v12, %v9350_v45 }
 0xcae   :  { %v9766_v1 = vadd.f32 %v9765_v15, %v9646_v60  ;;  %v18202_v11 = vpop.f32.mrf.mxu0  ;;  %v18208_v38 = vpop.f32.mrf.mxu1 }
 0xcaf   :  { %v10156_v35 = vpop.permute.xlu1 %10155 }
 0xcb0   :  { %v18192_v46 = vadd.f32 %v9892_v54, %v9766_v1  ;;  %v18206_v17 = vpop.f32.mrf.mxu0  ;;  %v18210_v3 = vpop.f32.mrf.mxu1  ;;  %v9506_v1 = vadd.f32 %v17884_v32, %v17889_v36  ;;  %v9622_v54 = vadd.f32 %v17867_v43, %v9476_v42  ;;  %v9664_v32 = vadd.f32 %v17969_v55, %v9546_v59 }
 0xcb1   :  { %18842 = vst [vmem:[#allocation8_spill] sm:$0xff] %v18210_v3  ;;  %v9997_v59 = vadd.f32 %v13559_v18, %v18013_v2 }
 0xcb2   :  { %v13565_v41 = vpop.f32.mrf.mxu0  ;;  %v18214_v7 = vpop.f32.mrf.mxu1  ;;  %v9738_v12 = vadd.f32 %v18172_v4, %v9622_v54  ;;  %v9787_v4 = vadd.f32 %v13540_v22, %v9664_v32 }
 0xcb4   :  { %v18212_v50 = vpop.f32.mrf.mxu0  ;;  %v18218_v8 = vpop.f32.mrf.mxu1  ;;  %v9861_v14 = vadd.f32 %v18174_v24, %v9738_v12  ;;  %v9917_v22 = vadd.f32 %v18196_v56, %v9787_v4 }
 0xcb6   :  { %v18216_v48 = vpop.f32.mrf.mxu0  ;;  %v18222_v6 = vpop.f32.mrf.mxu1 }
 0xcb8   :  { %v18220_v29 = vpop.f32.mrf.mxu0  ;;  %v18224_v21 = vpop.f32.mrf.mxu1 }
 0xcb9   :  { %18843 = vst [vmem:[#allocation14_spill] sm:$0xff] %v18220_v29  ;;  %18844 = vst [vmem:[#allocation11_spill] sm:$0xff] %v18224_v21  ;;  %v9640_v21 = vadd.f32 %v17897_v20, %v9506_v1  ;;  %v9536_v20 = vadd.f32 %v17975_v30, %v18178_v0 }
 0xcbb   :  { %v9759_v3 = vadd.f32 %v18176_v39, %v9640_v21  ;;  %v9752_v39 = vadd.f32 %v18182_v19, %v18002_v49  ;;  %v10015_v49 = vadd.f32 %v18212_v50, %v18192_v46 }
 0xcbd   :  { %v9885_v24 = vadd.f32 %v18180_v63, %v9759_v3 }
 0xd1d   :  { %v13593_v26 = vpop.f32.mrf.mxu0 }
 0xd1e   :  { %v10268_v60 = vadd.f32 %v13593_v26, %v10160_v28 }
 0xd1f   :  { %v10257_v57 = vpop.f32.mrf.mxu0 }
 0xd20   :  { %v10258_v51 = vadd.f32 %v10257_v57, %v10156_v35 }
 0xd22   :  { %v13596_v33 = vpop.f32.mrf.mxu0 }
 0xd23   :  { %v10288_v62 = vadd.f32 %v13596_v33, %v10168_v58  ;;  %v9991_v33 = vadd.f32 %v9990_v53, %v9861_v14  ;;  %v10009_v53 = vadd.f32 %v18202_v11, %v9885_v24  ;;  %v18847_v24 = vld [vmem:[#allocation11_spill] sm:$0xff] }
 0xd24   :  { %v10277_v9 = vpop.f32.mrf.mxu0 }
 0xd25   :  { %v13607_v23 = vpop.f32.mrf.mxu1  ;;  %v10123_v1 = vadd.f32 %v18208_v38, %v10009_v53  ;;  %v18850_v53 = vmov 2131351028  }
 0xd26   :  { %v10385_v25 = vadd.f32 %v13607_v23, %v10268_v60  ;;  %v10021_v23 = vadd.f32 %v13565_v41, %v18190_v61  ;;  %v10105_v61 = vadd.f32 %v18204_v52, %v9991_v33  ;;  %v10129_v60 = vadd.f32 %v18218_v8, %v10015_v49 }
 0xd27   :  { %v10378_v31 = vpop.f32.mrf.mxu1  ;;  %v13621_v37 = vpop.f32.mrf.mxu0  ;;  %v18848_v49 = vmov 683565275  }
 0xd28   :  { %v10379_v26 = vadd.f32 %v10378_v31, %v10258_v51  ;;  %v10484_v43 = vadd.f32 %v13621_v37, %v10385_v25  ;;  %v10278_v51 = vadd.f32 %v10277_v9, %v18170_v13  ;;  %v9658_v13 = vadd.f32 %v17995_v40, %v9536_v20 }
 0xd29   :  { %v10476_v47 = vpop.f32.mrf.mxu0  ;;  %v10135_v40 = vadd.f32 %v18214_v7, %v10021_v23  ;;  %v10033_v37 = vadd.f32 %v18216_v48, %v9917_v22 }
 0xd2a   :  { %v10477_v58 = vadd.f32 %v10476_v47, %v10379_v26 }
 0xd2b   :  { %v13610_v15 = vpop.f32.mrf.mxu1  ;;  %v10147_v8 = vadd.f32 %v18222_v6, %v10033_v37 }
 0xd2c   :  { %v10397_v36 = vadd.f32 %v13610_v15, %v10288_v62 }
 0xd2d   :  { %v10390_v34 = vpop.f32.mrf.mxu1 }
 0xd2e   :  { %v10391_v47 = vadd.f32 %v10390_v34, %v10278_v51  ;;  %v9877_v34 = vadd.f32 %v18185_v44, %v9752_v39 }
 0xd30   :  { %v10003_v7 = vadd.f32 %v18206_v17, %v9877_v34 }
 0xd31   :  { %v13624_v28 = vpop.f32.mrf.mxu0  ;;  %v13635_v45 = vpop.f32.mrf.mxu1 }
 0xd32   :  { %v10583_v16 = vadd.f32 %v13635_v45, %v10484_v43  ;;  %v10498_v62 = vadd.f32 %v13624_v28, %v10397_v36 }
 0xd33   :  { %v10490_v42 = vpop.f32.mrf.mxu0  ;;  %v10574_v29 = vpop.f32.mrf.mxu1 }
 0xd34   :  { %v10575_v25 = vadd.f32 %v10574_v29, %v10477_v58  ;;  %v10111_v29 = vadd.f32 %v18200_v5, %v9997_v59  ;;  %v10491_v41 = vadd.f32 %v10490_v42, %v10391_v47  ;;  %v9780_v5 = vadd.f32 %v18194_v27, %v9658_v13  ;;  %v18281_v59 = vld [vmem:[%s18609_s4 + $0x200] sm:$0xff] }
 0xd35   :  { %v13649_v35 = vpop.f32.mrf.mxu0  ;;  %11223 = vperm.xlu1 %13863, %v18281_v59  }
 0xd36   :  { %v13638_v57 = vpop.f32.mrf.mxu1  ;;  %v10688_v0 = vadd.f32 %v13649_v35, %v10583_v16  ;;  %v9909_v26 = vadd.f32 %v18198_v10, %v9780_v5  ;;  %v18845_v16 = vld [vmem:[#allocation8_spill] sm:$0xff]  ;;  %v18846_v35 = vld [vmem:[#allocation14_spill] sm:$0xff] }
 0xd37   :  { %v10681_v55 = vpop.f32.mrf.mxu0  ;;  %v10599_v30 = vadd.f32 %v13638_v57, %v10498_v62  ;;  %v10117_v58 = vadd.f32 %v18845_v16, %v10003_v7 }
 0xd38   :  { %v10590_v21 = vpop.f32.mrf.mxu1  ;;  %v10682_v19 = vadd.f32 %v10681_v55, %v10575_v25  ;;  %v10027_v10 = vadd.f32 %v18846_v35, %v9909_v26 }
 0xd39   :  { %v13652_v2 = vpop.f32.mrf.mxu0  ;;  %v10591_v46 = vadd.f32 %v10590_v21, %v10491_v41  ;;  %v18851_v41 = vmov 2102212464  }
 0xd3a   :  { %v13663_v18 = vpop.f32.mrf.mxu1  ;;  %v10700_v56 = vadd.f32 %v13652_v2, %v10599_v30  ;;  %v10141_v33 = vadd.f32 %v18847_v24, %v10027_v10 }
 0xd3b   :  { %v10781_v63 = vadd.f32 %v13663_v18, %v10688_v0  ;;  %v10693_v11 = vpop.f32.mrf.mxu0 }
 0xd3c   :  { %v10774_v3 = vpop.f32.mrf.mxu1  ;;  %v10694_v28 = vadd.f32 %v10693_v11, %v10591_v46 }
 0xd3d   :  { %v10797_v9 = vmul.f32 %v10781_v63, %v10111_v29  ;;  %v10775_v31 = vadd.f32 %v10774_v3, %v10682_v19  ;;  %v18849_v63 = vmov 2475754826  }
 0xd3e   :  { %v13666_v50 = vpop.f32.mrf.mxu1 }
 0xd3f   :  { %v18257_v44 = vadd.f32 %v10797_v9, %v10135_v40  ;;  %v10796_v15 = vmul.f32 %v10775_v31, %v10105_v61  ;;  %v10793_v52 = vadd.f32 %v13666_v50, %v10700_v56  ;;  %v18852_v40 = vmov 920167782  }
 0xd40   :  { %v10786_v48 = vpop.f32.mrf.mxu1  ;;  %v18853_v50 = vmov 1326507024  }
 0xd41   :  { %v10908_v54 = vand.u32 2147483647, %v18257_v44  ;;  %v10911_v12 = vand.u32 2139095040, %v18257_v44  ;;  %v18263_v27 = vadd.f32 %v10796_v15, %v10129_v60  ;;  %v10799_v45 = vmul.f32 %v10793_v52, %v10123_v1 }
 0xd42   :  { %v10787_v42 = vadd.f32 %v10786_v48, %v10694_v28 }
 0xd43   :  { %v10912_v32 = vshrl.u32 %v10911_v12, 23  ;;  %v10915_v36 = vand.u32 8388607, %v10908_v54  ;;  %v10804_v38 = vand.u32 2147483647, %v18263_v27  ;;  %v10807_v17 = vand.u32 2139095040, %v18263_v27 }
 0xd44   :  { %v18271_v43 = vadd.f32 %v10799_v45, %v10147_v8  ;;  %v10798_v55 = vmul.f32 %v10787_v42, %v10117_v58 }
 0xd45   :  { %v11789_v14 = vadd.s32 4294967169, %v10912_v32  ;;  %v10808_v20 = vshrl.u32 %v10807_v17, 23  ;;  %v10811_v6 = vand.u32 8388607, %v10804_v38  ;;  %v10916_v4 = vor.u32 8388608, %v10915_v36 }
 0xd46   :  { %v11119_v57 = vand.u32 2139095040, %v18271_v43  ;;  %v11116_v22 = vand.u32 2147483647, %v18271_v43  ;;  %v18292_v18 = vadd.f32 %v10798_v55, %v10141_v33 }
 0xd47   :  { %v10918_v51 = vadd.s32 1, %v11789_v14  ;;  %v11785_v62 = vadd.s32 4294967169, %v10808_v20  ;;  %v10812_v25 = vor.u32 8388608, %v10811_v6  ;;  %v18285_v0 = vshll.u32 %v10916_v4, 8 }
 0xd48   :  { %v11120_v39 = vshrl.u32 %v11119_v57, 23 }
 0xd49   :  { %vm10919_vm12 = vcmp.gt.s32.totalorder %v10918_v51, 0  ;;  %v10814_v21 = vadd.s32 1, %v11785_v62  ;;  %v18287_v13 = vshll.u32 %v10812_v25, 8 }
 0xd4a   :  { %v10920_v47 = vsel %vm10919_vm12, %v10918_v51, 0  ;;  %v18290_v2 = vadd.s32 4294967169, %v11120_v39 }
 0xd4b   :  { %v10921_v23 = vshrl.u32 %v10920_v47, 5  ;;  %v10922_v30 = vand.u32 31, %v10920_v47  ;;  %vm10815_vm13 = vcmp.gt.s32.totalorder %v10814_v21, 0 }
 0xd4c   :  { %v10816_v1 = vsel %vm10815_vm13, %v10814_v21, 0 }
 0xd4d   :  { %v10923_v29 = vsub.s32 32, %v10922_v30  ;;  %v10925_v19 = vshll.u32 %v18848_v49, %v10922_v30  ;;  %v10928_v34 = vshll.u32 %v18849_v63, %v10922_v30  ;;  %v10931_v61 = vshll.u32 %v18850_v53, %v10922_v30 }
 0xd4e   :  { %v10934_v3 = vshll.u32 %v18851_v41, %v10922_v30  ;;  %v10937_v56 = vshll.u32 %v18852_v40, %v10922_v30  ;;  %vm10940_vm14 = vcmp.lt.s32.totalorder %v10921_v23, 1  ;;  %vm10941_vm15 = vcmp.lt.s32.totalorder %v10921_v23, 2 }
 0xd4f   :  { %v10926_v9 = vshrl.u32 %v18849_v63, %v10923_v29  ;;  %v10929_v31 = vshrl.u32 %v18850_v53, %v10923_v29  ;;  %v10932_v5 = vshrl.u32 %v18851_v41, %v10923_v29  ;;  %v10924_v37 = vshrl.u32 %v18848_v49, %v10923_v29 }
 0xd50   :  { %v10935_v46 = vshrl.u32 %v18852_v40, %v10923_v29  ;;  %v10938_v60 = vshrl.u32 %v18853_v50, %v10923_v29  ;;  %vm10942_vm3 = vcmp.lt.s32.totalorder %v10921_v23, 3  ;;  %vm10943_vm1 = vcmp.lt.s32.totalorder %v10921_v23, 4 }
 0xd51   :  { %v10927_v11 = vor.u32 %v10926_v9, %v10925_v19  ;;  %v10930_v15 = vor.u32 %v10929_v31, %v10928_v34  ;;  %v10933_v52 = vor.u32 %v10932_v5, %v10931_v61  ;;  %v10818_v48 = vand.u32 31, %v10816_v1 }
 0xd52   :  { %v10936_v7 = vor.u32 %v10935_v46, %v10934_v3  ;;  %v10939_v12 = vor.u32 %v10938_v60, %v10937_v56  ;;  %v10817_v35 = vshrl.u32 %v10816_v1, 5 }
 0xd53   :  { %v10944_v26 = vsel %vm10940_vm14, %v10924_v37, %v10927_v11  ;;  %v10945_v8 = vsel %vm10943_vm1, %v10933_v52, 2102212464  ;;  %v10948_v28 = vsel %vm10940_vm14, %v10927_v11, %v10930_v15  ;;  %v10952_v45 = vsel %vm10940_vm14, %v10930_v15, %v10933_v52 }
 0xd54   :  { %v10946_v32 = vsel %vm10942_vm3, %v10930_v15, %v10945_v8  ;;  %v10949_v36 = vsel %vm10943_vm1, %v10936_v7, 920167782  ;;  %v10953_v17 = vsel %vm10943_vm1, %v10939_v12, 1326507024  ;;  %v10819_v42 = vsub.s32 32, %v10818_v48 }
 0xd55   :  { %v10947_v14 = vsel %vm10941_vm15, %v10944_v26, %v10946_v32  ;;  %v10950_v16 = vsel %vm10942_vm3, %v10933_v52, %v10949_v36  ;;  %v10954_v58 = vsel %vm10942_vm3, %v10936_v7, %v10953_v17  ;;  %v10821_v4 = vshll.u32 %v18848_v49, %v10818_v48 }
 0xd56   :  { %v10951_v10 = vsel %vm10941_vm15, %v10948_v28, %v10950_v16  ;;  %v10955_v20 = vsel %vm10941_vm15, %v10952_v45, %v10954_v58  ;;  %v10963_v6 = vmul.u32 %v18285_v0, %v10947_v14  ;;  %v10820_v55 = vshrl.u32 %v18848_v49, %v10819_v42 }
 0xd57   :  { %v18318_v51 = vmul.u32.u64.low %v18285_v0, %v10955_v20  ;;  %v18319_v57 = vmul.u32.u64.high %v18285_v0, %v10955_v20, %v18318_v51  ;;  %v18322_v62 = vmul.u32.u64.low %v18285_v0, %v10951_v10  ;;  %v18323_v25 = vmul.u32.u64.high %v18285_v0, %v10951_v10, %v18322_v62 }
 0xd58   :  { %v10822_v39 = vshrl.u32 %v18849_v63, %v10819_v42  ;;  %v10824_v24 = vshll.u32 %v18849_v63, %v10818_v48  ;;  %v10825_v33 = vshrl.u32 %v18850_v53, %v10819_v42  ;;  %v10827_v47 = vshll.u32 %v18850_v53, %v10818_v48 }
 0xd59   :  { %v10828_v21 = vshrl.u32 %v18851_v41, %v10819_v42  ;;  %v10830_v23 = vshll.u32 %v18851_v41, %v10818_v48  ;;  %v10831_v30 = vshrl.u32 %v18852_v40, %v10819_v42  ;;  %v10833_v19 = vshll.u32 %v18852_v40, %v10818_v48 }
 0xd5a   :  { %v10823_v29 = vor.u32 %v10822_v39, %v10821_v4  ;;  %v10826_v0 = vor.u32 %v10825_v33, %v10824_v24  ;;  %v10834_v34 = vshrl.u32 %v18853_v50, %v10819_v42  ;;  %vm10965_vm4 = vc.u32 %v18319_v57, %v18322_v62 }
 0xd5b   :  { %v10966_v61 = vadd.s32 1, %v18323_v25  ;;  %v10829_v3 = vor.u32 %v10828_v21, %v10827_v47  ;;  %vm10836_vm5 = vcmp.lt.s32.totalorder %v10817_v35, 1  ;;  %v10832_v56 = vor.u32 %v10831_v30, %v10830_v23 }
 0xd5c   :  { %v10835_v9 = vor.u32 %v10834_v34, %v10833_v19  ;;  %vm10837_vm6 = vcmp.lt.s32.totalorder %v10817_v35, 2  ;;  %vm10838_vm7 = vcmp.lt.s32.totalorder %v10817_v35, 3  ;;  %vm10839_vm8 = vcmp.lt.s32.totalorder %v10817_v35, 4 }
 0xd5d   :  { %v10967_v31 = vsel %vm10965_vm4, %v10966_v61, %v18323_v25  ;;  %v10840_v5 = vsel %vm10836_vm5, %v10820_v55, %v10823_v29  ;;  %v10844_v37 = vsel %vm10836_vm5, %v10823_v29, %v10826_v0  ;;  %v10841_v60 = vsel %vm10839_vm8, %v10829_v3, 2102212464 }
 0xd5e   :  { %v10968_v46 = vadd.s32 %v10967_v31, %v10963_v6  ;;  %v10845_v11 = vsel %vm10839_vm8, %v10832_v56, 920167782  ;;  %v10848_v15 = vsel %vm10836_vm5, %v10826_v0, %v10829_v3  ;;  %v10842_v52 = vsel %vm10838_vm7, %v10826_v0, %v10841_v60 }
 0xd5f   :  { %v10846_v1 = vsel %vm10838_vm7, %v10829_v3, %v10845_v11  ;;  %v10849_v7 = vsel %vm10839_vm8, %v10835_v9, 1326507024  ;;  %v11126_v12 = vadd.s32 1, %v18290_v2  ;;  %v11015_v28 = vand.u32 2139095040, %v18292_v18 }
 0xd60   :  { %v10969_v48 = vadd.s32 536870912, %v10968_v46  ;;  %v10847_v26 = vsel %vm10837_vm6, %v10844_v37, %v10846_v1  ;;  %v10850_v8 = vsel %vm10838_vm7, %v10832_v56, %v10849_v7  ;;  %v10843_v45 = vsel %vm10837_vm6, %v10840_v5, %v10842_v52 }
 0xd61   :  { %v10851_v32 = vsel %vm10837_vm6, %v10848_v15, %v10850_v8  ;;  %v18346_v36 = vmul.u32.u64.low %v18287_v13, %v10847_v26  ;;  %v18347_v17 = vmul.u32.u64.high %v18287_v13, %v10847_v26, %v18346_v36  ;;  %vm11127_vm9 = vcmp.gt.s32.totalorder %v11126_v12, 0 }
 0xd62   :  { %v18350_v42 = vshrl.u32 %v10969_v48, 30  ;;  %v18353_v14 = vmul.u32.u64.low %v18287_v13, %v10851_v32  ;;  %v18354_v2 = vmul.u32.u64.high %v18287_v13, %v10851_v32, %v18353_v14  ;;  %v11128_v16 = vsel %vm11127_vm9, %v11126_v12, 0 }
 0xd63   :  { %v11130_v10 = vand.u32 31, %v11128_v16  ;;  %v10859_v20 = vmul.u32 %v18287_v13, %v10843_v45  ;;  %v10862_v35 = vadd.s32 1, %v18347_v17  ;;  %v11123_v6 = vand.u32 8388607, %v11116_v22 }
 0xd64   :  { %v10971_v58 = vshll.u32 %v18350_v42, 30  ;;  %vm10861_vm10 = vc.u32 %v18354_v2, %v18346_v36  ;;  %v11016_v25 = vshrl.u32 %v11015_v28, 23  ;;  %v11129_v39 = vshrl.u32 %v11128_v16, 5 }
 0xd65   :  { %v11131_v51 = vsub.s32 32, %v11130_v10  ;;  %v10863_v55 = vsel %vm10861_vm10, %v10862_v35, %v18347_v17  ;;  %v11133_v24 = vshll.u32 %v18848_v49, %v11130_v10  ;;  %v11136_v33 = vshll.u32 %v18849_v63, %v11130_v10 }
 0xd66   :  { %v18361_v4 = vsub.s32 %v10968_v46, %v10971_v58  ;;  %v10864_v47 = vadd.s32 %v10863_v55, %v10859_v20  ;;  %v11139_v23 = vshll.u32 %v18850_v53, %v11130_v10  ;;  %v11142_v0 = vshll.u32 %v18851_v41, %v11130_v10 }
 0xd67   :  { %v11134_v21 = vshrl.u32 %v18849_v63, %v11131_v51  ;;  %v11137_v30 = vshrl.u32 %v18850_v53, %v11131_v51  ;;  %v11140_v29 = vshrl.u32 %v18851_v41, %v11131_v51  ;;  %v11143_v19 = vshrl.u32 %v18852_v40, %v11131_v51 }
 0xd68   :  { %v10974_v13 = vsub.s32 0, %v18361_v4  ;;  %v10865_v61 = vadd.s32 536870912, %v10864_v47  ;;  %v11145_v56 = vshll.u32 %v18852_v40, %v11130_v10  ;;  %v11146_v37 = vshrl.u32 %v18853_v50, %v11131_v51 }
 0xd69   :  { %v11135_v3 = vor.u32 %v11134_v21, %v11133_v24  ;;  %v11138_v9 = vor.u32 %v11137_v30, %v11136_v33  ;;  %v11141_v31 = vor.u32 %v11140_v29, %v11139_v23  ;;  %v11144_v5 = vor.u32 %v11143_v19, %v11142_v0 }
 0xd6a   :  { %v11790_v34 = vmin.u32 %v10974_v13, %v18361_v4  ;;  %v18378_v60 = vshrl.u32 %v10865_v61, 30  ;;  %v11124_v11 = vor.u32 8388608, %v11123_v6  ;;  %v11147_v15 = vor.u32 %v11146_v37, %v11145_v56 }
 0xd6b   :  { %vm11148_vm11 = vcmp.lt.s32.totalorder %v11129_v39, 1  ;;  %vm11149_vm12 = vcmp.lt.s32.totalorder %v11129_v39, 2  ;;  %v11793_v52 = vadd.s32 4294967169, %v11016_v25  ;;  %vm11150_vm13 = vcmp.lt.s32.totalorder %v11129_v39, 3 }
 0xd6c   :  { %v10976_v46 = vclz %v11790_v34  ;;  %v10867_v1 = vshll.u32 %v18378_v60, 30  ;;  %vm11151_vm14 = vcmp.lt.s32.totalorder %v11129_v39, 4  ;;  %v11156_v7 = vsel %vm11148_vm11, %v11135_v3, %v11138_v9 }
 0xd6d   :  { %v11132_v12 = vshrl.u32 %v18848_v49, %v11131_v51  ;;  %v11153_v48 = vsel %vm11151_vm14, %v11141_v31, 2102212464  ;;  %v11157_v26 = vsel %vm11151_vm14, %v11144_v5, 920167782  ;;  %v11161_v8 = vsel %vm11151_vm14, %v11147_v15, 1326507024 }
 0xd6e   :  { %v11791_v28 = vadd.s32 4294967294, %v10976_v46  ;;  %v18383_v45 = vsub.s32 %v10864_v47, %v10867_v1  ;;  %v11158_v32 = vsel %vm11150_vm13, %v11141_v31, %v11157_v26  ;;  %v11160_v17 = vsel %vm11148_vm11, %v11138_v9, %v11141_v31 }
 0xd6f   :  { %v11159_v14 = vsel %vm11149_vm12, %v11156_v7, %v11158_v32  ;;  %v11162_v16 = vsel %vm11150_vm13, %v11144_v5, %v11161_v8  ;;  %v11164_v58 = vshll.u32 %v11124_v11, 8  ;;  %v11152_v20 = vsel %vm11148_vm11, %v11132_v12, %v11135_v3 }
 0xd70   :  { %v10870_v10 = vsub.s32 0, %v18383_v45  ;;  %v11154_v35 = vsel %vm11150_vm13, %v11138_v9, %v11153_v48  ;;  %v11163_v6 = vsel %vm11149_vm12, %v11160_v17, %v11162_v16  ;;  %v11022_v55 = vadd.s32 1, %v11793_v52 }
 0xd71   :  { %v18393_v51 = vmul.u32.u64.low %v11164_v58, %v11159_v14  ;;  %v18394_v25 = vmul.u32.u64.high %v11164_v58, %v11159_v14, %v18393_v51  ;;  %vm11792_vm15 = vcmp.lt.s32.totalorder %v11791_v28, 0  ;;  %v11012_v33 = vand.u32 2147483647, %v18292_v18 }
 0xd72   :  { %v11786_v24 = vmin.u32 %v10870_v10, %v18383_v45  ;;  %v18399_v13 = vmul.u32.u64.low %v11164_v58, %v11163_v6  ;;  %v18400_v47 = vmul.u32.u64.high %v11164_v58, %v11163_v6, %v18399_v13  ;;  %vm11023_vm3 = vcmp.gt.s32.totalorder %v11022_v55, 0 }
 0xd73   :  { %v11155_v23 = vsel %vm11149_vm12, %v11152_v20, %v11154_v35  ;;  %v11024_v30 = vsel %vm11023_vm3, %v11022_v55, 0  ;;  %v18403_v29 = vsel %vm11792_vm15, 0, %v11791_v28  ;;  %v11174_v0 = vadd.s32 1, %v18394_v25 }
 0xd74   :  { %v10872_v21 = vclz %v11786_v24  ;;  %v11026_v19 = vand.u32 31, %v11024_v30  ;;  %v11019_v61 = vand.u32 8388607, %v11012_v33  ;;  %v11171_v3 = vmul.u32 %v11164_v58, %v11155_v23 }
 0xd75   :  { %vm11173_vm1 = vc.u32 %v18400_v47, %v18393_v51  ;;  %v10984_v9 = vsub.s32 4294967266, %v18403_v29  ;;  %v10980_v37 = vsub.s32 32, %v18403_v29  ;;  %v10964_v32 = vadd.s32 %v18322_v62, %v18319_v57 }
 0xd76   :  { %v11787_v34 = vadd.s32 4294967294, %v10872_v21  ;;  %v11027_v56 = vsub.s32 32, %v11026_v19  ;;  %v11175_v39 = vsel %vm11173_vm1, %v11174_v0, %v18394_v25  ;;  %v11020_v5 = vor.u32 8388608, %v11019_v61 }
 0xd77   :  { %v11176_v31 = vadd.s32 %v11175_v39, %v11171_v3  ;;  %v10985_v52 = vadd.s32 127, %v10984_v9  ;;  %v11029_v1 = vshll.u32 %v18848_v49, %v11026_v19  ;;  %v11032_v7 = vshll.u32 %v18849_v63, %v11026_v19 }
 0xd78   :  { %vm11788_vm4 = vcmp.lt.s32.totalorder %v11787_v34, 0  ;;  %v11030_v11 = vshrl.u32 %v18849_v63, %v11027_v56  ;;  %v11033_v15 = vshrl.u32 %v18850_v53, %v11027_v56  ;;  %v11036_v12 = vshrl.u32 %v18851_v41, %v11027_v56 }
 0xd79   :  { %v11177_v46 = vadd.s32 536870912, %v11176_v31  ;;  %v18418_v48 = vsel %vm11788_vm4, 0, %v11787_v34  ;;  %v11035_v8 = vshll.u32 %v18850_v53, %v11026_v19  ;;  %v11039_v28 = vshrl.u32 %v18852_v40, %v11027_v56 }
 0xd7a   :  { %v11025_v17 = vshrl.u32 %v11024_v30, 5  ;;  %v11038_v14 = vshll.u32 %v18851_v41, %v11026_v19  ;;  %v11031_v58 = vor.u32 %v11030_v11, %v11029_v1  ;;  %v11034_v63 = vor.u32 %v11033_v15, %v11032_v7 }
 0xd7b   :  { %v18420_v26 = vshrl.u32 %v11177_v46, 30  ;;  %v11037_v10 = vor.u32 %v11036_v12, %v11035_v8  ;;  %v10880_v20 = vsub.s32 4294967266, %v18418_v48  ;;  %v11041_v6 = vshll.u32 %v18852_v40, %v11026_v19 }
 0xd7c   :  { %v11040_v35 = vor.u32 %v11039_v28, %v11038_v14  ;;  %v11042_v53 = vshrl.u32 %v18853_v50, %v11027_v56  ;;  %v10982_v25 = vshrl.u32 %v10964_v32, %v10980_v37  ;;  %v10986_v55 = vshll.u32 %v10985_v52, 23 }
 0xd7d   :  { %v11179_v16 = vshll.u32 %v18420_v26, 30  ;;  %v11060_v13 = vshll.u32 %v11020_v5, 8  ;;  %v11028_v57 = vshrl.u32 %v18848_v49, %v11027_v56  ;;  %vm11044_vm5 = vcmp.lt.s32.totalorder %v11025_v17, 1 }
 0xd7e   :  { %v11043_v62 = vor.u32 %v11042_v53, %v11041_v6  ;;  %vm11047_vm6 = vcmp.lt.s32.totalorder %v11025_v17, 4  ;;  %v10876_v41 = vsub.s32 32, %v18418_v48  ;;  %v11052_v30 = vsel %vm11044_vm5, %v11031_v58, %v11034_v63 }
 0xd7f   :  { %v11180_v24 = vsub.s32 %v11176_v31, %v11179_v16  ;;  %v11049_v23 = vsel %vm11047_vm6, %v11037_v10, 2102212464  ;;  %v10881_v0 = vadd.s32 127, %v10880_v20  ;;  %vm11046_vm7 = vcmp.lt.s32.totalorder %v11025_v17, 3 }
 0xd80   :  { %v11053_v34 = vsel %vm11047_vm6, %v11040_v35, 920167782  ;;  %v11056_v40 = vsel %vm11044_vm5, %v11034_v63, %v11037_v10  ;;  %vm11045_vm8 = vcmp.lt.s32.totalorder %v11025_v17, 2  ;;  %v11057_v61 = vsel %vm11047_vm6, %v11043_v62, 1326507024 }
 0xd81   :  { %v11182_v21 = vsub.s32 0, %v11180_v24  ;;  %v11054_v50 = vsel %vm11046_vm7, %v11037_v10, %v11053_v34  ;;  %v11048_v3 = vsel %vm11044_vm5, %v11028_v57, %v11031_v58  ;;  %v11050_v9 = vsel %vm11046_vm7, %v11034_v63, %v11049_v23 }
 0xd82   :  { %v11055_v39 = vsel %vm11045_vm8, %v11052_v30, %v11054_v50  ;;  %v11058_v49 = vsel %vm11046_vm7, %v11040_v35, %v11057_v61  ;;  %v10981_v46 = vshll.u32 %v18361_v4, %v18403_v29  ;;  %v10860_v52 = vadd.s32 %v18346_v36, %v18354_v2 }
 0xd83   :  { %v11798_v19 = vmin.u32 %v11182_v21, %v11180_v24  ;;  %v11059_v31 = vsel %vm11045_vm8, %v11056_v40, %v11058_v49  ;;  %v18433_v5 = vmul.u32.u64.low %v11060_v13, %v11055_v39  ;;  %v18434_v37 = vmul.u32.u64.high %v11060_v13, %v11055_v39, %v18433_v5 }
 0xd84   :  { %v18439_v11 = vmul.u32.u64.low %v11060_v13, %v11059_v31  ;;  %v18440_v15 = vmul.u32.u64.high %v11060_v13, %v11059_v31, %v18439_v11  ;;  %v10882_v1 = vshll.u32 %v10881_v0, 23  ;;  %v11051_v12 = vsel %vm11045_vm8, %v11048_v3, %v11050_v9 }
 0xd85   :  { %v11184_v56 = vclz %v11798_v19  ;;  %v10983_v8 = vor.u32 %v10982_v25, %v10981_v46  ;;  %v10987_v28 = vor.u32 4788187, %v10986_v55  ;;  %v10878_v32 = vshrl.u32 %v10860_v52, %v10876_v41 }
 0xd86   :  { %v11172_v17 = vadd.s32 %v18393_v51, %v18400_v47  ;;  %v11070_v14 = vadd.s32 1, %v18434_v37  ;;  %v10877_v4 = vshll.u32 %v18383_v45, %v18418_v48  ;;  %v11067_v16 = vmul.u32 %v11060_v13, %v11051_v12 }
 0xd87   :  { %v11799_v7 = vadd.s32 4294967294, %v11184_v56  ;;  %vm11069_vm10 = vc.u32 %v18440_v15, %v18433_v5  ;;  %v10883_v36 = vor.u32 4788187, %v10882_v1  ;;  %v10988_v10 = vand.u32 2147483647, %v10987_v28 }
 0xd88   :  { %v11071_v63 = vsel %vm11069_vm10, %v11070_v14, %v18434_v37  ;;  %v10879_v35 = vor.u32 %v10878_v32, %v10877_v4  ;;  %v10990_v25 = vcvt.s32.f32 %v10983_v8  ;;  %vm10910_vm11 = vcmp.lt.s32.totalorder %v18257_v44, 0 }
 0xd89   :  { %vm11800_vm9 = vcmp.lt.s32.totalorder %v11799_v7, 0  ;;  %v11072_v20 = vadd.s32 %v11071_v63, %v11067_v16  ;;  %v10884_v55 = vand.u32 2147483647, %v10883_v36  ;;  %vm11118_vm12 = vcmp.lt.s32.totalorder %v18271_v43, 0 }
 0xd8a   :  { %v11187_v29 = vsel %vm11800_vm9, 0, %v11799_v7  ;;  %v10991_v57 = vmul.f32 %v10990_v25, %v10988_v10  ;;  %v10886_v62 = vcvt.s32.f32 %v10879_v35  ;;  %v11202_v9 = vsub.s32 4, %v18420_v26 }
 0xd8b   :  { %v11188_v2 = vsub.s32 32, %v11187_v29  ;;  %v11192_v58 = vsub.s32 4294967266, %v11187_v29  ;;  %v11189_v51 = vshll.u32 %v11180_v24, %v11187_v29  ;;  %v11073_v53 = vadd.s32 536870912, %v11072_v20 }
 0xd8c   :  { %v10887_v23 = vmul.f32 %v10886_v62, %v10884_v55  ;;  %v10992_v40 = vxor.u32 2147483648, %v10991_v57  ;;  %vm18462_vm13 = vcmp.le.f32.partialorder %v11116_v22, 0.7853982  ;;  %vm10806_vm14 = vcmp.lt.s32.totalorder %v18263_v27, 0 }
 0xd8d   :  { %v11190_v47 = vshrl.u32 %v11172_v17, %v11188_v2  ;;  %v11193_v6 = vadd.s32 127, %v11192_v58  ;;  %v18452_v13 = vshrl.u32 %v11073_v53, 30  ;;  %vm18472_vm15 = vcmp.le.f32.partialorder %v10908_v54, 0.7853982 }
 0xd8e   :  { %v10888_v50 = vxor.u32 2147483648, %v10887_v23  ;;  %v10993_v39 = vsel %vm10910_vm11, %v10992_v40, %v10991_v57  ;;  %v11203_v1 = vsel %vm11118_vm12, %v11202_v9, %v18420_v26  ;;  %vm18484_vm3 = vcmp.le.f32.partialorder %v10804_v38, 0.7853982 }
 0xd8f   :  { %v11191_v45 = vor.u32 %v11190_v47, %v11189_v51  ;;  %v11194_v48 = vshll.u32 %v11193_v6, 23  ;;  %v11075_v21 = vshll.u32 %v18452_v13, 30  ;;  %v10996_v11 = vsel %vm18472_vm15, %v18257_v44, %v10993_v39 }
 0xd90   :  { %v10889_v22 = vsel %vm10806_vm14, %v10888_v50, %v10887_v23  ;;  %v11205_v8 = vsel %vm18462_vm13, 0, %v11203_v1  ;;  %v11068_v26 = vadd.s32 %v18433_v5, %v18440_v15  ;;  %v10994_v38 = vsub.s32 4, %v18350_v42 }
 0xd91   :  { %v11195_v41 = vor.u32 4788187, %v11194_v48  ;;  %v11198_v0 = vcvt.s32.f32 %v11191_v45  ;;  %v11076_v34 = vsub.s32 %v11072_v20, %v11075_v21  ;;  %v10892_v54 = vsel %vm18484_vm3, %v18263_v27, %v10889_v22 }
 0xd92   :  { %v11209_v29 = vadd.s32 3, %v11205_v8  ;;  %v10890_v2 = vsub.s32 4, %v18378_v60  ;;  %v10995_v5 = vsel %vm10910_vm11, %v10994_v38, %v18350_v42  ;;  %vm11014_vm7 = vcmp.lt.s32.totalorder %v18292_v18, 0 }
 0xd93   :  { %v11196_v30 = vand.u32 2147483647, %v11195_v41  ;;  %v11078_v19 = vsub.s32 0, %v11076_v34  ;;  %v10997_v6 = vsel %vm18472_vm15, 0, %v10995_v5  ;;  %vm11208_vm8 = vweird.f32 %v18271_v43 }
 0xd94   :  { %v11210_v63 = vand.u32 3, %v11209_v29  ;;  %v10891_v35 = vsel %vm10806_vm14, %v10890_v2, %v18378_v60  ;;  %v11001_v62 = vadd.s32 3, %v10997_v6  ;;  %v11098_v21 = vsub.s32 4, %v18452_v13 }
 0xd95   :  { %v11199_v24 = vmul.f32 %v11198_v0, %v11196_v30  ;;  %v11794_v3 = vmin.u32 %v11078_v19, %v11076_v34  ;;  %v10893_v42 = vsel %vm18484_vm3, 0, %v10891_v35  ;;  %vm18512_vm9 = vcmp.le.f32.partialorder %v11012_v33, 0.7853982 }
 0xd96   :  { %vm11215_vm4 = vcmp.eq.s32.totalorder %v11210_v63, 2  ;;  %vm11212_vm5 = vcmp.eq.s32.totalorder %v11210_v63, 0  ;;  %vm11211_vm6 = vcmp.lt.s32.totalorder %v11210_v63, 2  ;;  %v10897_v40 = vadd.s32 3, %v10893_v42 }
 0xd97   :  { %v11200_v61 = vxor.u32 2147483648, %v11199_v24  ;;  %v11080_v37 = vclz %v11794_v3  ;;  %v11002_v50 = vand.u32 3, %v11001_v62  ;;  %v11099_v3 = vsel %vm11014_vm7, %v11098_v21, %v18452_v13 }
 0xd98   :  { %v18862_v39 = vmov 0.0   ;;  %v10898_v49 = vand.u32 3, %v10897_v40  ;;  %v11101_v22 = vsel %vm18512_vm9, 0, %v11099_v3  ;;  %vm11000_vm15 = vweird.f32 %v18257_v44 }
 0xd99   :  { %v11201_v56 = vsel %vm11118_vm12, %v11200_v61, %v11199_v24  ;;  %v11795_v52 = vadd.s32 4294967294, %v11080_v37  ;;  %v11227_v37 = vsel %vm4526_vm2, %v18281_v59, 0  ;;  %vm11004_vm10 = vcmp.eq.s32.totalorder %v11002_v50, 0 }
 0xd9a   :  { %v11204_v31 = vsel %vm18462_vm13, %v18271_v43, %v11201_v56  ;;  %vm11007_vm11 = vcmp.eq.s32.totalorder %v11002_v50, 2  ;;  %vm11003_vm12 = vcmp.lt.s32.totalorder %v11002_v50, 2  ;;  %vm10900_vm13 = vcmp.eq.s32.totalorder %v10898_v49, 0 }
 0xd9b   :  { %13933 = vcosq.f32 %v11204_v31  ;;  %vm11796_vm1 = vcmp.lt.s32.totalorder %v11795_v52, 0  ;;  %vm10903_vm14 = vcmp.eq.s32.totalorder %v10898_v49, 2  ;;  %v18539_v1 = vand.u32 4294901760, %v11227_v37 }
 0xd9c   :  { %13935 = vsinq.f32 %v11204_v31  ;;  %v11083_v12 = vsel %vm11796_vm1, 0, %v11795_v52  ;;  %v11105_v7 = vadd.s32 3, %v11101_v22  ;;  %vm10899_vm2 = vcmp.lt.s32.totalorder %v10898_v49, 2 }
 0xd9d   :  { %13937 = vcosq.f32 %v10996_v11  ;;  %v11084_v28 = vsub.s32 32, %v11083_v12  ;;  %v11088_v32 = vsub.s32 4294967266, %v11083_v12  ;;  %v11085_v17 = vshll.u32 %v11076_v34, %v11083_v12 }
 0xd9e   :  { %13939 = vsinq.f32 %v10996_v11  ;;  %v18544_v38 = vsub.f32 %v11227_v37, %v18539_v1  ;;  %vm10896_vm3 = vweird.f32 %v18263_v27 }
 0xd9f   :  { %13941 = vcosq.f32 %v10892_v54  ;;  %v11086_v14 = vshrl.u32 %v11068_v26, %v11084_v28  ;;  %v11089_v4 = vadd.s32 127, %v11088_v32  ;;  %v11106_v28 = vand.u32 3, %v11105_v7 }
 0xda0   :  { %13943 = vsinq.f32 %v10892_v54  ;;  %v11300_v44 = vand.u32 4294901760, %v18544_v38 }
 0xda1   :  { %v11087_v16 = vor.u32 %v11086_v14, %v11085_v17  ;;  %v11090_v36 = vshll.u32 %v11089_v4, 23  ;;  %vm11111_vm1 = vcmp.eq.s32.totalorder %v11106_v28, 2 }
 0xda3   :  { %v11091_v58 = vor.u32 4788187, %v11090_v36  ;;  %v11094_v20 = vcvt.s32.f32 %v11087_v16 }
 0xda5   :  { %v11092_v10 = vand.u32 2147483647, %v11091_v58 }
 0xda7   :  { %v11095_v53 = vmul.f32 %v11094_v20, %v11092_v10  ;;  %v11301_v10 = vsub.f32 %v18544_v38, %v11300_v44 }
 0xda8   :  { %v13934_v15 = vpop.eup %13933 }
 0xda9   :  { %v13936_v51 = vpop.eup %13935  ;;  %v11216_v47 = vxor.u32 2147483648, %v13934_v15  ;;  %v11096_v48 = vxor.u32 2147483648, %v11095_v53  ;;  %v11302_v6 = vand.u32 4294901760, %v11301_v10 }
 0xdaa   :  { %v11213_v25 = vxor.u32 2147483648, %v13936_v51  ;;  %v13938_v45 = vpop.eup %13937 }
 0xdab   :  { %v11217_v55 = vsel %vm11215_vm4, %v11216_v47, %v13936_v51  ;;  %v13940_v41 = vpop.eup %13939  ;;  %v11097_v0 = vsel %vm11014_vm7, %v11096_v48, %v11095_v53  ;;  %v11008_v9 = vxor.u32 2147483648, %v13938_v45  ;;  %vm11108_vm4 = vcmp.eq.s32.totalorder %v11106_v28, 0 }
 0xdac   :  { %v11214_v57 = vsel %vm11212_vm5, %v13934_v15, %v11213_v25  ;;  %v13942_v23 = vpop.eup %13941  ;;  %v11100_v24 = vsel %vm18512_vm9, %v18292_v18, %v11097_v0  ;;  %v11005_v61 = vxor.u32 2147483648, %v13940_v41  ;;  %vm11107_vm5 = vcmp.lt.s32.totalorder %v11106_v28, 2 }
 0xdad   :  { %v11218_v60 = vsel %vm11211_vm6, %v11214_v57, %v11217_v55  ;;  %v13944_v19 = vpop.eup %13943  ;;  %13945 = vcosq.f32 %v11100_v24  ;;  %v10904_v31 = vxor.u32 2147483648, %v13942_v23  ;;  %v11009_v52 = vsel %vm11007_vm11, %v11008_v9, %v13940_v41 }
 0xdae   :  { %v11219_v34 = vsel %vm11208_vm8, nan, %v11218_v60  ;;  %13947 = vsinq.f32 %v11100_v24  ;;  %v10901_v56 = vxor.u32 2147483648, %v13944_v19  ;;  %v11006_v11 = vsel %vm11004_vm10, %v13938_v45, %v11005_v61 }
 0xdaf   :  { %v18521_v43 = vand.u32 4294901760, %v11219_v34  ;;  %v10905_v54 = vsel %vm10903_vm14, %v10904_v31, %v13944_v19  ;;  %v11010_v8 = vsel %vm11003_vm12, %v11006_v11, %v11009_v52  ;;  %vm11104_vm6 = vweird.f32 %v18292_v18 }
 0xdb0   :  { %v10902_v59 = vsel %vm10900_vm13, %v13942_v23, %v10901_v56  ;;  %v11011_v32 = vsel %vm11000_vm15, nan, %v11010_v8  ;;  %v11224_v60 = vpop.permute.xlu1 %11223 }
 0xdb1   :  { %13668 = vmatpush3.msra.mxu0 %v18521_v43  ;;  %v18525_v33 = vsub.f32 %v11219_v34, %v18521_v43  ;;  %v10906_v26 = vsel %vm10899_vm2, %v10902_v59, %v10905_v54  ;;  %v18547_v16 = vand.u32 4294901760, %v11011_v32  ;;  %v11225_v21 = vrot.slane %v11224_v60, 1 }
 0xdb2   :  { %13669 = vmatprep.subr.mxu0 %v18862_v39  ;;  %v10907_v14 = vsel %vm10896_vm3, nan, %v10906_v26 }
 0xdb3   :  { %v11335_v46 = vand.u32 4294901760, %v18525_v33  ;;  %v18550_v58 = vand.u32 4294901760, %v10907_v14  ;;  %v11348_v27 = vsub.f32 %v11011_v32, %v18547_v16 }
 0xdb5   :  { %v11336_v13 = vsub.f32 %v18525_v33, %v11335_v46  ;;  %v11355_v35 = vsub.f32 %v10907_v14, %v18550_v58  ;;  %v11349_v47 = vand.u32 4294901760, %v11348_v27 }
 0xdb7   :  { %v11337_v12 = vand.u32 4294901760, %v11336_v13  ;;  %v11356_v53 = vand.u32 4294901760, %v11355_v35  ;;  %v11350_v55 = vsub.f32 %v11348_v27, %v11349_v47 }
 0xdb9   :  { %13679 = vmatpush3.msra.mxu1 %v11337_v12  ;;  %v11357_v45 = vsub.f32 %v11355_v35, %v11356_v53  ;;  %v11351_v48 = vand.u32 4294901760, %v11350_v55 }
 0xdba   :  { %13680 = vmatprep.subr.mxu1 %v18862_v39  ;;  %v13946_v17 = vpop.eup %13945 }
 0xdbb   :  { %v13948_v4 = vpop.eup %13947  ;;  %v11112_v29 = vxor.u32 2147483648, %v13946_v17  ;;  %v11358_v57 = vand.u32 4294901760, %v11357_v45 }
 0xdbc   :  { %v11109_v36 = vxor.u32 2147483648, %v13948_v4 }
 0xdbd   :  { %v11113_v2 = vsel %vm11111_vm1, %v11112_v29, %v13948_v4 }
 0xdbe   :  { %v11110_v63 = vsel %vm11108_vm4, %v13946_v17, %v11109_v36 }
 0xdbf   :  { %v11114_v5 = vsel %vm11107_vm5, %v11110_v63, %v11113_v2 }
 0xdc0   :  { %v11115_v15 = vsel %vm11104_vm6, nan, %v11114_v5 }
 0xdc1   :  { %v11257_v20 = vand.u32 4294901760, %v11115_v15 }
 0xdc3   :  { %13670 = vmatpush3.msra.mxu0 %v11257_v20  ;;  %v11341_v51 = vsub.f32 %v11115_v15, %v11257_v20 }
 0xdc4   :  { %13671 = vmatprep.subr.mxu0 %v18862_v39 }
 0xdc5   :  { %13672 = vmatpush3.msra.mxu0 %v18547_v16  ;;  %v11342_v18 = vand.u32 4294901760, %v11341_v51 }
 0xdc6   :  { %13673 = vmatprep.subr.mxu0 %v18862_v39 }
 0xdc7   :  { %13674 = vmatpush3.msra.mxu0 %v18550_v58  ;;  %v11343_v25 = vsub.f32 %v11341_v51, %v11342_v18 }
 0xdc8   :  { %13689 = vmatprep.subr.mxu0 %v18862_v39  ;;  %13676 = vmatmul.mubr.f32.vlgmr.msra.gmra.mxu0 %v11302_v6 }
 0xdc9   :  { %13690 = vmatpush3.msra.mxu0 %v18525_v33  ;;  %v11344_v42 = vand.u32 4294901760, %v11343_v25  ;;  %13697 = vmatprep.mubr.msk.f32.mxu0 %vm13982_vm0, %v18862_v39 }
 0xdca   :  { %13691 = vmatprep.subr.mxu0 %v18862_v39 }
 0xdcb   :  { %13681 = vmatpush3.msra.mxu1 %v11344_v42  ;;  %13692 = vmatpush3.msra.mxu0 %v11341_v51 }
 0xdcc   :  { %13682 = vmatprep.subr.mxu1 %v18862_v39  ;;  %13693 = vmatprep.subr.mxu0 %v18862_v39 }
 0xdcd   :  { %13683 = vmatpush3.msra.mxu1 %v11351_v48  ;;  %13694 = vmatpush3.msra.mxu0 %v11348_v27 }
 0xdce   :  { %13684 = vmatprep.subr.mxu1 %v18862_v39  ;;  %13695 = vmatprep.subr.mxu0 %v18862_v39 }
 0xdcf   :  { %13685 = vmatpush3.msra.mxu1 %v11358_v57  ;;  %13696 = vmatpush3.msra.mxu0 %v11355_v35 }
 0xdd0   :  { %13700 = vmatprep.subr.mxu1 %v18862_v39  ;;  %13711 = vmatprep.subr.mxu0 %v18862_v39 }
 0xdd1   :  { %13687 = vmatmul.mubr.f32.vlgmr.msra.gmra.mxu1 %v18539_v1  ;;  %13698 = vmatmul.mubr.f32.vlgmr.msra.gmra.mxu0 %v18544_v38 }
 0xdd2   :  { %13701 = vmatpush3.msra.mxu1 %v18521_v43  ;;  %13712 = vmatpush3.msra.mxu0 %v11335_v46 }
 0xdd3   :  { %13702 = vmatprep.subr.mxu1 %v18862_v39  ;;  %13713 = vmatprep.subr.mxu0 %v18862_v39 }
 0xdd4   :  { %13703 = vmatpush3.msra.mxu1 %v11257_v20  ;;  %13714 = vmatpush3.msra.mxu0 %v11342_v18 }
 0xdd5   :  { %13704 = vmatprep.subr.mxu1 %v18862_v39  ;;  %13715 = vmatprep.subr.mxu0 %v18862_v39 }
 0xdd6   :  { %13705 = vmatpush3.msra.mxu1 %v18547_v16  ;;  %13716 = vmatpush3.msra.mxu0 %v11349_v47 }
 0xdd7   :  { %13706 = vmatprep.subr.mxu1 %v18862_v39  ;;  %13717 = vmatprep.subr.mxu0 %v18862_v39 }
 0xdd8   :  { %13707 = vmatpush3.msra.mxu1 %v18550_v58  ;;  %13718 = vmatpush3.msra.mxu0 %v11356_v53 }
 0xdd9   :  { %13708 = vmatprep.mubr.msk.f32.mxu1 %vm13982_vm0, %v18862_v39  ;;  %13722 = vmatprep.subr.mxu1 %v18862_v39 }
 0xdda   :  { %13709 = vmatmul.mubr.f32.vlgmr.msra.gmra.mxu1 %v11300_v44  ;;  %13719 = vmatprep.mubr.msk.f32.mxu0 %vm13982_vm0, %v18862_v39 }
 0xddb   :  { %13723 = vmatpush3.msra.mxu1 %v18521_v43  ;;  %13720 = vmatmul.mubr.f32.vlgmr.msra.gmra.mxu0 %v18539_v1 }
 0xddc   :  { %13724 = vmatprep.subr.mxu1 %v18862_v39  ;;  %13730 = vmatprep.mubr.msk.f32.mxu1 %vm13982_vm0, %v18862_v39 }
 0xddd   :  { %13725 = vmatpush3.msra.mxu1 %v11257_v20 }
 0xdde   :  { %13726 = vmatprep.subr.mxu1 %v18862_v39 }
 0xddf   :  { %13727 = vmatpush3.msra.mxu1 %v18547_v16 }
 0xde0   :  { %13728 = vmatprep.subr.mxu1 %v18862_v39 }
 0xde1   :  { %13729 = vmatpush3.msra.mxu1 %v18550_v58 }
 0xde2   :  { %13731 = vmatmul.mubr.f32.vlgmr.msra.gmra.mxu1 %v18539_v1 }
 0xe88   :  { %v11304_v62 = vpop.f32.mrf.mxu0 }
 0xe89   :  { %v11305_v0 = vadd.f32 %v11304_v62, %v11225_v21 }
 0xe8a   :  { %v13677_v41 = vpop.f32.mrf.mxu0 }
 0xe91   :  { %v11395_v23 = vpop.f32.mrf.mxu1  ;;  %v11475_v30 = vpop.f32.mrf.mxu0 }
 0xe92   :  { %v11396_v24 = vadd.f32 %v11395_v23, %v11305_v0 }
 0xe93   :  { %v13688_v34 = vpop.f32.mrf.mxu1  ;;  %v13699_v40 = vpop.f32.mrf.mxu0 }
 0xe94   :  { %v11476_v19 = vadd.f32 %v11475_v30, %v11396_v24 }
 0xe9a   :  { %v11552_v43 = vpop.f32.mrf.mxu1 }
 0xe9b   :  { %v11635_v50 = vpop.f32.mrf.mxu0  ;;  %v11553_v33 = vadd.f32 %v11552_v43, %v11476_v19 }
 0xe9c   :  { %v13710_v61 = vpop.f32.mrf.mxu1 }
 0xe9d   :  { %v13721_v3 = vpop.f32.mrf.mxu0  ;;  %v11636_v9 = vadd.f32 %v11635_v50, %v11553_v33 }
 0xea2   :  { %v11710_v39 = vpop.f32.mrf.mxu1 }
 0xea3   :  { %v11711_v49 = vadd.f32 %v11710_v39, %v11636_v9 }
 0xea4   :  { %v13732_v56 = vpop.f32.mrf.mxu1 }
 0xea5   :  { %11714 = vst [vmem:[%s18611_s5] sm:$0x1] %v11711_v49 }

</bundles_post_ra>
